<compile_context>
chip_gen: v5e
topology: v5e:2x2
jax: 0.10.0
libtpu: 0.0.40
codegen_flags: <defaults>
</compile_context>

<pallas_src>
import jax
import jax.numpy as jnp
from jax import lax
from jax.experimental import pallas as pl
from jax.experimental.pallas import tpu as pltpu

EPS = 1e-3
NEG = -1e30   # spatial-padding sentinel: never wins the max-pool, zeroed (-> exact zero-padding
              # conv semantics) while being packed for the matmul.


def _round_up(v, m):
    return (v + m - 1) // m * m


def _mixed5a_kernel(x_ref, w_ref, b_ref, o_ref, pk_ref):
    """Fused BasicConv2d(3x3,s2,p1)+BN+ReLU and MaxPool(3x3,s2,p1) for one output tile.

    x_ref : (4, HH, WH, C)        bf16  stride-2 parity planes of the sentinel-padded input
    w_ref : (9*C, CO)             bf16  tap-major conv weights, BN scale folded
    b_ref : (1, CO)               f32   folded BN bias
    o_ref : (1, TH, WO, CO + C)   bf16  [0:CO) = conv branch, [CO:CO+C) = maxpool branch
    pk_ref: (TH*WO, 9*C)          bf16  scratch: K-packed conv LHS for a single MXU matmul
    """
    TH = o_ref.shape[1]
    WO = o_ref.shape[2]
    C = x_ref.shape[3]
    CO = w_ref.shape[1]
    M = TH * WO
    ho0 = pl.program_id(1) * TH                       # first output row of this tile

    pool = None
    pending = None
    for t in range(9):                                # unrolled 3x3 tap loop
        di, dj = divmod(t, 3)
        p = (di % 2) * 2 + (dj % 2)                   # parity plane for this tap
        slab = x_ref[p, pl.ds(ho0 + di // 2, TH), pl.ds(dj // 2, WO), :]
        slab = slab.reshape(M, C)                     # WO % 16 == 0 -> pure relabel
        # pool branch: bf16 running max; sentinel never wins (every window has its valid center)
        pool = slab if t == 0 else jnp.maximum(pool, slab)
        # conv branch: sentinel -> 0 (== zero padding); result goes straight into the K-pack
        z = jnp.where(slab > -1e29, slab, 0).astype(jnp.bfloat16)
        if t % 2 == 0:
            pending = z
        else:                                         # pairwise store -> 128-lane aligned slots
            pk_ref[:, (t - 1) * C:(t + 1) * C] = jnp.concatenate([pending, z], axis=-1)
    pk_ref[:, 8 * C:9 * C] = pending                  # last (9th) tap, aligned slot

    # single MXU matmul over the packed K=9*C, f32 accumulation inside the MXU
    acc = jnp.dot(pk_ref[...], w_ref[...], preferred_element_type=jnp.float32)
    conv = jnp.maximum(acc + b_ref[...], 0.0).astype(jnp.bfloat16)   # folded BN + ReLU
    # one lane-dense (CO + C = 384 = 3*128) store of [conv | pool]
    o_ref[0, :, :, :] = jnp.concatenate([conv, pool], axis=-1).reshape(TH, WO, CO + C)


@jax.jit
def mixed_5a(x_nchw, params):
    N, C, H, W = x_nchw.shape
    Cout = params["w"].shape[0]
    Ho = (H - 1) // 2 + 1                                       # 3x3, stride 2, pad 1
    Wo = (W - 1) // 2 + 1

    # --- tiling: ~512-row M tiles, bf16-sublane-aligned width, >=2 row tiles when N == 1 ------
    Wo_p = _round_up(Wo, 16)
    TH = max(1, min(Ho, 512 // Wo_p))
    if N == 1:                                                  # keep both v7x TCs busy
        TH = max(1, min(TH, pl.cdiv(Ho, 2)))
    n_hb = pl.cdiv(Ho, TH)
    Ho_p = n_hb * TH

    # --- sentinel-pad + repack into 4 stride-2 parity planes straight from NCHW (one pass) ----
    HH, WH = Ho_p + 1, Wo_p + 1
    Hp, Wp = 2 * HH, 2 * WH
    xp = jnp.pad(x_nchw.astype(jnp.bfloat16),
                 ((0, 0), (0, 0), (1, Hp - 1 - H), (1, Wp - 1 - W)),
                 constant_values=NEG)                           # (N, C, Hp, Wp)
    planes = (xp.reshape(N, C, HH, 2, WH, 2)
                .transpose(0, 3, 5, 2, 4, 1)                    # (N, rp, cp, HH, WH, C)
                .reshape(N * 4, HH, WH, C))

    # --- fold BN (eval) into weights/bias; tap-major K layout matching the kernel pack --------
    scale = params["gamma"] / jnp.sqrt(params["rvar"] + EPS)
    bias = (params["beta"] - params["rmean"] * scale).reshape(1, Cout).astype(jnp.float32)
    wk = jnp.transpose(params["w"], (2, 3, 1, 0)).reshape(9 * C, Cout)   # (tap*Cin, Cout)
    wk = (wk * scale[None, :]).astype(jnp.bfloat16)

    out = pl.pallas_call(
        _mixed5a_kernel,
        out_shape=jax.ShapeDtypeStruct((N, Ho_p, Wo_p, Cout + C), jnp.bfloat16),
        grid=(N, n_hb),
        in_specs=[
            pl.BlockSpec((4, HH, WH, C), lambda n, h: (n, 0, 0, 0)),
            pl.BlockSpec((9 * C, Cout), lambda n, h: (0, 0)),
            pl.BlockSpec((1, Cout), lambda n, h: (0, 0)),
        ],
        out_specs=pl.BlockSpec((1, TH, Wo_p, Cout + C), lambda n, h: (n, h, 0, 0)),
        scratch_shapes=[pltpu.VMEM((TH * Wo_p, 9 * C), jnp.bfloat16)],
        compiler_params=pltpu.CompilerParams(
            dimension_semantics=("parallel", "parallel"),
            vmem_limit_bytes=32 * 1024 * 1024),
    )(planes, wk, bias)

    # slice off spatial padding; channel order already matches torch.cat((conv, pool), dim=1)
    y = out[:, :Ho, :Wo, :]                                     # (N, Ho, Wo, Cout + C) bf16
    return jnp.transpose(y, (0, 3, 1, 2)).astype(jnp.float32)   # NHWC -> NCHW, module dtype


# ---------------------------------------------------------------------------
# Parameters + pure-JAX reference (sanity check vs lax conv / reduce_window)
# ---------------------------------------------------------------------------
def make_mixed5a_params(key, cin=192, cout=192):
    k1, k2, k3, k4, k5 = jax.random.split(key, 5)
    return dict(
        w=jax.random.normal(k1, (cout, cin, 3, 3), jnp.float32) * 0.05,
        gamma=jax.random.uniform(k2, (cout,), jnp.float32, 0.5, 1.5),
        beta=jax.random.normal(k3, (cout,), jnp.float32) * 0.1,
        rmean=jax.random.normal(k4, (cout,), jnp.float32) * 0.1,
        rvar=jax.random.uniform(k5, (cout,), jnp.float32, 0.5, 1.5),
    )


def _ref_mixed5a(x_nchw, p):
    x = jnp.transpose(x_nchw, (0, 2, 3, 1))
    w = jnp.transpose(p["w"], (2, 3, 1, 0))                     # HWIO
    y = lax.conv_general_dilated(
        x, w, (2, 2), ((1, 1), (1, 1)),
        dimension_numbers=("NHWC", "HWIO", "NHWC"),
        precision=lax.Precision.HIGHEST)
    scale = p["gamma"] / jnp.sqrt(p["rvar"] + EPS)
    bias = p["beta"] - p["rmean"] * scale
    conv = jnp.maximum(y * scale + bias, 0.0)
    pool = lax.reduce_window(x, -jnp.inf, lax.max, (1, 3, 3, 1), (1, 2, 2, 1),
                             ((0, 0), (1, 1), (1, 1), (0, 0)))
    out = jnp.concatenate([conv, pool], axis=-1)
    return jnp.transpose(out, (0, 3, 1, 2))


def _check(out, ref):
    err = jnp.abs(out - ref)
    tol = 0.1 + 0.02 * jnp.abs(ref)                  # abs + rel (bf16 operands, f32 accumulate)
    assert bool(jnp.all(err <= tol)), f"mismatch: max abs err {float(jnp.max(err))}"


if __name__ == "__main__":
    key = jax.random.PRNGKey(0)
    k_x, k_x2, k_p = jax.random.split(key, 3)
    params = make_mixed5a_params(k_p)            # channel count (192) is fixed by the module

    # small even spatial size, batch 2 (NCHW, like PyTorch)
    x = jax.random.normal(k_x, (2, 192, 16, 16), jnp.float32)
    out = jax.block_until_ready(mixed_5a(x, params))
    assert out.shape == (2, 192 + 192, 8, 8), out.shape
    _check(out, _ref_mixed5a(x, params))

    # odd spatial size + batch 1: exercises padded rows/cols, Wo != Wo_p, Ho % TH != 0,
    # and the N==1 row-split (v7x two-TensorCore) path
    x2 = jax.random.normal(k_x2, (1, 192, 13, 13), jnp.float32)
    out2 = jax.block_until_ready(mixed_5a(x2, params))
    assert out2.shape == (1, 192 + 192, 7, 7), out2.shape
    _check(out2, _ref_mixed5a(x2, params))

    print("KERNEL_OK")
</pallas_src>

<mosaic_0001>
module attributes {stable_mosaic.version = 11 : i64} {
  func.func @_mixed5a_kernel(%arg0: i32, %arg1: i32, %arg2: memref<4x9x17x192xbf16, #tpu.memory_space<vmem>>, %arg3: memref<1728x192xbf16, #tpu.memory_space<vmem>>, %arg4: memref<1x192xf32, #tpu.memory_space<vmem>>, %arg5: memref<1x8x16x384xbf16, #tpu.memory_space<vmem>>, %arg6: memref<128x1728xbf16, #tpu.memory_space<vmem>>) attributes {dimension_semantics = [#tpu.dimension_semantics<parallel>, #tpu.dimension_semantics<parallel>], iteration_bounds = array<i64: 2, 1>, scalar_prefetch = 0 : i64, scratch_operands = 1 : i64, tpu.core_type = #tpu.core_type<tc>, window_params = [{transform_indices = @transform_0, window_bounds = array<i64: 4, 9, 17, 192>}, {pipeline_mode = #tpu.pipeline_mode<synchronous>, transform_indices = @transform_1, window_bounds = array<i64: 1728, 192>}, {pipeline_mode = #tpu.pipeline_mode<synchronous>, transform_indices = @transform_2, window_bounds = array<i64: 1, 192>}, {transform_indices = @transform_3, window_bounds = array<i64: 1, 8, 16, 384>}]} {
    %c8_i32 = arith.constant 8 : i32
    %0 = arith.muli %arg1, %c8_i32 : i32
    %c0_i32 = arith.constant 0 : i32
    %1 = arith.addi %0, %c0_i32 : i32
    %c0 = arith.constant 0 : index
    %2 = arith.index_cast %1 : i32 to index
    %c0_0 = arith.constant 0 : index
    %c0_1 = arith.constant 0 : index
    %3 = vector.load %arg2[%c0, %2, %c0_0, %c0_1] : memref<4x9x17x192xbf16, #tpu.memory_space<vmem>>, vector<1x8x16x192xbf16>
    %4 = vector.shape_cast %3 : vector<1x8x16x192xbf16> to vector<8x16x192xbf16>
    %5 = vector.shape_cast %4 : vector<8x16x192xbf16> to vector<128x192xbf16>
    %cst = arith.constant -1.002730e+29 : bf16
    %6 = vector.broadcast %cst : bf16 to vector<128x192xbf16>
    %7 = arith.cmpf ogt, %5, %6 : vector<128x192xbf16>
    %c0_i32_2 = arith.constant 0 : i32
    %8 = arith.sitofp %c0_i32_2 : i32 to bf16
    %9 = vector.broadcast %8 : bf16 to vector<128x192xbf16>
    %10 = arith.select %7, %5, %9 : vector<128x192xi1>, vector<128x192xbf16>
    %c0_i32_3 = arith.constant 0 : i32
    %11 = arith.addi %0, %c0_i32_3 : i32
    %c1 = arith.constant 1 : index
    %12 = arith.index_cast %11 : i32 to index
    %c0_4 = arith.constant 0 : index
    %c0_5 = arith.constant 0 : index
    %13 = vector.load %arg2[%c1, %12, %c0_4, %c0_5] : memref<4x9x17x192xbf16, #tpu.memory_space<vmem>>, vector<1x8x16x192xbf16>
    %14 = vector.shape_cast %13 : vector<1x8x16x192xbf16> to vector<8x16x192xbf16>
    %15 = vector.shape_cast %14 : vector<8x16x192xbf16> to vector<128x192xbf16>
    %16 = arith.maximumf %5, %15 : vector<128x192xbf16>
    %cst_6 = arith.constant -1.002730e+29 : bf16
    %17 = vector.broadcast %cst_6 : bf16 to vector<128x192xbf16>
    %18 = arith.cmpf ogt, %15, %17 : vector<128x192xbf16>
    %c0_i32_7 = arith.constant 0 : i32
    %19 = arith.sitofp %c0_i32_7 : i32 to bf16
    %20 = vector.broadcast %19 : bf16 to vector<128x192xbf16>
    %21 = arith.select %18, %15, %20 : vector<128x192xi1>, vector<128x192xbf16>
    %22 = tpu.concatenate %10, %21 in 1 : vector<128x192xbf16>, vector<128x192xbf16> -> vector<128x384xbf16>
    %c0_8 = arith.constant 0 : index
    %c0_9 = arith.constant 0 : index
    %23 = vector.load %arg6[%c0_8, %c0_9] : memref<128x1728xbf16, #tpu.memory_space<vmem>>, vector<128x384xbf16>
    tpu.vector_store %arg6[%c0_8, %c0_9], %22 {strides = array<i32>} : memref<128x1728xbf16, #tpu.memory_space<vmem>>, vector<128x384xbf16>,
    %c0_i32_10 = arith.constant 0 : i32
    %24 = arith.addi %0, %c0_i32_10 : i32
    %c0_11 = arith.constant 0 : index
    %25 = arith.index_cast %24 : i32 to index
    %c1_12 = arith.constant 1 : index
    %c0_13 = arith.constant 0 : index
    %26 = vector.load %arg2[%c0_11, %25, %c1_12, %c0_13] : memref<4x9x17x192xbf16, #tpu.memory_space<vmem>>, vector<1x8x16x192xbf16>
    %27 = vector.shape_cast %26 : vector<1x8x16x192xbf16> to vector<8x16x192xbf16>
    %28 = vector.shape_cast %27 : vector<8x16x192xbf16> to vector<128x192xbf16>
    %29 = arith.maximumf %16, %28 : vector<128x192xbf16>
    %cst_14 = arith.constant -1.002730e+29 : bf16
    %30 = vector.broadcast %cst_14 : bf16 to vector<128x192xbf16>
    %31 = arith.cmpf ogt, %28, %30 : vector<128x192xbf16>
    %c0_i32_15 = arith.constant 0 : i32
    %32 = arith.sitofp %c0_i32_15 : i32 to bf16
    %33 = vector.broadcast %32 : bf16 to vector<128x192xbf16>
    %34 = arith.select %31, %28, %33 : vector<128x192xi1>, vector<128x192xbf16>
    %c0_i32_16 = arith.constant 0 : i32
    %35 = arith.addi %0, %c0_i32_16 : i32
    %c2 = arith.constant 2 : index
    %36 = arith.index_cast %35 : i32 to index
    %c0_17 = arith.constant 0 : index
    %c0_18 = arith.constant 0 : index
    %37 = vector.load %arg2[%c2, %36, %c0_17, %c0_18] : memref<4x9x17x192xbf16, #tpu.memory_space<vmem>>, vector<1x8x16x192xbf16>
    %38 = vector.shape_cast %37 : vector<1x8x16x192xbf16> to vector<8x16x192xbf16>
    %39 = vector.shape_cast %38 : vector<8x16x192xbf16> to vector<128x192xbf16>
    %40 = arith.maximumf %29, %39 : vector<128x192xbf16>
    %cst_19 = arith.constant -1.002730e+29 : bf16
    %41 = vector.broadcast %cst_19 : bf16 to vector<128x192xbf16>
    %42 = arith.cmpf ogt, %39, %41 : vector<128x192xbf16>
    %c0_i32_20 = arith.constant 0 : i32
    %43 = arith.sitofp %c0_i32_20 : i32 to bf16
    %44 = vector.broadcast %43 : bf16 to vector<128x192xbf16>
    %45 = arith.select %42, %39, %44 : vector<128x192xi1>, vector<128x192xbf16>
    %46 = tpu.concatenate %34, %45 in 1 : vector<128x192xbf16>, vector<128x192xbf16> -> vector<128x384xbf16>
    %c0_21 = arith.constant 0 : index
    %c384 = arith.constant 384 : index
    %47 = vector.load %arg6[%c0_21, %c384] : memref<128x1728xbf16, #tpu.memory_space<vmem>>, vector<128x384xbf16>
    tpu.vector_store %arg6[%c0_21, %c384], %46 {strides = array<i32>} : memref<128x1728xbf16, #tpu.memory_space<vmem>>, vector<128x384xbf16>,
    %c0_i32_22 = arith.constant 0 : i32
    %48 = arith.addi %0, %c0_i32_22 : i32
    %c3 = arith.constant 3 : index
    %49 = arith.index_cast %48 : i32 to index
    %c0_23 = arith.constant 0 : index
    %c0_24 = arith.constant 0 : index
    %50 = vector.load %arg2[%c3, %49, %c0_23, %c0_24] : memref<4x9x17x192xbf16, #tpu.memory_space<vmem>>, vector<1x8x16x192xbf16>
    %51 = vector.shape_cast %50 : vector<1x8x16x192xbf16> to vector<8x16x192xbf16>
    %52 = vector.shape_cast %51 : vector<8x16x192xbf16> to vector<128x192xbf16>
    %53 = arith.maximumf %40, %52 : vector<128x192xbf16>
    %cst_25 = arith.constant -1.002730e+29 : bf16
    %54 = vector.broadcast %cst_25 : bf16 to vector<128x192xbf16>
    %55 = arith.cmpf ogt, %52, %54 : vector<128x192xbf16>
    %c0_i32_26 = arith.constant 0 : i32
    %56 = arith.sitofp %c0_i32_26 : i32 to bf16
    %57 = vector.broadcast %56 : bf16 to vector<128x192xbf16>
    %58 = arith.select %55, %52, %57 : vector<128x192xi1>, vector<128x192xbf16>
    %c0_i32_27 = arith.constant 0 : i32
    %59 = arith.addi %0, %c0_i32_27 : i32
    %c2_28 = arith.constant 2 : index
    %60 = arith.index_cast %59 : i32 to index
    %c1_29 = arith.constant 1 : index
    %c0_30 = arith.constant 0 : index
    %61 = vector.load %arg2[%c2_28, %60, %c1_29, %c0_30] : memref<4x9x17x192xbf16, #tpu.memory_space<vmem>>, vector<1x8x16x192xbf16>
    %62 = vector.shape_cast %61 : vector<1x8x16x192xbf16> to vector<8x16x192xbf16>
    %63 = vector.shape_cast %62 : vector<8x16x192xbf16> to vector<128x192xbf16>
    %64 = arith.maximumf %53, %63 : vector<128x192xbf16>
    %cst_31 = arith.constant -1.002730e+29 : bf16
    %65 = vector.broadcast %cst_31 : bf16 to vector<128x192xbf16>
    %66 = arith.cmpf ogt, %63, %65 : vector<128x192xbf16>
    %c0_i32_32 = arith.constant 0 : i32
    %67 = arith.sitofp %c0_i32_32 : i32 to bf16
    %68 = vector.broadcast %67 : bf16 to vector<128x192xbf16>
    %69 = arith.select %66, %63, %68 : vector<128x192xi1>, vector<128x192xbf16>
    %70 = tpu.concatenate %58, %69 in 1 : vector<128x192xbf16>, vector<128x192xbf16> -> vector<128x384xbf16>
    %c0_33 = arith.constant 0 : index
    %c768 = arith.constant 768 : index
    %71 = vector.load %arg6[%c0_33, %c768] : memref<128x1728xbf16, #tpu.memory_space<vmem>>, vector<128x384xbf16>
    tpu.vector_store %arg6[%c0_33, %c768], %70 {strides = array<i32>} : memref<128x1728xbf16, #tpu.memory_space<vmem>>, vector<128x384xbf16>,
    %c1_i32 = arith.constant 1 : i32
    %72 = arith.addi %0, %c1_i32 : i32
    %c0_34 = arith.constant 0 : index
    %73 = arith.index_cast %72 : i32 to index
    %c0_35 = arith.constant 0 : index
    %c0_36 = arith.constant 0 : index
    %74 = vector.load %arg2[%c0_34, %73, %c0_35, %c0_36] : memref<4x9x17x192xbf16, #tpu.memory_space<vmem>>, vector<1x8x16x192xbf16>
    %75 = vector.shape_cast %74 : vector<1x8x16x192xbf16> to vector<8x16x192xbf16>
    %76 = vector.shape_cast %75 : vector<8x16x192xbf16> to vector<128x192xbf16>
    %77 = arith.maximumf %64, %76 : vector<128x192xbf16>
    %cst_37 = arith.constant -1.002730e+29 : bf16
    %78 = vector.broadcast %cst_37 : bf16 to vector<128x192xbf16>
    %79 = arith.cmpf ogt, %76, %78 : vector<128x192xbf16>
    %c0_i32_38 = arith.constant 0 : i32
    %80 = arith.sitofp %c0_i32_38 : i32 to bf16
    %81 = vector.broadcast %80 : bf16 to vector<128x192xbf16>
    %82 = arith.select %79, %76, %81 : vector<128x192xi1>, vector<128x192xbf16>
    %c1_i32_39 = arith.constant 1 : i32
    %83 = arith.addi %0, %c1_i32_39 : i32
    %c1_40 = arith.constant 1 : index
    %84 = arith.index_cast %83 : i32 to index
    %c0_41 = arith.constant 0 : index
    %c0_42 = arith.constant 0 : index
    %85 = vector.load %arg2[%c1_40, %84, %c0_41, %c0_42] : memref<4x9x17x192xbf16, #tpu.memory_space<vmem>>, vector<1x8x16x192xbf16>
    %86 = vector.shape_cast %85 : vector<1x8x16x192xbf16> to vector<8x16x192xbf16>
    %87 = vector.shape_cast %86 : vector<8x16x192xbf16> to vector<128x192xbf16>
    %88 = arith.maximumf %77, %87 : vector<128x192xbf16>
    %cst_43 = arith.constant -1.002730e+29 : bf16
    %89 = vector.broadcast %cst_43 : bf16 to vector<128x192xbf16>
    %90 = arith.cmpf ogt, %87, %89 : vector<128x192xbf16>
    %c0_i32_44 = arith.constant 0 : i32
    %91 = arith.sitofp %c0_i32_44 : i32 to bf16
    %92 = vector.broadcast %91 : bf16 to vector<128x192xbf16>
    %93 = arith.select %90, %87, %92 : vector<128x192xi1>, vector<128x192xbf16>
    %94 = tpu.concatenate %82, %93 in 1 : vector<128x192xbf16>, vector<128x192xbf16> -> vector<128x384xbf16>
    %c0_45 = arith.constant 0 : index
    %c1152 = arith.constant 1152 : index
    %95 = vector.load %arg6[%c0_45, %c1152] : memref<128x1728xbf16, #tpu.memory_space<vmem>>, vector<128x384xbf16>
    tpu.vector_store %arg6[%c0_45, %c1152], %94 {strides = array<i32>} : memref<128x1728xbf16, #tpu.memory_space<vmem>>, vector<128x384xbf16>,
    %c1_i32_46 = arith.constant 1 : i32
    %96 = arith.addi %0, %c1_i32_46 : i32
    %c0_47 = arith.constant 0 : index
    %97 = arith.index_cast %96 : i32 to index
    %c1_48 = arith.constant 1 : index
    %c0_49 = arith.constant 0 : index
    %98 = vector.load %arg2[%c0_47, %97, %c1_48, %c0_49] : memref<4x9x17x192xbf16, #tpu.memory_space<vmem>>, vector<1x8x16x192xbf16>
    %99 = vector.shape_cast %98 : vector<1x8x16x192xbf16> to vector<8x16x192xbf16>
    %100 = vector.shape_cast %99 : vector<8x16x192xbf16> to vector<128x192xbf16>
    %101 = arith.maximumf %88, %100 : vector<128x192xbf16>
    %cst_50 = arith.constant -1.002730e+29 : bf16
    %102 = vector.broadcast %cst_50 : bf16 to vector<128x192xbf16>
    %103 = arith.cmpf ogt, %100, %102 : vector<128x192xbf16>
    %c0_i32_51 = arith.constant 0 : i32
    %104 = arith.sitofp %c0_i32_51 : i32 to bf16
    %105 = vector.broadcast %104 : bf16 to vector<128x192xbf16>
    %106 = arith.select %103, %100, %105 : vector<128x192xi1>, vector<128x192xbf16>
    %c0_52 = arith.constant 0 : index
    %c1536 = arith.constant 1536 : index
    %107 = vector.load %arg6[%c0_52, %c1536] : memref<128x1728xbf16, #tpu.memory_space<vmem>>, vector<128x192xbf16>
    tpu.vector_store %arg6[%c0_52, %c1536], %106 {strides = array<i32>} : memref<128x1728xbf16, #tpu.memory_space<vmem>>, vector<128x192xbf16>,
    %c0_53 = arith.constant 0 : index
    %c0_54 = arith.constant 0 : index
    %108 = vector.load %arg6[%c0_53, %c0_54] : memref<128x1728xbf16, #tpu.memory_space<vmem>>, vector<128x1728xbf16>
    %c0_55 = arith.constant 0 : index
    %c0_56 = arith.constant 0 : index
    %109 = vector.load %arg3[%c0_55, %c0_56] : memref<1728x192xbf16, #tpu.memory_space<vmem>>, vector<1728x192xbf16>
    %cst_57 = arith.constant dense<0.000000e+00> : vector<128x192xf32>
    %110 = tpu.matmul %108, %109, %cst_57 {dimension_numbers = #tpu.dot_dimension_numbers<[1], [0], [0], [1], [0, 0, 1, 1], [], []>} : vector<128x1728xbf16>, vector<1728x192xbf16>, vector<128x192xf32> -> vector<128x192xf32>
    %c0_58 = arith.constant 0 : index
    %c0_59 = arith.constant 0 : index
    %111 = vector.load %arg4[%c0_58, %c0_59] : memref<1x192xf32, #tpu.memory_space<vmem>>, vector<1x192xf32>
    %112 = vector.broadcast %111 : vector<1x192xf32> to vector<128x192xf32>
    %113 = arith.addf %110, %112 : vector<128x192xf32>
    %cst_60 = arith.constant 0.000000e+00 : f32
    %114 = vector.broadcast %cst_60 : f32 to vector<128x192xf32>
    %115 = arith.maximumf %113, %114 : vector<128x192xf32>
    %116 = arith.truncf %115 : vector<128x192xf32> to vector<128x192xbf16>
    %117 = tpu.concatenate %116, %101 in 1 : vector<128x192xbf16>, vector<128x192xbf16> -> vector<128x384xbf16>
    %118 = vector.shape_cast %117 : vector<128x384xbf16> to vector<8x16x384xbf16>
    %c0_61 = arith.constant 0 : index
    %c0_62 = arith.constant 0 : index
    %c0_63 = arith.constant 0 : index
    %c0_64 = arith.constant 0 : index
    %119 = vector.load %arg5[%c0_61, %c0_62, %c0_63, %c0_64] : memref<1x8x16x384xbf16, #tpu.memory_space<vmem>>, vector<1x8x16x384xbf16>
    %120 = vector.shape_cast %119 : vector<1x8x16x384xbf16> to vector<8x16x384xbf16>
    %121 = vector.shape_cast %118 : vector<8x16x384xbf16> to vector<1x8x16x384xbf16>
    tpu.vector_store %arg5[%c0_61, %c0_62, %c0_63, %c0_64], %121 {strides = array<i32>} : memref<1x8x16x384xbf16, #tpu.memory_space<vmem>>, vector<1x8x16x384xbf16>,
    return
  }
  func.func @transform_0(%arg0: i32, %arg1: i32) -> (i32, i32, i32, i32) {
    %c0_i32 = arith.constant 0 : i32
    %c0_i32_0 = arith.constant 0 : i32
    %c0_i32_1 = arith.constant 0 : i32
    %c0_i32_2 = arith.constant 0 : i32
    return %arg0, %c0_i32, %c0_i32_0, %c0_i32_1 : i32, i32, i32, i32
  }
  func.func @transform_1(%arg0: i32, %arg1: i32) -> (i32, i32) {
    %c0_i32 = arith.constant 0 : i32
    %c0_i32_0 = arith.constant 0 : i32
    %c0_i32_1 = arith.constant 0 : i32
    return %c0_i32, %c0_i32_0 : i32, i32
  }
  func.func @transform_2(%arg0: i32, %arg1: i32) -> (i32, i32) {
    %c0_i32 = arith.constant 0 : i32
    %c0_i32_0 = arith.constant 0 : i32
    %c0_i32_1 = arith.constant 0 : i32
    return %c0_i32, %c0_i32_0 : i32, i32
  }
  func.func @transform_3(%arg0: i32, %arg1: i32) -> (i32, i32, i32, i32) {
    %c0_i32 = arith.constant 0 : i32
    %c0_i32_0 = arith.constant 0 : i32
    %c0_i32_1 = arith.constant 0 : i32
    return %arg0, %arg1, %c0_i32, %c0_i32_0 : i32, i32, i32, i32
  }
}

</mosaic_0001>

<bundles_post_ra>
// kernel: mixed_5a.1
= control target key start
LH: loop header
LB: loop body
LE: loop exit
PB: predicated region body
PF: predicated region fallthrough
CT: control target
= control target key end

     0   :  { %s9577_s12 = smov 0   ;;  %s9579_s13 = smov 0   ;;  %s14655_s0 = inlined_call_operand.vmem [shape: bf16[8,9,17,192], index: 0, kind: input, shape index: {}]   ;;  %s14656_s1 = inlined_call_operand.vmem [shape: bf16[1728,192], index: 1, kind: input, shape index: {}]   ;;  %s14657_s2 = inlined_call_operand.vmem [shape: f32[1,192], index: 2, kind: input, shape index: {}]   ;;  %s14658_s3 = inlined_call_operand.vmem [shape: bf16[2,8,16,384], index: 3, kind: output, shape index: {}]  }
   0x1   :  { %s9581_s14 = smov 0  }
   0x2 LB: > { %s25_s15 = sadd.s32 1, %s9550_s13  ;;  %p7634_p0 = scmp.ge.s32.totalorder %s9554_s14, 1  ;;  %s9554_s14 = sphi %s9581_s14, %s13_s14   ;;  %s9550_s13 = sphi %s9579_s13, %s15692_s13   ;;  %s9546_s12 = sphi %s9577_s12, %s15691_s12  }
   0x3   : > { %p27_p1 = scmp.ge.s32.totalorder %s25_s15, 2  ;;  %p153_p2 = scmp.lt.s32.totalorder %s9554_s14, 3 }
   0x5   : > { %s15694_s15 = smov (%p27_p1, %s25_s15), 0  ;;  %p154_p3 = pnand %p7634_p0, %p153_p2 }
   0x7   : > { %157 = sbr.rel (%p154_p3) target bundleno = 1318 (0x526), region = 32 }
   0xc   : > { %s7635_s16 = sshll.u32 %s9546_s12, 2  ;;  %s9556_s21 = smov 64  }
   0xd   : > { %p184_p4 = scmp.lt.s32.totalorder %s7635_s16, 7  ;;  %p191_p5 = scmp.lt.s32.totalorder %s9546_s12, 1 }
   0xf   : > { %s15696_s16 = smov (!%p184_p4, %s7635_s16), 7  ;;  %s15698_s12 = smov (!%p191_p5, %s9546_s12), 1 }
  0x10   : > { %s9504_s17 = smul.u32 216, %s15696_s16 }
  0x11   : > { %s9505_s11 = smul.u32 192, %s15698_s12 }
  0x12   : > { %s9601_s20 = scalar_lea.vmem %s14655_s0, %s9504_s17 }
  0x13   : > { %v9604_v0 = vld [vmem:[%s9601_s20 + $0x1b0] sm:$0xff]  ;;  %v9607_v1 = vld [vmem:[%s9601_s20 + $0x1b8] sm:$0xff]  ;;  %v9625_v13 = vld [vmem:[%s9601_s20 + $0xe0] sm:$0xff]  ;;  %s14552_s17 = scalar_lea.vmem %s14658_s3, %s9505_s11 }
  0x14   : > { %v9610_v2 = vld [vmem:[%s9601_s20 + $0xf0] sm:$0xff]  ;;  %v1265_v3 = vunpack.c.l.bf16 %v9604_v0  ;;  %v1266_v4 = vunpack.c.h.bf16 %v9604_v0  ;;  %v14678_v5 = vunpack.c.l.bf16 %v9607_v1  ;;  %v14676_v6 = vunpack.c.h.bf16 %v9607_v1  ;;  %v9617_v7 = vld [vmem:[%s9601_s20 + $0xf8] sm:$0xff]  ;;  %v9675_v30 = vld [vmem:[%s9601_s20 + $0x1c8] sm:$0xff] }
  0x15   : > { %14946 = vst [vmem:[#allocation3_spill] sm:$0xff] %v9617_v7  ;;  %v341_v8 = vunpack.c.l.bf16 %v9610_v2  ;;  %v342_v9 = vunpack.c.h.bf16 %v9610_v2  ;;  %v14674_v10 = vunpack.c.l.bf16 %v9617_v7  ;;  %v14673_v11 = vunpack.c.h.bf16 %v9617_v7  ;;  %v7638_v12 = vld [vmem:[%s9601_s20 + $0xd8] sm:$0xff]  ;;  %v9681_v35 = vld [vmem:[%s9601_s20 + $0x1d0] sm:$0xff]  ;;  %v9711_v50 = vld [vmem:[%s9601_s20 + $0x1e0] sm:$0xff] }
  0x16   : > { %vm1345_vm0 = vcmp.gt.f32.partialorder %v1265_v3, -1.0027314e+29  ;;  %vm1346_vm1 = vcmp.gt.f32.partialorder %v1266_v4, -1.0027314e+29  ;;  %vm1347_vm2 = vcmp.gt.f32.partialorder %v14678_v5, -1.0027314e+29  ;;  %vm1348_vm3 = vcmp.gt.f32.partialorder %v14676_v6, -1.0027314e+29  ;;  %14955 = vst [vmem:[#allocation4_spill] sm:$0xff] %v9681_v35  ;;  %v9714_v51 = vld [vmem:[%s9601_s20 + $0x1e8] sm:$0xff] }
  0x17   : > { %vm1377_vm4 = vmpackc.low %vm1346_vm1, %vm1345_vm0  ;;  %vm9631_vm5 = vcmp.gt.f32.partialorder %v341_v8, -1.0027314e+29  ;;  %vm9635_vm6 = vcmp.gt.f32.partialorder %v342_v9, -1.0027314e+29  ;;  %vm9641_vm7 = vcmp.gt.f32.partialorder %v14674_v10, -1.0027314e+29  ;;  %vm9647_vm8 = vcmp.gt.f32.partialorder %v14673_v11, -1.0027314e+29  ;;  %14962 = vst [vmem:[#allocation5_spill] sm:$0xff] %v9714_v51  ;;  %v7642_v61 = vld [vmem:[%s9601_s20 + $0x108] sm:$0xff] }
  0x18   : > { %vm1378_vm9 = vmpackc.low %vm1348_vm3, %vm1347_vm2  ;;  %v9652_v18 = vsel %vm1377_vm4, %v9604_v0, 0  ;;  %v337_v19 = vunpack.c.l.bf16 %v7638_v12  ;;  %v338_v20 = vunpack.c.h.bf16 %v7638_v12  ;;  %v14682_v21 = vunpack.c.l.bf16 %v9625_v13  ;;  %v9890_v6 = vld [vmem:[%s9601_s20 + $0x248] sm:$0xff]  ;;  %v7684_v27 = vld [vmem:[%s9601_s20 + $0x258] sm:$0xff] }
  0x19   : > { %v9656_v22 = vsel %vm1378_vm9, %v9607_v1, 0  ;;  %v1481_v23 = vunpack.c.l.b16 %v9652_v18  ;;  %vm451_vm10 = vmpackc.low %vm9635_vm6, %vm9631_vm5  ;;  %v14680_v25 = vunpack.c.h.bf16 %v9625_v13  ;;  %v1269_v41 = vunpack.c.l.bf16 %v9675_v30  ;;  %14974 = vst [vmem:[#allocation13_spill] sm:$0xff] %v9890_v6  ;;  %v9920_v24 = vld [vmem:[%s9601_s20 + $0x260] sm:$0xff] }
  0x1a   : > { %v1483_v26 = vunpack.c.l.b16 %v9656_v22  ;;  %vm452_vm11 = vmpackc.low %vm9647_vm8, %vm9641_vm7  ;;  %v467_v28 = vsel %vm451_vm10, %v9610_v2, 0  ;;  %v9672_v29 = vmax.f32 %v1265_v3, %v337_v19  ;;  %v9678_v34 = vmax.f32 %v1266_v4, %v338_v20  ;;  %v9735_v4 = vld [vmem:[%s9601_s20 + $0x110] sm:$0xff]  ;;  %14976 = vst [vmem:[#allocation15_spill] sm:$0xff] %v9920_v24 }
  0x1b   : > { %v468_v31 = vsel %vm452_vm11, %v9617_v7, 0  ;;  %v558_v32 = vunpack.c.h.b16 %v467_v28  ;;  %v557_v33 = vunpack.c.l.b16 %v467_v28  ;;  %vm417_vm12 = vcmp.gt.f32.partialorder %v337_v19, -1.0027314e+29  ;;  %14963 = vst [vmem:[#allocation6_spill] sm:$0xff] %v9735_v4 }
  0x1c   : > { %v1513_v36 = vpack.c.b16 %v1483_v26, %v1481_v23  ;;  %v559_v37 = vunpack.c.l.b16 %v468_v31  ;;  %v560_v38 = vunpack.c.h.b16 %v468_v31  ;;  %vm418_vm13 = vcmp.gt.f32.partialorder %v338_v20, -1.0027314e+29  ;;  %v9754_v20 = vld [vmem:[%s9601_s20 + $0x1f8] sm:$0xff] }
  0x1d   : > { %vm9685_vm14 = vcmp.gt.f32.partialorder %v14682_v21, -1.0027314e+29  ;;  %vm9691_vm15 = vcmp.gt.f32.partialorder %v14680_v25, -1.0027314e+29  ;;  %vm449_vm0 = vmpackc.low %vm418_vm13, %vm417_vm12  ;;  %v1270_v43 = vunpack.c.h.bf16 %v9675_v30  ;;  %v14666_v44 = vunpack.c.l.bf16 %v9681_v35  ;;  %v9908_v25 = vld [vmem:[%s9601_s20 + $0x170] sm:$0xff] }
  0x1e   : > { %1529 = vrot.lane.b32.xlu1 %v1513_v36, %s9556_s21  ;;  %v588_v42 = vpack.c.b16 %v560_v38, %v558_v32  ;;  %v14665_v45 = vunpack.c.h.bf16 %v9681_v35  ;;  %vm450_vm1 = vmpackc.low %vm9691_vm15, %vm9685_vm14  ;;  %v465_v46 = vsel %vm449_vm0, %v7638_v12, 0  ;;  %v9704_v47 = vmax.f32 %v1269_v41, %v341_v8  ;;  %v9763_v32 = vld [vmem:[%s9601_s20 + $0x200] sm:$0xff]  ;;  %14975 = vst [vmem:[#allocation14_spill] sm:$0xff] %v9908_v25 }
  0x1f   : > { %vm9706_vm2 = vcmp.gt.f32.partialorder %v1269_v41, -1.0027314e+29  ;;  %v587_v49 = vpack.c.b16 %v559_v37, %v557_v33  ;;  %v466_v52 = vsel %vm450_vm1, %v9625_v13, 0  ;;  %v553_v53 = vunpack.c.l.b16 %v465_v46  ;;  %14964 = vst [vmem:[#allocation7_spill] sm:$0xff] %v9763_v32 }
  0x20   : > { %607 = vrot.lane.b32.xlu2 %v588_v42, %s9556_s21  ;;  %v554_v54 = vunpack.c.h.b16 %v465_v46  ;;  %v9718_v55 = vmax.f32 %v1270_v43, %v342_v9  ;;  %v555_v56 = vunpack.c.l.b16 %v466_v52  ;;  %v556_v57 = vunpack.c.h.b16 %v466_v52  ;;  %v9779_v46 = vld [vmem:[%s9601_s20 + $0x128] sm:$0xff] }
  0x21   : > { %vm1350_vm3 = vcmp.gt.f32.partialorder %v1270_v43, -1.0027314e+29  ;;  %vm1351_vm4 = vcmp.gt.f32.partialorder %v14666_v44, -1.0027314e+29  ;;  %vm1352_vm5 = vcmp.gt.f32.partialorder %v14665_v45, -1.0027314e+29  ;;  %v1273_v58 = vunpack.c.l.bf16 %v9711_v50  ;;  %v7644_v43 = vld [vmem:[%s9601_s20 + $0x120] sm:$0xff]  ;;  %14965 = vst [vmem:[#allocation8_spill] sm:$0xff] %v9779_v46 }
  0x22   : > { %vm1379_vm6 = vmpackc.low %vm1350_vm3, %vm9706_vm2  ;;  %v1274_v59 = vunpack.c.h.bf16 %v9711_v50  ;;  %v14663_v60 = vunpack.c.l.bf16 %v9714_v51  ;;  %v585_v62 = vpack.c.b16 %v555_v56, %v553_v53  ;;  %v586_v2 = vpack.c.b16 %v556_v57, %v554_v54 }
  0x23   : > { %vm1380_vm7 = vmpackc.low %vm1352_vm5, %vm1351_vm4  ;;  %v9731_v63 = vsel %vm1379_vm6, %v9675_v30, 0  ;;  %v14661_v3 = vunpack.c.h.bf16 %v9714_v51  ;;  %vm1353_vm8 = vcmp.gt.f32.partialorder %v1273_v58, -1.0027314e+29  ;;  %v345_v14 = vunpack.c.l.bf16 %v7642_v61 }
  0x24   : > { %v9738_v8 = vsel %vm1380_vm7, %v9681_v35, 0  ;;  %v1485_v9 = vunpack.c.l.b16 %v9731_v63  ;;  %vm1354_vm9 = vcmp.gt.f32.partialorder %v1274_v59, -1.0027314e+29  ;;  %601 = vrot.lane.b32.xlu0 %v585_v62, %s9556_s21  ;;  %vm1355_vm10 = vcmp.gt.f32.partialorder %v14663_v60, -1.0027314e+29  ;;  %v9835_v60 = vld [vmem:[%s9601_s20 + $0x228] sm:$0xff] }
  0x25   : > { %v1487_v12 = vunpack.c.l.b16 %v9738_v8  ;;  %vm1356_vm11 = vcmp.gt.f32.partialorder %v14661_v3, -1.0027314e+29  ;;  %vm1381_vm12 = vmpackc.low %vm1354_vm9, %vm1353_vm8  ;;  %v346_v16 = vunpack.c.h.bf16 %v7642_v61  ;;  %v14672_v17 = vunpack.c.l.bf16 %v9735_v4 }
  0x26   : > { %605 = vrot.lane.b32.xlu1 %v587_v49, %s9556_s21  ;;  %vm1382_vm13 = vmpackc.low %vm1356_vm11, %vm1355_vm10  ;;  %v9749_v15 = vsel %vm1381_vm12, %v9711_v50, 0  ;;  %v14671_v19 = vunpack.c.h.bf16 %v9735_v4  ;;  %v9760_v31 = vmax.f32 %v1273_v58, %v345_v14  ;;  %vm425_vm14 = vcmp.gt.f32.partialorder %v345_v14, -1.0027314e+29 }
  0x27   : > { %v1515_v23 = vpack.c.b16 %v1487_v12, %v1485_v9  ;;  %v9757_v26 = vsel %vm1382_vm13, %v9714_v51, 0  ;;  %v1489_v28 = vunpack.c.l.b16 %v9749_v15  ;;  %v9766_v36 = vmax.f32 %v1274_v59, %v346_v16  ;;  %v9793_v12 = vld [vmem:[%s9601_s20 + $0x210] sm:$0xff] }
  0x28   : > { %v1491_v33 = vunpack.c.l.b16 %v9757_v26  ;;  %vm426_vm15 = vcmp.gt.f32.partialorder %v346_v16, -1.0027314e+29  ;;  %vm427_vm0 = vcmp.gt.f32.partialorder %v14672_v17, -1.0027314e+29  ;;  %vm428_vm1 = vcmp.gt.f32.partialorder %v14671_v19, -1.0027314e+29 }
  0x29   : > { %1533 = vrot.lane.b32.xlu2 %v1515_v23, %s9556_s21  ;;  %vm453_vm2 = vmpackc.low %vm426_vm15, %vm425_vm14  ;;  %v1277_v37 = vunpack.c.l.bf16 %v9754_v20  ;;  %v1278_v38 = vunpack.c.h.bf16 %v9754_v20  ;;  %v14660_v41 = vunpack.c.l.bf16 %v9763_v32  ;;  %v14659_v42 = vunpack.c.h.bf16 %v9763_v32 }
  0x2a   : > { %v1517_v39 = vpack.c.b16 %v1491_v33, %v1489_v28  ;;  %vm454_vm3 = vmpackc.low %vm428_vm1, %vm427_vm0  ;;  %v469_v40 = vsel %vm453_vm2, %v7642_v61, 0  ;;  %v349_v56 = vunpack.c.l.bf16 %v7644_v43  ;;  %v350_v57 = vunpack.c.h.bf16 %v7644_v43  ;;  %v7646_v33 = vld [vmem:[%s9601_s20 + $0x138] sm:$0xff] }
  0x2b   : > { %v470_v48 = vsel %vm454_vm3, %v9735_v4, 0  ;;  %v562_v49 = vunpack.c.h.b16 %v469_v40  ;;  %v561_v52 = vunpack.c.l.b16 %v469_v40  ;;  %vm1357_vm4 = vcmp.gt.f32.partialorder %v1277_v37, -1.0027314e+29 }
  0x2c   : > { %v564_v53 = vunpack.c.h.b16 %v470_v48  ;;  %v563_v54 = vunpack.c.l.b16 %v470_v48  ;;  %vm1358_vm5 = vcmp.gt.f32.partialorder %v1278_v38, -1.0027314e+29  ;;  %vm1359_vm6 = vcmp.gt.f32.partialorder %v14660_v41, -1.0027314e+29  ;;  %603 = vrot.lane.b32.xlu0 %v586_v2, %s9556_s21  ;;  %v9796_v2 = vld [vmem:[%s9601_s20 + $0x218] sm:$0xff] }
  0x2d   : > { %vm1360_vm7 = vcmp.gt.f32.partialorder %v14659_v42, -1.0027314e+29  ;;  %vm1383_vm8 = vmpackc.low %vm1358_vm5, %vm1357_vm4  ;;  %v14670_v58 = vunpack.c.l.bf16 %v9779_v46  ;;  %v14668_v9 = vunpack.c.h.bf16 %v9779_v46  ;;  %14966 = vst [vmem:[#allocation9_spill] sm:$0xff] %v9796_v2  ;;  %v9802_v23 = vmax.f32 %v1277_v37, %v349_v56 }
  0x2e   : > { %v590_v59 = vpack.c.b16 %v564_v53, %v562_v49  ;;  %v589_v61 = vpack.c.b16 %v563_v54, %v561_v52  ;;  %vm1384_vm9 = vmpackc.low %vm1360_vm7, %vm1359_vm6  ;;  %v9789_v62 = vsel %vm1383_vm8, %v9754_v20, 0  ;;  %v9804_v28 = vmax.f32 %v1278_v38, %v350_v57  ;;  %v9819_v54 = vld [vmem:[%s9601_s20 + $0x140] sm:$0xff] }
  0x2f   : > { %v9799_v14 = vsel %vm1384_vm9, %v9763_v32, 0  ;;  %v1493_v16 = vunpack.c.l.b16 %v9789_v62  ;;  %vm429_vm10 = vcmp.gt.f32.partialorder %v349_v56, -1.0027314e+29  ;;  %vm430_vm11 = vcmp.gt.f32.partialorder %v350_v57, -1.0027314e+29  ;;  %14967 = vst [vmem:[#allocation10_spill] sm:$0xff] %v9819_v54 }
  0x30   : > { %611 = vrot.lane.b32.xlu1 %v590_v59, %s9556_s21  ;;  %v1495_v40 = vunpack.c.l.b16 %v9799_v14  ;;  %vm431_vm12 = vcmp.gt.f32.partialorder %v14670_v58, -1.0027314e+29  ;;  %vm432_vm13 = vcmp.gt.f32.partialorder %v14668_v9, -1.0027314e+29  ;;  %vm455_vm14 = vmpackc.low %vm430_vm11, %vm429_vm10  ;;  %v1281_v37 = vunpack.c.l.bf16 %v9793_v12 }
  0x31   : > { %1537 = vrot.lane.b32.xlu2 %v1517_v39, %s9556_s21  ;;  %v1282_v38 = vunpack.c.h.bf16 %v9793_v12  ;;  %v14662_v48 = vunpack.c.l.bf16 %v9796_v2  ;;  %vm456_vm15 = vmpackc.low %vm432_vm13, %vm431_vm12  ;;  %v471_v52 = vsel %vm455_vm14, %v7644_v43, 0  ;;  %v14664_v53 = vunpack.c.h.bf16 %v9796_v2 }
  0x32   : > { %v1519_v49 = vpack.c.b16 %v1495_v40, %v1493_v16  ;;  %v353_v56 = vunpack.c.l.bf16 %v7646_v33  ;;  %v472_v39 = vsel %vm456_vm15, %v9779_v46, 0  ;;  %v566_v57 = vunpack.c.h.b16 %v471_v52 }
  0x33   : > { %v565_v59 = vunpack.c.l.b16 %v471_v52  ;;  %vm1361_vm0 = vcmp.gt.f32.partialorder %v1281_v37, -1.0027314e+29  ;;  %v568_v42 = vunpack.c.h.b16 %v472_v39  ;;  %v567_v41 = vunpack.c.l.b16 %v472_v39 }
  0x34   : > { %vm1362_vm1 = vcmp.gt.f32.partialorder %v1282_v38, -1.0027314e+29  ;;  %vm1363_vm2 = vcmp.gt.f32.partialorder %v14662_v48, -1.0027314e+29  ;;  %609 = vrot.lane.b32.xlu0 %v589_v61, %s9556_s21  ;;  %vm1364_vm3 = vcmp.gt.f32.partialorder %v14664_v53, -1.0027314e+29  ;;  %v9827_v43 = vmax.f32 %v1281_v37, %v353_v56  ;;  %v9838_v61 = vld [vmem:[%s9601_s20 + $0x230] sm:$0xff] }
  0x35   : > { %vm1385_vm4 = vmpackc.low %vm1362_vm1, %vm1361_vm0  ;;  %v354_v16 = vunpack.c.h.bf16 %v7646_v33  ;;  %v14667_v40 = vunpack.c.l.bf16 %v9819_v54  ;;  %v592_v52 = vpack.c.b16 %v568_v42, %v566_v57  ;;  %v591_v3 = vpack.c.b16 %v567_v41, %v565_v59  ;;  %14968 = vst [vmem:[#allocation11_spill] sm:$0xff] %v9838_v61  ;;  %v7648_v41 = vld [vmem:[%s9601_s20 + $0x150] sm:$0xff] }
  0x36   : > { %vm1386_vm5 = vmpackc.low %vm1364_vm3, %vm1363_vm2  ;;  %v9831_v39 = vsel %vm1385_vm4, %v9793_v12, 0  ;;  %v14669_v48 = vunpack.c.h.bf16 %v9819_v54  ;;  %vm9846_vm6 = vcmp.gt.f32.partialorder %v353_v56, -1.0027314e+29  ;;  %v1286_v56 = vunpack.c.h.bf16 %v9835_v60 }
  0x37   : > { %v9841_v53 = vsel %vm1386_vm5, %v9796_v2, 0  ;;  %v1497_v37 = vunpack.c.l.b16 %v9831_v39  ;;  %v9844_v45 = vmax.f32 %v1282_v38, %v354_v16  ;;  %vm434_vm7 = vcmp.gt.f32.partialorder %v354_v16, -1.0027314e+29 }
  0x38   : > { %615 = vrot.lane.b32.xlu1 %v592_v52, %s9556_s21  ;;  %v1499_v57 = vunpack.c.l.b16 %v9841_v53  ;;  %vm435_vm8 = vcmp.gt.f32.partialorder %v14667_v40, -1.0027314e+29  ;;  %vm436_vm9 = vcmp.gt.f32.partialorder %v14669_v48, -1.0027314e+29  ;;  %vm457_vm10 = vmpackc.low %vm434_vm7, %vm9846_vm6  ;;  %v1285_v38 = vunpack.c.l.bf16 %v9835_v60  ;;  %v9865_v40 = vld [vmem:[%s9601_s20 + $0x158] sm:$0xff] }
  0x39   : > { %1541 = vrot.lane.b32.xlu2 %v1519_v49, %s9556_s21  ;;  %v14675_v59 = vunpack.c.l.bf16 %v9838_v61  ;;  %v14677_v52 = vunpack.c.h.bf16 %v9838_v61  ;;  %vm458_vm11 = vmpackc.low %vm436_vm9, %vm435_vm8  ;;  %v473_v44 = vsel %vm457_vm10, %v7646_v33, 0  ;;  %14971 = vst [vmem:[#allocation12_spill] sm:$0xff] %v9865_v40  ;;  %v357_v9 = vunpack.c.l.bf16 %v7648_v41 }
  0x3a   : > { %v1521_v16 = vpack.c.b16 %v1499_v57, %v1497_v37  ;;  %v358_v48 = vunpack.c.h.bf16 %v7648_v41  ;;  %v474_v49 = vsel %vm458_vm11, %v9819_v54, 0  ;;  %v570_v42 = vunpack.c.h.b16 %v473_v44  ;;  %v7682_v57 = vld [vmem:[%s9601_s20 + $0x240] sm:$0xff] }
  0x3b   : > { %v569_v58 = vunpack.c.l.b16 %v473_v44  ;;  %vm9868_vm12 = vcmp.gt.f32.partialorder %v1285_v38, -1.0027314e+29  ;;  %v572_v17 = vunpack.c.h.b16 %v474_v49  ;;  %v571_v11 = vunpack.c.l.b16 %v474_v49 }
  0x3c   : > { %vm1366_vm13 = vcmp.gt.f32.partialorder %v1286_v56, -1.0027314e+29  ;;  %vm1367_vm14 = vcmp.gt.f32.partialorder %v14675_v59, -1.0027314e+29  ;;  %613 = vrot.lane.b32.xlu0 %v591_v3, %s9556_s21  ;;  %vm1368_vm15 = vcmp.gt.f32.partialorder %v14677_v52, -1.0027314e+29  ;;  %v9879_v44 = vmax.f32 %v1285_v38, %v357_v9 }
  0x3d   : > { %vm1387_vm0 = vmpackc.low %vm1366_vm13, %vm9868_vm12  ;;  %v9881_v33 = vmax.f32 %v1286_v56, %v358_v48  ;;  %v14679_v37 = vunpack.c.l.bf16 %v9865_v40  ;;  %v594_v49 = vpack.c.b16 %v572_v17, %v570_v42  ;;  %v593_v10 = vpack.c.b16 %v571_v11, %v569_v58  ;;  %v7650_v42 = vld [vmem:[%s9601_s20 + $0x168] sm:$0xff] }
  0x3e   : > { %vm1388_vm1 = vmpackc.low %vm1368_vm15, %vm1367_vm14  ;;  %v9886_v59 = vsel %vm1387_vm0, %v9835_v60, 0  ;;  %v14681_v3 = vunpack.c.h.bf16 %v9865_v40  ;;  %vm437_vm2 = vcmp.gt.f32.partialorder %v357_v9, -1.0027314e+29  ;;  %vm438_vm3 = vcmp.gt.f32.partialorder %v358_v48, -1.0027314e+29 }
  0x3f   : > { %v9893_v19 = vsel %vm1388_vm1, %v9838_v61, 0  ;;  %v1501_v38 = vunpack.c.l.b16 %v9886_v59  ;;  %vm439_vm4 = vcmp.gt.f32.partialorder %v14679_v37, -1.0027314e+29  ;;  %vm459_vm6 = vmpackc.low %vm438_vm3, %vm437_vm2  ;;  %v1289_v17 = vunpack.c.l.bf16 %v7682_v57 }
  0x40   : > { %619 = vrot.lane.b32.xlu1 %v594_v49, %s9556_s21  ;;  %v1503_v11 = vunpack.c.l.b16 %v9893_v19  ;;  %vm440_vm5 = vcmp.gt.f32.partialorder %v14681_v3, -1.0027314e+29  ;;  %v475_v58 = vsel %vm459_vm6, %v7648_v41, 0  ;;  %v1290_v56 = vunpack.c.h.bf16 %v7682_v57 }
  0x41   : > { %1545 = vrot.lane.b32.xlu2 %v1521_v16, %s9556_s21  ;;  %vm460_vm7 = vmpackc.low %vm440_vm5, %vm439_vm4  ;;  %v14683_v9 = vunpack.c.l.bf16 %v9890_v6  ;;  %v14684_v48 = vunpack.c.h.bf16 %v9890_v6  ;;  %v574_v5 = vunpack.c.h.b16 %v475_v58  ;;  %v573_v37 = vunpack.c.l.b16 %v475_v58 }
  0x42   : > { %v1523_v49 = vpack.c.b16 %v1503_v11, %v1501_v38  ;;  %v476_v52 = vsel %vm460_vm7, %v9865_v40, 0  ;;  %vm1369_vm8 = vcmp.gt.f32.partialorder %v1289_v17, -1.0027314e+29  ;;  %vm1370_vm9 = vcmp.gt.f32.partialorder %v1290_v56, -1.0027314e+29 }
  0x43   : > { %v576_v3 = vunpack.c.h.b16 %v476_v52  ;;  %v575_v21 = vunpack.c.l.b16 %v476_v52  ;;  %vm1371_vm10 = vcmp.gt.f32.partialorder %v14683_v9, -1.0027314e+29  ;;  %vm1372_vm11 = vcmp.gt.f32.partialorder %v14684_v48, -1.0027314e+29  ;;  %vm1389_vm12 = vmpackc.low %vm1370_vm9, %vm1369_vm8 }
  0x44   : > { %v361_v41 = vunpack.c.l.bf16 %v7650_v42  ;;  %v362_v16 = vunpack.c.h.bf16 %v7650_v42  ;;  %617 = vrot.lane.b32.xlu0 %v593_v10, %s9556_s21  ;;  %vm1390_vm13 = vmpackc.low %vm1372_vm11, %vm1371_vm10  ;;  %v9915_v58 = vsel %vm1389_vm12, %v7682_v57, 0  ;;  %v14689_v52 = vunpack.c.l.bf16 %v9908_v25 }
  0x45   : > { %v596_v38 = vpack.c.b16 %v576_v3, %v574_v5  ;;  %v595_v11 = vpack.c.b16 %v575_v21, %v573_v37  ;;  %v9923_v9 = vsel %vm1390_vm13, %v9890_v6, 0  ;;  %v1505_v48 = vunpack.c.l.b16 %v9915_v58  ;;  %v9948_v6 = vld [vmem:[%s9601_s20 + $0x188] sm:$0xff] }
  0x46   : > { %v9926_v40 = vmax.f32 %v1289_v17, %v361_v41  ;;  %v9928_v54 = vmax.f32 %v1290_v56, %v362_v16  ;;  %v1507_v5 = vunpack.c.l.b16 %v9923_v9  ;;  %v14692_v10 = vunpack.c.h.bf16 %v9908_v25  ;;  %v7652_v17 = vld [vmem:[%s9601_s20 + $0x180] sm:$0xff]  ;;  %14979 = vst [vmem:[#allocation16_spill] sm:$0xff] %v9948_v6 }
  0x47   : > { %vm441_vm14 = vcmp.gt.f32.partialorder %v361_v41, -1.0027314e+29  ;;  %vm442_vm15 = vcmp.gt.f32.partialorder %v362_v16, -1.0027314e+29  ;;  %vm9935_vm0 = vcmp.gt.f32.partialorder %v14689_v52, -1.0027314e+29  ;;  %v1293_v37 = vunpack.c.l.bf16 %v7684_v27 }
  0x48   : > { %623 = vrot.lane.b32.xlu1 %v596_v38, %s9556_s21  ;;  %vm461_vm1 = vmpackc.low %vm442_vm15, %vm441_vm14  ;;  %v1294_v57 = vunpack.c.h.bf16 %v7684_v27  ;;  %v1525_v56 = vpack.c.b16 %v1507_v5, %v1505_v48  ;;  %vm444_vm2 = vcmp.gt.f32.partialorder %v14692_v10, -1.0027314e+29  ;;  %v14695_v16 = vunpack.c.h.bf16 %v9920_v24 }
  0x49   : > { %1549 = vrot.lane.b32.xlu2 %v1523_v49, %s9556_s21  ;;  %v477_v41 = vsel %vm461_vm1, %v7650_v42, 0  ;;  %vm462_vm3 = vmpackc.low %vm444_vm2, %vm9935_vm0  ;;  %vm1373_vm4 = vcmp.gt.f32.partialorder %v1293_v37, -1.0027314e+29  ;;  %v14980_v49 = vunpack.c.l.bf16 %v9920_v24  ;;  %v365_v48 = vunpack.c.l.bf16 %v7652_v17 }
  0x4a   : > { %v578_v38 = vunpack.c.h.b16 %v477_v41  ;;  %v577_v52 = vunpack.c.l.b16 %v477_v41  ;;  %vm1374_vm5 = vcmp.gt.f32.partialorder %v1294_v57, -1.0027314e+29  ;;  %v478_v3 = vsel %vm462_vm3, %v9908_v25, 0 }
  0x4b   : > { %vm1375_vm6 = vcmp.gt.f32.partialorder %v14980_v49, -1.0027314e+29  ;;  %vm1376_vm7 = vcmp.gt.f32.partialorder %v14695_v16, -1.0027314e+29  ;;  %vm1391_vm8 = vmpackc.low %vm1374_vm5, %vm1373_vm4  ;;  %v580_v42 = vunpack.c.h.b16 %v478_v3  ;;  %v579_v5 = vunpack.c.l.b16 %v478_v3 }
  0x4c   : > { %vm1392_vm9 = vmpackc.low %vm1376_vm7, %vm1375_vm6  ;;  %v9955_v21 = vsel %vm1391_vm8, %v7684_v27, 0  ;;  %v366_v41 = vunpack.c.h.bf16 %v7652_v17  ;;  %621 = vrot.lane.b32.xlu0 %v595_v11, %s9556_s21  ;;  %v9962_v49 = vmax.f32 %v1293_v37, %v365_v48  ;;  %v14704_v16 = vunpack.c.l.bf16 %v9948_v6  ;;  %v7723_v37 = vld [vmem:[%s9601_s20 + $0x1d8] sm:$0x11] }
  0x4d   : > { %v9959_v10 = vsel %vm1392_vm9, %v9920_v24, 0  ;;  %v1509_v25 = vunpack.c.l.b16 %v9955_v21  ;;  %v598_v46 = vpack.c.b16 %v580_v42, %v578_v38  ;;  %v597_v4 = vpack.c.b16 %v579_v5, %v577_v52 }
  0x4e   : > { %14981 = vst [vmem:[#allocation17_spill] sm:$0xff] %v9959_v10  ;;  %v1511_v3 = vunpack.c.l.b16 %v9959_v10  ;;  %v9966_v7 = vmax.f32 %v1294_v57, %v366_v41  ;;  %v14705_v27 = vunpack.c.h.bf16 %v9948_v6  ;;  %vm445_vm10 = vcmp.gt.f32.partialorder %v365_v48, -1.0027314e+29 }
  0x4f   : > { %14982 = vst [vmem:[#allocation18_spill] sm:$0xff] %v9962_v49  ;;  %vm446_vm11 = vcmp.gt.f32.partialorder %v366_v41, -1.0027314e+29  ;;  %vm9971_vm12 = vcmp.gt.f32.partialorder %v14704_v16, -1.0027314e+29  ;;  %vm827_vm14 = vsmask.f32 3328  ;;  %v1973_v52 = vshrl.u32 %v9675_v30, 16 }
  0x50   : > { %14983 = vst [vmem:[#allocation19_spill] sm:$0xff] %v9966_v7  ;;  %627 = vrot.lane.b32.xlu1 %v598_v46, %s9556_s21  ;;  %v1527_v24 = vpack.c.b16 %v1511_v3, %v1509_v25  ;;  %vm463_vm13 = vmpackc.low %vm446_vm11, %vm445_vm10  ;;  %vm828_vm15 = vsmask.f32 7440  ;;  %vm448_vm0 = vcmp.gt.f32.partialorder %v14705_v27, -1.0027314e+29  ;;  %v1976_v38 = vshll.u32 %v9675_v30, 16 }
  0x51   : > { %1553 = vrot.lane.b32.xlu2 %v1525_v56, %s9556_s21  ;;  %v479_v57 = vsel %vm463_vm13, %v7652_v17, 0  ;;  %v1982_v48 = vshll.u32 %v9681_v35, 16  ;;  %vm464_vm1 = vmpackc.low %vm448_vm0, %vm9971_vm12  ;;  %v1975_v42 = vrot.slane %v1973_v52, 4  ;;  %v1986_v5 = vshrl.u32 %v9681_v35, 16  ;;  %v7720_v52 = vld [vmem:[%s9601_s20 + $0x1c0] sm:$0x11] }
  0x52   : > { %v582_v25 = vunpack.c.h.b16 %v479_v57  ;;  %v581_v46 = vunpack.c.l.b16 %v479_v57  ;;  %v480_v41 = vsel %vm464_vm1, %v9948_v6, 0  ;;  %v1978_v56 = vrot.slane %v1976_v38, 5  ;;  %vm9997_vm2 = vmor %vm827_vm14, %vm828_vm15 }
  0x53   : > { %v1984_v3 = vrot.slane %v1982_v48, 5  ;;  %v1992_v16 = vshll.u32 %v7723_v37, 16  ;;  %v584_v27 = vunpack.c.h.b16 %v480_v41  ;;  %v583_v17 = vunpack.c.l.b16 %v480_v41 }
  0x54   : > { %v1988_v7 = vrot.slane %v1986_v5, 4  ;;  %v14986_v30 = vunpack.c.h.b16 %v9652_v18  ;;  %v14987_v49 = vunpack.c.h.b16 %v9656_v22  ;;  %625 = vrot.lane.b32.xlu0 %v597_v4, %s9556_s21  ;;  %v1979_v10 = vor.u32 %v1978_v56, %v1975_v42 }
  0x55   : > { %v1994_v57 = vrot.slane %v1992_v16, 5  ;;  %v1949_v35 = vshrl.u32 %v9604_v0, 16  ;;  %v1952_v6 = vshll.u32 %v9604_v0, 16  ;;  %v600_v38 = vpack.c.b16 %v584_v27, %v582_v25 }
  0x56   : > { %v1514_v11 = vpack.c.b16 %v14987_v49, %v14986_v30  ;;  %v599_v48 = vpack.c.b16 %v583_v17, %v581_v46  ;;  %v14988_v37 = vmov 0  ;;  %v1989_v18 = vor.u32 %v1988_v7, %v1984_v3 }
  0x57   : > { %v14989_v37 = vsel %vm9997_vm2, 4294967295, %v14988_v37  ;;  %v1958_v22 = vshll.u32 %v9607_v1, 16  ;;  %v1980_v49 = vrot.slane %v1979_v10, 4  ;;  %v1951_v4 = vrot.slane %v1949_v35, 4 }
  0x58   : > { %14990 = vst [vmem:[#allocation20_spill] sm:$0xff] %v14989_v37  ;;  %v1954_v42 = vrot.slane %v1952_v6, 5  ;;  %v1962_v16 = vshrl.u32 %v9607_v1, 16  ;;  %631 = vrot.lane.b32.xlu1 %v600_v38, %s9556_s21  ;;  %v1990_v5 = vrot.slane %v1989_v18, 4  ;;  %v1968_v27 = vshll.u32 %v7720_v52, 16 }
  0x59   : > { %v1960_v0 = vrot.slane %v1958_v22, 5  ;;  %v1490_v25 = vunpack.c.h.b16 %v9749_v15  ;;  %1557 = vrot.lane.b32.xlu2 %v1527_v24, %s9556_s21  ;;  %v1985_v46 = vsel %vm9997_vm2, %v1980_v49, %v1984_v3  ;;  %v1492_v10 = vunpack.c.h.b16 %v9757_v26 }
  0x5a   : > { %v1955_v7 = vor.u32 %v1954_v42, %v1951_v4  ;;  %v1964_v41 = vrot.slane %v1962_v16, 4  ;;  %v10011_v6 = vsel %vm9997_vm2, %v1990_v5, %v1994_v57  ;;  %v2192_v35 = vunpack.c.l.bf16 %v1985_v46 }
  0x5b   : > { %14991 = vst [vmem:[#allocation21_spill] sm:$0xff] %v10011_v6  ;;  %v2193_v56 = vunpack.c.h.bf16 %v1985_v46  ;;  %v1970_v17 = vrot.slane %v1968_v27, 5  ;;  %v14712_v30 = vunpack.c.l.bf16 %v10011_v6  ;;  %v14711_v15 = vunpack.c.h.bf16 %v10011_v6 }
  0x5c   : > { %v1956_v52 = vrot.slane %v1955_v7, 4  ;;  %v1965_v24 = vor.u32 %v1964_v41, %v1960_v0  ;;  %v10016_v38 = vmax.f32 %v9704_v47, %v2192_v35  ;;  %vm2272_vm3 = vcmp.gt.f32.partialorder %v2192_v35, -1.0027314e+29  ;;  %629 = vrot.lane.b32.xlu0 %v599_v48, %s9556_s21 }
  0x5d   : > { %v10019_v3 = vmax.f32 %v9718_v55, %v2193_v56  ;;  %vm2273_vm4 = vcmp.gt.f32.partialorder %v2193_v56, -1.0027314e+29  ;;  %vm2274_vm5 = vcmp.gt.f32.partialorder %v14712_v30, -1.0027314e+29  ;;  %vm2275_vm6 = vcmp.gt.f32.partialorder %v14711_v15, -1.0027314e+29 }
  0x5e   : > { %vm2302_vm7 = vmpackc.low %vm2273_vm4, %vm2272_vm3  ;;  %v1961_v26 = vsel %vm9997_vm2, %v1956_v52, %v1960_v0  ;;  %v1966_v47 = vrot.slane %v1965_v24, 4  ;;  %v1518_v22 = vpack.c.b16 %v1492_v10, %v1490_v25  ;;  %v1997_v42 = vshrl.u32 %v9711_v50, 16  ;;  %v7726_v25 = vld [vmem:[%s9601_s20 + $0x1f0] sm:$0x11] }
  0x5f   : > { %vm2303_vm8 = vmpackc.low %vm2275_vm6, %vm2274_vm5  ;;  %v10028_v57 = vsel %vm2302_vm7, %v1985_v46, 0  ;;  %v2188_v55 = vunpack.c.l.bf16 %v1961_v26  ;;  %v2189_v18 = vunpack.c.h.bf16 %v1961_v26  ;;  %v2010_v10 = vshrl.u32 %v9714_v51, 16 }
  0x60   : > { %v10031_v48 = vsel %vm2303_vm8, %v10011_v6, 0  ;;  %v2408_v49 = vunpack.c.l.b16 %v10028_v57  ;;  %v10036_v4 = vsel %vm9997_vm2, %v1966_v47, %v1970_v17  ;;  %1531 = vrot.lane.b32.xlu1 %v1514_v11, %s9556_s21  ;;  %v1999_v7 = vrot.slane %v1997_v42, 4 }
  0x61   : > { %14992 = vst [vmem:[#allocation22_spill] sm:$0xff] %v10036_v4  ;;  %v2410_v16 = vunpack.c.l.b16 %v10031_v48  ;;  %v10042_v5 = vmax.f32 %v9672_v29, %v2188_v55  ;;  %v10045_v0 = vmax.f32 %v9678_v34, %v2189_v18  ;;  %v14718_v27 = vunpack.c.l.bf16 %v10036_v4 }
  0x62   : > { %v14713_v46 = vunpack.c.h.bf16 %v10036_v4  ;;  %vm2268_vm9 = vcmp.gt.f32.partialorder %v2188_v55, -1.0027314e+29  ;;  %vm2269_vm10 = vcmp.gt.f32.partialorder %v2189_v18, -1.0027314e+29  ;;  %v2000_v11 = vshll.u32 %v9711_v50, 16 }
  0x63   : > { %v2438_v41 = vpack.c.b16 %v2410_v16, %v2408_v49  ;;  %vm2270_vm11 = vcmp.gt.f32.partialorder %v14718_v27, -1.0027314e+29  ;;  %vm2300_vm12 = vmpackc.low %vm2269_vm10, %vm2268_vm9  ;;  %v2006_v29 = vshll.u32 %v9714_v51, 16  ;;  %v2016_v35 = vshll.u32 %v7726_v25, 16 }
  0x64   : > { %vm2271_vm13 = vcmp.gt.f32.partialorder %v14713_v46, -1.0027314e+29  ;;  %v10056_v34 = vsel %vm2300_vm12, %v1961_v26, 0  ;;  %v2002_v17 = vrot.slane %v2000_v11, 5  ;;  %v1486_v50 = vunpack.c.h.b16 %v9731_v63  ;;  %v7729_v11 = vld [vmem:[%s9601_s20 + $0x208] sm:$0x11] }
  0x65   : > { %2456 = vrot.lane.b32.xlu2 %v2438_v41, %s9556_s21  ;;  %vm2301_vm14 = vmpackc.low %vm2271_vm13, %vm2270_vm11  ;;  %v2404_v56 = vunpack.c.l.b16 %v10056_v34  ;;  %v2008_v52 = vrot.slane %v2006_v29, 5  ;;  %v2012_v47 = vrot.slane %v2010_v10, 4  ;;  %v2018_v55 = vrot.slane %v2016_v35, 5 }
  0x66   : > { %v10063_v24 = vsel %vm2301_vm14, %v10036_v4, 0  ;;  %v1488_v26 = vunpack.c.h.b16 %v9738_v8  ;;  %v2003_v49 = vor.u32 %v2002_v17, %v1999_v7  ;;  %v1494_v42 = vunpack.c.h.b16 %v9789_v62 }
  0x67   : > { %v2406_v18 = vunpack.c.l.b16 %v10063_v24  ;;  %v1496_v16 = vunpack.c.h.b16 %v9799_v14  ;;  %v2013_v25 = vor.u32 %v2012_v47, %v2008_v52  ;;  %v2021_v29 = vshrl.u32 %v9754_v20, 16 }
  0x68   : > { %v1516_v41 = vpack.c.b16 %v1488_v26, %v1486_v50  ;;  %v2024_v63 = vshll.u32 %v9754_v20, 16  ;;  %v2004_v30 = vrot.slane %v2003_v49, 4  ;;  %v2030_v8 = vshll.u32 %v9763_v32, 16 }
  0x69   : > { %v2436_v15 = vpack.c.b16 %v2406_v18, %v2404_v56  ;;  %v10072_v10 = vpack.c.b16 %v1496_v16, %v1494_v42  ;;  %v2014_v35 = vrot.slane %v2013_v25, 4  ;;  %v2023_v46 = vrot.slane %v2021_v29, 4  ;;  %v10101_v16 = vld [vmem:[%s9601_s20 + $0x18] sm:$0xff] }
  0x6a   : > { %v2026_v7 = vrot.slane %v2024_v63, 5  ;;  %v2034_v62 = vshrl.u32 %v9763_v32, 16  ;;  %v2009_v14 = vsel %vm9997_vm2, %v2004_v30, %v2008_v52  ;;  %v2032_v17 = vrot.slane %v2030_v8, 5 }
  0x6b   : > { %2452 = vrot.lane.b32.xlu0 %v2436_v15, %s9556_s21  ;;  %v2040_v50 = vshll.u32 %v7729_v11, 16  ;;  %v1498_v20 = vunpack.c.h.b16 %v9831_v39  ;;  %v10082_v56 = vsel %vm9997_vm2, %v2014_v35, %v2018_v55  ;;  %v2196_v47 = vunpack.c.l.bf16 %v2009_v14 }
  0x6c   : > { %14993 = vst [vmem:[#allocation23_spill] sm:$0xff] %v10082_v56  ;;  %v2197_v26 = vunpack.c.h.bf16 %v2009_v14  ;;  %v2027_v18 = vor.u32 %v2026_v7, %v2023_v46  ;;  %v14717_v49 = vunpack.c.l.bf16 %v10082_v56  ;;  %v14716_v15 = vunpack.c.h.bf16 %v10082_v56 }
  0x6d   : > { %1539 = vrot.lane.b32.xlu2 %v1518_v22, %s9556_s21  ;;  %v2036_v30 = vrot.slane %v2034_v62, 4  ;;  %v2042_v52 = vrot.slane %v2040_v50, 5  ;;  %v10088_v42 = vmax.f32 %v9760_v31, %v2196_v47  ;;  %vm2276_vm15 = vcmp.gt.f32.partialorder %v2196_v47, -1.0027314e+29 }
  0x6e   : > { %v10091_v39 = vmax.f32 %v9766_v36, %v2197_v26  ;;  %vm2277_vm0 = vcmp.gt.f32.partialorder %v2197_v26, -1.0027314e+29  ;;  %vm2278_vm1 = vcmp.gt.f32.partialorder %v14717_v49, -1.0027314e+29  ;;  %vm2279_vm3 = vcmp.gt.f32.partialorder %v14716_v15, -1.0027314e+29  ;;  %v10104_v36 = vld [vmem:[%s9601_s20 + $0x20] sm:$0xff]  ;;  %v9319_v15 = vld [vmem:[%s14656_s1 + $0xf4] sm:$0xf0] }
  0x6f   : > { %vm2304_vm4 = vmpackc.low %vm2277_vm0, %vm2276_vm15  ;;  %v2028_v22 = vrot.slane %v2027_v18, 4  ;;  %v2037_v46 = vor.u32 %v2036_v30, %v2032_v17  ;;  %v1500_v31 = vunpack.c.h.b16 %v9841_v53  ;;  %v858_v50 = vshll.u32 %v10101_v16, 16 }
  0x70   : > { %vm2305_vm5 = vmpackc.low %vm2279_vm3, %vm2278_vm1  ;;  %v10097_v55 = vsel %vm2304_vm4, %v2009_v14, 0  ;;  %v855_v14 = vshrl.u32 %v10101_v16, 16  ;;  %v864_v47 = vshll.u32 %v10104_v36, 16  ;;  %v2082_v49 = vshrl.u32 %v9838_v61, 16 }
  0x71   : > { %14994 = vst [vmem:[#allocation24_spill] sm:$0xff] %v10097_v55  ;;  %v10107_v25 = vsel %vm2305_vm5, %v10082_v56, 0  ;;  %v2412_v11 = vunpack.c.l.b16 %v10097_v55  ;;  %v2033_v29 = vsel %vm9997_vm2, %v2028_v22, %v2032_v17  ;;  %v2038_v63 = vrot.slane %v2037_v46, 4  ;;  %v9351_v56 = vld [vmem:[%s14656_s1 + $0x1f4] sm:$0xf0] }
  0x72   : > { %14995 = vst [vmem:[#allocation25_spill] sm:$0xff] %v10107_v25  ;;  %v2414_v8 = vunpack.c.l.b16 %v10107_v25  ;;  %v2200_v35 = vunpack.c.l.bf16 %v2033_v29  ;;  %v2201_v7 = vunpack.c.h.bf16 %v2033_v29  ;;  %v10113_v62 = vpack.c.b16 %v1500_v31, %v1498_v20  ;;  %v808_v20 = vld [vmem:[%s9601_s20 + $0x28] sm:$0x11] }
  0x73   : > { %1535 = vrot.lane.b32.xlu0 %v1516_v41, %s9556_s21  ;;  %v10118_v53 = vsel %vm9997_vm2, %v2038_v63, %v2042_v52  ;;  %v857_v52 = vrot.slane %v855_v14, 4  ;;  %v868_v46 = vshrl.u32 %v10104_v36, 16  ;;  %v7735_v63 = vld [vmem:[%s9601_s20 + $0x238] sm:$0x11]  ;;  %v2084_v32 = vrot.slane %v2082_v49, 4 }
  0x74   : > { %14996 = vst [vmem:[#allocation26_spill] sm:$0xff] %v10118_v53  ;;  %v2440_v17 = vpack.c.b16 %v2414_v8, %v2412_v11  ;;  %v10124_v26 = vmax.f32 %v9802_v23, %v2200_v35  ;;  %v10127_v18 = vmax.f32 %v9804_v28, %v2201_v7  ;;  %v14715_v41 = vunpack.c.l.bf16 %v10118_v53 }
  0x75   : > { %v14714_v30 = vunpack.c.h.bf16 %v10118_v53  ;;  %vm2280_vm6 = vcmp.gt.f32.partialorder %v2200_v35, -1.0027314e+29  ;;  %vm2281_vm7 = vcmp.gt.f32.partialorder %v2201_v7, -1.0027314e+29  ;;  %v860_v23 = vrot.slane %v858_v50, 5 }
  0x76   : > { %2460 = vrot.lane.b32.xlu1 %v2440_v17, %s9556_s21  ;;  %vm10135_vm8 = vcmp.gt.f32.partialorder %v14715_v41, -1.0027314e+29  ;;  %vm2306_vm9 = vmpackc.low %vm2281_vm7, %vm2280_vm6  ;;  %v866_v28 = vrot.slane %v864_v47, 5  ;;  %v874_v11 = vshll.u32 %v808_v20, 16  ;;  %v2069_v8 = vshrl.u32 %v9835_v60, 16  ;;  %v8336_v47 = vld [vmem:[%s14656_s1 + $0x70] sm:$0xf] }
  0x77   : > { %vm2283_vm10 = vcmp.gt.f32.partialorder %v14714_v30, -1.0027314e+29  ;;  %v10142_v31 = vsel %vm2306_vm9, %v2033_v29, 0  ;;  %v861_v7 = vor.u32 %v860_v23, %v857_v52  ;;  %v870_v14 = vrot.slane %v868_v46, 4  ;;  %v9303_v29 = vld [vmem:[%s14656_s1 + $0x74] sm:$0xf0] }
  0x78   : > { %14999 = vst [vmem:[#allocation27_spill] sm:$0xff] %v10142_v31  ;;  %vm2307_vm11 = vmpackc.low %vm2283_vm10, %vm10135_vm8  ;;  %v2416_v35 = vunpack.c.l.b16 %v10142_v31  ;;  %v2072_v50 = vshll.u32 %v9835_v60, 16  ;;  %v876_v20 = vrot.slane %v874_v11, 5  ;;  %v2071_v22 = vrot.slane %v2069_v8, 4  ;;  %v8400_v52 = vld [vmem:[%s14656_s1 + $0xf0] sm:$0xf] }
  0x79   : > { %v10157_v17 = vsel %vm2307_vm11, %v10118_v53, 0  ;;  %v2078_v30 = vshll.u32 %v9838_v61, 16  ;;  %v862_v23 = vrot.slane %v861_v7, 4  ;;  %v871_v46 = vor.u32 %v870_v14, %v866_v28  ;;  %v8528_v11 = vld [vmem:[%s14656_s1 + $0x1f0] sm:$0xf] }
  0x7a   : > { %15000 = vst [vmem:[#allocation28_spill] sm:$0xff] %v10157_v17  ;;  %v2418_v60 = vunpack.c.l.b16 %v10157_v17  ;;  %v2074_v41 = vrot.slane %v2072_v50, 5  ;;  %v2088_v27 = vshll.u32 %v7735_v63, 16  ;;  %v8337_v53 = vor.u32 %v9303_v29, %v8336_v47  ;;  %v10176_v4 = vpop.permute.xlu2 %607 }
  0x7b   : > { %v2080_v8 = vrot.slane %v2078_v30, 5  ;;  %v867_v14 = vsel %vm9997_vm2, %v862_v23, %v866_v28  ;;  %v872_v50 = vrot.slane %v871_v46, 4  ;;  %v8401_v28 = vor.u32 %v9319_v15, %v8400_v52 }
  0x7c   : > { %v2442_v7 = vpack.c.b16 %v2418_v60, %v2416_v35  ;;  %v2075_v6 = vor.u32 %v2074_v41, %v2071_v22  ;;  %v1074_v17 = vunpack.c.l.bf16 %v867_v14  ;;  %v1075_v31 = vunpack.c.h.bf16 %v867_v14  ;;  %5780 = vmatpush.bf16.msra.mxu0 %v8337_v53  ;;  %v8328_v41 = vld [vmem:[%s14656_s1 + $0x60] sm:$0xf]  ;;  %v9349_v60 = vld [vmem:[%s14656_s1 + $0x1e4] sm:$0xf0] }
  0x7d   : > { %v2090_v30 = vrot.slane %v2088_v27, 5  ;;  %v10183_v63 = vsel %vm9997_vm2, %v872_v50, %v876_v20  ;;  %v8529_v47 = vor.u32 %v9351_v56, %v8528_v11  ;;  %vm633_vm12 = vcmask 523264   ;;  %v8392_v56 = vld [vmem:[%s14656_s1 + $0xe0] sm:$0xf]  ;;  %5829 = vmatpush.bf16.msra.mxu1 %v8401_v28 }
  0x7e   : > { %1543 = vrot.lane.b32.xlu1 %v10072_v10, %s9556_s21  ;;  %2464 = vrot.lane.b32.xlu0 %v2442_v7, %s9556_s21  ;;  %v2076_v35 = vrot.slane %v2075_v6, 4  ;;  %v10189_v27 = vmax.f32 %v10016_v38, %v1074_v17  ;;  %v10192_v49 = vmax.f32 %v10019_v3, %v1075_v31  ;;  %v14734_v10 = vunpack.c.l.bf16 %v10183_v63  ;;  %v9301_v6 = vld [vmem:[%s14656_s1 + $0x64] sm:$0xf0] }
  0x7f   : > { %v14733_v53 = vunpack.c.h.bf16 %v10183_v63  ;;  %v9317_v38 = vld [vmem:[%s14656_s1 + $0xe4] sm:$0xf0]  ;;  %vm7654_vm13 = vcmask 1043456  ;;  %vm1154_vm14 = vcmp.gt.f32.partialorder %v1074_v17, -1.0027314e+29  ;;  %vm1155_vm15 = vcmp.gt.f32.partialorder %v1075_v31, -1.0027314e+29  ;;  %5927 = vmatpush.bf16.msra.mxu3 %v8529_v47 }
  0x80   : > { %v2081_v3 = vsel %vm9997_vm2, %v2076_v35, %v2080_v8  ;;  %v2085_v15 = vor.u32 %v2084_v32, %v2080_v8  ;;  %vm1156_vm0 = vcmp.gt.f32.partialorder %v14734_v10, -1.0027314e+29  ;;  %vm1184_vm3 = vmpackc.low %vm1155_vm15, %vm1154_vm14  ;;  %v8329_v17 = vor.u32 %v9301_v6, %v8328_v41  ;;  %v8520_v32 = vld [vmem:[%s14656_s1 + $0x1e0] sm:$0xf] }
  0x81   : > { %vm1157_vm1 = vcmp.gt.f32.partialorder %v14733_v53, -1.0027314e+29  ;;  %v2208_v29 = vunpack.c.l.bf16 %v2081_v3  ;;  %v2209_v20 = vunpack.c.h.bf16 %v2081_v3  ;;  %v1200_v22 = vsel %vm1184_vm3, %v867_v14, 0 }
  0x82   : > { %vm1185_vm4 = vmpackc.low %vm1157_vm1, %vm1156_vm0  ;;  %v2086_v52 = vrot.slane %v2085_v15, 4  ;;  %v8393_v31 = vor.u32 %v9317_v38, %v8392_v56  ;;  %v1429_v46 = vunpack.c.l.b16 %v1200_v22  ;;  %v1430_v11 = vunpack.c.h.b16 %v1200_v22  ;;  %5781 = vmatpush.bf16.msra.mxu0 %v8329_v17  ;;  %v7732_v15 = vld [vmem:[%s9601_s20 + $0x220] sm:$0x11]  ;;  %v10261_v17 = vld [vmem:[%s9601_s20 + $0x30] sm:$0xff] }
  0x83   : > { %v1201_v23 = vsel %vm1185_vm4, %v10183_v63, 0  ;;  %v10219_v8 = vmax.f32 %v9879_v44, %v2208_v29  ;;  %v10226_v50 = vmax.f32 %v9881_v33, %v2209_v20  ;;  %vm10228_vm5 = vcmp.gt.f32.partialorder %v2208_v29, -1.0027314e+29  ;;  %v10241_v56 = vpop.permute.xlu2 %1533 }
  0x84   : > { %v1432_v7 = vunpack.c.h.b16 %v1201_v23  ;;  %v10223_v14 = vsel %vm9997_vm2, %v2086_v52, %v2090_v30  ;;  %5830 = vmatpush.bf16.msra.mxu1 %v8393_v31  ;;  %vm2289_vm6 = vcmp.gt.f32.partialorder %v2209_v20, -1.0027314e+29  ;;  %v8521_v47 = vor.u32 %v9349_v60, %v8520_v32  ;;  %15004 = vst [vmem:[#allocation30_spill] sm:$0xff] %v10241_v56  ;;  %v10264_v31 = vld [vmem:[%s9601_s20 + $0x38] sm:$0xff] }
  0x85   : > { %15001 = vst [vmem:[#allocation29_spill] sm:$0xff] %v10223_v14  ;;  %v14732_v28 = vunpack.c.l.bf16 %v10223_v14  ;;  %v14731_v44 = vunpack.c.h.bf16 %v10223_v14  ;;  %vm2310_vm7 = vmpackc.low %vm2289_vm6, %vm10228_vm5  ;;  %v2045_v33 = vshrl.u32 %v9793_v12, 16  ;;  %v2048_v41 = vshll.u32 %v9793_v12, 16 }
  0x86   : > { %1547 = vrot.lane.b32.xlu0 %v10113_v62, %s9556_s21  ;;  %v1458_v30 = vpack.c.b16 %v1432_v7, %v1430_v11  ;;  %v2054_v6 = vshll.u32 %v9796_v2, 16  ;;  %v10251_v62 = vsel %vm2310_vm7, %v2081_v3, 0  ;;  %5928 = vmatpush.bf16.msra.mxu3 %v8521_v47  ;;  %v2058_v29 = vshrl.u32 %v9796_v2, 16 }
  0x87   : > { %vm10245_vm8 = vcmp.gt.f32.partialorder %v14732_v28, -1.0027314e+29  ;;  %vm2291_vm9 = vcmp.gt.f32.partialorder %v14731_v44, -1.0027314e+29  ;;  %15007 = vst [vmem:[#allocation31_spill] sm:$0xff] %v10251_v62  ;;  %v2424_v20 = vunpack.c.l.b16 %v10251_v62  ;;  %v2047_v22 = vrot.slane %v2045_v33, 4  ;;  %v811_v33 = vld [vmem:[%s9601_s20 + $0x40] sm:$0x11] }
  0x88   : > { %v1574_v12 = vsel %vm633_vm12, %v1458_v30, %v10241_v56  ;;  %vm2311_vm10 = vmpackc.low %vm2291_vm9, %vm10245_vm8  ;;  %v2050_v52 = vrot.slane %v2048_v41, 5  ;;  %v2056_v11 = vrot.slane %v2054_v6, 5  ;;  %v2060_v47 = vrot.slane %v2058_v29, 4  ;;  %v8320_v6 = vld [vmem:[%s14656_s1 + $0x50] sm:$0xf] }
  0x89   : > { %v1605_v3 = vunpack.c.l.b16 %v1574_v12  ;;  %v7689_v32 = vsel %vm7654_vm13, %v1201_v23, %v1574_v12  ;;  %v10268_v60 = vsel %vm2311_vm10, %v10223_v14, 0  ;;  %v2064_v30 = vshll.u32 %v7732_v15, 16  ;;  %v9299_v15 = vld [vmem:[%s14656_s1 + $0x54] sm:$0xf0] }
  0x8a   : > { %15008 = vst [vmem:[#allocation32_spill] sm:$0xff] %v10268_v60  ;;  %v2426_v7 = vunpack.c.l.b16 %v10268_v60  ;;  %v2051_v35 = vor.u32 %v2050_v52, %v2047_v22  ;;  %v879_v41 = vshrl.u32 %v10261_v17, 16  ;;  %v882_v44 = vshll.u32 %v10261_v17, 16 }
  0x8b   : > { %1703 = vst [vmem:[#allocation2 + $0xb4] sm:$0xff] %v7689_v32  ;;  %v1637_v38 = vpack.c.b16 %v1605_v3, %v1429_v46  ;;  %v888_v28 = vshll.u32 %v10264_v31, 16  ;;  %v2061_v12 = vor.u32 %v2060_v47, %v2056_v11  ;;  %v2066_v10 = vrot.slane %v2064_v30, 5 }
  0x8c   : > { %v2446_v53 = vpack.c.b16 %v2426_v7, %v2424_v20  ;;  %v2052_v23 = vrot.slane %v2051_v35, 4  ;;  %v881_v46 = vrot.slane %v879_v41, 4  ;;  %v884_v29 = vrot.slane %v882_v44, 5 }
  0x8d   : > { %1701 = vst [vmem:[#allocation2 + $0x7c] sm:$0xff] %v1637_v38  ;;  %v890_v22 = vrot.slane %v888_v28, 5  ;;  %v892_v52 = vshrl.u32 %v10264_v31, 16  ;;  %v2062_v3 = vrot.slane %v2061_v12, 4  ;;  %v898_v32 = vshll.u32 %v811_v33, 16 }
  0x8e   : > { %2472 = vrot.lane.b32.xlu1 %v2446_v53, %s9556_s21  ;;  %v2057_v20 = vsel %vm9997_vm2, %v2052_v23, %v2056_v11  ;;  %v1506_v7 = vunpack.c.h.b16 %v9915_v58  ;;  %v885_v30 = vor.u32 %v884_v29, %v881_v46  ;;  %v1508_v44 = vunpack.c.h.b16 %v9923_v9  ;;  %v8384_v53 = vld [vmem:[%s14656_s1 + $0xd0] sm:$0xf]  ;;  %v9315_v58 = vld [vmem:[%s14656_s1 + $0xd4] sm:$0xf0] }
  0x8f   : > { %v2204_v35 = vunpack.c.l.bf16 %v2057_v20  ;;  %v2205_v47 = vunpack.c.h.bf16 %v2057_v20  ;;  %v894_v14 = vrot.slane %v892_v52, 4  ;;  %v10288_v38 = vsel %vm9997_vm2, %v2062_v3, %v2066_v10  ;;  %v8464_v9 = vld [vmem:[%s14656_s1 + $0x170] sm:$0xf]  ;;  %v9335_v12 = vld [vmem:[%s14656_s1 + $0x174] sm:$0xf0] }
  0x90   : > { %15009 = vst [vmem:[#allocation33_spill] sm:$0xff] %v10288_v38  ;;  %v900_v28 = vrot.slane %v898_v32, 5  ;;  %v8321_v41 = vor.u32 %v9299_v15, %v8320_v6  ;;  %v14738_v10 = vunpack.c.l.bf16 %v10288_v38  ;;  %v14737_v23 = vunpack.c.h.bf16 %v10288_v38  ;;  %v9347_v15 = vld [vmem:[%s14656_s1 + $0x1d4] sm:$0xf0]  ;;  %v8312_v52 = vld [vmem:[%s14656_s1 + $0x40] sm:$0xf] }
  0x91   : > { %v10298_v11 = vmax.f32 %v9827_v43, %v2204_v35  ;;  %v10301_v33 = vmax.f32 %v9844_v45, %v2205_v47  ;;  %v8512_v43 = vld [vmem:[%s14656_s1 + $0x1d0] sm:$0xf]  ;;  %vm2284_vm11 = vcmp.gt.f32.partialorder %v2204_v35, -1.0027314e+29  ;;  %vm2285_vm14 = vcmp.gt.f32.partialorder %v2205_v47, -1.0027314e+29 }
  0x92   : > { %v886_v45 = vrot.slane %v885_v30, 4  ;;  %v895_v6 = vor.u32 %v894_v14, %v890_v22  ;;  %5782 = vmatpush.bf16.msra.mxu0 %v8321_v41  ;;  %vm2286_vm15 = vcmp.gt.f32.partialorder %v14738_v10, -1.0027314e+29  ;;  %vm2287_vm0 = vcmp.gt.f32.partialorder %v14737_v23, -1.0027314e+29  ;;  %vm2308_vm1 = vmpackc.low %vm2285_vm14, %vm2284_vm11  ;;  %v9297_v14 = vld [vmem:[%s14656_s1 + $0x44] sm:$0xf0] }
  0x93   : > { %v1526_v46 = vpack.c.b16 %v1508_v44, %v1506_v7  ;;  %v8385_v29 = vor.u32 %v9315_v58, %v8384_v53  ;;  %vm2309_vm3 = vmpackc.low %vm2287_vm0, %vm2286_vm15  ;;  %v10327_v3 = vsel %vm2308_vm1, %v2057_v20, 0  ;;  %v8465_v47 = vor.u32 %v9335_v12, %v8464_v9  ;;  %v8376_v7 = vld [vmem:[%s14656_s1 + $0xc0] sm:$0xf]  ;;  %v9313_v20 = vld [vmem:[%s14656_s1 + $0xc4] sm:$0xf0] }
  0x94   : > { %15010 = vst [vmem:[#allocation34_spill] sm:$0xff] %v10327_v3  ;;  %v891_v32 = vsel %vm9997_vm2, %v886_v45, %v890_v22  ;;  %v896_v35 = vrot.slane %v895_v6, 4  ;;  %v10335_v30 = vsel %vm2309_vm3, %v10288_v38, 0  ;;  %v2420_v44 = vunpack.c.l.b16 %v10327_v3  ;;  %v8456_v22 = vld [vmem:[%s14656_s1 + $0x160] sm:$0xf] }
  0x95   : > { %15011 = vst [vmem:[#allocation35_spill] sm:$0xff] %v10335_v30  ;;  %v1078_v41 = vunpack.c.l.bf16 %v891_v32  ;;  %v1079_v53 = vunpack.c.h.bf16 %v891_v32  ;;  %5831 = vmatpush.bf16.msra.mxu1 %v8385_v29  ;;  %v2422_v58 = vunpack.c.l.b16 %v10335_v30  ;;  %5878 = vmatpush.bf16.msra.mxu2 %v8465_v47  ;;  %v8513_v12 = vor.u32 %v9347_v15, %v8512_v43  ;;  %v9333_v6 = vld [vmem:[%s14656_s1 + $0x164] sm:$0xf0]  ;;  %v8504_v29 = vld [vmem:[%s14656_s1 + $0x1c0] sm:$0xf]  ;;  %v10394_v30 = vpop.permute.xlu2 %1537 }
  0x96   : > { %v10347_v9 = vsel %vm9997_vm2, %v896_v35, %v900_v28  ;;  %1555 = vrot.lane.b32.xlu1 %v1526_v46, %s9556_s21  ;;  %v8313_v45 = vor.u32 %v9297_v14, %v8312_v52  ;;  %v9345_v23 = vld [vmem:[%s14656_s1 + $0x1c4] sm:$0xf0]  ;;  %v10368_v52 = vld [vmem:[%s9601_s20] sm:$0xff]  ;;  %v8377_v47 = vor.u32 %v9313_v20, %v8376_v7  ;;  %v1504_v38 = vunpack.c.h.b16 %v9893_v19 }
  0x97   : > { %v10360_v28 = vmax.f32 %v10088_v42, %v1078_v41  ;;  %v10363_v46 = vmax.f32 %v10091_v39, %v1079_v53  ;;  %v14740_v43 = vunpack.c.l.bf16 %v10347_v9  ;;  %v14739_v15 = vunpack.c.h.bf16 %v10347_v9  ;;  %v10371_v14 = vld [vmem:[%s9601_s20 + $0x8] sm:$0xff]  ;;  %5929 = vmatpush.bf16.msra.mxu3 %v8513_v12 }
  0x98   : > { %v2444_v35 = vpack.c.b16 %v2422_v58, %v2420_v44  ;;  %vm1158_vm4 = vcmp.gt.f32.partialorder %v1078_v41, -1.0027314e+29  ;;  %vm1159_vm5 = vcmp.gt.f32.partialorder %v1079_v53, -1.0027314e+29  ;;  %5783 = vmatpush.bf16.msra.mxu0 %v8313_v45  ;;  %v8457_v42 = vor.u32 %v9333_v6, %v8456_v22  ;;  %v805_v44 = vld [vmem:[%s9601_s20 + $0x10] sm:$0x11]  ;;  %v10385_v22 = vld [vmem:[%s9601_s20 + $0x48] sm:$0xff] }
  0x99   : > { %vm1160_vm6 = vcmp.gt.f32.partialorder %v14740_v43, -1.0027314e+29  ;;  %vm1161_vm7 = vcmp.gt.f32.partialorder %v14739_v15, -1.0027314e+29  ;;  %vm1186_vm8 = vmpackc.low %vm1159_vm5, %vm1158_vm4  ;;  %v8505_v39 = vor.u32 %v9345_v23, %v8504_v29  ;;  %5832 = vmatpush.bf16.msra.mxu1 %v8377_v47  ;;  %v831_v41 = vshrl.u32 %v10368_v52, 16 }
  0x9a   : > { %2468 = vrot.lane.b32.xlu2 %v2444_v35, %s9556_s21  ;;  %vm1187_vm9 = vmpackc.low %vm1161_vm7, %vm1160_vm6  ;;  %v1202_v10 = vsel %vm1186_vm8, %v891_v32, 0  ;;  %v834_v7 = vshll.u32 %v10368_v52, 16  ;;  %v840_v53 = vshll.u32 %v10371_v14, 16  ;;  %5879 = vmatpush.bf16.msra.mxu2 %v8457_v42  ;;  %v844_v23 = vshrl.u32 %v10371_v14, 16  ;;  %v10388_v35 = vld [vmem:[%s9601_s20 + $0x50] sm:$0xff] }
  0x9b   : > { %v1203_v20 = vsel %vm1187_vm9, %v10347_v9, 0  ;;  %v1433_v58 = vunpack.c.l.b16 %v1202_v10  ;;  %v1434_v12 = vunpack.c.h.b16 %v1202_v10  ;;  %5930 = vmatpush.bf16.msra.mxu3 %v8505_v39  ;;  %v833_v32 = vrot.slane %v831_v41, 4 }
  0x9c   : > { %v1436_v45 = vunpack.c.h.b16 %v1203_v20  ;;  %v836_v6 = vrot.slane %v834_v7, 5  ;;  %v842_v29 = vrot.slane %v840_v53, 5  ;;  %v846_v47 = vrot.slane %v844_v23, 4  ;;  %v814_v53 = vld [vmem:[%s9601_s20 + $0x58] sm:$0x11] }
  0x9d   : > { %v850_v15 = vshll.u32 %v805_v44, 16  ;;  %v1502_v43 = vunpack.c.h.b16 %v9886_v59  ;;  %v903_v60 = vshrl.u32 %v10385_v22, 16  ;;  %v906_v62 = vshll.u32 %v10385_v22, 16 }
  0x9e   : > { %v1459_v10 = vpack.c.b16 %v1436_v45, %v1434_v12  ;;  %v837_v42 = vor.u32 %v836_v6, %v833_v32  ;;  %v847_v39 = vor.u32 %v846_v47, %v842_v29  ;;  %v912_v3 = vshll.u32 %v10388_v35, 16 }
  0x9f   : > { %v852_v41 = vrot.slane %v850_v15, 5  ;;  %v1524_v7 = vpack.c.b16 %v1504_v38, %v1502_v43  ;;  %v905_v23 = vrot.slane %v903_v60, 4  ;;  %v908_v19 = vrot.slane %v906_v62, 5 }
  0xa0   : > { %v1577_v44 = vsel %vm633_vm12, %v1459_v10, %v10394_v30  ;;  %v838_v59 = vrot.slane %v837_v42, 4  ;;  %v848_v32 = vrot.slane %v847_v39, 4  ;;  %v914_v6 = vrot.slane %v912_v3, 5 }
  0xa1   : > { %v1609_v12 = vunpack.c.l.b16 %v1577_v44  ;;  %v7691_v45 = vsel %vm7654_vm13, %v1203_v20, %v1577_v44  ;;  %v909_v38 = vor.u32 %v908_v19, %v905_v23  ;;  %v916_v43 = vshrl.u32 %v10388_v35, 16  ;;  %v7736_v44 = vld [vmem:[%s9601_s20 + $0x240] sm:$0xff] }
  0xa2   : > { %1707 = vst [vmem:[#allocation2 + $0x124] sm:$0xff] %v7691_v45  ;;  %v843_v47 = vsel %vm9997_vm2, %v838_v59, %v842_v29  ;;  %1551 = vrot.lane.b32.xlu2 %v1524_v7, %s9556_s21  ;;  %v922_v15 = vshll.u32 %v814_v53, 16  ;;  %v10407_v60 = vsel %vm9997_vm2, %v848_v32, %v852_v41  ;;  %v7737_v45 = vld [vmem:[%s9601_s20 + $0x248] sm:$0xff]  ;;  %v223_v55 = vunpack.c.h.bf16 %v10368_v52 }
  0xa3   : > { %v1641_v61 = vpack.c.b16 %v1609_v12, %v1433_v58  ;;  %v1070_v62 = vunpack.c.l.bf16 %v843_v47  ;;  %v1071_v10 = vunpack.c.h.bf16 %v843_v47  ;;  %v14750_v20 = vunpack.c.l.bf16 %v10407_v60 }
  0xa4   : > { %v14749_v3 = vunpack.c.h.bf16 %v10407_v60  ;;  %v910_v42 = vrot.slane %v909_v38, 4  ;;  %v918_v39 = vrot.slane %v916_v43, 4  ;;  %v924_v41 = vrot.slane %v922_v15, 5 }
  0xa5   : > { %1705 = vst [vmem:[#allocation2 + $0xec] sm:$0xff] %v1641_v61  ;;  %v10412_v29 = vmax.f32 %v10042_v5, %v1070_v62  ;;  %v10415_v7 = vmax.f32 %v10045_v0, %v1071_v10  ;;  %vm1150_vm10 = vcmp.gt.f32.partialorder %v1070_v62, -1.0027314e+29  ;;  %vm1151_vm11 = vcmp.gt.f32.partialorder %v1071_v10, -1.0027314e+29 }
  0xa6   : > { %vm1152_vm14 = vcmp.gt.f32.partialorder %v14750_v20, -1.0027314e+29  ;;  %vm1153_vm15 = vcmp.gt.f32.partialorder %v14749_v3, -1.0027314e+29  ;;  %vm1182_vm0 = vmpackc.low %vm1151_vm11, %vm1150_vm10  ;;  %v915_v58 = vsel %vm9997_vm2, %v910_v42, %v914_v6  ;;  %v919_v61 = vor.u32 %v918_v39, %v914_v6  ;;  %v10432_v6 = vpop.permute.xlu1 %1529 }
  0xa7   : > { %vm1183_vm1 = vmpackc.low %vm1153_vm15, %vm1152_vm14  ;;  %v1198_v5 = vsel %vm1182_vm0, %v843_v47, 0  ;;  %v1082_v53 = vunpack.c.l.bf16 %v915_v58  ;;  %v1083_v0 = vunpack.c.h.bf16 %v915_v58  ;;  %15012 = vst [vmem:[#allocation36_spill] sm:$0xff] %v10432_v6  ;;  %v2093_v15 = vshrl.u32 %v7736_v44, 16 }
  0xa8   : > { %v1199_v59 = vsel %vm1183_vm1, %v10407_v60, 0  ;;  %v1425_v23 = vunpack.c.l.b16 %v1198_v5  ;;  %v1426_v19 = vunpack.c.h.b16 %v1198_v5  ;;  %v920_v12 = vrot.slane %v919_v61, 4 }
  0xa9   : > { %v1428_v32 = vunpack.c.h.b16 %v1199_v59  ;;  %v10427_v38 = vmax.f32 %v10124_v26, %v1082_v53  ;;  %v10430_v43 = vmax.f32 %v10127_v18, %v1083_v0  ;;  %vm1162_vm3 = vcmp.gt.f32.partialorder %v1082_v53, -1.0027314e+29  ;;  %v7738_v18 = vld [vmem:[%s9601_s20 + $0x250] sm:$0x11] }
  0xaa   : > { %v10436_v47 = vsel %vm9997_vm2, %v920_v12, %v924_v41  ;;  %vm1163_vm4 = vcmp.gt.f32.partialorder %v1083_v0, -1.0027314e+29  ;;  %v2096_v62 = vshll.u32 %v7736_v44, 16  ;;  %v2102_v26 = vshll.u32 %v7737_v45, 16 }
  0xab   : > { %v1457_v10 = vpack.c.b16 %v1428_v32, %v1426_v19  ;;  %v14753_v42 = vunpack.c.l.bf16 %v10436_v47  ;;  %v14755_v39 = vunpack.c.h.bf16 %v10436_v47  ;;  %vm1188_vm5 = vmpackc.low %vm1163_vm4, %vm1162_vm3  ;;  %v2095_v5 = vrot.slane %v2093_v15, 4 }
  0xac   : > { %v1204_v61 = vsel %vm1188_vm5, %v915_v58, 0  ;;  %v2098_v53 = vrot.slane %v2096_v62, 5  ;;  %v2106_v3 = vshrl.u32 %v7737_v45, 16  ;;  %v2104_v45 = vrot.slane %v2102_v26, 5 }
  0xad   : > { %v1571_v20 = vsel %vm633_vm12, %v1457_v10, %v10432_v6  ;;  %vm1164_vm6 = vcmp.gt.f32.partialorder %v14753_v42, -1.0027314e+29  ;;  %vm1165_vm7 = vcmp.gt.f32.partialorder %v14755_v39, -1.0027314e+29  ;;  %v1437_v41 = vunpack.c.l.b16 %v1204_v61 }
  0xae   : > { %v1601_v0 = vunpack.c.l.b16 %v1571_v20  ;;  %v7687_v44 = vsel %vm7654_vm13, %v1199_v59, %v1571_v20  ;;  %vm1189_vm8 = vmpackc.low %vm1165_vm7, %vm1164_vm6  ;;  %v1438_v19 = vunpack.c.h.b16 %v1204_v61  ;;  %v2099_v58 = vor.u32 %v2098_v53, %v2095_v5 }
  0xaf   : > { %1699 = vst [vmem:[#allocation2 + $0x44] sm:$0xff] %v7687_v44  ;;  %v1205_v12 = vsel %vm1189_vm8, %v10436_v47, 0  ;;  %v2108_v32 = vrot.slane %v2106_v3, 4  ;;  %v2112_v15 = vshll.u32 %v7738_v18, 16  ;;  %v222_v42 = vunpack.c.l.bf16 %v10368_v52 }
  0xb0   : > { %v1633_v62 = vpack.c.b16 %v1601_v0, %v1425_v23  ;;  %v1440_v10 = vunpack.c.h.b16 %v1205_v12  ;;  %v2100_v2 = vrot.slane %v2099_v58, 4  ;;  %v224_v20 = vunpack.c.l.bf16 %v10371_v14  ;;  %v10458_v23 = vpop.permute.xlu2 %1541 }
  0xb1   : > { %v2109_v25 = vor.u32 %v2108_v32, %v2104_v45  ;;  %v2114_v39 = vrot.slane %v2112_v15, 5  ;;  %v10455_v26 = vmax.f32 %v10412_v29, %v222_v42  ;;  %v225_v3 = vunpack.c.h.bf16 %v10371_v14  ;;  %15014 = vst [vmem:[#allocation38_spill] sm:$0xff] %v10458_v23  ;;  %v8368_v15 = vld [vmem:[%s14656_s1 + $0xb0] sm:$0xf]  ;;  %v8360_v32 = vld [vmem:[%s14656_s1 + $0xa0] sm:$0xf] }
  0xb2   : > { %1697 = vst [vmem:[#allocation2 + $0xc] sm:$0xff] %v1633_v62  ;;  %v1460_v59 = vpack.c.b16 %v1440_v10, %v1438_v19  ;;  %v2105_v61 = vsel %vm9997_vm2, %v2100_v2, %v2104_v45  ;;  %v10461_v0 = vmax.f32 %v10415_v7, %v223_v55  ;;  %vm10465_vm9 = vcmp.gt.f32.partialorder %v222_v42, -1.0027314e+29  ;;  %v9311_v62 = vld [vmem:[%s14656_s1 + $0xb4] sm:$0xf0]  ;;  %v8496_v19 = vld [vmem:[%s14656_s1 + $0x1b0] sm:$0xf] }
  0xb3   : > { %15013 = vst [vmem:[#allocation37_spill] sm:$0xff] %v10455_v26  ;;  %v2110_v18 = vrot.slane %v2109_v25, 4  ;;  %v2212_v5 = vunpack.c.l.bf16 %v2105_v61  ;;  %v2213_v53 = vunpack.c.h.bf16 %v2105_v61  ;;  %vm10469_vm10 = vcmp.gt.f32.partialorder %v223_v55, -1.0027314e+29  ;;  %v8304_v55 = vld [vmem:[%s14656_s1 + $0x30] sm:$0xf] }
  0xb4   : > { %15015 = vst [vmem:[#allocation39_spill] sm:$0xff] %v10461_v0  ;;  %v1580_v44 = vsel %vm633_vm12, %v1460_v59, %v10458_v23  ;;  %vm10473_vm11 = vcmp.gt.f32.partialorder %v224_v20, -1.0027314e+29  ;;  %vm286_vm14 = vmpackc.low %vm10469_vm10, %vm10465_vm9  ;;  %v9331_v10 = vld [vmem:[%s14656_s1 + $0x154] sm:$0xf0]  ;;  %vm10520_vm1 = vcmp.gt.f32.partialorder %v225_v3, -1.0027314e+29 }
  0xb5   : > { %v1613_v25 = vunpack.c.l.b16 %v1580_v44  ;;  %v7693_v58 = vsel %vm7654_vm13, %v1205_v12, %v1580_v44  ;;  %v10480_v7 = vsel %vm9997_vm2, %v2110_v18, %v2114_v39  ;;  %v10483_v42 = vmax.f32 %v9926_v40, %v2212_v5  ;;  %v9295_v12 = vld [vmem:[%s14656_s1 + $0x34] sm:$0xf0]  ;;  %v8296_v23 = vld [vmem:[%s14656_s1 + $0x20] sm:$0xf]  ;;  %vm287_vm7 = vmpackc.low %vm10520_vm1, %vm10473_vm11 }
  0xb6   : > { %15022 = vst [vmem:[#allocation40_spill] sm:$0xff] %v10480_v7  ;;  %v10496_v39 = vmax.f32 %v9928_v54, %v2213_v53  ;;  %v14757_v40 = vunpack.c.l.bf16 %v10480_v7  ;;  %v14759_v45 = vunpack.c.h.bf16 %v10480_v7  ;;  %vm10500_vm15 = vcmp.gt.f32.partialorder %v2212_v5, -1.0027314e+29  ;;  %v8448_v54 = vld [vmem:[%s14656_s1 + $0x150] sm:$0xf]  ;;  %v9343_v2 = vld [vmem:[%s14656_s1 + $0x1b4] sm:$0xf0] }
  0xb7   : > { %1711 = vst [vmem:[#allocation2 + $0x194] sm:$0xff] %v7693_v58  ;;  %v1645_v59 = vpack.c.b16 %v1613_v25, %v1437_v41  ;;  %vm10516_vm0 = vcmp.gt.f32.partialorder %v2213_v53, -1.0027314e+29  ;;  %v10525_v44 = vsel %vm286_vm14, %v10368_v52, 0  ;;  %v15033_v52 = vunpack.c.l.bf16 %v9625_v13 }
  0xb8   : > { %vm10535_vm3 = vcmp.gt.f32.partialorder %v14757_v40, -1.0027314e+29  ;;  %vm10541_vm4 = vcmp.gt.f32.partialorder %v14759_v45, -1.0027314e+29  ;;  %vm2312_vm5 = vmpackc.low %vm10516_vm0, %vm10500_vm15  ;;  %v15034_v58 = vunpack.c.h.bf16 %v9625_v13  ;;  %v9293_v45 = vld [vmem:[%s14656_s1 + $0x24] sm:$0xf0]  ;;  %v8305_v18 = vor.u32 %v9295_v12, %v8304_v55 }
  0xb9   : > { %v371_v25 = vmax.f32 %v224_v20, %v15033_v52  ;;  %1709 = vst [vmem:[#allocation2 + $0x15c] sm:$0xff] %v1645_v59  ;;  %vm2313_vm6 = vmpackc.low %vm10541_vm4, %vm10535_vm3  ;;  %v10566_v13 = vsel %vm2312_vm5, %v2105_v61, 0  ;;  %v497_v20 = vunpack.c.l.b16 %v10525_v44  ;;  %v9309_v52 = vld [vmem:[%s14656_s1 + $0xa4] sm:$0xf0]  ;;  %v8440_v59 = vld [vmem:[%s14656_s1 + $0x140] sm:$0xf]  ;;  %v15037_v61 = vunpack.c.l.bf16 %v10407_v60 }
  0xba   : > { %v372_v40 = vmax.f32 %v225_v3, %v15034_v58  ;;  %15035 = vst [vmem:[#allocation41_spill] sm:$0xff] %v10566_v13  ;;  %v498_v3 = vunpack.c.h.b16 %v10525_v44  ;;  %v10577_v41 = vsel %vm2313_vm6, %v10480_v7, 0  ;;  %v2428_v53 = vunpack.c.l.b16 %v10566_v13  ;;  %v9329_v58 = vld [vmem:[%s14656_s1 + $0x144] sm:$0xf0]  ;;  %v10592_v7 = vld [vmem:[%s9601_s20 + $0x60] sm:$0xff]  ;;  %5784 = vmatpush.bf16.msra.mxu0 %v8305_v18 }
  0xbb   : > { %15036 = vst [vmem:[#allocation42_spill] sm:$0xff] %v10577_v41  ;;  %v1104_v55 = vmax.f32 %v371_v25, %v15037_v61  ;;  %v15038_v12 = vunpack.c.h.bf16 %v10407_v60  ;;  %v2430_v13 = vunpack.c.l.b16 %v10577_v41  ;;  %v303_v29 = vsel %vm287_vm7, %v10371_v14, 0  ;;  %v8488_v25 = vld [vmem:[%s14656_s1 + $0x1a0] sm:$0xf]  ;;  %v9341_v60 = vld [vmem:[%s14656_s1 + $0x1a4] sm:$0xf0] }
  0xbc   : > { %v8369_v5 = vor.u32 %v9311_v62, %v8368_v15  ;;  %v8449_v56 = vor.u32 %v9331_v10, %v8448_v54  ;;  %v15039_v61 = vunpack.c.l.bf16 %v9607_v1  ;;  %v15040_v41 = vunpack.c.h.bf16 %v9607_v1  ;;  %v10611_v15 = vld [vmem:[%s9601_s20 + $0x68] sm:$0xff]  ;;  %v817_v62 = vld [vmem:[%s9601_s20 + $0x70] sm:$0x11]  ;;  %v10614_v10 = vpop.permute.xlu0 %601 }
  0xbd   : > { %v1105_v44 = vmax.f32 %v372_v40, %v15038_v12  ;;  %v500_v40 = vunpack.c.h.b16 %v303_v29  ;;  %v8497_v14 = vor.u32 %v9343_v2, %v8496_v19  ;;  %v2448_v54 = vpack.c.b16 %v2430_v13, %v2428_v53 }
  0xbe   : > { %v10604_v12 = vmax.f32 %v1104_v55, %v15039_v61  ;;  %5833 = vmatpush.bf16.msra.mxu1 %v8369_v5  ;;  %5880 = vmatpush.bf16.msra.mxu2 %v8449_v56  ;;  %v8297_v18 = vor.u32 %v9293_v45, %v8296_v23  ;;  %v8361_v0 = vor.u32 %v9309_v52, %v8360_v32  ;;  %v927_v26 = vshrl.u32 %v10592_v7, 16 }
  0xbf   : > { %v10608_v51 = vmax.f32 %v1105_v44, %v15040_v41  ;;  %v529_v6 = vpack.c.b16 %v500_v40, %v498_v3  ;;  %5931 = vmatpush.bf16.msra.mxu3 %v8497_v14  ;;  %v8441_v55 = vor.u32 %v9329_v58, %v8440_v59  ;;  %v8489_v61 = vor.u32 %v9341_v60, %v8488_v25  ;;  %v606_v60 = vpop.permute.xlu1 %605 }
  0xc0   : > { %v930_v1 = vshll.u32 %v10592_v7, 16  ;;  %2476 = vrot.lane.b32.xlu0 %v2448_v54, %s9556_s21  ;;  %5785 = vmatpush.bf16.msra.mxu0 %v8297_v18  ;;  %v929_v19 = vrot.slane %v927_v26, 4  ;;  %v936_v2 = vshll.u32 %v10611_v15, 16  ;;  %v940_v13 = vshrl.u32 %v10611_v15, 16 }
  0xc1   : > { %15041 = vst [vmem:[#allocation43_spill] sm:$0xff] %v10608_v51  ;;  %v946_v41 = vshll.u32 %v817_v62, 16  ;;  %v645_v56 = vsel %vm633_vm12, %v529_v6, %v10614_v10  ;;  %v226_v45 = vunpack.c.l.bf16 %v10101_v16  ;;  %v227_v32 = vunpack.c.h.bf16 %v10101_v16 }
  0xc2   : > { %v932_v23 = vrot.slane %v930_v1, 5  ;;  %v675_v3 = vunpack.c.l.b16 %v645_v56  ;;  %v7655_v52 = vsel %vm7654_vm13, %v303_v29, %v645_v56  ;;  %5834 = vmatpush.bf16.msra.mxu1 %v8361_v0  ;;  %5881 = vmatpush.bf16.msra.mxu2 %v8441_v55  ;;  %v938_v59 = vrot.slane %v936_v2, 5 }
  0xc3   : > { %v942_v26 = vrot.slane %v940_v13, 4  ;;  %773 = vst [vmem:[#allocation2 + $0x38] sm:$0xff] %v7655_v52  ;;  %5932 = vmatpush.bf16.msra.mxu3 %v8489_v61  ;;  %v948_v44 = vrot.slane %v946_v41, 5  ;;  %v10627_v58 = vmax.f32 %v10189_v27, %v226_v45  ;;  %v10630_v6 = vmax.f32 %v10192_v49, %v227_v32  ;;  %v15042_v27 = vld [vmem:[#allocation3_spill] sm:$0xff] }
  0xc4   : > { %v933_v53 = vor.u32 %v932_v23, %v929_v19  ;;  %v707_v5 = vpack.c.b16 %v675_v3, %v497_v20  ;;  %v228_v40 = vunpack.c.l.bf16 %v10104_v36  ;;  %v229_v0 = vunpack.c.h.bf16 %v10104_v36  ;;  %v9291_v3 = vld [vmem:[%s14656_s1 + $0x14] sm:$0xf0] }
  0xc5   : > { %v943_v25 = vor.u32 %v942_v26, %v938_v59  ;;  %vm258_vm8 = vcmp.gt.f32.partialorder %v226_v45, -1.0027314e+29  ;;  %vm259_vm9 = vcmp.gt.f32.partialorder %v227_v32, -1.0027314e+29  ;;  %v635_v14 = vsel %vm633_vm12, %v606_v60, %v10176_v4  ;;  %v8352_v26 = vld [vmem:[%s14656_s1 + $0x90] sm:$0xf] }
  0xc6   : > { %v934_v29 = vrot.slane %v933_v53, 4  ;;  %771 = vst [vmem:[#allocation2] sm:$0xff] %v707_v5  ;;  %vm260_vm10 = vcmp.gt.f32.partialorder %v228_v40, -1.0027314e+29  ;;  %vm261_vm11 = vcmp.gt.f32.partialorder %v229_v0, -1.0027314e+29  ;;  %vm288_vm14 = vmpackc.low %vm259_vm9, %vm258_vm8  ;;  %v15043_v49 = vunpack.c.l.bf16 %v15042_v27  ;;  %v9307_v53 = vld [vmem:[%s14656_s1 + $0x94] sm:$0xf0] }
  0xc7   : > { %v944_v62 = vrot.slane %v943_v25, 4  ;;  %vm289_vm15 = vmpackc.low %vm261_vm11, %vm260_vm10  ;;  %v10641_v18 = vsel %vm288_vm14, %v10101_v16, 0  ;;  %v15044_v55 = vunpack.c.h.bf16 %v15042_v27  ;;  %v680_v1 = vunpack.c.l.b16 %v635_v14  ;;  %v9327_v27 = vld [vmem:[%s14656_s1 + $0x134] sm:$0xf0] }
  0xc8   : > { %v375_v20 = vmax.f32 %v228_v40, %v15043_v49  ;;  %v939_v54 = vsel %vm9997_vm2, %v934_v29, %v938_v59  ;;  %v305_v13 = vsel %vm289_vm15, %v10104_v36, 0  ;;  %v502_v16 = vunpack.c.h.b16 %v10641_v18  ;;  %v8288_v36 = vld [vmem:[%s14656_s1 + $0x10] sm:$0xf] }
  0xc9   : > { %v376_v61 = vmax.f32 %v229_v0, %v15044_v55  ;;  %v10647_v4 = vsel %vm9997_vm2, %v944_v62, %v948_v44  ;;  %v1086_v19 = vunpack.c.l.bf16 %v939_v54  ;;  %v1087_v2 = vunpack.c.h.bf16 %v939_v54  ;;  %v8432_v62 = vld [vmem:[%s14656_s1 + $0x130] sm:$0xf] }
  0xca   : > { %v14769_v41 = vunpack.c.l.bf16 %v10647_v4  ;;  %v14768_v56 = vunpack.c.h.bf16 %v10647_v4  ;;  %v682_v59 = vunpack.c.h.b16 %v635_v14  ;;  %v712_v5 = vpack.c.b16 %v680_v1, %v680_v1  ;;  %v604_v14 = vpop.permute.xlu0 %603  ;;  %v8480_v49 = vld [vmem:[%s14656_s1 + $0x190] sm:$0xf]  ;;  %v8280_v1 = vld [vmem:[%s14656_s1] sm:$0xf] }
  0xcb   : > { %v10655_v45 = vmax.f32 %v10298_v11, %v1086_v19  ;;  %v10658_v32 = vmax.f32 %v10301_v33, %v1087_v2  ;;  %vm1166_vm0 = vcmp.gt.f32.partialorder %v1086_v19, -1.0027314e+29  ;;  %vm1167_vm1 = vcmp.gt.f32.partialorder %v1087_v2, -1.0027314e+29  ;;  %v15051_v11 = vld [vmem:[#allocation17_spill] sm:$0xff] }
  0xcc   : > { %vm10668_vm3 = vcmp.gt.f32.partialorder %v14769_v41, -1.0027314e+29  ;;  %vm10674_vm4 = vcmp.gt.f32.partialorder %v14768_v56, -1.0027314e+29  ;;  %vm1190_vm5 = vmpackc.low %vm1167_vm1, %vm1166_vm0  ;;  %v504_v33 = vunpack.c.h.b16 %v305_v13  ;;  %v15049_v25 = vunpack.c.l.bf16 %v10183_v63  ;;  %776 = vst [vmem:[#allocation2 + $0x78] sm:$0xf] %v712_v5  ;;  %v8424_v5 = vld [vmem:[%s14656_s1 + $0x120] sm:$0xf] }
  0xcd   : > { %vm1191_vm6 = vmpackc.low %vm10674_vm4, %vm10668_vm3  ;;  %v10688_v44 = vsel %vm1190_vm5, %v939_v54, 0  ;;  %v15050_v0 = vunpack.c.h.bf16 %v10183_v63  ;;  %v714_v2 = vpack.c.b16 %v682_v59, %v682_v59  ;;  %v1510_v52 = vunpack.c.h.b16 %v9955_v21  ;;  %v9305_v21 = vld [vmem:[%s14656_s1 + $0x84] sm:$0xf0] }
  0xce   : > { %v10692_v40 = vmax.f32 %v375_v20, %v15049_v25  ;;  %v1207_v20 = vsel %vm1191_vm6, %v10647_v4, 0  ;;  %v1441_v54 = vunpack.c.l.b16 %v10688_v44  ;;  %v1442_v63 = vunpack.c.h.b16 %v10688_v44  ;;  %v9289_v44 = vld [vmem:[%s14656_s1 + $0x4] sm:$0xf0] }
  0xcf   : > { %v10696_v29 = vmax.f32 %v376_v61, %v15050_v0  ;;  %v530_v55 = vpack.c.b16 %v504_v33, %v502_v16  ;;  %v9339_v61 = vld [vmem:[%s14656_s1 + $0x194] sm:$0xf0]  ;;  %v1444_v19 = vunpack.c.h.b16 %v1207_v20  ;;  %v1512_v25 = vunpack.c.h.b16 %v15051_v11  ;;  %v8344_v16 = vld [vmem:[%s14656_s1 + $0x80] sm:$0xf]  ;;  %v9325_v11 = vld [vmem:[%s14656_s1 + $0x124] sm:$0xf0] }
  0xd0   : > { %v634_v0 = vsel %vm633_vm12, %v10614_v10, %v604_v14  ;;  %v8289_v56 = vor.u32 %v9291_v3, %v8288_v36  ;;  %v8353_v59 = vor.u32 %v9307_v53, %v8352_v26  ;;  %778 = vst [vmem:[#allocation2 + $0xb0] sm:$0xf] %v714_v2  ;;  %v8472_v36 = vld [vmem:[%s14656_s1 + $0x180] sm:$0xf]  ;;  %v9337_v3 = vld [vmem:[%s14656_s1 + $0x184] sm:$0xf0]  ;;  %v10743_v26 = vpop.permute.xlu2 %1545  ;;  %v8345_v51 = vor.u32 %v9305_v21, %v8344_v16 }
  0xd1   : > { %v648_v33 = vsel %vm633_vm12, %v530_v55, %v606_v60  ;;  %v1461_v41 = vpack.c.b16 %v1444_v19, %v1442_v63  ;;  %v1528_v10 = vpack.c.b16 %v1512_v25, %v1510_v52  ;;  %15052 = vst [vmem:[#allocation3_spill] sm:$0xff] %v10743_v26  ;;  %v676_v53 = vunpack.c.l.b16 %v634_v0  ;;  %v9177_v55 = vld [vmem:[#allocation2 + $0xc] sm:$0xf]  ;;  %v7842_v19 = vld [vmem:[#allocation2 + $0x40] sm:$0xf0]  ;;  %v10746_v2 = vld [vmem:[%s9601_s20 + $0x78] sm:$0xff] }
  0xd2   : > { %v679_v23 = vunpack.c.l.b16 %v648_v33  ;;  %v7657_v60 = vsel %vm7654_vm13, %v305_v13, %v648_v33  ;;  %v678_v14 = vunpack.c.h.b16 %v634_v0  ;;  %5786 = vmatpush.bf16.msra.mxu0 %v8289_v56  ;;  %5835 = vmatpush.bf16.msra.mxu1 %v8353_v59  ;;  %v8433_v63 = vor.u32 %v9327_v27, %v8432_v62  ;;  %v10754_v0 = vld [vmem:[%s9601_s20 + $0x80] sm:$0xff] }
  0xd3   : > { %777 = vst [vmem:[#allocation2 + $0xa8] sm:$0xff] %v7657_v60  ;;  %v8481_v13 = vor.u32 %v9339_v61, %v8480_v49  ;;  %v1583_v52 = vsel %vm633_vm12, %v1461_v41, %v10743_v26  ;;  %v15053_v25 = vunpack.c.l.b16 %v10641_v18  ;;  %1559 = vrot.lane.b32.xlu0 %v1528_v10, %s9556_s21  ;;  %v8281_v60 = vor.u32 %v9289_v44, %v8280_v1  ;;  %v820_v61 = vld [vmem:[%s9601_s20 + $0x88] sm:$0x11] }
  0xd4   : > { %v1617_v56 = vunpack.c.l.b16 %v1583_v52  ;;  %v7695_v62 = vsel %vm7654_vm13, %v1207_v20, %v1583_v52  ;;  %v708_v27 = vpack.c.b16 %v676_v53, %v676_v53  ;;  %v710_v49 = vpack.c.b16 %v678_v14, %v678_v14  ;;  %5882 = vmatpush.bf16.msra.mxu2 %v8433_v63  ;;  %v610_v52 = vpop.permute.xlu0 %609 }
  0xd5   : > { %v711_v33 = vpack.c.b16 %v679_v23, %v15053_v25  ;;  %5933 = vmatpush.bf16.msra.mxu3 %v8481_v13  ;;  %1715 = vst [vmem:[#allocation2 + $0x204] sm:$0xff] %v7695_v62  ;;  %v8425_v59 = vor.u32 %v9325_v11, %v8424_v5  ;;  %v8473_v41 = vor.u32 %v9337_v3, %v8472_v36  ;;  %v951_v18 = vshrl.u32 %v10746_v2, 16  ;;  %v15055_v25 = vld [vmem:[#allocation6_spill] sm:$0xff] }
  0xd6   : > { %v10758_v26 = vor.u32 %v9177_v55, %v7842_v19  ;;  %v1649_v23 = vpack.c.b16 %v1617_v56, %v1441_v54  ;;  %5787 = vmatpush.bf16.msra.mxu0 %v8281_v60  ;;  %5836 = vmatpush.bf16.msra.mxu1 %v8345_v51  ;;  %v954_v1 = vshll.u32 %v10746_v2, 16  ;;  %v960_v20 = vshll.u32 %v10754_v0, 16  ;;  %772 = vst [vmem:[#allocation2 + $0x8] sm:$0xf] %v708_v27  ;;  %v612_v19 = vpop.permute.xlu1 %611 }
  0xd7   : > { %775 = vst [vmem:[#allocation2 + $0x70] sm:$0xff] %v711_v33  ;;  %v964_v44 = vshrl.u32 %v10754_v0, 16  ;;  %v953_v16 = vrot.slane %v951_v18, 4  ;;  %v970_v21 = vshll.u32 %v820_v61, 16  ;;  %v230_v5 = vunpack.c.l.bf16 %v10261_v17 }
  0xd8   : > { %15054 = vst [vmem:[#allocation17_spill] sm:$0xff] %v10758_v26  ;;  %v231_v11 = vunpack.c.h.bf16 %v10261_v17  ;;  %5883 = vmatpush.bf16.msra.mxu2 %v8425_v59  ;;  %v956_v54 = vrot.slane %v954_v1, 5  ;;  %v962_v10 = vrot.slane %v960_v20, 5  ;;  %v232_v51 = vunpack.c.l.bf16 %v10264_v31 }
  0xd9   : > { %1713 = vst [vmem:[#allocation2 + $0x1cc] sm:$0xff] %v1649_v23  ;;  %5934 = vmatpush.bf16.msra.mxu3 %v8473_v41  ;;  %v966_v36 = vrot.slane %v964_v44, 4  ;;  %v972_v3 = vrot.slane %v970_v21, 5  ;;  %v10768_v53 = vmax.f32 %v10360_v28, %v230_v5  ;;  %v233_v63 = vunpack.c.h.bf16 %v10264_v31 }
  0xda   : > { %774 = vst [vmem:[#allocation2 + $0x40] sm:$0xf] %v710_v49  ;;  %v10771_v14 = vmax.f32 %v10363_v46, %v231_v11  ;;  %v957_v13 = vor.u32 %v956_v54, %v953_v16  ;;  %vm262_vm7 = vcmp.gt.f32.partialorder %v230_v5, -1.0027314e+29  ;;  %vm263_vm8 = vcmp.gt.f32.partialorder %v231_v11, -1.0027314e+29 }
  0xdb   : > { %v967_v55 = vor.u32 %v966_v36, %v962_v10  ;;  %vm264_vm9 = vcmp.gt.f32.partialorder %v232_v51, -1.0027314e+29  ;;  %vm265_vm10 = vcmp.gt.f32.partialorder %v233_v63, -1.0027314e+29  ;;  %vm290_vm11 = vmpackc.low %vm263_vm8, %vm262_vm7  ;;  %v15056_v33 = vunpack.c.l.bf16 %v15055_v25 }
  0xdc   : > { %5935 = vmatmul.bf16.vlgmr.msra.gmra.mxu3 %v10758_v26  ;;  %v15057_v60 = vunpack.c.h.bf16 %v15055_v25  ;;  %v958_v56 = vrot.slane %v957_v13, 4  ;;  %vm291_vm14 = vmpackc.low %vm265_vm10, %vm264_vm9  ;;  %v306_v27 = vsel %vm290_vm11, %v10261_v17, 0  ;;  %v636_v49 = vsel %vm633_vm12, %v610_v52, %v612_v19  ;;  %v8416_v13 = vld [vmem:[%s14656_s1 + $0x110] sm:$0xf]  ;;  %v8408_v19 = vld [vmem:[%s14656_s1 + $0x100] sm:$0xf] }
  0xdd   : > { %v379_v28 = vmax.f32 %v232_v51, %v15056_v33  ;;  %v968_v62 = vrot.slane %v967_v55, 4  ;;  %v307_v61 = vsel %vm291_vm14, %v10264_v31, 0  ;;  %v505_v59 = vunpack.c.l.b16 %v306_v27  ;;  %v9323_v55 = vld [vmem:[%s14656_s1 + $0x114] sm:$0xf0]  ;;  %v9321_v25 = vld [vmem:[%s14656_s1 + $0x104] sm:$0xf0] }
  0xde   : > { %v380_v46 = vmax.f32 %v233_v63, %v15057_v60  ;;  %v506_v41 = vunpack.c.h.b16 %v306_v27  ;;  %v684_v18 = vunpack.c.l.b16 %v636_v49  ;;  %v963_v23 = vsel %vm9997_vm2, %v958_v56, %v962_v10  ;;  %v7832_v10 = vld [vmem:[#allocation2] sm:$0xf]  ;;  %v9183_v63 = vld [vmem:[#allocation2 + $0x34] sm:$0xf0]  ;;  %v7834_v60 = vld [vmem:[#allocation2 + $0x38] sm:$0xf0] }
  0xdf   : > { %v10786_v1 = vsel %vm9997_vm2, %v968_v62, %v972_v3  ;;  %v508_v20 = vunpack.c.h.b16 %v307_v61  ;;  %v686_v44 = vunpack.c.h.b16 %v636_v49  ;;  %v1090_v16 = vunpack.c.l.bf16 %v963_v23  ;;  %v9176_v3 = vld [vmem:[#allocation2 + $0x4] sm:$0xf]  ;;  %v8720_v56 = vld [vmem:[%s14656_s1 + $0x370] sm:$0xf]  ;;  %v10927_v26 = vld [vmem:[%s9601_s20 + $0xa8] sm:$0xff] }
  0xe0   : > { %v1091_v21 = vunpack.c.h.bf16 %v963_v23  ;;  %v14774_v17 = vunpack.c.l.bf16 %v10786_v1  ;;  %v14771_v5 = vunpack.c.h.bf16 %v10786_v1  ;;  %v716_v31 = vpack.c.b16 %v684_v18, %v684_v18  ;;  %v10816_v62 = vld [vmem:[%s9601_s20 + $0x90] sm:$0xff] }
  0xe1   : > { %v531_v11 = vpack.c.b16 %v508_v20, %v506_v41  ;;  %v718_v54 = vpack.c.b16 %v686_v44, %v686_v44  ;;  %v15058_v36 = vunpack.c.l.bf16 %v10347_v9  ;;  %v10807_v33 = vmax.f32 %v10219_v8, %v1090_v16  ;;  %v9399_v41 = vld [vmem:[%s14656_s1 + $0x374] sm:$0xf0]  ;;  %v9184_v27 = vld [vmem:[#allocation2 + $0x3c] sm:$0xf0] }
  0xe2   : > { %vm1170_vm15 = vcmp.gt.f32.partialorder %v1090_v16, -1.0027314e+29  ;;  %vm1171_vm0 = vcmp.gt.f32.partialorder %v1091_v21, -1.0027314e+29  ;;  %vm10820_vm1 = vcmp.gt.f32.partialorder %v14774_v17, -1.0027314e+29  ;;  %vm1173_vm3 = vcmp.gt.f32.partialorder %v14771_v5, -1.0027314e+29  ;;  %780 = vst [vmem:[#allocation2 + $0xe8] sm:$0xf] %v716_v31 }
  0xe3   : > { %v10792_v51 = vmax.f32 %v379_v28, %v15058_v36  ;;  %v10810_v28 = vmax.f32 %v10226_v50, %v1091_v21  ;;  %vm1192_vm4 = vmpackc.low %vm1171_vm0, %vm1170_vm15  ;;  %v651_v8 = vsel %vm633_vm12, %v531_v11, %v610_v52  ;;  %v15061_v50 = vunpack.c.h.bf16 %v10347_v9  ;;  %782 = vst [vmem:[#allocation2 + $0x120] sm:$0xf] %v718_v54  ;;  %v10840_v52 = vld [vmem:[%s9601_s20 + $0x98] sm:$0xff]  ;;  %v823_v21 = vld [vmem:[%s9601_s20 + $0xa0] sm:$0x11] }
  0xe4   : > { %vm1193_vm5 = vmpackc.low %vm1173_vm3, %vm10820_vm1  ;;  %v1208_v18 = vsel %vm1192_vm4, %v963_v23, 0  ;;  %v683_v20 = vunpack.c.l.b16 %v651_v8  ;;  %v7659_v44 = vsel %vm7654_vm13, %v307_v61, %v651_v8  ;;  %v10837_v16 = vor.u32 %v9183_v63, %v7832_v10  ;;  %v7840_v36 = vld [vmem:[#allocation2 + $0x8] sm:$0xf] }
  0xe5   : > { %v10829_v49 = vmax.f32 %v380_v46, %v15061_v50  ;;  %v1209_v9 = vsel %vm1193_vm5, %v10786_v1, 0  ;;  %v1445_v46 = vunpack.c.l.b16 %v1208_v18  ;;  %v1446_v11 = vunpack.c.h.b16 %v1208_v18  ;;  %781 = vst [vmem:[#allocation2 + $0x118] sm:$0xff] %v7659_v44 }
  0xe6   : > { %15062 = vst [vmem:[#allocation6_spill] sm:$0xff] %v10837_v16  ;;  %v10844_v31 = vor.u32 %v9176_v3, %v7834_v60  ;;  %v1448_v50 = vunpack.c.h.b16 %v1209_v9  ;;  %v715_v23 = vpack.c.b16 %v683_v20, %v505_v59  ;;  %5788 = vmatmul.bf16.vlgmr.msra.gmra.mxu0 %v10837_v16  ;;  %v8417_v61 = vor.u32 %v9323_v55, %v8416_v13  ;;  %v10854_v20 = vpop.permute.xlu2 %1549 }
  0xe7   : > { %v8409_v54 = vor.u32 %v9321_v25, %v8408_v19  ;;  %v8721_v10 = vor.u32 %v9399_v41, %v8720_v56  ;;  %v975_v63 = vshrl.u32 %v10816_v62, 16  ;;  %v978_v8 = vshll.u32 %v10816_v62, 16  ;;  %15065 = vst [vmem:[#allocation46_spill] sm:$0xff] %v10854_v20 }
  0xe8   : > { %15063 = vst [vmem:[#allocation44_spill] sm:$0xff] %v10844_v31  ;;  %5837 = vmatmul.bf16.vlgmr.msra.gmra.mxu1 %v10844_v31  ;;  %v984_v18 = vshll.u32 %v10840_v52, 16  ;;  %v1462_v44 = vpack.c.b16 %v1448_v50, %v1446_v11  ;;  %5884 = vmatpush.bf16.msra.mxu2 %v8417_v61  ;;  %v988_v3 = vshrl.u32 %v10840_v52, 16  ;;  %v994_v60 = vshll.u32 %v823_v21, 16 }
  0xe9   : > { %779 = vst [vmem:[#allocation2 + $0xe0] sm:$0xff] %v715_v23  ;;  %v10852_v59 = vor.u32 %v9184_v27, %v7840_v36  ;;  %v977_v13 = vrot.slane %v975_v63, 4  ;;  %v980_v55 = vrot.slane %v978_v8, 5  ;;  %v234_v25 = vunpack.c.l.bf16 %v10385_v22 }
  0xea   : > { %v986_v19 = vrot.slane %v984_v18, 5  ;;  %v1586_v56 = vsel %vm633_vm12, %v1462_v44, %v10854_v20  ;;  %v990_v41 = vrot.slane %v988_v3, 4  ;;  %v996_v5 = vrot.slane %v994_v60, 5  ;;  %v616_v3 = vpop.permute.xlu1 %615  ;;  %v614_v60 = vpop.permute.xlu0 %613 }
  0xeb   : > { %15064 = vst [vmem:[#allocation45_spill] sm:$0xff] %v10852_v59  ;;  %v235_v11 = vunpack.c.h.bf16 %v10385_v22  ;;  %v1621_v50 = vunpack.c.l.b16 %v1586_v56  ;;  %v7697_v23 = vsel %vm7654_vm13, %v1209_v9, %v1586_v56  ;;  %v981_v21 = vor.u32 %v980_v55, %v977_v13 }
  0xec   : > { %v10862_v36 = vmax.f32 %v10427_v38, %v234_v25  ;;  %1719 = vst [vmem:[#allocation2 + $0x274] sm:$0xff] %v7697_v23  ;;  %5885 = vmatpush.bf16.msra.mxu2 %v8409_v54  ;;  %v991_v27 = vor.u32 %v990_v41, %v986_v19  ;;  %v236_v63 = vunpack.c.l.bf16 %v10388_v35  ;;  %v237_v8 = vunpack.c.h.bf16 %v10388_v35  ;;  %v15067_v38 = vld [vmem:[#allocation8_spill] sm:$0xff] }
  0xed   : > { %v10865_v61 = vmax.f32 %v10430_v43, %v235_v11  ;;  %v1653_v18 = vpack.c.b16 %v1621_v50, %v1445_v46  ;;  %v982_v44 = vrot.slane %v981_v21, 4  ;;  %vm266_vm6 = vcmp.gt.f32.partialorder %v234_v25, -1.0027314e+29 }
  0xee   : > { %vm267_vm7 = vcmp.gt.f32.partialorder %v235_v11, -1.0027314e+29  ;;  %v992_v9 = vrot.slane %v991_v27, 4  ;;  %vm268_vm8 = vcmp.gt.f32.partialorder %v236_v63, -1.0027314e+29  ;;  %vm269_vm9 = vcmp.gt.f32.partialorder %v237_v8, -1.0027314e+29 }
  0xef   : > { %15066 = vst [vmem:[#allocation47_spill] sm:$0xff] %v10865_v61  ;;  %vm292_vm10 = vmpackc.low %vm267_vm7, %vm266_vm6  ;;  %v15068_v54 = vunpack.c.l.bf16 %v15067_v38  ;;  %v987_v43 = vsel %vm9997_vm2, %v982_v44, %v986_v19  ;;  %5886 = vmatmul.bf16.vlgmr.msra.gmra.mxu2 %v10852_v59  ;;  %v637_v25 = vsel %vm633_vm12, %v614_v60, %v616_v3  ;;  %v8784_v44 = vld [vmem:[%s14656_s1 + $0x3f0] sm:$0xf]  ;;  %v826_v59 = vld [vmem:[%s9601_s20 + $0xb8] sm:$0x11] }
  0xf0   : > { %6074 = vmatpush.bf16.msrb.mxu2 %v8721_v10  ;;  %1717 = vst [vmem:[#allocation2 + $0x23c] sm:$0xff] %v1653_v18  ;;  %vm293_vm11 = vmpackc.low %vm269_vm9, %vm268_vm8  ;;  %v10875_v46 = vsel %vm292_vm10, %v10385_v22, 0  ;;  %v15069_v10 = vunpack.c.h.bf16 %v15067_v38  ;;  %v10882_v56 = vsel %vm9997_vm2, %v992_v9, %v996_v5  ;;  %v1094_v41 = vunpack.c.l.bf16 %v987_v43  ;;  %v9367_v5 = vld [vmem:[%s14656_s1 + $0x274] sm:$0xf0]  ;;  %v7898_v18 = vld [vmem:[#allocation2 + $0xb0] sm:$0xf0] }
  0xf1   : > { %v383_v13 = vmax.f32 %v236_v63, %v15068_v54  ;;  %v1095_v11 = vunpack.c.h.bf16 %v987_v43  ;;  %v309_v50 = vsel %vm293_vm11, %v10388_v35, 0  ;;  %v14773_v19 = vunpack.c.l.bf16 %v10882_v56  ;;  %v8592_v35 = vld [vmem:[%s14656_s1 + $0x270] sm:$0xf]  ;;  %v9415_v9 = vld [vmem:[%s14656_s1 + $0x3f4] sm:$0xf0] }
  0xf2   : > { %v384_v55 = vmax.f32 %v237_v8, %v15069_v10  ;;  %v14772_v23 = vunpack.c.h.bf16 %v10882_v56  ;;  %v509_v22 = vunpack.c.l.b16 %v10875_v46  ;;  %v510_v21 = vunpack.c.h.b16 %v10875_v46  ;;  %v9191_v8 = vld [vmem:[#allocation2 + $0x7c] sm:$0xf] }
  0xf3   : > { %v10890_v27 = vmax.f32 %v10483_v42, %v1094_v41  ;;  %v10893_v63 = vmax.f32 %v10496_v39, %v1095_v11  ;;  %vm1174_vm14 = vcmp.gt.f32.partialorder %v1094_v41, -1.0027314e+29  ;;  %vm1175_vm15 = vcmp.gt.f32.partialorder %v1095_v11, -1.0027314e+29  ;;  %v8656_v11 = vld [vmem:[%s14656_s1 + $0x2f0] sm:$0xf] }
  0xf4   : > { %vm1176_vm0 = vcmp.gt.f32.partialorder %v14773_v19, -1.0027314e+29  ;;  %vm1177_vm1 = vcmp.gt.f32.partialorder %v14772_v23, -1.0027314e+29  ;;  %vm1194_vm3 = vmpackc.low %vm1175_vm15, %vm1174_vm14  ;;  %v512_v42 = vunpack.c.h.b16 %v309_v50  ;;  %v688_v39 = vunpack.c.l.b16 %v637_v25  ;;  %v9383_v23 = vld [vmem:[%s14656_s1 + $0x2f4] sm:$0xf0] }
  0xf5   : > { %vm1195_vm4 = vmpackc.low %vm1177_vm1, %vm1176_vm0  ;;  %v1210_v3 = vsel %vm1194_vm3, %v987_v43, 0  ;;  %v690_v38 = vunpack.c.h.b16 %v637_v25  ;;  %v15070_v54 = vunpack.c.l.bf16 %v10436_v47  ;;  %v15072_v10 = vunpack.c.h.bf16 %v10436_v47 }
  0xf6   : > { %v1211_v43 = vsel %vm1195_vm4, %v10882_v56, 0  ;;  %v1449_v19 = vunpack.c.l.b16 %v1210_v3  ;;  %v1450_v25 = vunpack.c.h.b16 %v1210_v3  ;;  %v532_v17 = vpack.c.b16 %v512_v42, %v510_v21  ;;  %v10938_v42 = vpop.permute.xlu2 %1553 }
  0xf7   : > { %v10913_v46 = vmax.f32 %v383_v13, %v15070_v54  ;;  %v10917_v41 = vmax.f32 %v384_v55, %v15072_v10  ;;  %v1452_v13 = vunpack.c.h.b16 %v1211_v43  ;;  %v720_v54 = vpack.c.b16 %v688_v39, %v688_v39  ;;  %v10930_v10 = vld [vmem:[%s9601_s20 + $0xb0] sm:$0xff]  ;;  %15075 = vst [vmem:[#allocation50_spill] sm:$0xff] %v10938_v42 }
  0xf8   : > { %v722_v47 = vpack.c.b16 %v690_v38, %v690_v38  ;;  %v8593_v55 = vor.u32 %v9367_v5, %v8592_v35  ;;  %v654_v16 = vsel %vm633_vm12, %v532_v17, %v614_v60  ;;  %v8785_v31 = vor.u32 %v9415_v9, %v8784_v44 }
  0xf9   : > { %15071 = vst [vmem:[#allocation8_spill] sm:$0xff] %v10913_v46  ;;  %v8657_v20 = vor.u32 %v9383_v23, %v8656_v11  ;;  %v1463_v46 = vpack.c.b16 %v1452_v13, %v1450_v25  ;;  %v687_v61 = vunpack.c.l.b16 %v654_v16  ;;  %v7661_v3 = vsel %vm7654_vm13, %v309_v50, %v654_v16 }
  0xfa   : > { %15073 = vst [vmem:[#allocation48_spill] sm:$0xff] %v10917_v41  ;;  %v10934_v41 = vor.u32 %v9191_v8, %v7898_v18  ;;  %5976 = vmatpush.bf16.msrb.mxu0 %v8593_v55  ;;  %v999_v21 = vshrl.u32 %v10927_v26, 16  ;;  %6123 = vmatpush.bf16.msrb.mxu3 %v8785_v31  ;;  %v1002_v35 = vshll.u32 %v10927_v26, 16  ;;  %v1008_v17 = vshll.u32 %v10930_v10, 16 }
  0xfb   : > { %784 = vst [vmem:[#allocation2 + $0x158] sm:$0xf] %v720_v54  ;;  %6025 = vmatpush.bf16.msrb.mxu1 %v8657_v20  ;;  %v1012_v60 = vshrl.u32 %v10930_v10, 16  ;;  %v1018_v23 = vshll.u32 %v826_v59, 16  ;;  %v1589_v5 = vsel %vm633_vm12, %v1463_v46, %v10938_v42  ;;  %v719_v16 = vpack.c.b16 %v687_v61, %v509_v22  ;;  %v620_v54 = vpop.permute.xlu1 %619 }
  0xfc   : > { %15074 = vst [vmem:[#allocation49_spill] sm:$0xff] %v10934_v41  ;;  %5940 = vmatmul.bf16.gmra.mxu3 %v10934_v41  ;;  %v1001_v50 = vrot.slane %v999_v21, 4  ;;  %v238_v8 = vunpack.c.l.bf16 %v10592_v7  ;;  %v1625_v18 = vunpack.c.l.b16 %v1589_v5  ;;  %v7699_v31 = vsel %vm7654_vm13, %v1211_v43, %v1589_v5 }
  0xfd   : > { %785 = vst [vmem:[#allocation2 + $0x188] sm:$0xff] %v7661_v3  ;;  %v1004_v20 = vrot.slane %v1002_v35, 5  ;;  %v1010_v39 = vrot.slane %v1008_v17, 5  ;;  %v1014_v44 = vrot.slane %v1012_v60, 4  ;;  %v1020_v9 = vrot.slane %v1018_v23, 5 }
  0xfe   : > { %786 = vst [vmem:[#allocation2 + $0x190] sm:$0xf] %v722_v47  ;;  %v10949_v59 = vmax.f32 %v10655_v45, %v238_v8  ;;  %v239_v38 = vunpack.c.h.bf16 %v10592_v7  ;;  %v1657_v61 = vpack.c.b16 %v1625_v18, %v1449_v19  ;;  %v240_v46 = vunpack.c.l.bf16 %v10611_v15  ;;  %v618_v45 = vpop.permute.xlu0 %617  ;;  %v15076_v19 = vld [vmem:[#allocation10_spill] sm:$0xff] }
  0xff   : > { %1723 = vst [vmem:[#allocation2 + $0x2e4] sm:$0xff] %v7699_v31  ;;  %v1005_v22 = vor.u32 %v1004_v20, %v1001_v50  ;;  %v241_v11 = vunpack.c.h.bf16 %v10611_v15  ;;  %v1015_v25 = vor.u32 %v1014_v44, %v1010_v39  ;;  %vm270_vm5 = vcmp.gt.f32.partialorder %v238_v8, -1.0027314e+29 }
 0x100   : > { %783 = vst [vmem:[#allocation2 + $0x150] sm:$0xff] %v719_v16  ;;  %v10955_v43 = vmax.f32 %v10658_v32, %v239_v38  ;;  %vm271_vm6 = vcmp.gt.f32.partialorder %v239_v38, -1.0027314e+29  ;;  %vm272_vm7 = vcmp.gt.f32.partialorder %v240_v46, -1.0027314e+29  ;;  %v15077_v47 = vunpack.c.l.bf16 %v15076_v19 }
 0x101   : > { %1721 = vst [vmem:[#allocation2 + $0x2ac] sm:$0xff] %v1657_v61  ;;  %v1006_v13 = vrot.slane %v1005_v22, 4  ;;  %vm273_vm8 = vcmp.gt.f32.partialorder %v241_v11, -1.0027314e+29  ;;  %vm294_vm9 = vmpackc.low %vm271_vm6, %vm270_vm5  ;;  %v1016_v3 = vrot.slane %v1015_v25, 4  ;;  %v15078_v35 = vunpack.c.h.bf16 %v15076_v19 }
 0x102   : > { %v387_v55 = vmax.f32 %v240_v46, %v15077_v47  ;;  %vm295_vm10 = vmpackc.low %vm273_vm8, %vm272_vm7  ;;  %v310_v21 = vsel %vm294_vm9, %v10592_v7, 0  ;;  %v638_v17 = vsel %vm633_vm12, %v618_v45, %v620_v54  ;;  %v9197_v46 = vld [vmem:[#allocation2 + $0xa4] sm:$0xf0]  ;;  %v7740_v54 = vld [vmem:[%s9601_s20 + $0x260] sm:$0xff] }
 0x103   : > { %v388_v32 = vmax.f32 %v241_v11, %v15078_v35  ;;  %v1011_v60 = vsel %vm9997_vm2, %v1006_v13, %v1010_v39  ;;  %v311_v23 = vsel %vm295_vm10, %v10611_v15, 0  ;;  %v513_v5 = vunpack.c.l.b16 %v310_v21  ;;  %v15079_v39 = vld [vmem:[#allocation18_spill] sm:$0xff]  ;;  %v15080_v15 = vld [vmem:[#allocation19_spill] sm:$0xff] }
 0x104   : > { %v514_v16 = vunpack.c.h.b16 %v310_v21  ;;  %v10968_v50 = vsel %vm9997_vm2, %v1016_v3, %v1020_v9  ;;  %v1098_v8 = vunpack.c.l.bf16 %v1011_v60  ;;  %v1099_v18 = vunpack.c.h.bf16 %v1011_v60  ;;  %v7888_v9 = vld [vmem:[#allocation2 + $0x70] sm:$0xf]  ;;  %v7739_v13 = vld [vmem:[%s9601_s20 + $0x258] sm:$0xff] }
 0x105   : > { %v516_v31 = vunpack.c.h.b16 %v311_v23  ;;  %v14781_v7 = vunpack.c.l.bf16 %v10968_v50  ;;  %v14780_v20 = vunpack.c.h.bf16 %v10968_v50  ;;  %v692_v44 = vunpack.c.l.b16 %v638_v17 }
 0x106   : > { %v694_v38 = vunpack.c.h.b16 %v638_v17  ;;  %v10973_v61 = vmax.f32 %v15079_v39, %v1098_v8  ;;  %v10976_v22 = vmax.f32 %v15080_v15, %v1099_v18  ;;  %vm1178_vm11 = vcmp.gt.f32.partialorder %v1098_v8, -1.0027314e+29  ;;  %v9190_v8 = vld [vmem:[#allocation2 + $0x74] sm:$0xf] }
 0x107   : > { %vm1179_vm14 = vcmp.gt.f32.partialorder %v1099_v18, -1.0027314e+29  ;;  %vm1180_vm15 = vcmp.gt.f32.partialorder %v14781_v7, -1.0027314e+29  ;;  %vm1181_vm0 = vcmp.gt.f32.partialorder %v14780_v20, -1.0027314e+29  ;;  %v533_v11 = vpack.c.b16 %v516_v31, %v514_v16  ;;  %v7890_v18 = vld [vmem:[#allocation2 + $0xa8] sm:$0xf0] }
 0x108   : > { %vm1196_vm1 = vmpackc.low %vm1179_vm14, %vm1178_vm11  ;;  %v724_v25 = vpack.c.b16 %v692_v44, %v692_v44  ;;  %v726_v47 = vpack.c.b16 %v694_v38, %v694_v38  ;;  %v15081_v3 = vunpack.c.l.bf16 %v10647_v4  ;;  %v15082_v35 = vunpack.c.h.bf16 %v10647_v4  ;;  %v8712_v4 = vld [vmem:[%s14656_s1 + $0x360] sm:$0xf] }
 0x109   : > { %vm1197_vm3 = vmpackc.low %vm1181_vm0, %vm1180_vm15  ;;  %v1212_v19 = vsel %vm1196_vm1, %v1011_v60, 0  ;;  %v657_v44 = vsel %vm633_vm12, %v533_v11, %v618_v45  ;;  %v7741_v60 = vld [vmem:[%s9601_s20 + $0x268] sm:$0x11]  ;;  %v11006_v45 = vor.u32 %v9190_v8, %v7890_v18  ;;  %v2117_v11 = vshrl.u32 %v7739_v13, 16 }
 0x10a   : > { %v10986_v21 = vmax.f32 %v387_v55, %v15081_v3  ;;  %v10990_v17 = vmax.f32 %v388_v32, %v15082_v35  ;;  %v1213_v39 = vsel %vm1197_vm3, %v10968_v50, 0  ;;  %v1453_v16 = vunpack.c.l.b16 %v1212_v19  ;;  %788 = vst [vmem:[#allocation2 + $0x1c8] sm:$0xf] %v724_v25  ;;  %v9397_v32 = vld [vmem:[%s14656_s1 + $0x364] sm:$0xf0] }
 0x10b   : > { %v1454_v31 = vunpack.c.h.b16 %v1212_v19  ;;  %v1456_v38 = vunpack.c.h.b16 %v1213_v39  ;;  %v691_v15 = vunpack.c.l.b16 %v657_v44  ;;  %v7663_v55 = vsel %vm7654_vm13, %v311_v23, %v657_v44  ;;  %790 = vst [vmem:[#allocation2 + $0x200] sm:$0xf] %v726_v47  ;;  %v11004_v19 = vpop.permute.xlu2 %1557  ;;  %v7704_v47 = vld [vmem:[%s9601_s20 + $0x2a0] sm:$0xff]  ;;  %5842 = vmatmul.bf16.gmra.mxu1 %v11006_v45 }
 0x10c   : > { %15083 = vst [vmem:[#allocation10_spill] sm:$0xff] %v10990_v17  ;;  %v10996_v3 = vor.u32 %v9197_v46, %v7888_v9  ;;  %v2120_v25 = vshll.u32 %v7739_v13, 16  ;;  %v2126_v23 = vshll.u32 %v7740_v54, 16  ;;  %v2130_v35 = vshrl.u32 %v7740_v54, 16 }
 0x10d   : > { %789 = vst [vmem:[#allocation2 + $0x1f8] sm:$0xff] %v7663_v55  ;;  %v1464_v9 = vpack.c.b16 %v1456_v38, %v1454_v31  ;;  %v723_v46 = vpack.c.b16 %v691_v15, %v513_v5  ;;  %v2136_v44 = vshll.u32 %v7741_v60, 16  ;;  %v2119_v20 = vrot.slane %v2117_v11, 4  ;;  %v7705_v55 = vld [vmem:[%s9601_s20 + $0x2a8] sm:$0xff]  ;;  %v7896_v11 = vld [vmem:[#allocation2 + $0x78] sm:$0xf] }
 0x10e   : > { %15084 = vst [vmem:[#allocation18_spill] sm:$0xff] %v10996_v3  ;;  %5793 = vmatmul.bf16.gmra.mxu0 %v10996_v3  ;;  %v2122_v7 = vrot.slane %v2120_v25, 5  ;;  %v2128_v41 = vrot.slane %v2126_v23, 5  ;;  %v8713_v42 = vor.u32 %v9397_v32, %v8712_v4  ;;  %v2132_v13 = vrot.slane %v2130_v35, 4  ;;  %v9198_v25 = vld [vmem:[#allocation2 + $0xac] sm:$0xf0] }
 0x10f   : > { %15085 = vst [vmem:[#allocation19_spill] sm:$0xff] %v11006_v45  ;;  %v1592_v8 = vsel %vm633_vm12, %v1464_v9, %v11004_v19  ;;  %v2138_v18 = vrot.slane %v2136_v44, 5  ;;  %v1784_v17 = vunpack.c.l.bf16 %v7704_v47  ;;  %v1785_v54 = vunpack.c.h.bf16 %v7704_v47 }
 0x110   : > { %787 = vst [vmem:[#allocation2 + $0x1c0] sm:$0xff] %v723_v46  ;;  %v1629_v31 = vunpack.c.l.b16 %v1592_v8  ;;  %v7701_v5 = vsel %vm7654_vm13, %v1213_v39, %v1592_v8  ;;  %v2123_v38 = vor.u32 %v2122_v7, %v2119_v20  ;;  %6075 = vmatpush.bf16.msrb.mxu2 %v8713_v42  ;;  %v2133_v60 = vor.u32 %v2132_v13, %v2128_v41  ;;  %v11025_v42 = vpop.permute.xlu1 %623 }
 0x111   : > { %1727 = vst [vmem:[#allocation2 + $0x354] sm:$0xff] %v7701_v5  ;;  %v11016_v15 = vmax.f32 %v10627_v58, %v1784_v17  ;;  %v1786_v4 = vunpack.c.l.bf16 %v7705_v55  ;;  %v1787_v32 = vunpack.c.h.bf16 %v7705_v55  ;;  %v11019_v46 = vmax.f32 %v10630_v6, %v1785_v54 }
 0x112   : > { %v1661_v23 = vpack.c.b16 %v1629_v31, %v1453_v16  ;;  %v2124_v9 = vrot.slane %v2123_v38, 4  ;;  %vm11021_vm4 = vcmp.gt.f32.partialorder %v1784_v17, -1.0027314e+29  ;;  %v2134_v7 = vrot.slane %v2133_v60, 4  ;;  %v15092_v17 = vld [vmem:[#allocation4_spill] sm:$0xff] }
 0x113   : > { %vm1865_vm5 = vcmp.gt.f32.partialorder %v1785_v54, -1.0027314e+29  ;;  %vm11027_vm6 = vcmp.gt.f32.partialorder %v1786_v4, -1.0027314e+29  ;;  %vm11031_vm7 = vcmp.gt.f32.partialorder %v1787_v32, -1.0027314e+29  ;;  %v15093_v39 = vunpack.c.l.bf16 %v15092_v17  ;;  %v11055_v54 = vpop.permute.xlu0 %621 }
 0x114   : > { %1725 = vst [vmem:[#allocation2 + $0x31c] sm:$0xff] %v1661_v23  ;;  %v2129_v6 = vsel %vm9997_vm2, %v2124_v9, %v2128_v41  ;;  %vm1894_vm8 = vmpackc.low %vm1865_vm5, %vm11021_vm4  ;;  %v15094_v44 = vunpack.c.h.bf16 %v15092_v17  ;;  %v11045_v13 = vor.u32 %v9198_v25, %v7896_v11  ;;  %v11049_v31 = vsel %vm9997_vm2, %v2134_v7, %v2138_v18  ;;  %v11059_v25 = vpop.permute.xlu2 %2456 }
 0x115   : > { %v1303_v16 = vmax.f32 %v10692_v40, %v15093_v39  ;;  %15096 = vst [vmem:[#allocation51_spill] sm:$0xff] %v11049_v31  ;;  %v2216_v5 = vunpack.c.l.bf16 %v2129_v6  ;;  %v2217_v38 = vunpack.c.h.bf16 %v2129_v6  ;;  %vm1895_vm9 = vmpackc.low %vm11031_vm7, %vm11027_vm6  ;;  %v1910_v41 = vsel %vm1894_vm8, %v7704_v47, 0 }
 0x116   : > { %v1304_v8 = vmax.f32 %v10696_v29, %v15094_v44  ;;  %15095 = vst [vmem:[#allocation4_spill] sm:$0xff] %v11045_v13  ;;  %v14785_v40 = vunpack.c.l.bf16 %v11049_v31  ;;  %v14784_v29 = vunpack.c.h.bf16 %v11049_v31  ;;  %v1911_v60 = vsel %vm1895_vm9, %v7705_v55, 0  ;;  %5891 = vmatmul.bf16.gmra.mxu2 %v11045_v13 }
 0x117   : > { %v2352_v11 = vunpack.c.l.b16 %v1910_v41  ;;  %15097 = vst [vmem:[#allocation52_spill] sm:$0xff] %v11059_v25  ;;  %v11063_v18 = vmax.f32 %v10973_v61, %v2216_v5  ;;  %v11066_v23 = vmax.f32 %v10976_v22, %v2217_v38  ;;  %vm2296_vm10 = vcmp.gt.f32.partialorder %v2216_v5, -1.0027314e+29 }
 0x118   : > { %vm2297_vm11 = vcmp.gt.f32.partialorder %v2217_v38, -1.0027314e+29  ;;  %vm2298_vm14 = vcmp.gt.f32.partialorder %v14785_v40, -1.0027314e+29  ;;  %vm2299_vm15 = vcmp.gt.f32.partialorder %v14784_v29, -1.0027314e+29  ;;  %v2353_v47 = vunpack.c.h.b16 %v1910_v41  ;;  %v11098_v5 = vpop.permute.xlu1 %627 }
 0x119   : > { %vm2314_vm0 = vmpackc.low %vm2297_vm11, %vm2296_vm10  ;;  %v2355_v55 = vunpack.c.h.b16 %v1911_v60  ;;  %v11074_v35 = vmax.f32 %v1303_v16, %v1786_v4  ;;  %v11076_v61 = vmax.f32 %v1304_v8, %v1787_v32  ;;  %v242_v22 = vunpack.c.l.bf16 %v10746_v2  ;;  %v8584_v8 = vld [vmem:[%s14656_s1 + $0x260] sm:$0xf] }
 0x11a   : > { %vm2315_vm1 = vmpackc.low %vm2299_vm15, %vm2298_vm14  ;;  %v11072_v9 = vsel %vm2314_vm0, %v2129_v6, 0  ;;  %v243_v17 = vunpack.c.h.bf16 %v10746_v2  ;;  %v244_v4 = vunpack.c.l.bf16 %v10754_v0  ;;  %v245_v32 = vunpack.c.h.bf16 %v10754_v0 }
 0x11b   : > { %15098 = vst [vmem:[#allocation53_spill] sm:$0xff] %v11074_v35  ;;  %v11080_v7 = vsel %vm2315_vm1, %v11049_v31, 0  ;;  %v2432_v58 = vunpack.c.l.b16 %v11072_v9  ;;  %v2381_v20 = vpack.c.b16 %v2355_v55, %v2353_v47  ;;  %v11086_v44 = vmax.f32 %v10807_v33, %v242_v22  ;;  %v8776_v55 = vld [vmem:[%s14656_s1 + $0x3e0] sm:$0xf] }
 0x11c   : > { %15099 = vst [vmem:[#allocation54_spill] sm:$0xff] %v11076_v61  ;;  %v2434_v39 = vunpack.c.l.b16 %v11080_v7  ;;  %v11093_v16 = vmax.f32 %v10810_v28, %v243_v17  ;;  %vm274_vm3 = vcmp.gt.f32.partialorder %v242_v22, -1.0027314e+29  ;;  %vm275_vm4 = vcmp.gt.f32.partialorder %v243_v17, -1.0027314e+29  ;;  %v9365_v28 = vld [vmem:[%s14656_s1 + $0x264] sm:$0xf0]  ;;  %v1540_v40 = vpop.permute.xlu2 %1539 }
 0x11d   : > { %v2497_v6 = vsel %vm633_vm12, %v2381_v20, %v11059_v25  ;;  %vm11101_vm5 = vcmp.gt.f32.partialorder %v244_v4, -1.0027314e+29  ;;  %vm296_vm6 = vmpackc.low %vm275_vm4, %vm274_vm3  ;;  %vm277_vm7 = vcmp.gt.f32.partialorder %v245_v32, -1.0027314e+29  ;;  %v15106_v3 = vunpack.c.h.bf16 %v10786_v1 }
 0x11e   : > { %v2450_v33 = vpack.c.b16 %v2434_v39, %v2432_v58  ;;  %v2528_v38 = vunpack.c.l.b16 %v2497_v6  ;;  %v7745_v41 = vsel %vm7654_vm13, %v1911_v60, %v2497_v6  ;;  %v11112_v22 = vsel %vm296_vm6, %v10746_v2, 0  ;;  %v15102_v58 = vld [vmem:[#allocation12_spill] sm:$0xff]  ;;  %vm297_vm8 = vmpackc.low %vm277_vm7, %vm11101_vm5 }
 0x11f   : > { %2626 = vst [vmem:[#allocation2 + $0xc0] sm:$0xff] %v7745_v41  ;;  %v15103_v60 = vunpack.c.l.bf16 %v15102_v58  ;;  %v15104_v17 = vunpack.c.h.bf16 %v15102_v58  ;;  %v9413_v6 = vld [vmem:[%s14656_s1 + $0x3e4] sm:$0xf0]  ;;  %v517_v41 = vunpack.c.l.b16 %v11112_v22  ;;  %v518_v2 = vunpack.c.h.b16 %v11112_v22 }
 0x120   : > { %2480 = vrot.lane.b32.xlu2 %v2450_v33, %s9556_s21  ;;  %v2560_v29 = vpack.c.b16 %v2528_v38, %v2352_v11  ;;  %v9381_v33 = vld [vmem:[%s14656_s1 + $0x2e4] sm:$0xf0]  ;;  %v11135_v11 = vpop.permute.xlu0 %625  ;;  %v313_v38 = vsel %vm297_vm8, %v10754_v0, 0  ;;  %v15105_v22 = vunpack.c.l.bf16 %v10786_v1  ;;  %v8585_v37 = vor.u32 %v9365_v28, %v8584_v8 }
 0x121   : > { %v391_v20 = vmax.f32 %v244_v4, %v15103_v60  ;;  %v392_v39 = vmax.f32 %v245_v32, %v15104_v17  ;;  %v639_v4 = vsel %vm633_vm12, %v11055_v54, %v11025_v42  ;;  %v8648_v32 = vld [vmem:[%s14656_s1 + $0x2e0] sm:$0xf]  ;;  %v9205_v17 = vld [vmem:[#allocation2 + $0xec] sm:$0xf]  ;;  %v7954_v42 = vld [vmem:[#allocation2 + $0x120] sm:$0xf0]  ;;  %v520_v13 = vunpack.c.h.b16 %v313_v38 }
 0x122   : > { %v696_v47 = vunpack.c.l.b16 %v639_v4  ;;  %v698_v58 = vunpack.c.h.b16 %v639_v4  ;;  %2624 = vst [vmem:[#allocation2 + $0x88] sm:$0xff] %v2560_v29  ;;  %v8777_v31 = vor.u32 %v9413_v6, %v8776_v55  ;;  %v8649_v0 = vor.u32 %v9381_v33, %v8648_v32  ;;  %5977 = vmatpush.bf16.msrb.mxu0 %v8585_v37  ;;  %v7944_v55 = vld [vmem:[#allocation2 + $0xe0] sm:$0xf]  ;;  %v632_v6 = vpop.permute.xlu1 %631  ;;  %v7946_v32 = vld [vmem:[#allocation2 + $0x118] sm:$0xf0] }
 0x123   : > { %v11140_v60 = vmax.f32 %v391_v20, %v15105_v22  ;;  %v11144_v45 = vmax.f32 %v392_v39, %v15106_v3  ;;  %v2405_v4 = vunpack.c.h.b16 %v10056_v34  ;;  %v534_v25 = vpack.c.b16 %v520_v13, %v518_v2  ;;  %v9211_v39 = vld [vmem:[#allocation2 + $0x114] sm:$0xf0]  ;;  %v9204_v2 = vld [vmem:[#allocation2 + $0xe4] sm:$0xf]  ;;  %v8704_v33 = vld [vmem:[%s14656_s1 + $0x350] sm:$0xf] }
 0x124   : > { %v728_v61 = vpack.c.b16 %v696_v47, %v696_v47  ;;  %v730_v35 = vpack.c.b16 %v698_v58, %v698_v58  ;;  %6124 = vmatpush.bf16.msrb.mxu3 %v8777_v31  ;;  %v2407_v20 = vunpack.c.h.b16 %v10063_v24  ;;  %v11148_v22 = vor.u32 %v9205_v17, %v7954_v42  ;;  %6026 = vmatpush.bf16.msrb.mxu1 %v8649_v0  ;;  %v9395_v17 = vld [vmem:[%s14656_s1 + $0x354] sm:$0xf0] }
 0x125   : > { %v1563_v29 = vsel %vm633_vm12, %v10394_v30, %v1540_v40  ;;  %v246_v8 = vunpack.c.l.bf16 %v10816_v62  ;;  %v247_v28 = vunpack.c.h.bf16 %v10816_v62  ;;  %v660_v34 = vsel %vm633_vm12, %v534_v25, %v11055_v54 }
 0x126   : > { %15107 = vst [vmem:[#allocation12_spill] sm:$0xff] %v11148_v22  ;;  %v1610_v1 = vunpack.c.l.b16 %v1563_v29  ;;  %v1612_v3 = vunpack.c.h.b16 %v1563_v29  ;;  %v2437_v37 = vpack.c.b16 %v2407_v20, %v2405_v4  ;;  %5945 = vmatmul.bf16.gmra.mxu3 %v11148_v22  ;;  %v248_v24 = vunpack.c.l.bf16 %v10840_v52  ;;  %v9212_v29 = vld [vmem:[#allocation2 + $0x11c] sm:$0xf0] }
 0x127   : > { %792 = vst [vmem:[#allocation2 + $0x238] sm:$0xf] %v728_v61  ;;  %v249_v13 = vunpack.c.h.bf16 %v10840_v52  ;;  %v695_v30 = vunpack.c.l.b16 %v660_v34  ;;  %v7665_v31 = vsel %vm7654_vm13, %v313_v38, %v660_v34  ;;  %v11162_v54 = vmax.f32 %v10890_v27, %v246_v8  ;;  %v7952_v38 = vld [vmem:[#allocation2 + $0xe8] sm:$0xf]  ;;  %v15110_v27 = vld [vmem:[#allocation14_spill] sm:$0xff] }
 0x128   : > { %794 = vst [vmem:[#allocation2 + $0x270] sm:$0xf] %v730_v35  ;;  %v1642_v40 = vpack.c.b16 %v1610_v1, %v1610_v1  ;;  %v1644_v61 = vpack.c.b16 %v1612_v3, %v1612_v3  ;;  %2454 = vrot.lane.b32.xlu2 %v2437_v37, %s9556_s21  ;;  %v11165_v25 = vmax.f32 %v10893_v63, %v247_v28  ;;  %vm11167_vm9 = vcmp.gt.f32.partialorder %v246_v8, -1.0027314e+29  ;;  %v11189_v1 = vpop.permute.xlu0 %629 }
 0x129   : > { %793 = vst [vmem:[#allocation2 + $0x268] sm:$0xff] %v7665_v31  ;;  %vm279_vm10 = vcmp.gt.f32.partialorder %v247_v28, -1.0027314e+29  ;;  %v727_v47 = vpack.c.b16 %v695_v30, %v517_v41  ;;  %vm280_vm11 = vcmp.gt.f32.partialorder %v248_v24, -1.0027314e+29  ;;  %vm281_vm14 = vcmp.gt.f32.partialorder %v249_v13, -1.0027314e+29  ;;  %v8576_v31 = vld [vmem:[%s14656_s1 + $0x250] sm:$0xf] }
 0x12a   : > { %1706 = vst [vmem:[#allocation2 + $0xf4] sm:$0xf] %v1642_v40  ;;  %vm298_vm15 = vmpackc.low %vm279_vm10, %vm11167_vm9  ;;  %v15111_v63 = vunpack.c.l.bf16 %v15110_v27  ;;  %v15112_v0 = vunpack.c.h.bf16 %v15110_v27  ;;  %v640_v4 = vsel %vm633_vm12, %v11135_v11, %v11098_v5  ;;  %v11187_v20 = vor.u32 %v9211_v39, %v7944_v55 }
 0x12b   : > { %1708 = vst [vmem:[#allocation2 + $0x12c] sm:$0xf] %v1644_v61  ;;  %vm299_vm0 = vmpackc.low %vm281_vm14, %vm280_vm11  ;;  %v314_v42 = vsel %vm298_vm15, %v10816_v62, 0  ;;  %v700_v34 = vunpack.c.l.b16 %v640_v4  ;;  %v702_v62 = vunpack.c.h.b16 %v640_v4  ;;  %v15115_v30 = vunpack.c.h.bf16 %v10882_v56 }
 0x12c   : > { %v395_v58 = vmax.f32 %v248_v24, %v15111_v63  ;;  %v396_v41 = vmax.f32 %v249_v13, %v15112_v0  ;;  %15113 = vst [vmem:[#allocation14_spill] sm:$0xff] %v11187_v20  ;;  %v315_v3 = vsel %vm299_vm0, %v10840_v52, 0  ;;  %v521_v8 = vunpack.c.l.b16 %v314_v42  ;;  %5798 = vmatmul.bf16.gmra.mxu0 %v11187_v20  ;;  %v9363_v52 = vld [vmem:[%s14656_s1 + $0x254] sm:$0xf0] }
 0x12d   : > { %791 = vst [vmem:[#allocation2 + $0x230] sm:$0xff] %v727_v47  ;;  %v522_v28 = vunpack.c.h.b16 %v314_v42  ;;  %v524_v37 = vunpack.c.h.b16 %v315_v3  ;;  %v15114_v24 = vunpack.c.l.bf16 %v10882_v56  ;;  %v732_v40 = vpack.c.b16 %v700_v34, %v700_v34 }
 0x12e   : > { %v11198_v5 = vmax.f32 %v396_v41, %v15115_v30  ;;  %v11207_v61 = vor.u32 %v9204_v2, %v7946_v32  ;;  %v8705_v55 = vor.u32 %v9395_v17, %v8704_v33  ;;  %v11209_v39 = vor.u32 %v9212_v29, %v7952_v38  ;;  %v8768_v33 = vld [vmem:[%s14656_s1 + $0x3d0] sm:$0xf] }
 0x12f   : > { %v11194_v13 = vmax.f32 %v395_v58, %v15114_v24  ;;  %v535_v35 = vpack.c.b16 %v524_v37, %v522_v28  ;;  %v734_v56 = vpack.c.b16 %v702_v62, %v702_v62  ;;  %v250_v47 = vunpack.c.l.bf16 %v10927_v26  ;;  %796 = vst [vmem:[#allocation2 + $0x2a8] sm:$0xf] %v732_v40  ;;  %v9219_v62 = vld [vmem:[#allocation2 + $0x15c] sm:$0xf]  ;;  %v8010_v24 = vld [vmem:[#allocation2 + $0x190] sm:$0xf0] }
 0x130   : > { %15116 = vst [vmem:[#allocation55_spill] sm:$0xff] %v11207_v61  ;;  %v251_v27 = vunpack.c.h.bf16 %v10927_v26  ;;  %5847 = vmatmul.bf16.gmra.mxu1 %v11207_v61  ;;  %6076 = vmatpush.bf16.msrb.mxu2 %v8705_v55  ;;  %v252_v63 = vunpack.c.l.bf16 %v10930_v10  ;;  %v253_v58 = vunpack.c.h.bf16 %v10930_v10  ;;  %v641_v2 = vsel %vm633_vm12, %v11189_v1, %v632_v6  ;;  %v9411_v6 = vld [vmem:[%s14656_s1 + $0x3d4] sm:$0xf0]  ;;  %v8640_v55 = vld [vmem:[%s14656_s1 + $0x2d0] sm:$0xf] }
 0x131   : > { %15117 = vst [vmem:[#allocation56_spill] sm:$0xff] %v11209_v39  ;;  %v8577_v32 = vor.u32 %v9363_v52, %v8576_v31  ;;  %v663_v38 = vsel %vm633_vm12, %v535_v35, %v11135_v11  ;;  %5896 = vmatmul.bf16.gmra.mxu2 %v11209_v39  ;;  %v11225_v17 = vmax.f32 %v11063_v18, %v250_v47  ;;  %vm11230_vm1 = vcmp.gt.f32.partialorder %v250_v47, -1.0027314e+29  ;;  %v1532_v18 = vpop.permute.xlu1 %1531  ;;  %v9379_v35 = vld [vmem:[%s14656_s1 + $0x2d4] sm:$0xf0]  ;;  %v9253_v61 = vld [vmem:[#allocation2 + $0x264] sm:$0xf0] }
 0x132   : > { %798 = vst [vmem:[#allocation2 + $0x2e0] sm:$0xf] %v734_v56  ;;  %v11228_v42 = vmax.f32 %v11066_v23, %v251_v27  ;;  %v699_v41 = vunpack.c.l.b16 %v663_v38  ;;  %v7667_v11 = vsel %vm7654_vm13, %v315_v3, %v663_v38  ;;  %vm283_vm3 = vcmp.gt.f32.partialorder %v251_v27, -1.0027314e+29  ;;  %v15122_v23 = vld [vmem:[#allocation16_spill] sm:$0xff] }
 0x133   : > { %vm11238_vm4 = vcmp.gt.f32.partialorder %v252_v63, -1.0027314e+29  ;;  %5978 = vmatpush.bf16.msrb.mxu0 %v8577_v32  ;;  %797 = vst [vmem:[#allocation2 + $0x2d8] sm:$0xff] %v7667_v11  ;;  %vm285_vm5 = vcmp.gt.f32.partialorder %v253_v58, -1.0027314e+29  ;;  %vm300_vm6 = vmpackc.low %vm283_vm3, %vm11230_vm1  ;;  %v15123_v29 = vunpack.c.l.bf16 %v15122_v23  ;;  %v15124_v34 = vunpack.c.h.bf16 %v15122_v23 }
 0x134   : > { %v704_v3 = vunpack.c.l.b16 %v641_v2  ;;  %v731_v30 = vpack.c.b16 %v699_v41, %v521_v8  ;;  %vm301_vm7 = vmpackc.low %vm285_vm5, %vm11238_vm4  ;;  %v316_v31 = vsel %vm300_vm6, %v10927_v26, 0  ;;  %v706_v52 = vunpack.c.h.b16 %v641_v2 }
 0x135   : > { %v399_v28 = vmax.f32 %v252_v63, %v15123_v29  ;;  %v400_v37 = vmax.f32 %v253_v58, %v15124_v34  ;;  %v8769_v40 = vor.u32 %v9411_v6, %v8768_v33  ;;  %v317_v56 = vsel %vm301_vm7, %v10930_v10, 0  ;;  %v7702_v63 = vld [vmem:[%s9601_s20 + $0x288] sm:$0xff]  ;;  %v11259_v58 = vpop.permute.xlu0 %2452  ;;  %v7703_v6 = vld [vmem:[%s9601_s20 + $0x290] sm:$0xff] }
 0x136   : > { %v525_v47 = vunpack.c.l.b16 %v316_v31  ;;  %v526_v8 = vunpack.c.h.b16 %v316_v31  ;;  %v736_v27 = vpack.c.b16 %v704_v3, %v704_v3  ;;  %795 = vst [vmem:[#allocation2 + $0x2a0] sm:$0xff] %v731_v30  ;;  %v528_v26 = vunpack.c.h.b16 %v317_v56  ;;  %v15128_v29 = vld [vmem:[#allocation36_spill] sm:$0xff] }
 0x137   : > { %v738_v2 = vpack.c.b16 %v706_v52, %v706_v52  ;;  %v15125_v32 = vunpack.c.l.bf16 %v10968_v50  ;;  %v15126_v38 = vunpack.c.h.bf16 %v10968_v50  ;;  %6125 = vmatpush.bf16.msrb.mxu3 %v8769_v40  ;;  %v8641_v10 = vor.u32 %v9379_v35, %v8640_v55  ;;  %v15130_v52 = vld [vmem:[#allocation39_spill] sm:$0xff]  ;;  %v9225_v55 = vld [vmem:[#allocation2 + $0x184] sm:$0xf0]  ;;  %v9218_v35 = vld [vmem:[#allocation2 + $0x154] sm:$0xf] }
 0x138   : > { %800 = vst [vmem:[#allocation2 + $0x318] sm:$0xf] %v736_v27  ;;  %v2409_v41 = vunpack.c.h.b16 %v10028_v57  ;;  %v2411_v11 = vunpack.c.h.b16 %v10031_v48  ;;  %v11272_v4 = vor.u32 %v9219_v62, %v8010_v24  ;;  %v536_v23 = vpack.c.b16 %v528_v26, %v526_v8  ;;  %v8000_v57 = vld [vmem:[#allocation2 + $0x150] sm:$0xf]  ;;  %v8002_v8 = vld [vmem:[#allocation2 + $0x188] sm:$0xf0] }
 0x139   : > { %v11263_v33 = vmax.f32 %v399_v28, %v15125_v32  ;;  %v11267_v0 = vmax.f32 %v400_v37, %v15126_v38  ;;  %802 = vst [vmem:[#allocation2 + $0x350] sm:$0xf] %v738_v2  ;;  %v1561_v28 = vsel %vm633_vm12, %v15128_v29, %v1532_v18  ;;  %v1780_v34 = vunpack.c.l.bf16 %v7702_v63  ;;  %6027 = vmatpush.bf16.msrb.mxu1 %v8641_v10  ;;  %v15129_v62 = vld [vmem:[#allocation37_spill] sm:$0xff]  ;;  %v9393_v38 = vld [vmem:[%s14656_s1 + $0x344] sm:$0xf0]  ;;  %v7706_v10 = vld [vmem:[%s9601_s20 + $0x2b8] sm:$0xff] }
 0x13a   : > { %15127 = vst [vmem:[#allocation16_spill] sm:$0xff] %v11272_v4  ;;  %v1781_v3 = vunpack.c.h.bf16 %v7702_v63  ;;  %v2439_v50 = vpack.c.b16 %v2411_v11, %v2409_v41  ;;  %5950 = vmatmul.bf16.gmra.mxu3 %v11272_v4  ;;  %v1602_v37 = vunpack.c.l.b16 %v1561_v28  ;;  %v1604_v30 = vunpack.c.h.b16 %v1561_v28  ;;  %v11302_v11 = vpop.permute.xlu1 %2460  ;;  %v15135_v28 = vld [vmem:[#allocation43_spill] sm:$0xff]  ;;  %v7708_v4 = vld [vmem:[%s9601_s20 + $0x2d0] sm:$0xff] }
 0x13b   : > { %v1782_v31 = vunpack.c.l.bf16 %v7703_v6  ;;  %v666_v48 = vsel %vm633_vm12, %v536_v23, %v11189_v1  ;;  %v11280_v24 = vmax.f32 %v15129_v62, %v1780_v34  ;;  %v1783_v18 = vunpack.c.h.bf16 %v7703_v6  ;;  %v8696_v1 = vld [vmem:[%s14656_s1 + $0x340] sm:$0xf] }
 0x13c   : > { %v11283_v40 = vmax.f32 %v15130_v52, %v1781_v3  ;;  %v703_v27 = vunpack.c.l.b16 %v666_v48  ;;  %v7669_v26 = vsel %vm7654_vm13, %v317_v56, %v666_v48  ;;  %2458 = vrot.lane.b32.xlu2 %v2439_v50, %s9556_s21  ;;  %v1634_v2 = vpack.c.b16 %v1602_v37, %v1602_v37  ;;  %v8568_v41 = vld [vmem:[%s14656_s1 + $0x240] sm:$0xf] }
 0x13d   : > { %v1636_v32 = vpack.c.b16 %v1604_v30, %v1604_v30  ;;  %801 = vst [vmem:[#allocation2 + $0x348] sm:$0xff] %v7669_v26  ;;  %vm1860_vm8 = vcmp.gt.f32.partialorder %v1780_v34, -1.0027314e+29  ;;  %vm1861_vm9 = vcmp.gt.f32.partialorder %v1781_v3, -1.0027314e+29  ;;  %vm11294_vm10 = vcmp.gt.f32.partialorder %v1782_v31, -1.0027314e+29  ;;  %v7707_v3 = vld [vmem:[%s9601_s20 + $0x2c0] sm:$0xff]  ;;  %v1536_v52 = vpop.permute.xlu0 %1535 }
 0x13e   : > { %vm11298_vm11 = vcmp.gt.f32.partialorder %v1783_v18, -1.0027314e+29  ;;  %v735_v23 = vpack.c.b16 %v703_v27, %v525_v47  ;;  %1698 = vst [vmem:[#allocation2 + $0x14] sm:$0xf] %v1634_v2  ;;  %vm1892_vm14 = vmpackc.low %vm1861_vm9, %vm1860_vm8  ;;  %v11305_v29 = vmax.f32 %v10604_v12, %v1782_v31  ;;  %v11308_v50 = vmax.f32 %v15135_v28, %v1783_v18  ;;  %v9226_v27 = vld [vmem:[#allocation2 + $0x18c] sm:$0xf0]  ;;  %v15143_v28 = vld [vmem:[#allocation30_spill] sm:$0xff] }
 0x13f   : > { %v11310_v34 = vor.u32 %v9225_v55, %v8000_v57  ;;  %1700 = vst [vmem:[#allocation2 + $0x4c] sm:$0xf] %v1636_v32  ;;  %vm1893_vm15 = vmpackc.low %vm11298_vm11, %vm11294_vm10  ;;  %v1908_v37 = vsel %vm1892_vm14, %v7702_v63, 0  ;;  %v11317_v30 = vor.u32 %v9218_v35, %v8002_v8  ;;  %v8697_v47 = vor.u32 %v9393_v38, %v8696_v1  ;;  %v8008_v8 = vld [vmem:[#allocation2 + $0x158] sm:$0xf] }
 0x140   : > { %v1788_v48 = vunpack.c.l.bf16 %v7706_v10  ;;  %799 = vst [vmem:[#allocation2 + $0x310] sm:$0xff] %v735_v23  ;;  %v1909_v12 = vsel %vm1893_vm15, %v7703_v6, 0  ;;  %v2348_v31 = vunpack.c.l.b16 %v1908_v37  ;;  %v2349_v62 = vunpack.c.h.b16 %v1908_v37  ;;  %v15138_v6 = vld [vmem:[#allocation5_spill] sm:$0xff] }
 0x141   : > { %15136 = vst [vmem:[#allocation36_spill] sm:$0xff] %v11310_v34  ;;  %5803 = vmatmul.bf16.gmra.mxu0 %v11310_v34  ;;  %v1789_v57 = vunpack.c.h.bf16 %v7706_v10  ;;  %v2351_v18 = vunpack.c.h.b16 %v1909_v12  ;;  %5852 = vmatmul.bf16.gmra.mxu1 %v11317_v30  ;;  %v1790_v63 = vunpack.c.l.bf16 %v7707_v3  ;;  %v1791_v35 = vunpack.c.h.bf16 %v7707_v3 }
 0x142   : > { %15137 = vst [vmem:[#allocation37_spill] sm:$0xff] %v11317_v30  ;;  %6077 = vmatpush.bf16.msrb.mxu2 %v8697_v47  ;;  %v11322_v55 = vmax.f32 %v10768_v53, %v1788_v48  ;;  %vm1868_vm0 = vcmp.gt.f32.partialorder %v1788_v48, -1.0027314e+29  ;;  %v15139_v2 = vunpack.c.l.bf16 %v15138_v6  ;;  %v15140_v53 = vunpack.c.h.bf16 %v15138_v6  ;;  %v9409_v47 = vld [vmem:[%s14656_s1 + $0x3c4] sm:$0xf0] }
 0x143   : > { %v11325_v26 = vmax.f32 %v10771_v14, %v1789_v57  ;;  %vm1869_vm1 = vcmp.gt.f32.partialorder %v1789_v57, -1.0027314e+29  ;;  %v2380_v1 = vpack.c.b16 %v2351_v18, %v2349_v62  ;;  %vm1870_vm3 = vcmp.gt.f32.partialorder %v1790_v63, -1.0027314e+29  ;;  %v9361_v14 = vld [vmem:[%s14656_s1 + $0x244] sm:$0xf0]  ;;  %v8632_v18 = vld [vmem:[%s14656_s1 + $0x2c0] sm:$0xf] }
 0x144   : > { %v1307_v32 = vmax.f32 %v10792_v51, %v15139_v2  ;;  %vm1871_vm4 = vcmp.gt.f32.partialorder %v1791_v35, -1.0027314e+29  ;;  %vm1896_vm5 = vmpackc.low %vm1869_vm1, %vm1868_vm0  ;;  %v1308_v38 = vmax.f32 %v10829_v49, %v15140_v53  ;;  %v11341_v51 = vor.u32 %v9226_v27, %v8008_v8  ;;  %v8760_v49 = vld [vmem:[%s14656_s1 + $0x3c0] sm:$0xf]  ;;  %v8066_v2 = vld [vmem:[#allocation2 + $0x200] sm:$0xf0] }
 0x145   : > { %vm1897_vm6 = vmpackc.low %vm1871_vm4, %vm1870_vm3  ;;  %v1912_v56 = vsel %vm1896_vm5, %v7706_v10, 0  ;;  %v1562_v37 = vsel %vm633_vm12, %v15143_v28, %v1536_v52  ;;  %v2494_v48 = vsel %vm633_vm12, %v2380_v1, %v11259_v58  ;;  %v9377_v52 = vld [vmem:[%s14656_s1 + $0x2c4] sm:$0xf0]  ;;  %v8569_v53 = vor.u32 %v9361_v14, %v8568_v41  ;;  %v1544_v28 = vpop.permute.xlu1 %1543  ;;  %v15148_v14 = vld [vmem:[#allocation38_spill] sm:$0xff] }
 0x146   : > { %v11339_v23 = vmax.f32 %v1307_v32, %v1790_v63  ;;  %15142 = vst [vmem:[#allocation43_spill] sm:$0xff] %v11341_v51  ;;  %v1913_v62 = vsel %vm1897_vm6, %v7707_v3, 0  ;;  %v2356_v10 = vunpack.c.l.b16 %v1912_v56  ;;  %v2357_v57 = vunpack.c.h.b16 %v1912_v56  ;;  %5901 = vmatmul.bf16.gmra.mxu2 %v11341_v51  ;;  %v9233_v3 = vld [vmem:[#allocation2 + $0x1cc] sm:$0xf] }
 0x147   : > { %v2524_v63 = vunpack.c.l.b16 %v2494_v48  ;;  %v7743_v8 = vsel %vm7654_vm13, %v1909_v12, %v2494_v48  ;;  %v2359_v27 = vunpack.c.h.b16 %v1913_v62  ;;  %v11360_v6 = vmax.f32 %v1308_v38, %v1791_v35  ;;  %v15145_v30 = vld [vmem:[#allocation24_spill] sm:$0xff]  ;;  %5979 = vmatpush.bf16.msrb.mxu0 %v8569_v53  ;;  %v15146_v38 = vld [vmem:[#allocation25_spill] sm:$0xff] }
 0x148   : > { %15141 = vst [vmem:[#allocation39_spill] sm:$0xff] %v11339_v23  ;;  %v1606_v32 = vunpack.c.l.b16 %v1562_v37  ;;  %v1608_v1 = vunpack.c.h.b16 %v1562_v37  ;;  %v8761_v56 = vor.u32 %v9409_v47, %v8760_v49  ;;  %v8633_v34 = vor.u32 %v9377_v52, %v8632_v18 }
 0x149   : > { %15144 = vst [vmem:[#allocation5_spill] sm:$0xff] %v11360_v6  ;;  %v2556_v22 = vpack.c.b16 %v2524_v63, %v2348_v31  ;;  %v2382_v39 = vpack.c.b16 %v2359_v27, %v2357_v57  ;;  %v2413_v12 = vunpack.c.h.b16 %v15145_v30  ;;  %v2415_v51 = vunpack.c.h.b16 %v15146_v38  ;;  %v11373_v30 = vpop.permute.xlu0 %2464  ;;  %v9239_v63 = vld [vmem:[#allocation2 + $0x1f4] sm:$0xf0]  ;;  %v15149_v27 = vld [vmem:[#allocation47_spill] sm:$0xff] }
 0x14a   : > { %2622 = vst [vmem:[#allocation2 + $0x50] sm:$0xff] %v7743_v8  ;;  %v1638_v48 = vpack.c.b16 %v1606_v32, %v1606_v32  ;;  %v1640_v35 = vpack.c.b16 %v1608_v1, %v1608_v1  ;;  %6126 = vmatpush.bf16.msrb.mxu3 %v8761_v56  ;;  %v11366_v20 = vor.u32 %v9233_v3, %v8066_v2  ;;  %v7709_v8 = vld [vmem:[%s9601_s20 + $0x2d8] sm:$0xff]  ;;  %v1792_v37 = vunpack.c.l.bf16 %v7708_v4  ;;  %v9232_v32 = vld [vmem:[#allocation2 + $0x1c4] sm:$0xf] }
 0x14b   : > { %2620 = vst [vmem:[#allocation2 + $0x18] sm:$0xff] %v2556_v22  ;;  %v2500_v41 = vsel %vm633_vm12, %v2382_v39, %v11302_v11  ;;  %6028 = vmatpush.bf16.msrb.mxu1 %v8633_v34  ;;  %v1564_v31 = vsel %vm633_vm12, %v15148_v14, %v1544_v28  ;;  %v1793_v49 = vunpack.c.h.bf16 %v7708_v4  ;;  %v2441_v18 = vpack.c.b16 %v2415_v51, %v2413_v12  ;;  %v8056_v22 = vld [vmem:[#allocation2 + $0x1c0] sm:$0xf]  ;;  %v8058_v1 = vld [vmem:[#allocation2 + $0x1f8] sm:$0xf0] }
 0x14c   : > { %15147 = vst [vmem:[#allocation30_spill] sm:$0xff] %v11366_v20  ;;  %v2532_v47 = vunpack.c.l.b16 %v2500_v41  ;;  %v7747_v57 = vsel %vm7654_vm13, %v1913_v62, %v2500_v41  ;;  %5955 = vmatmul.bf16.gmra.mxu3 %v11366_v20  ;;  %v1614_v52 = vunpack.c.l.b16 %v1564_v31  ;;  %v1616_v39 = vunpack.c.h.b16 %v1564_v31  ;;  %v11383_v62 = vpop.permute.xlu2 %2468  ;;  %v15154_v38 = vld [vmem:[#allocation7_spill] sm:$0xff]  ;;  %v15158_v31 = vld [vmem:[#allocation48_spill] sm:$0xff] }
 0x14d   : > { %1702 = vst [vmem:[#allocation2 + $0x84] sm:$0xf] %v1638_v48  ;;  %v11378_v34 = vmax.f32 %v10862_v36, %v1792_v37  ;;  %v11381_v3 = vmax.f32 %v15149_v27, %v1793_v49  ;;  %v1794_v2 = vunpack.c.l.bf16 %v7709_v8  ;;  %2462 = vrot.lane.b32.xlu2 %v2441_v18, %s9556_s21  ;;  %v1795_v56 = vunpack.c.h.bf16 %v7709_v8  ;;  %v7710_v36 = vld [vmem:[%s9601_s20 + $0x2e8] sm:$0xff] }
 0x14e   : > { %2630 = vst [vmem:[#allocation2 + $0x130] sm:$0xff] %v7747_v57  ;;  %v2564_v51 = vpack.c.b16 %v2532_v47, %v2356_v10  ;;  %v1646_v53 = vpack.c.b16 %v1614_v52, %v1614_v52  ;;  %vm11386_vm7 = vcmp.gt.f32.partialorder %v1792_v37, -1.0027314e+29  ;;  %v1648_v12 = vpack.c.b16 %v1616_v39, %v1616_v39  ;;  %v15156_v10 = vld [vmem:[#allocation8_spill] sm:$0xff]  ;;  %v7711_v57 = vld [vmem:[%s9601_s20 + $0x2f0] sm:$0xff] }
 0x14f   : > { %1704 = vst [vmem:[#allocation2 + $0xbc] sm:$0xf] %v1640_v35  ;;  %vm1873_vm8 = vcmp.gt.f32.partialorder %v1793_v49, -1.0027314e+29  ;;  %vm11391_vm9 = vcmp.gt.f32.partialorder %v1794_v2, -1.0027314e+29  ;;  %v15155_v41 = vunpack.c.l.bf16 %v15154_v38  ;;  %vm1875_vm10 = vcmp.gt.f32.partialorder %v1795_v56, -1.0027314e+29 }
 0x150   : > { %2628 = vst [vmem:[#allocation2 + $0xf8] sm:$0xff] %v2564_v51  ;;  %vm1898_vm11 = vmpackc.low %vm1873_vm8, %vm11386_vm7  ;;  %v15157_v14 = vunpack.c.h.bf16 %v15154_v38  ;;  %v11403_v47 = vor.u32 %v9239_v63, %v8056_v22  ;;  %v11405_v49 = vor.u32 %v9232_v32, %v8058_v1  ;;  %v1796_v39 = vunpack.c.l.bf16 %v7710_v36  ;;  %v8064_v51 = vld [vmem:[#allocation2 + $0x1c8] sm:$0xf]  ;;  %v9240_v22 = vld [vmem:[#allocation2 + $0x1fc] sm:$0xf0] }
 0x151   : > { %v1311_v35 = vmax.f32 %v15156_v10, %v15155_v41  ;;  %1710 = vst [vmem:[#allocation2 + $0x164] sm:$0xf] %v1646_v53  ;;  %vm1899_vm14 = vmpackc.low %vm1875_vm10, %vm11391_vm9  ;;  %v1914_v18 = vsel %vm1898_vm11, %v7708_v4, 0  ;;  %v1797_v27 = vunpack.c.h.bf16 %v7710_v36  ;;  %v9391_v1 = vld [vmem:[%s14656_s1 + $0x334] sm:$0xf0]  ;;  %v1799_v53 = vunpack.c.h.bf16 %v7711_v57 }
 0x152   : > { %v1312_v37 = vmax.f32 %v15158_v31, %v15157_v14  ;;  %15159 = vst [vmem:[#allocation24_spill] sm:$0xff] %v11403_v47  ;;  %v1915_v28 = vsel %vm1899_vm14, %v7709_v8, 0  ;;  %v2360_v38 = vunpack.c.l.b16 %v1914_v18  ;;  %v2361_v41 = vunpack.c.h.b16 %v1914_v18  ;;  %5808 = vmatmul.bf16.gmra.mxu0 %v11403_v47  ;;  %5857 = vmatmul.bf16.gmra.mxu1 %v11405_v49  ;;  %v8688_v8 = vld [vmem:[%s14656_s1 + $0x330] sm:$0xf]  ;;  %v15168_v14 = vld [vmem:[#allocation10_spill] sm:$0xff]  ;;  %v1548_v18 = vpop.permute.xlu0 %1547 }
 0x153   : > { %15160 = vst [vmem:[#allocation25_spill] sm:$0xff] %v11405_v49  ;;  %v11410_v52 = vmax.f32 %v1311_v35, %v1794_v2  ;;  %v2363_v63 = vunpack.c.h.b16 %v1915_v28  ;;  %v11417_v32 = vmax.f32 %v10949_v59, %v1796_v39  ;;  %v11420_v4 = vmax.f32 %v10955_v43, %v1797_v27 }
 0x154   : > { %1712 = vst [vmem:[#allocation2 + $0x19c] sm:$0xf] %v1648_v12  ;;  %v11412_v10 = vmax.f32 %v1312_v37, %v1795_v56  ;;  %v1798_v2 = vunpack.c.l.bf16 %v7711_v57  ;;  %vm1876_vm15 = vcmp.gt.f32.partialorder %v1796_v39, -1.0027314e+29  ;;  %vm1877_vm0 = vcmp.gt.f32.partialorder %v1797_v27, -1.0027314e+29  ;;  %v15163_v56 = vld [vmem:[#allocation9_spill] sm:$0xff]  ;;  %v15174_v27 = vld [vmem:[#allocation3_spill] sm:$0xff] }
 0x155   : > { %15161 = vst [vmem:[#allocation38_spill] sm:$0xff] %v11410_v52  ;;  %v15164_v12 = vunpack.c.l.bf16 %v15163_v56  ;;  %v2383_v48 = vpack.c.b16 %v2363_v63, %v2361_v41  ;;  %vm1900_vm3 = vmpackc.low %vm1877_vm0, %vm1876_vm15  ;;  %v15167_v35 = vunpack.c.h.bf16 %v15163_v56  ;;  %v11438_v37 = vor.u32 %v9240_v22, %v8064_v51  ;;  %v8560_v39 = vld [vmem:[%s14656_s1 + $0x230] sm:$0xf]  ;;  %v9407_v22 = vld [vmem:[%s14656_s1 + $0x3b4] sm:$0xf0] }
 0x156   : > { %15162 = vst [vmem:[#allocation47_spill] sm:$0xff] %v11412_v10  ;;  %vm11431_vm1 = vcmp.gt.f32.partialorder %v1798_v2, -1.0027314e+29  ;;  %vm11446_vm4 = vcmp.gt.f32.partialorder %v1799_v53, -1.0027314e+29  ;;  %v11450_v41 = vsel %vm1900_vm3, %v7710_v36, 0  ;;  %v8689_v56 = vor.u32 %v9391_v1, %v8688_v8  ;;  %v8752_v51 = vld [vmem:[%s14656_s1 + $0x3b0] sm:$0xf]  ;;  %v1552_v1 = vpop.permute.xlu2 %1551  ;;  %v11480_v36 = vpop.permute.xlu1 %2472 }
 0x157   : > { %v1315_v59 = vmax.f32 %v10986_v21, %v15164_v12  ;;  %v1316_v31 = vmax.f32 %v15168_v14, %v15167_v35  ;;  %15169 = vst [vmem:[#allocation7_spill] sm:$0xff] %v11438_v37  ;;  %v9359_v21 = vld [vmem:[%s14656_s1 + $0x234] sm:$0xf0]  ;;  %v2503_v12 = vsel %vm633_vm12, %v2383_v48, %v11373_v30  ;;  %vm1901_vm5 = vmpackc.low %vm11446_vm4, %vm11431_vm1  ;;  %5906 = vmatmul.bf16.gmra.mxu2 %v11438_v37 }
 0x158   : > { %v9375_v48 = vld [vmem:[%s14656_s1 + $0x2b4] sm:$0xf0]  ;;  %v2536_v43 = vunpack.c.l.b16 %v2503_v12  ;;  %v7749_v35 = vsel %vm7654_vm13, %v1915_v28, %v2503_v12  ;;  %v1917_v14 = vsel %vm1901_vm5, %v7711_v57, 0  ;;  %6078 = vmatpush.bf16.msrb.mxu2 %v8689_v56  ;;  %v8561_v49 = vor.u32 %v9359_v21, %v8560_v39  ;;  %v8114_v56 = vld [vmem:[#allocation2 + $0x268] sm:$0xf0] }
 0x159   : > { %v11452_v63 = vmax.f32 %v1315_v59, %v1798_v2  ;;  %v2365_v2 = vunpack.c.h.b16 %v11450_v41  ;;  %v11468_v8 = vmax.f32 %v1316_v31, %v1799_v53  ;;  %v8624_v59 = vld [vmem:[%s14656_s1 + $0x2b0] sm:$0xf]  ;;  %v1565_v53 = vsel %vm633_vm12, %v15174_v27, %v1548_v18  ;;  %2634 = vst [vmem:[#allocation2 + $0x1a0] sm:$0xff] %v7749_v35  ;;  %v15175_v52 = vld [vmem:[#allocation46_spill] sm:$0xff]  ;;  %v8122_v12 = vld [vmem:[#allocation2 + $0x270] sm:$0xf0] }
 0x15a   : > { %v8112_v31 = vld [vmem:[#allocation2 + $0x230] sm:$0xf]  ;;  %v2367_v20 = vunpack.c.h.b16 %v1917_v14  ;;  %v1618_v37 = vunpack.c.l.b16 %v1565_v53  ;;  %v1620_v47 = vunpack.c.h.b16 %v1565_v53  ;;  %v8753_v10 = vor.u32 %v9407_v22, %v8752_v51  ;;  %v9247_v18 = vld [vmem:[#allocation2 + $0x23c] sm:$0xf]  ;;  %5980 = vmatpush.bf16.msrb.mxu0 %v8561_v49  ;;  %v15177_v51 = vld [vmem:[#allocation28_spill] sm:$0xff] }
 0x15b   : > { %15172 = vst [vmem:[#allocation8_spill] sm:$0xff] %v11452_v63  ;;  %v2568_v63 = vpack.c.b16 %v2536_v43, %v2360_v38  ;;  %v1566_v28 = vsel %vm633_vm12, %v15175_v52, %v1552_v1  ;;  %v8625_v57 = vor.u32 %v9375_v48, %v8624_v59  ;;  %v15176_v38 = vld [vmem:[#allocation27_spill] sm:$0xff]  ;;  %v2419_v22 = vunpack.c.h.b16 %v15177_v51  ;;  %v7713_v59 = vld [vmem:[%s9601_s20 + $0x308] sm:$0xff]  ;;  %v8120_v43 = vld [vmem:[#allocation2 + $0x238] sm:$0xf] }
 0x15c   : > { %15173 = vst [vmem:[#allocation48_spill] sm:$0xff] %v11468_v8  ;;  %v9246_v8 = vld [vmem:[#allocation2 + $0x234] sm:$0xf]  ;;  %v2384_v27 = vpack.c.b16 %v2367_v20, %v2365_v2  ;;  %v1650_v6 = vpack.c.b16 %v1618_v37, %v1618_v37  ;;  %v1652_v35 = vpack.c.b16 %v1620_v47, %v1620_v47  ;;  %v1622_v23 = vunpack.c.l.b16 %v1566_v28  ;;  %6127 = vmatpush.bf16.msrb.mxu3 %v8753_v10  ;;  %v7712_v1 = vld [vmem:[%s9601_s20 + $0x300] sm:$0xff]  ;;  %v15185_v51 = vld [vmem:[#allocation34_spill] sm:$0xff] }
 0x15d   : > { %2632 = vst [vmem:[#allocation2 + $0x168] sm:$0xff] %v2568_v63  ;;  %v1624_v39 = vunpack.c.h.b16 %v1566_v28  ;;  %6029 = vmatpush.bf16.msrb.mxu1 %v8625_v57  ;;  %v2417_v21 = vunpack.c.h.b16 %v15176_v38  ;;  %v11486_v52 = vor.u32 %v9253_v61, %v8112_v31  ;;  %v11492_v47 = vor.u32 %v9246_v8, %v8114_v56  ;;  %v9254_v61 = vld [vmem:[#allocation2 + $0x26c] sm:$0xf0]  ;;  %v8680_v53 = vld [vmem:[%s14656_s1 + $0x320] sm:$0xf] }
 0x15e   : > { %v2506_v48 = vsel %vm633_vm12, %v2384_v27, %v11383_v62  ;;  %1714 = vst [vmem:[#allocation2 + $0x1d4] sm:$0xf] %v1650_v6  ;;  %v1654_v20 = vpack.c.b16 %v1622_v23, %v1622_v23  ;;  %v11494_v49 = vor.u32 %v9247_v18, %v8122_v12  ;;  %v9389_v23 = vld [vmem:[%s14656_s1 + $0x324] sm:$0xf0]  ;;  %v1800_v6 = vunpack.c.l.bf16 %v7712_v1  ;;  %v8552_v28 = vld [vmem:[%s14656_s1 + $0x220] sm:$0xf] }
 0x15f   : > { %15178 = vst [vmem:[#allocation9_spill] sm:$0xff] %v11486_v52  ;;  %v2540_v10 = vunpack.c.l.b16 %v2506_v48  ;;  %v7751_v37 = vsel %vm7654_vm13, %v1917_v14, %v2506_v48  ;;  %v1656_v63 = vpack.c.b16 %v1624_v39, %v1624_v39  ;;  %v2443_v2 = vpack.c.b16 %v2419_v22, %v2417_v21  ;;  %v9357_v57 = vld [vmem:[%s14656_s1 + $0x224] sm:$0xf0]  ;;  %v15182_v12 = vld [vmem:[#allocation11_spill] sm:$0xff] }
 0x160   : > { %15179 = vst [vmem:[#allocation10_spill] sm:$0xff] %v11492_v47  ;;  %5960 = vmatmul.bf16.gmra.mxu3 %v11494_v49  ;;  %v1801_v8 = vunpack.c.h.bf16 %v7712_v1  ;;  %v1802_v31 = vunpack.c.l.bf16 %v7713_v59  ;;  %v1803_v14 = vunpack.c.h.bf16 %v7713_v59  ;;  %v15181_v56 = vunpack.c.l.b16 %v11450_v41  ;;  %v8744_v21 = vld [vmem:[%s14656_s1 + $0x3a0] sm:$0xf]  ;;  %v9405_v41 = vld [vmem:[%s14656_s1 + $0x3a4] sm:$0xf0] }
 0x161   : > { %15180 = vst [vmem:[#allocation3_spill] sm:$0xff] %v11494_v49  ;;  %2466 = vrot.lane.b32.xlu2 %v2443_v2, %s9556_s21  ;;  %v15183_v27 = vunpack.c.l.bf16 %v15182_v12  ;;  %v15184_v39 = vunpack.c.h.bf16 %v15182_v12  ;;  %v2421_v22 = vunpack.c.h.b16 %v15185_v51  ;;  %v11527_v48 = vmax.f32 %v11086_v44, %v1800_v6  ;;  %v11554_v2 = vpop.permute.xlu0 %2476  ;;  %v7714_v51 = vld [vmem:[%s9601_s20 + $0x318] sm:$0xff] }
 0x162   : > { %1716 = vst [vmem:[#allocation2 + $0x20c] sm:$0xf] %v1652_v35  ;;  %v2572_v18 = vpack.c.b16 %v2540_v10, %v15181_v56  ;;  %vm11532_vm6 = vcmp.gt.f32.partialorder %v1800_v6, -1.0027314e+29  ;;  %vm1881_vm7 = vcmp.gt.f32.partialorder %v1801_v8, -1.0027314e+29  ;;  %5813 = vmatmul.bf16.gmra.mxu0 %v11486_v52  ;;  %5862 = vmatmul.bf16.gmra.mxu1 %v11492_v47  ;;  %vm11541_vm8 = vcmp.gt.f32.partialorder %v1802_v31, -1.0027314e+29  ;;  %v15193_v49 = vld [vmem:[#allocation50_spill] sm:$0xff] }
 0x163   : > { %2638 = vst [vmem:[#allocation2 + $0x210] sm:$0xff] %v7751_v37  ;;  %v1319_v35 = vmax.f32 %v11140_v60, %v15183_v27  ;;  %v1320_v38 = vmax.f32 %v11144_v45, %v15184_v39  ;;  %v11530_v60 = vmax.f32 %v11093_v16, %v1801_v8  ;;  %v8616_v45 = vld [vmem:[%s14656_s1 + $0x2a0] sm:$0xf]  ;;  %vm1883_vm9 = vcmp.gt.f32.partialorder %v1803_v14, -1.0027314e+29  ;;  %vm1902_vm10 = vmpackc.low %vm1881_vm7, %vm11532_vm6  ;;  %v1556_v37 = vpop.permute.xlu1 %1555  ;;  %v9261_v39 = vld [vmem:[#allocation2 + $0x2ac] sm:$0xf] }
 0x164   : > { %1718 = vst [vmem:[#allocation2 + $0x244] sm:$0xf] %v1654_v20  ;;  %vm1903_vm11 = vmpackc.low %vm1883_vm9, %vm11541_vm8  ;;  %v1918_v6 = vsel %vm1902_vm10, %v7712_v1, 0  ;;  %v11558_v8 = vor.u32 %v9254_v61, %v8120_v43  ;;  %v8681_v56 = vor.u32 %v9389_v23, %v8680_v53  ;;  %v1567_v44 = vsel %vm633_vm12, %v15193_v49, %v1556_v37  ;;  %v15194_v43 = vld [vmem:[#allocation35_spill] sm:$0xff] }
 0x165   : > { %1720 = vst [vmem:[#allocation2 + $0x27c] sm:$0xf] %v1656_v63  ;;  %v11547_v16 = vmax.f32 %v1319_v35, %v1802_v31  ;;  %v11549_v10 = vmax.f32 %v1320_v38, %v1803_v14  ;;  %v9373_v63 = vld [vmem:[%s14656_s1 + $0x2a4] sm:$0xf0]  ;;  %v8553_v31 = vor.u32 %v9357_v57, %v8552_v28  ;;  %v9267_v14 = vld [vmem:[#allocation2 + $0x2d4] sm:$0xf0]  ;;  %v2369_v27 = vunpack.c.h.b16 %v1918_v6 }
 0x166   : > { %2636 = vst [vmem:[#allocation2 + $0x1d8] sm:$0xff] %v2572_v18  ;;  %v8168_v18 = vld [vmem:[#allocation2 + $0x2a0] sm:$0xf]  ;;  %v1919_v12 = vsel %vm1903_vm11, %v7713_v59, 0  ;;  %v8745_v35 = vor.u32 %v9405_v41, %v8744_v21  ;;  %v8178_v38 = vld [vmem:[#allocation2 + $0x2e0] sm:$0xf0]  ;;  %6079 = vmatpush.bf16.msrb.mxu2 %v8681_v56  ;;  %v8617_v1 = vor.u32 %v9373_v63, %v8616_v45  ;;  %v2423_v61 = vunpack.c.h.b16 %v15194_v43 }
 0x167   : > { %15190 = vst [vmem:[#allocation46_spill] sm:$0xff] %v11547_v16  ;;  %v2371_v20 = vunpack.c.h.b16 %v1919_v12  ;;  %5981 = vmatpush.bf16.msrb.mxu0 %v8553_v31  ;;  %v7715_v53 = vld [vmem:[%s9601_s20 + $0x320] sm:$0xff]  ;;  %v2368_v23 = vunpack.c.l.b16 %v1918_v6  ;;  %v1626_v28 = vunpack.c.l.b16 %v1567_v44  ;;  %v1628_v57 = vunpack.c.h.b16 %v1567_v44  ;;  %5911 = vmatmul.bf16.gmra.mxu2 %v11558_v8  ;;  %v8170_v31 = vld [vmem:[#allocation2 + $0x2d8] sm:$0xf0]  ;;  %v8176_v6 = vld [vmem:[#allocation2 + $0x2a8] sm:$0xf] }
 0x168   : > { %15191 = vst [vmem:[#allocation27_spill] sm:$0xff] %v11549_v10  ;;  %6128 = vmatpush.bf16.msrb.mxu3 %v8745_v35  ;;  %v11565_v59 = vor.u32 %v9267_v14, %v8168_v18  ;;  %6030 = vmatpush.bf16.msrb.mxu1 %v8617_v1  ;;  %v2445_v41 = vpack.c.b16 %v2423_v61, %v2421_v22  ;;  %v9260_v56 = vld [vmem:[#allocation2 + $0x2a4] sm:$0xf]  ;;  %v1804_v49 = vunpack.c.l.bf16 %v7714_v51  ;;  %v1805_v63 = vunpack.c.h.bf16 %v7714_v51  ;;  %v9268_v35 = vld [vmem:[#allocation2 + $0x2dc] sm:$0xf0] }
 0x169   : > { %15192 = vst [vmem:[#allocation28_spill] sm:$0xff] %v11558_v8  ;;  %v2385_v21 = vpack.c.b16 %v2371_v20, %v2369_v27  ;;  %v11568_v52 = vor.u32 %v9261_v39, %v8178_v38  ;;  %v1658_v45 = vpack.c.b16 %v1626_v28, %v1626_v28  ;;  %v1660_v37 = vpack.c.b16 %v1628_v57, %v1628_v57  ;;  %v8672_v18 = vld [vmem:[%s14656_s1 + $0x310] sm:$0xf]  ;;  %v9387_v14 = vld [vmem:[%s14656_s1 + $0x314] sm:$0xf0]  ;;  %v1560_v8 = vpop.permute.xlu0 %1559 }
 0x16a   : > { %15195 = vst [vmem:[#allocation11_spill] sm:$0xff] %v11565_v59  ;;  %v1806_v43 = vunpack.c.l.bf16 %v7715_v53  ;;  %2470 = vrot.lane.b32.xlu2 %v2445_v41, %s9556_s21  ;;  %v11580_v27 = vmax.f32 %v11162_v54, %v1804_v49  ;;  %v1807_v39 = vunpack.c.h.bf16 %v7715_v53  ;;  %vm11582_vm14 = vcmp.gt.f32.partialorder %v1804_v49, -1.0027314e+29  ;;  %v8544_v20 = vld [vmem:[%s14656_s1 + $0x210] sm:$0xf]  ;;  %v9355_v44 = vld [vmem:[%s14656_s1 + $0x214] sm:$0xf0] }
 0x16b   : > { %15196 = vst [vmem:[#allocation34_spill] sm:$0xff] %v11568_v52  ;;  %v2509_v22 = vsel %vm633_vm12, %v2385_v21, %v11480_v36  ;;  %v8736_v1 = vld [vmem:[%s14656_s1 + $0x390] sm:$0xf]  ;;  %v11597_v28 = vmax.f32 %v11165_v25, %v1805_v63  ;;  %vm1885_vm15 = vcmp.gt.f32.partialorder %v1805_v63, -1.0027314e+29  ;;  %v9403_v57 = vld [vmem:[%s14656_s1 + $0x394] sm:$0xf0] }
 0x16c   : > { %v2544_v61 = vunpack.c.l.b16 %v2509_v22  ;;  %v7753_v54 = vsel %vm7654_vm13, %v1919_v12, %v2509_v22  ;;  %1722 = vst [vmem:[#allocation2 + $0x2b4] sm:$0xf] %v1658_v45  ;;  %vm1886_vm0 = vcmp.gt.f32.partialorder %v1806_v43, -1.0027314e+29  ;;  %vm1887_vm1 = vcmp.gt.f32.partialorder %v1807_v39, -1.0027314e+29  ;;  %vm1904_vm3 = vmpackc.low %vm1885_vm15, %vm11582_vm14  ;;  %v15199_v21 = vld [vmem:[#allocation13_spill] sm:$0xff] }
 0x16d   : > { %2642 = vst [vmem:[#allocation2 + $0x280] sm:$0xff] %v7753_v54  ;;  %v15200_v41 = vunpack.c.l.bf16 %v15199_v21  ;;  %v15201_v12 = vunpack.c.h.bf16 %v15199_v21  ;;  %v8608_v45 = vld [vmem:[%s14656_s1 + $0x290] sm:$0xf]  ;;  %v11613_v22 = vor.u32 %v9260_v56, %v8170_v31  ;;  %vm1905_vm4 = vmpackc.low %vm1887_vm1, %vm1886_vm0  ;;  %v1920_v38 = vsel %vm1904_vm3, %v7714_v51, 0 }
 0x16e   : > { %v2576_v63 = vpack.c.b16 %v2544_v61, %v2368_v23  ;;  %1724 = vst [vmem:[#allocation2 + $0x2ec] sm:$0xf] %v1660_v37  ;;  %v8673_v54 = vor.u32 %v9387_v14, %v8672_v18  ;;  %v1921_v21 = vsel %vm1905_vm4, %v7715_v53, 0  ;;  %v8545_v31 = vor.u32 %v9355_v44, %v8544_v20  ;;  %v7716_v51 = vld [vmem:[%s9601_s20 + $0x330] sm:$0xff]  ;;  %v7717_v18 = vld [vmem:[%s9601_s20 + $0x338] sm:$0xff]  ;;  %v15206_v61 = vld [vmem:[#allocation31_spill] sm:$0xff] }
 0x16f   : > { %v1323_v49 = vmax.f32 %v11194_v13, %v15200_v41  ;;  %v1324_v25 = vmax.f32 %v11198_v5, %v15201_v12  ;;  %15202 = vst [vmem:[#allocation50_spill] sm:$0xff] %v11613_v22  ;;  %v9371_v13 = vld [vmem:[%s14656_s1 + $0x294] sm:$0xf0]  ;;  %v2373_v5 = vunpack.c.h.b16 %v1920_v38  ;;  %v11620_v12 = vor.u32 %v9268_v35, %v8176_v6 }
 0x170   : > { %2640 = vst [vmem:[#allocation2 + $0x248] sm:$0xff] %v2576_v63  ;;  %v2375_v23 = vunpack.c.h.b16 %v1921_v21  ;;  %6080 = vmatpush.bf16.msrb.mxu2 %v8673_v54  ;;  %v8737_v37 = vor.u32 %v9403_v57, %v8736_v1  ;;  %5965 = vmatmul.bf16.gmra.mxu3 %v11568_v52  ;;  %v1568_v14 = vsel %vm633_vm12, %v11004_v19, %v1560_v8  ;;  %v2372_v35 = vunpack.c.l.b16 %v1920_v38  ;;  %v8664_v54 = vld [vmem:[%s14656_s1 + $0x300] sm:$0xf]  ;;  %v15219_v52 = vld [vmem:[#allocation42_spill] sm:$0xff] }
 0x171   : > { %v11618_v41 = vmax.f32 %v1323_v49, %v1806_v43  ;;  %15204 = vst [vmem:[#allocation13_spill] sm:$0xff] %v11620_v12  ;;  %v11622_v56 = vmax.f32 %v1324_v25, %v1807_v39  ;;  %v8609_v53 = vor.u32 %v9371_v13, %v8608_v45  ;;  %v2425_v43 = vunpack.c.h.b16 %v15206_v61  ;;  %v15207_v49 = vld [vmem:[#allocation32_spill] sm:$0xff]  ;;  %5982 = vmatpush.bf16.msrb.mxu0 %v8545_v31 }
 0x172   : > { %v2427_v6 = vunpack.c.h.b16 %v15207_v49  ;;  %v2386_v63 = vpack.c.b16 %v2375_v23, %v2373_v5  ;;  %6129 = vmatpush.bf16.msrb.mxu3 %v8737_v37  ;;  %v1630_v39 = vunpack.c.l.b16 %v1568_v14  ;;  %v1632_v25 = vunpack.c.h.b16 %v1568_v14  ;;  %5818 = vmatmul.bf16.gmra.mxu0 %v11565_v59  ;;  %v9385_v13 = vld [vmem:[%s14656_s1 + $0x304] sm:$0xf0]  ;;  %v8536_v14 = vld [vmem:[%s14656_s1 + $0x200] sm:$0xf] }
 0x173   : > { %15203 = vst [vmem:[#allocation35_spill] sm:$0xff] %v11618_v41  ;;  %6031 = vmatpush.bf16.msrb.mxu1 %v8609_v53  ;;  %v1808_v44 = vunpack.c.l.bf16 %v7716_v51  ;;  %v1809_v1 = vunpack.c.h.bf16 %v7716_v51  ;;  %v1810_v57 = vunpack.c.l.bf16 %v7717_v18  ;;  %v1811_v38 = vunpack.c.h.bf16 %v7717_v18  ;;  %v9353_v53 = vld [vmem:[%s14656_s1 + $0x204] sm:$0xf0]  ;;  %v15212_v49 = vld [vmem:[#allocation15_spill] sm:$0xff] }
 0x174   : > { %15205 = vst [vmem:[#allocation57_spill] sm:$0xff] %v11622_v56  ;;  %v2447_v20 = vpack.c.b16 %v2427_v6, %v2425_v43  ;;  %5867 = vmatmul.bf16.gmra.mxu1 %v11613_v22  ;;  %v2512_v19 = vsel %vm633_vm12, %v2386_v63, %v11554_v2  ;;  %v1662_v8 = vpack.c.b16 %v1630_v39, %v1630_v39  ;;  %v15213_v6 = vunpack.c.l.bf16 %v15212_v49 }
 0x175   : > { %v1664_v45 = vpack.c.b16 %v1632_v25, %v1632_v25  ;;  %v2548_v5 = vunpack.c.l.b16 %v2512_v19  ;;  %v7755_v23 = vsel %vm7654_vm13, %v1921_v21, %v2512_v19  ;;  %v11644_v31 = vmax.f32 %v11225_v17, %v1808_v44  ;;  %v8728_v21 = vld [vmem:[%s14656_s1 + $0x380] sm:$0xf]  ;;  %v9401_v17 = vld [vmem:[%s14656_s1 + $0x384] sm:$0xf0] }
 0x176   : > { %2474 = vrot.lane.b32.xlu2 %v2447_v20, %s9556_s21  ;;  %v11647_v37 = vmax.f32 %v11228_v42, %v1809_v1  ;;  %2646 = vst [vmem:[#allocation2 + $0x2f0] sm:$0xff] %v7755_v23  ;;  %vm1888_vm5 = vcmp.gt.f32.partialorder %v1808_v44, -1.0027314e+29  ;;  %vm1889_vm6 = vcmp.gt.f32.partialorder %v1809_v1, -1.0027314e+29  ;;  %vm11661_vm7 = vcmp.gt.f32.partialorder %v1810_v57, -1.0027314e+29  ;;  %v8600_v20 = vld [vmem:[%s14656_s1 + $0x280] sm:$0xf] }
 0x177   : > { %vm11665_vm8 = vcmp.gt.f32.partialorder %v1811_v38, -1.0027314e+29  ;;  %v2580_v43 = vpack.c.b16 %v2548_v5, %v2372_v35  ;;  %1726 = vst [vmem:[#allocation2 + $0x324] sm:$0xf] %v1662_v8  ;;  %vm1906_vm9 = vmpackc.low %vm1889_vm6, %vm1888_vm5  ;;  %v1327_v63 = vmax.f32 %v11263_v33, %v15213_v6  ;;  %v15214_v39 = vunpack.c.h.bf16 %v15212_v49  ;;  %v9369_v35 = vld [vmem:[%s14656_s1 + $0x284] sm:$0xf0]  ;;  %5916 = vmatmul.bf16.gmra.mxu2 %v11620_v12  ;;  %v11696_v5 = vld [vmem:[%s9601_s20 + $0xf8] sm:$0xff]  ;;  %v5789_v49 = vpop.f32.mrf.mxu0 }
 0x178   : > { %1728 = vst [vmem:[#allocation2 + $0x35c] sm:$0xf] %v1664_v45  ;;  %vm1907_vm10 = vmpackc.low %vm11665_vm8, %vm11661_vm7  ;;  %v11685_v44 = vsel %vm1906_vm9, %v7716_v51, 0  ;;  %v8665_v33 = vor.u32 %v9385_v13, %v8664_v54  ;;  %v7774_v45 = vld [vmem:[%s9601_s20 + $0xf0] sm:$0xff]  ;;  %v9275_v23 = vld [vmem:[#allocation2 + $0x31c] sm:$0xf]  ;;  %v8537_v54 = vor.u32 %v9353_v53, %v8536_v14  ;;  %v8729_v13 = vor.u32 %v9401_v17, %v8728_v21 }
 0x179   : > { %v1328_v25 = vmax.f32 %v11267_v0, %v15214_v39  ;;  %v4118_v0 = vld [vmem:[%s14657_s2] sm:$0x3]  ;;  %2644 = vst [vmem:[#allocation2 + $0x2b8] sm:$0xff] %v2580_v43  ;;  %v1923_v1 = vsel %vm1907_vm10, %v7717_v18, 0  ;;  %v2377_v19 = vunpack.c.h.b16 %v11685_v44  ;;  %v11692_v8 = vmax.f32 %v1327_v63, %v1810_v57  ;;  %v8234_v42 = vld [vmem:[#allocation2 + $0x350] sm:$0xf0] }
 0x17a   : > { %15216 = vst [vmem:[#allocation32_spill] sm:$0xff] %v11696_v5  ;;  %v2379_v51 = vunpack.c.h.b16 %v1923_v1  ;;  %6081 = vmatpush.bf16.msrb.mxu2 %v8665_v33  ;;  %v8601_v43 = vor.u32 %v9369_v35, %v8600_v20  ;;  %v11700_v6 = vperm.slane %v4118_v0, 0  ;;  %v15218_v18 = vld [vmem:[#allocation41_spill] sm:$0xff]  ;;  %v2431_v57 = vunpack.c.h.b16 %v15219_v52  ;;  %5983 = vmatpush.bf16.msrb.mxu0 %v8537_v54  ;;  %v9281_v14 = vld [vmem:[#allocation2 + $0x344] sm:$0xf0]  ;;  %v5838_v52 = vpop.f32.mrf.mxu1 }
 0x17b   : > { %15215 = vst [vmem:[#allocation31_spill] sm:$0xff] %v11692_v8  ;;  %v11698_v61 = vmax.f32 %v1328_v25, %v1811_v38  ;;  %v2429_v39 = vunpack.c.h.b16 %v15218_v18  ;;  %v8224_v12 = vld [vmem:[#allocation2 + $0x310] sm:$0xf]  ;;  %6130 = vmatpush.bf16.msrb.mxu3 %v8729_v13  ;;  %v2899_v59 = vunpack.c.l.bf16 %v7774_v45  ;;  %v2900_v22 = vunpack.c.h.bf16 %v7774_v45  ;;  %v9274_v53 = vld [vmem:[#allocation2 + $0x314] sm:$0xf] }
 0x17c   : > { %v2387_v63 = vpack.c.b16 %v2379_v51, %v2377_v19  ;;  %v14816_v38 = vunpack.c.l.bf16 %v11696_v5  ;;  %v11705_v25 = vor.u32 %v9275_v23, %v8234_v42  ;;  %v8226_v21 = vld [vmem:[#allocation2 + $0x348] sm:$0xf0]  ;;  %6032 = vmatpush.bf16.msrb.mxu1 %v8601_v43  ;;  %v5790_v17 = vadd.f32 %v5789_v49, %v11700_v6  ;;  %v11720_v42 = vpop.permute.xlu2 %2480 }
 0x17d   : > { %15217 = vst [vmem:[#allocation15_spill] sm:$0xff] %v11698_v61  ;;  %v2449_v20 = vpack.c.b16 %v2431_v57, %v2429_v39  ;;  %v14813_v35 = vunpack.c.h.bf16 %v11696_v5  ;;  %v11710_v33 = vmax.f32 %v11280_v24, %v2899_v59  ;;  %v11713_v0 = vmax.f32 %v11283_v40, %v2900_v22  ;;  %v9463_v39 = vld [vmem:[%s14656_s1 + $0x574] sm:$0xf0]  ;;  %v7776_v57 = vld [vmem:[%s9601_s20 + $0x108] sm:$0xff] }
 0x17e   : > { %15220 = vst [vmem:[#allocation41_spill] sm:$0xff] %v11705_v25  ;;  %vm11715_vm11 = vcmp.gt.f32.partialorder %v2899_v59, -1.0027314e+29  ;;  %vm2980_vm14 = vcmp.gt.f32.partialorder %v2900_v22, -1.0027314e+29  ;;  %v2376_v23 = vunpack.c.l.b16 %v11685_v44  ;;  %v5839_v51 = vadd.f32 %v5838_v52, %v5790_v17  ;;  %v8232_v22 = vld [vmem:[#allocation2 + $0x318] sm:$0xf]  ;;  %v11752_v17 = vld [vmem:[%s9601_s20 + $0x110] sm:$0xff] }
 0x17f   : > { %2478 = vrot.lane.b32.xlu2 %v2449_v20, %s9556_s21  ;;  %vm2981_vm15 = vcmp.gt.f32.partialorder %v14816_v38, -1.0027314e+29  ;;  %vm2982_vm0 = vcmp.gt.f32.partialorder %v14813_v35, -1.0027314e+29  ;;  %vm3011_vm1 = vmpackc.low %vm2980_vm14, %vm11715_vm11  ;;  %v2515_v24 = vsel %vm633_vm12, %v2387_v63, %v11720_v42  ;;  %v11731_v40 = vor.u32 %v9281_v14, %v8224_v12  ;;  %v9282_v44 = vld [vmem:[#allocation2 + $0x34c] sm:$0xf0]  ;;  %15225 = vst [vmem:[#allocation59_spill] sm:$0xff] %v11752_v17 }
 0x180   : > { %v11733_v59 = vor.u32 %v9274_v53, %v8226_v21  ;;  %vm3012_vm3 = vmpackc.low %vm2982_vm0, %vm2981_vm15  ;;  %v3027_v54 = vsel %vm3011_vm1, %v7774_v45, 0  ;;  %5970 = vmatmul.bf16.gmra.mxu3 %v11705_v25  ;;  %v2552_v13 = vunpack.c.l.b16 %v2515_v24  ;;  %v7757_v49 = vsel %vm7654_vm13, %v1923_v1, %v2515_v24  ;;  %v8976_v12 = vld [vmem:[%s14656_s1 + $0x570] sm:$0xf]  ;;  %v9431_v53 = vld [vmem:[%s14656_s1 + $0x474] sm:$0xf0]  ;;  %v5887_v21 = vpop.f32.mrf.mxu2 }
 0x181   : > { %15223 = vst [vmem:[#allocation42_spill] sm:$0xff] %v11731_v40  ;;  %v3028_v43 = vsel %vm3012_vm3, %v11696_v5, 0  ;;  %v3115_v18 = vunpack.c.l.b16 %v3027_v54  ;;  %v3116_v63 = vunpack.c.h.b16 %v3027_v54  ;;  %v8848_v1 = vld [vmem:[%s14656_s1 + $0x470] sm:$0xf]  ;;  %v11754_v52 = vor.u32 %v9282_v44, %v8232_v22  ;;  %v7904_v25 = vld [vmem:[#allocation2 + $0x80] sm:$0xf] }
 0x182   : > { %15224 = vst [vmem:[#allocation58_spill] sm:$0xff] %v11733_v59  ;;  %v3117_v45 = vunpack.c.l.b16 %v3028_v43  ;;  %v3118_v14 = vunpack.c.h.b16 %v3028_v43  ;;  %v2584_v20 = vpack.c.b16 %v2552_v13, %v2376_v23  ;;  %v8977_v19 = vor.u32 %v9463_v39, %v8976_v12  ;;  %v9040_v54 = vld [vmem:[%s14656_s1 + $0x5f0] sm:$0xf]  ;;  %5823 = vmatmul.bf16.gmra.mxu0 %v11731_v40  ;;  %v9447_v13 = vld [vmem:[%s14656_s1 + $0x4f4] sm:$0xf0] }
 0x183   : > { %2650 = vst [vmem:[#allocation2 + $0x360] sm:$0xff] %v7757_v49  ;;  %v8849_v24 = vor.u32 %v9431_v53, %v8848_v1  ;;  %v9479_v49 = vld [vmem:[%s14656_s1 + $0x5f4] sm:$0xf0]  ;;  %v8912_v43 = vld [vmem:[%s14656_s1 + $0x4f0] sm:$0xf]  ;;  %v2433_v12 = vunpack.c.h.b16 %v11072_v9  ;;  %v11771_v39 = vadd.f32 %v5887_v21, %v5839_v51  ;;  %v2435_v53 = vunpack.c.h.b16 %v11080_v7 }
 0x184   : > { %15226 = vst [vmem:[#allocation60_spill] sm:$0xff] %v11754_v52  ;;  %5872 = vmatmul.bf16.gmra.mxu1 %v11733_v59  ;;  %v3147_v23 = vpack.c.b16 %v3117_v45, %v3115_v18  ;;  %v3148_v22 = vpack.c.b16 %v3118_v14, %v3116_v63  ;;  %v9041_v44 = vor.u32 %v9479_v49, %v9040_v54  ;;  %v2903_v35 = vunpack.c.l.bf16 %v7776_v57  ;;  %v11776_v18 = vpop.f32.mrf.mxu3  ;;  %v11778_v45 = vpop.f32.mrf.mxu0  ;;  %v9185_v21 = vld [vmem:[#allocation2 + $0x44] sm:$0xf0] }
 0x185   : > { %2648 = vst [vmem:[#allocation2 + $0x328] sm:$0xff] %v2584_v20  ;;  %6270 = vmatpush.bf16.msra.mxu2 %v8977_v19  ;;  %6172 = vmatpush.bf16.msra.mxu0 %v8849_v24  ;;  %v8913_v1 = vor.u32 %v9447_v13, %v8912_v43  ;;  %v2904_v63 = vunpack.c.h.bf16 %v7776_v57  ;;  %v14815_v9 = vunpack.c.l.bf16 %v11752_v17  ;;  %v14814_v14 = vunpack.c.h.bf16 %v11752_v17  ;;  %v2455_v20 = vpop.permute.xlu2 %2454  ;;  %v11791_v24 = vpop.f32.mrf.mxu1  ;;  %v9473_v59 = vld [vmem:[%s14656_s1 + $0x5c4] sm:$0xf0] }
 0x186   : > { %3163 = vrot.lane.b32.xlu1 %v3147_v23, %s9556_s21  ;;  %3165 = vrot.lane.b32.xlu0 %v3148_v22, %s9556_s21  ;;  %v2451_v51 = vpack.c.b16 %v2435_v53, %v2433_v12  ;;  %v11783_v7 = vmax.f32 %v11016_v15, %v2903_v35  ;;  %vm11785_vm4 = vcmp.gt.f32.partialorder %v2903_v35, -1.0027314e+29  ;;  %v2484_v19 = vsel %vm633_vm12, %v11259_v58, %v2455_v20  ;;  %v9179_v15 = vld [vmem:[#allocation2 + $0x1c] sm:$0xf]  ;;  %v7858_v58 = vld [vmem:[#allocation2 + $0x50] sm:$0xf0] }
 0x187   : > { %6319 = vmatpush.bf16.msra.mxu3 %v9041_v44  ;;  %6221 = vmatpush.bf16.msra.mxu1 %v8913_v1  ;;  %v11794_v54 = vmax.f32 %v11019_v46, %v2904_v63  ;;  %vm2984_vm5 = vcmp.gt.f32.partialorder %v2904_v63, -1.0027314e+29  ;;  %vm2985_vm6 = vcmp.gt.f32.partialorder %v14815_v9, -1.0027314e+29  ;;  %v2525_v49 = vunpack.c.l.b16 %v2484_v19  ;;  %v7848_v63 = vld [vmem:[#allocation2 + $0x10] sm:$0xf] }
 0x188   : > { %v2527_v43 = vunpack.c.h.b16 %v2484_v19  ;;  %5921 = vmatmul.bf16.gmra.mxu2 %v11754_v52  ;;  %2482 = vrot.lane.b32.xlu2 %v2451_v51, %s9556_s21  ;;  %vm2986_vm7 = vcmp.gt.f32.partialorder %v14814_v14, -1.0027314e+29  ;;  %vm3013_vm8 = vmpackc.low %vm2984_vm5, %vm11785_vm4  ;;  %v11805_v53 = vor.u32 %v9179_v15, %v7858_v58  ;;  %v9178_v19 = vld [vmem:[#allocation2 + $0x14] sm:$0xf]  ;;  %v7850_v14 = vld [vmem:[#allocation2 + $0x48] sm:$0xf0] }
 0x189   : > { %vm3014_vm9 = vmpackc.low %vm2986_vm7, %vm2985_vm6  ;;  %v3029_v46 = vsel %vm3013_vm8, %v7776_v57, 0  ;;  %v2557_v35 = vpack.c.b16 %v2525_v49, %v2525_v49  ;;  %v7856_v49 = vld [vmem:[#allocation2 + $0x18] sm:$0xf]  ;;  %v8968_v58 = vld [vmem:[%s14656_s1 + $0x560] sm:$0xf] }
 0x18a   : > { %v2559_v23 = vpack.c.b16 %v2527_v43, %v2527_v43  ;;  %v3030_v22 = vsel %vm3014_vm9, %v11752_v17, 0  ;;  %v3119_v44 = vunpack.c.l.b16 %v3029_v46  ;;  %v3120_v12 = vunpack.c.h.b16 %v3029_v46  ;;  %15229 = vst [vmem:[#allocation61_spill] sm:$0xff] %v11805_v53  ;;  %v9186_v43 = vld [vmem:[#allocation2 + $0x4c] sm:$0xf0]  ;;  %v9199_v52 = vld [vmem:[#allocation2 + $0xb4] sm:$0xf0] }
 0x18b   : > { %v3121_v13 = vunpack.c.l.b16 %v3030_v22  ;;  %v3122_v1 = vunpack.c.h.b16 %v3030_v22  ;;  %2621 = vst [vmem:[#allocation2 + $0x20] sm:$0xf] %v2557_v35  ;;  %v11816_v46 = vor.u32 %v9185_v21, %v7848_v63  ;;  %v11818_v35 = vor.u32 %v9178_v19, %v7850_v14  ;;  %v9461_v22 = vld [vmem:[%s14656_s1 + $0x564] sm:$0xf0]  ;;  %v9032_v14 = vld [vmem:[%s14656_s1 + $0x5e0] sm:$0xf] }
 0x18c   : > { %2623 = vst [vmem:[#allocation2 + $0x58] sm:$0xf] %v2559_v23  ;;  %v11807_v9 = vpop.f32.mrf.mxu3  ;;  %v5794_v57 = vpop.f32.mrf.mxu0  ;;  %v9445_v19 = vld [vmem:[%s14656_s1 + $0x4e4] sm:$0xf0]  ;;  %v11850_v38 = vor.u32 %v9186_v43, %v7856_v49 }
 0x18d   : > { %v3149_v20 = vpack.c.b16 %v3121_v13, %v3119_v44  ;;  %v3150_v51 = vpack.c.b16 %v3122_v1, %v3120_v12  ;;  %v5795_v15 = vadd.f32 %v5794_v57, %v11700_v6  ;;  %15230 = vst [vmem:[#allocation62_spill] sm:$0xff] %v11816_v46  ;;  %v5843_v23 = vpop.f32.mrf.mxu1  ;;  %v8840_v44 = vld [vmem:[%s14656_s1 + $0x460] sm:$0xf]  ;;  %v9429_v13 = vld [vmem:[%s14656_s1 + $0x464] sm:$0xf0]  ;;  %v8969_v1 = vor.u32 %v9461_v22, %v8968_v58  ;;  %v11847_v58 = vpop.f32.mrf.mxu2 }
 0x18e   : > { %15231 = vst [vmem:[#allocation63_spill] sm:$0xff] %v11818_v35  ;;  %v8841_v63 = vor.u32 %v9429_v13, %v8840_v44  ;;  %v7778_v57 = vld [vmem:[%s9601_s20 + $0x120] sm:$0xff] }
 0x18f   : > { %3167 = vrot.lane.b32.xlu1 %v3149_v20, %s9556_s21  ;;  %3169 = vrot.lane.b32.xlu0 %v3150_v51, %s9556_s21  ;;  %v5844_v12 = vadd.f32 %v5843_v23, %v5795_v15  ;;  %v9477_v20 = vld [vmem:[%s14656_s1 + $0x5e4] sm:$0xf0]  ;;  %v8904_v51 = vld [vmem:[%s14656_s1 + $0x4e0] sm:$0xf]  ;;  %v2907_v22 = vunpack.c.l.bf16 %v7778_v57  ;;  %v2908_v44 = vunpack.c.h.bf16 %v7778_v57  ;;  %15233 = vst [vmem:[#allocation65_spill] sm:$0xff] %v11850_v38 }
 0x190   : > { %6131 = vmatmul.bf16.vlgmr.msrb.gmra.mxu3 %v11805_v53  ;;  %v9033_v21 = vor.u32 %v9477_v20, %v9032_v14  ;;  %v11845_v15 = vld [vmem:[%s9601_s20 + $0x128] sm:$0xff]  ;;  %6271 = vmatpush.bf16.msra.mxu2 %v8969_v1  ;;  %v8905_v23 = vor.u32 %v9445_v19, %v8904_v51 }
 0x191   : > { %15232 = vst [vmem:[#allocation64_spill] sm:$0xff] %v11845_v15  ;;  %6173 = vmatpush.bf16.msra.mxu0 %v8841_v63  ;;  %v14820_v13 = vunpack.c.l.bf16 %v11845_v15  ;;  %v14819_v14 = vunpack.c.h.bf16 %v11845_v15  ;;  %v11854_v20 = vmax.f32 %v11322_v55, %v2907_v22  ;;  %v11857_v17 = vmax.f32 %v11325_v26, %v2908_v44  ;;  %v15234_v1 = vld [vmem:[#allocation52_spill] sm:$0xff]  ;;  %v7914_v26 = vld [vmem:[#allocation2 + $0xc0] sm:$0xf0] }
 0x192   : > { %5984 = vmatmul.bf16.vlgmr.msrb.gmra.mxu0 %v11816_v46  ;;  %6320 = vmatpush.bf16.msra.mxu3 %v9033_v21  ;;  %vm2987_vm10 = vcmp.gt.f32.partialorder %v2907_v22, -1.0027314e+29  ;;  %vm2988_vm11 = vcmp.gt.f32.partialorder %v2908_v44, -1.0027314e+29  ;;  %v9193_v63 = vld [vmem:[#allocation2 + $0x8c] sm:$0xf]  ;;  %v7906_v46 = vld [vmem:[#allocation2 + $0xb8] sm:$0xf0] }
 0x193   : > { %6222 = vmatpush.bf16.msra.mxu1 %v8905_v23  ;;  %vm2989_vm14 = vcmp.gt.f32.partialorder %v14820_v13, -1.0027314e+29  ;;  %vm2990_vm15 = vcmp.gt.f32.partialorder %v14819_v14, -1.0027314e+29  ;;  %vm3015_vm0 = vmpackc.low %vm2988_vm11, %vm2987_vm10 }
 0x194   : > { %6033 = vmatmul.bf16.vlgmr.msrb.gmra.mxu1 %v11818_v35  ;;  %vm3016_vm1 = vmpackc.low %vm2990_vm15, %vm2989_vm14  ;;  %v3031_v43 = vsel %vm3015_vm0, %v7778_v57, 0  ;;  %v11866_v51 = vpop.f32.mrf.mxu3 }
 0x195   : > { %v3032_v21 = vsel %vm3016_vm1, %v11845_v15, 0  ;;  %v3123_v19 = vunpack.c.l.b16 %v3031_v43  ;;  %v3124_v23 = vunpack.c.h.b16 %v3031_v43 }
 0x196   : > { %v2459_v49 = vpop.permute.xlu2 %2458  ;;  %v3125_v14 = vunpack.c.l.b16 %v3032_v21  ;;  %v3126_v13 = vunpack.c.h.b16 %v3032_v21  ;;  %v9024_v21 = vld [vmem:[%s14656_s1 + $0x5d0] sm:$0xf] }
 0x197   : > { %v2485_v55 = vsel %vm633_vm12, %v15234_v1, %v2459_v49  ;;  %v9192_v1 = vld [vmem:[#allocation2 + $0x84] sm:$0xf] }
 0x198   : > { %6082 = vmatmul.bf16.vlgmr.msrb.gmra.mxu2 %v11850_v38  ;;  %v2529_v22 = vunpack.c.l.b16 %v2485_v55  ;;  %v2531_v44 = vunpack.c.h.b16 %v2485_v55  ;;  %v11869_v38 = vor.u32 %v9193_v63, %v7914_v26  ;;  %v3151_v57 = vpack.c.b16 %v3125_v14, %v3123_v19  ;;  %v7912_v14 = vld [vmem:[#allocation2 + $0x88] sm:$0xf]  ;;  %v9200_v26 = vld [vmem:[#allocation2 + $0xbc] sm:$0xf0]  ;;  %v9475_v19 = vld [vmem:[%s14656_s1 + $0x5d4] sm:$0xf0] }
 0x199   : > { %v3152_v49 = vpack.c.b16 %v3126_v13, %v3124_v23  ;;  %v5892_v35 = vpop.f32.mrf.mxu2  ;;  %v11876_v55 = vor.u32 %v9199_v52, %v7904_v25  ;;  %v11878_v63 = vor.u32 %v9192_v1, %v7906_v46  ;;  %v9459_v25 = vld [vmem:[%s14656_s1 + $0x554] sm:$0xf0]  ;;  %v8832_v52 = vld [vmem:[%s14656_s1 + $0x450] sm:$0xf]  ;;  %v11914_v1 = vld [vmem:[%s9601_s20 + $0x140] sm:$0xff] }
 0x19a   : > { %v2561_v5 = vpack.c.b16 %v2529_v22, %v2529_v22  ;;  %v2563_v53 = vpack.c.b16 %v2531_v44, %v2531_v44  ;;  %15235 = vst [vmem:[#allocation52_spill] sm:$0xff] %v11869_v38  ;;  %3171 = vrot.lane.b32.xlu1 %v3151_v57, %s9556_s21  ;;  %v11872_v43 = vadd.f32 %v5892_v35, %v5844_v12  ;;  %v9427_v46 = vld [vmem:[%s14656_s1 + $0x454] sm:$0xf0]  ;;  %v8896_v23 = vld [vmem:[%s14656_s1 + $0x4d0] sm:$0xf]  ;;  %v14833_v15 = vunpack.c.l.bf16 %v11914_v1 }
 0x19b   : > { %3173 = vrot.lane.b32.xlu0 %v3152_v49, %s9556_s21  ;;  %15236 = vst [vmem:[#allocation66_spill] sm:$0xff] %v11876_v55  ;;  %v8833_v13 = vor.u32 %v9427_v46, %v8832_v52  ;;  %v11907_v22 = vor.u32 %v9200_v26, %v7912_v14  ;;  %v9025_v44 = vor.u32 %v9475_v19, %v9024_v21  ;;  %v9443_v57 = vld [vmem:[%s14656_s1 + $0x4d4] sm:$0xf0]  ;;  %v14835_v14 = vunpack.c.h.bf16 %v11914_v1  ;;  %v7970_v19 = vld [vmem:[#allocation2 + $0x130] sm:$0xf0] }
 0x19c   : > { %2625 = vst [vmem:[#allocation2 + $0x90] sm:$0xf] %v2561_v5  ;;  %v8960_v5 = vld [vmem:[%s14656_s1 + $0x550] sm:$0xf]  ;;  %v11887_v35 = vpop.f32.mrf.mxu3  ;;  %v7780_v49 = vld [vmem:[%s9601_s20 + $0x138] sm:$0xff]  ;;  %vm2993_vm5 = vcmp.gt.f32.partialorder %v14833_v15, -1.0027314e+29 }
 0x19d   : > { %2627 = vst [vmem:[#allocation2 + $0xc8] sm:$0xf] %v2563_v53  ;;  %v11885_v53 = vpop.f32.mrf.mxu0  ;;  %v8961_v12 = vor.u32 %v9459_v25, %v8960_v5  ;;  %v11916_v5 = vpop.f32.mrf.mxu1  ;;  %6174 = vmatpush.bf16.msra.mxu0 %v8833_v13  ;;  %v8897_v25 = vor.u32 %v9443_v57, %v8896_v23  ;;  %v2911_v52 = vunpack.c.l.bf16 %v7780_v49  ;;  %v2912_v46 = vunpack.c.h.bf16 %v7780_v49  ;;  %6321 = vmatpush.bf16.msra.mxu3 %v9025_v44  ;;  %v9207_v13 = vld [vmem:[#allocation2 + $0xfc] sm:$0xf] }
 0x19e   : > { %15237 = vst [vmem:[#allocation67_spill] sm:$0xff] %v11878_v63  ;;  %vm2994_vm6 = vcmp.gt.f32.partialorder %v14835_v14, -1.0027314e+29 }
 0x19f   : > { %15238 = vst [vmem:[#allocation68_spill] sm:$0xff] %v11907_v22  ;;  %6272 = vmatpush.bf16.msra.mxu2 %v8961_v12  ;;  %6223 = vmatpush.bf16.msra.mxu1 %v8897_v25  ;;  %v11922_v26 = vmax.f32 %v11378_v34, %v2911_v52  ;;  %v11925_v21 = vmax.f32 %v11381_v3, %v2912_v46  ;;  %vm2991_vm3 = vcmp.gt.f32.partialorder %v2911_v52, -1.0027314e+29  ;;  %vm2992_vm4 = vcmp.gt.f32.partialorder %v2912_v46, -1.0027314e+29  ;;  %vm3018_vm8 = vmpackc.low %vm2994_vm6, %vm2993_vm5  ;;  %v7960_v52 = vld [vmem:[#allocation2 + $0xf0] sm:$0xf] }
 0x1a0   : > { %6136 = vmatmul.bf16.gmra.mxu3 %v11869_v38  ;;  %15239 = vst [vmem:[#allocation69_spill] sm:$0xff] %v11914_v1  ;;  %vm3017_vm7 = vmpackc.low %vm2992_vm4, %vm2991_vm3  ;;  %v3034_v57 = vsel %vm3018_vm8, %v11914_v1, 0  ;;  %v9213_v46 = vld [vmem:[#allocation2 + $0x124] sm:$0xf0]  ;;  %v9206_v38 = vld [vmem:[#allocation2 + $0xf4] sm:$0xf] }
 0x1a1   : > { %v3033_v34 = vsel %vm3017_vm7, %v7780_v49, 0  ;;  %v11936_v15 = vpop.f32.mrf.mxu2  ;;  %v9457_v49 = vld [vmem:[%s14656_s1 + $0x544] sm:$0xf0] }
 0x1a2   : > { %5989 = vmatmul.bf16.gmra.mxu0 %v11876_v55  ;;  %v3127_v25 = vunpack.c.l.b16 %v3033_v34  ;;  %v3129_v55 = vunpack.c.l.b16 %v3034_v57  ;;  %v3128_v14 = vunpack.c.h.b16 %v3033_v34  ;;  %v9425_v34 = vld [vmem:[%s14656_s1 + $0x444] sm:$0xf0] }
 0x1a4   : > { %6038 = vmatmul.bf16.gmra.mxu1 %v11878_v63  ;;  %v3130_v63 = vunpack.c.h.b16 %v3034_v57  ;;  %v9016_v57 = vld [vmem:[%s14656_s1 + $0x5c0] sm:$0xf] }
 0x1a5   : > { %v9017_v56 = vor.u32 %v9473_v59, %v9016_v57  ;;  %v7782_v59 = vld [vmem:[%s9601_s20 + $0x150] sm:$0xff] }
 0x1a6   : > { %v3154_v61 = vpack.c.b16 %v3130_v63, %v3128_v14  ;;  %v11967_v63 = vor.u32 %v9213_v46, %v7960_v52 }
 0x1a7   : > { %v2463_v12 = vpop.permute.xlu2 %2462  ;;  %6322 = vmatpush.bf16.msra.mxu3 %v9017_v56 }
 0x1a8   : > { %6087 = vmatmul.bf16.gmra.mxu2 %v11907_v22  ;;  %v2486_v23 = vsel %vm633_vm12, %v11302_v11, %v2463_v12  ;;  %v11934_v22 = vor.u32 %v9207_v13, %v7970_v19  ;;  %v8952_v11 = vld [vmem:[%s14656_s1 + $0x540] sm:$0xf]  ;;  %15242 = vst [vmem:[#allocation72_spill] sm:$0xff] %v11967_v63  ;;  %3177 = vrot.lane.b32.xlu0 %v3154_v61, %s9556_s21 }
 0x1a9   : > { %v2533_v44 = vunpack.c.l.b16 %v2486_v23  ;;  %v2535_v3 = vunpack.c.h.b16 %v2486_v23  ;;  %v8824_v12 = vld [vmem:[%s14656_s1 + $0x440] sm:$0xf]  ;;  %v5799_v19 = vpop.f32.mrf.mxu0  ;;  %v11947_v1 = vpop.f32.mrf.mxu3  ;;  %v8953_v40 = vor.u32 %v9457_v49, %v8952_v11  ;;  %v9441_v49 = vld [vmem:[%s14656_s1 + $0x4c4] sm:$0xf0] }
 0x1aa   : > { %15240 = vst [vmem:[#allocation70_spill] sm:$0xff] %v11934_v22  ;;  %v5800_v47 = vadd.f32 %v5799_v19, %v11700_v6  ;;  %v8825_v8 = vor.u32 %v9425_v34, %v8824_v12  ;;  %v8888_v11 = vld [vmem:[%s14656_s1 + $0x4c0] sm:$0xf]  ;;  %v11976_v12 = vld [vmem:[%s9601_s20 + $0x158] sm:$0xff] }
 0x1ab   : > { %v2565_v23 = vpack.c.b16 %v2533_v44, %v2533_v44  ;;  %v2567_v13 = vpack.c.b16 %v2535_v3, %v2535_v3  ;;  %15241 = vst [vmem:[#allocation71_spill] sm:$0xff] %v11947_v1  ;;  %v7962_v44 = vld [vmem:[#allocation2 + $0x128] sm:$0xf0]  ;;  %v3153_v3 = vpack.c.b16 %v3129_v55, %v3127_v25  ;;  %6273 = vmatpush.bf16.msra.mxu2 %v8953_v40  ;;  %v7968_v25 = vld [vmem:[#allocation2 + $0xf8] sm:$0xf]  ;;  %v14843_v52 = vunpack.c.l.bf16 %v11976_v12 }
 0x1ac   : > { %v8889_v41 = vor.u32 %v9441_v49, %v8888_v11  ;;  %v11969_v14 = vor.u32 %v9206_v38, %v7962_v44  ;;  %6175 = vmatpush.bf16.msra.mxu0 %v8825_v8  ;;  %v9214_v40 = vld [vmem:[#allocation2 + $0x12c] sm:$0xf0]  ;;  %15244 = vst [vmem:[#allocation74_spill] sm:$0xff] %v11976_v12  ;;  %v14842_v38 = vunpack.c.h.bf16 %v11976_v12  ;;  %v8026_v11 = vld [vmem:[#allocation2 + $0x1a0] sm:$0xf0] }
 0x1ad   : > { %2629 = vst [vmem:[#allocation2 + $0x100] sm:$0xf] %v2565_v23  ;;  %v5848_v19 = vpop.f32.mrf.mxu1  ;;  %3175 = vrot.lane.b32.xlu1 %v3153_v3, %s9556_s21  ;;  %v2915_v23 = vunpack.c.l.bf16 %v7782_v59  ;;  %v11980_v61 = vor.u32 %v9214_v40, %v7968_v25  ;;  %vm2997_vm11 = vcmp.gt.f32.partialorder %v14843_v52, -1.0027314e+29  ;;  %v9221_v3 = vld [vmem:[#allocation2 + $0x16c] sm:$0xf] }
 0x1ae   : > { %2631 = vst [vmem:[#allocation2 + $0x138] sm:$0xf] %v2567_v13  ;;  %v5849_v55 = vadd.f32 %v5848_v19, %v5800_v47  ;;  %6224 = vmatpush.bf16.msra.mxu1 %v8889_v41  ;;  %v2916_v47 = vunpack.c.h.bf16 %v7782_v59  ;;  %vm2998_vm14 = vcmp.gt.f32.partialorder %v14842_v38, -1.0027314e+29 }
 0x1af   : > { %15243 = vst [vmem:[#allocation73_spill] sm:$0xff] %v11969_v14  ;;  %v11986_v41 = vmax.f32 %v11417_v32, %v2915_v23  ;;  %vm2995_vm9 = vcmp.gt.f32.partialorder %v2915_v23, -1.0027314e+29  ;;  %vm3020_vm0 = vmpackc.low %vm2998_vm14, %vm2997_vm11 }
 0x1b0   : > { %6141 = vmatmul.bf16.gmra.mxu3 %v11934_v22  ;;  %15245 = vst [vmem:[#allocation75_spill] sm:$0xff] %v11980_v61  ;;  %v11989_v13 = vmax.f32 %v11420_v4, %v2916_v47  ;;  %vm2996_vm10 = vcmp.gt.f32.partialorder %v2916_v47, -1.0027314e+29  ;;  %v3036_v49 = vsel %vm3020_vm0, %v11976_v12, 0  ;;  %v9220_v22 = vld [vmem:[#allocation2 + $0x164] sm:$0xf] }
 0x1b1   : > { %v5801_v46 = vpop.f32.mrf.mxu0  ;;  %v11983_v56 = vpop.f32.mrf.mxu3  ;;  %vm3019_vm15 = vmpackc.low %vm2996_vm10, %vm2995_vm9  ;;  %v3133_v23 = vunpack.c.l.b16 %v3036_v49  ;;  %v3134_v47 = vunpack.c.h.b16 %v3036_v49  ;;  %v9423_v49 = vld [vmem:[%s14656_s1 + $0x434] sm:$0xf0] }
 0x1b2   : > { %5994 = vmatmul.bf16.gmra.mxu0 %v11967_v63  ;;  %v5802_v8 = vadd.f32 %v5801_v46, %v11700_v6  ;;  %15246 = vst [vmem:[#allocation76_spill] sm:$0xff] %v11983_v56  ;;  %v3035_v4 = vsel %vm3019_vm15, %v7782_v59, 0  ;;  %v8944_v46 = vld [vmem:[%s14656_s1 + $0x530] sm:$0xf]  ;;  %v9455_v59 = vld [vmem:[%s14656_s1 + $0x534] sm:$0xf0] }
 0x1b3   : > { %v3131_v19 = vunpack.c.l.b16 %v3035_v4  ;;  %v3132_v25 = vunpack.c.h.b16 %v3035_v4  ;;  %v8816_v4 = vld [vmem:[%s14656_s1 + $0x430] sm:$0xf]  ;;  %v8945_v63 = vor.u32 %v9455_v59, %v8944_v46 }
 0x1b4   : > { %6043 = vmatmul.bf16.gmra.mxu1 %v11969_v14  ;;  %v5897_v34 = vpop.f32.mrf.mxu2  ;;  %v8817_v14 = vor.u32 %v9423_v49, %v8816_v4  ;;  %v8024_v4 = vld [vmem:[#allocation2 + $0x168] sm:$0xf]  ;;  %v9228_v49 = vld [vmem:[#allocation2 + $0x19c] sm:$0xf0] }
 0x1b5   : > { %v5850_v57 = vpop.f32.mrf.mxu1  ;;  %v11996_v44 = vadd.f32 %v5897_v34, %v5849_v55  ;;  %v8016_v34 = vld [vmem:[#allocation2 + $0x160] sm:$0xf]  ;;  %v3155_v12 = vpack.c.b16 %v3133_v23, %v3131_v19  ;;  %v9439_v19 = vld [vmem:[%s14656_s1 + $0x4b4] sm:$0xf0]  ;;  %6274 = vmatpush.bf16.msra.mxu2 %v8945_v63 }
 0x1b6   : > { %v5851_v32 = vadd.f32 %v5850_v57, %v5802_v8  ;;  %v9227_v8 = vld [vmem:[#allocation2 + $0x194] sm:$0xf0]  ;;  %v12004_v57 = vor.u32 %v9221_v3, %v8026_v11  ;;  %v9008_v3 = vld [vmem:[%s14656_s1 + $0x5b0] sm:$0xf]  ;;  %6176 = vmatpush.bf16.msra.mxu0 %v8817_v14 }
 0x1b7   : > { %v9471_v11 = vld [vmem:[%s14656_s1 + $0x5b4] sm:$0xf0]  ;;  %3179 = vrot.lane.b32.xlu1 %v3155_v12, %s9556_s21 }
 0x1b8   : > { %6092 = vmatmul.bf16.gmra.mxu2 %v11980_v61  ;;  %15247 = vst [vmem:[#allocation77_spill] sm:$0xff] %v12004_v57  ;;  %v8018_v61 = vld [vmem:[#allocation2 + $0x198] sm:$0xf0]  ;;  %v9009_v10 = vor.u32 %v9471_v11, %v9008_v3 }
 0x1ba   : > { %6323 = vmatpush.bf16.msra.mxu3 %v9009_v10 }
 0x1bb   : > { %v2467_v40 = vpop.permute.xlu2 %2466 }
 0x1bc   : > { %v2487_v55 = vsel %vm633_vm12, %v11373_v30, %v2467_v40  ;;  %v3156_v30 = vpack.c.b16 %v3134_v47, %v3132_v25  ;;  %v8880_v40 = vld [vmem:[%s14656_s1 + $0x4b0] sm:$0xf] }
 0x1bd   : > { %v2537_v38 = vunpack.c.l.b16 %v2487_v55  ;;  %v2539_v52 = vunpack.c.h.b16 %v2487_v55  ;;  %v5899_v55 = vpop.f32.mrf.mxu2  ;;  %v8881_v16 = vor.u32 %v9439_v19, %v8880_v40  ;;  %v12033_v59 = vpop.f32.mrf.mxu3  ;;  %v9453_v40 = vld [vmem:[%s14656_s1 + $0x524] sm:$0xf0] }
 0x1be   : > { %v5804_v47 = vpop.f32.mrf.mxu0  ;;  %3181 = vrot.lane.b32.xlu0 %v3156_v30, %s9556_s21  ;;  %v5853_v1 = vpop.f32.mrf.mxu1  ;;  %v12031_v46 = vadd.f32 %v5899_v55, %v5851_v32  ;;  %v7784_v32 = vld [vmem:[%s9601_s20 + $0x168] sm:$0xff]  ;;  %v12043_v30 = vld [vmem:[%s9601_s20 + $0x170] sm:$0xff] }
 0x1bf   : > { %v2569_v25 = vpack.c.b16 %v2537_v38, %v2537_v38  ;;  %v2571_v23 = vpack.c.b16 %v2539_v52, %v2539_v52  ;;  %v5805_v56 = vadd.f32 %v5804_v47, %v11700_v6  ;;  %v12035_v52 = vor.u32 %v9227_v8, %v8016_v34  ;;  %6225 = vmatpush.bf16.msra.mxu1 %v8881_v16  ;;  %v8082_v47 = vld [vmem:[#allocation2 + $0x210] sm:$0xf0] }
 0x1c0   : > { %6146 = vmatmul.bf16.gmra.mxu3 %v12004_v57  ;;  %v12037_v38 = vor.u32 %v9220_v22, %v8018_v61  ;;  %15250 = vst [vmem:[#allocation80_spill] sm:$0xff] %v12043_v30  ;;  %v2919_v3 = vunpack.c.l.bf16 %v7784_v32  ;;  %v2920_v34 = vunpack.c.h.bf16 %v7784_v32  ;;  %v14851_v22 = vunpack.c.l.bf16 %v12043_v30 }
 0x1c1   : > { %2633 = vst [vmem:[#allocation2 + $0x170] sm:$0xf] %v2569_v25  ;;  %v5854_v12 = vadd.f32 %v5853_v1, %v5805_v56  ;;  %v14850_v14 = vunpack.c.h.bf16 %v12043_v30  ;;  %v12049_v1 = vor.u32 %v9228_v49, %v8024_v4 }
 0x1c2   : > { %15248 = vst [vmem:[#allocation78_spill] sm:$0xff] %v12035_v52  ;;  %5999 = vmatmul.bf16.gmra.mxu0 %v12035_v52  ;;  %v12052_v56 = vmax.f32 %v11527_v48, %v2919_v3  ;;  %v12055_v8 = vmax.f32 %v11530_v60, %v2920_v34  ;;  %vm2999_vm1 = vcmp.gt.f32.partialorder %v2919_v3, -1.0027314e+29  ;;  %vm3000_vm3 = vcmp.gt.f32.partialorder %v2920_v34, -1.0027314e+29  ;;  %v9255_v52 = vld [vmem:[#allocation2 + $0x274] sm:$0xf0] }
 0x1c3   : > { %15249 = vst [vmem:[#allocation79_spill] sm:$0xff] %v12037_v38  ;;  %vm12059_vm4 = vcmp.gt.f32.partialorder %v14851_v22, -1.0027314e+29  ;;  %vm3002_vm5 = vcmp.gt.f32.partialorder %v14850_v14, -1.0027314e+29  ;;  %vm3021_vm6 = vmpackc.low %vm3000_vm3, %vm2999_vm1  ;;  %v9241_v14 = vld [vmem:[#allocation2 + $0x204] sm:$0xf0] }
 0x1c4   : > { %2635 = vst [vmem:[#allocation2 + $0x1a8] sm:$0xf] %v2571_v23  ;;  %6048 = vmatmul.bf16.gmra.mxu1 %v12037_v38  ;;  %v2471_v63 = vpop.permute.xlu2 %2470  ;;  %v9235_v23 = vld [vmem:[#allocation2 + $0x1dc] sm:$0xf]  ;;  %vm3022_vm7 = vmpackc.low %vm3002_vm5, %vm12059_vm4  ;;  %v3037_v55 = vsel %vm3021_vm6, %v7784_v32, 0 }
 0x1c5   : > { %v2488_v10 = vsel %vm633_vm12, %v11383_v62, %v2471_v63  ;;  %15251 = vst [vmem:[#allocation81_spill] sm:$0xff] %v12049_v1  ;;  %v12067_v60 = vpop.f32.mrf.mxu3  ;;  %v3038_v49 = vsel %vm3022_vm7, %v12043_v30, 0  ;;  %v3135_v63 = vunpack.c.l.b16 %v3037_v55  ;;  %v3136_v3 = vunpack.c.h.b16 %v3037_v55  ;;  %v9234_v22 = vld [vmem:[#allocation2 + $0x1d4] sm:$0xf]  ;;  %v8936_v32 = vld [vmem:[%s14656_s1 + $0x520] sm:$0xf] }
 0x1c6   : > { %v2541_v16 = vunpack.c.l.b16 %v2488_v10  ;;  %v2543_v61 = vunpack.c.h.b16 %v2488_v10  ;;  %v5806_v11 = vpop.f32.mrf.mxu0  ;;  %v5855_v19 = vpop.f32.mrf.mxu1  ;;  %v3137_v10 = vunpack.c.l.b16 %v3038_v49  ;;  %v12074_v57 = vor.u32 %v9235_v23, %v8082_v47  ;;  %v9000_v23 = vld [vmem:[%s14656_s1 + $0x5a0] sm:$0xf]  ;;  %v9469_v47 = vld [vmem:[%s14656_s1 + $0x5a4] sm:$0xf0]  ;;  %v8074_v55 = vld [vmem:[#allocation2 + $0x208] sm:$0xf0] }
 0x1c7   : > { %v5807_v62 = vadd.f32 %v5806_v11, %v11700_v6  ;;  %v8072_v11 = vld [vmem:[#allocation2 + $0x1d0] sm:$0xf]  ;;  %v9001_v30 = vor.u32 %v9469_v47, %v9000_v23  ;;  %v8130_v38 = vld [vmem:[#allocation2 + $0x278] sm:$0xf0] }
 0x1c8   : > { %v2573_v48 = vpack.c.b16 %v2541_v16, %v2541_v16  ;;  %v2575_v25 = vpack.c.b16 %v2543_v61, %v2543_v61  ;;  %6097 = vmatmul.bf16.gmra.mxu2 %v12049_v1  ;;  %v3138_v16 = vunpack.c.h.b16 %v3038_v49  ;;  %15254 = vst [vmem:[#allocation82_spill] sm:$0xff] %v12074_v57  ;;  %v12106_v47 = vor.u32 %v9241_v14, %v8072_v11  ;;  %v12116_v14 = vld [vmem:[%s9601_s20 + $0x188] sm:$0xff] }
 0x1c9   : > { %v5856_v4 = vadd.f32 %v5855_v19, %v5807_v62  ;;  %v5902_v34 = vpop.f32.mrf.mxu2  ;;  %v8808_v62 = vld [vmem:[%s14656_s1 + $0x420] sm:$0xf]  ;;  %v3157_v19 = vpack.c.b16 %v3137_v10, %v3135_v63  ;;  %v12108_v1 = vor.u32 %v9234_v22, %v8074_v55  ;;  %6324 = vmatpush.bf16.msra.mxu3 %v9001_v30  ;;  %15257 = vst [vmem:[#allocation85_spill] sm:$0xff] %v12116_v14  ;;  %v14857_v30 = vunpack.c.l.bf16 %v12116_v14 }
 0x1ca   : > { %2637 = vst [vmem:[#allocation2 + $0x1e0] sm:$0xf] %v2573_v48  ;;  %v12072_v61 = vadd.f32 %v5902_v34, %v5854_v12  ;;  %v3158_v12 = vpack.c.b16 %v3138_v16, %v3136_v3  ;;  %v8937_v48 = vor.u32 %v9453_v40, %v8936_v32  ;;  %v8872_v63 = vld [vmem:[%s14656_s1 + $0x4a0] sm:$0xf]  ;;  %v9437_v3 = vld [vmem:[%s14656_s1 + $0x4a4] sm:$0xf0] }
 0x1cb   : > { %2639 = vst [vmem:[#allocation2 + $0x218] sm:$0xf] %v2575_v25  ;;  %v9421_v25 = vld [vmem:[%s14656_s1 + $0x424] sm:$0xf0]  ;;  %3183 = vrot.lane.b32.xlu1 %v3157_v19, %s9556_s21  ;;  %v8873_v16 = vor.u32 %v9437_v3, %v8872_v63  ;;  %v9242_v63 = vld [vmem:[#allocation2 + $0x20c] sm:$0xf0] }
 0x1cc   : > { %v8809_v34 = vor.u32 %v9421_v25, %v8808_v62  ;;  %3185 = vrot.lane.b32.xlu0 %v3158_v12, %s9556_s21  ;;  %6275 = vmatpush.bf16.msra.mxu2 %v8937_v48  ;;  %15255 = vst [vmem:[#allocation83_spill] sm:$0xff] %v12106_v47  ;;  %vm3005_vm10 = vcmp.gt.f32.partialorder %v14857_v30, -1.0027314e+29 }
 0x1cd   : > { %15256 = vst [vmem:[#allocation84_spill] sm:$0xff] %v12108_v1  ;;  %6226 = vmatpush.bf16.msra.mxu1 %v8873_v16  ;;  %v14856_v16 = vunpack.c.h.bf16 %v12116_v14 }
 0x1ce   : > { %6177 = vmatpush.bf16.msra.mxu0 %v8809_v34 }
 0x1cf   : > { %v5809_v32 = vpop.f32.mrf.mxu0  ;;  %v5858_v40 = vpop.f32.mrf.mxu1  ;;  %vm3006_vm11 = vcmp.gt.f32.partialorder %v14856_v16, -1.0027314e+29 }
 0x1d0   : > { %v2475_v49 = vpop.permute.xlu2 %2474  ;;  %6151 = vmatmul.bf16.gmra.mxu3 %v12074_v57  ;;  %v5810_v23 = vadd.f32 %v5809_v32, %v11700_v6  ;;  %vm3024_vm15 = vmpackc.low %vm3006_vm11, %vm3005_vm10 }
 0x1d1   : > { %v2489_v10 = vsel %vm633_vm12, %v11480_v36, %v2475_v49  ;;  %v12110_v36 = vpop.f32.mrf.mxu3  ;;  %v8080_v49 = vld [vmem:[#allocation2 + $0x1d8] sm:$0xf]  ;;  %v5904_v48 = vpop.f32.mrf.mxu2 }
 0x1d2   : > { %v2545_v62 = vunpack.c.l.b16 %v2489_v10  ;;  %v2547_v25 = vunpack.c.h.b16 %v2489_v10  ;;  %v5859_v3 = vadd.f32 %v5858_v40, %v5810_v23  ;;  %6004 = vmatmul.bf16.gmra.mxu0 %v12106_v47  ;;  %v7786_v10 = vld [vmem:[%s9601_s20 + $0x180] sm:$0xff]  ;;  %v12118_v22 = vadd.f32 %v5904_v48, %v5856_v4 }
 0x1d3   : > { %v2923_v11 = vunpack.c.l.bf16 %v7786_v10  ;;  %v2924_v55 = vunpack.c.h.bf16 %v7786_v10  ;;  %v12121_v34 = vor.u32 %v9242_v63, %v8080_v49  ;;  %v3040_v49 = vsel %vm3024_vm15, %v12116_v14, 0  ;;  %v9248_v14 = vld [vmem:[#allocation2 + $0x244] sm:$0xf] }
 0x1d4   : > { %v2577_v19 = vpack.c.b16 %v2545_v62, %v2545_v62  ;;  %v2579_v12 = vpack.c.b16 %v2547_v25, %v2547_v25  ;;  %6053 = vmatmul.bf16.gmra.mxu1 %v12108_v1  ;;  %v3142_v16 = vunpack.c.h.b16 %v3040_v49  ;;  %v8128_v1 = vld [vmem:[#allocation2 + $0x240] sm:$0xf] }
 0x1d5   : > { %15258 = vst [vmem:[#allocation86_spill] sm:$0xff] %v12121_v34  ;;  %v12125_v32 = vmax.f32 %v11580_v27, %v2923_v11  ;;  %v12128_v40 = vmax.f32 %v11597_v28, %v2924_v55  ;;  %vm3003_vm8 = vcmp.gt.f32.partialorder %v2923_v11, -1.0027314e+29  ;;  %vm3004_vm9 = vcmp.gt.f32.partialorder %v2924_v55, -1.0027314e+29  ;;  %v9249_v28 = vld [vmem:[#allocation2 + $0x24c] sm:$0xf] }
 0x1d6   : > { %2641 = vst [vmem:[#allocation2 + $0x250] sm:$0xf] %v2577_v19  ;;  %vm3023_vm14 = vmpackc.low %vm3004_vm9, %vm3003_vm8  ;;  %v8138_v19 = vld [vmem:[#allocation2 + $0x280] sm:$0xf0]  ;;  %v3141_v55 = vunpack.c.l.b16 %v3040_v49 }
 0x1d7   : > { %2643 = vst [vmem:[#allocation2 + $0x288] sm:$0xf] %v2579_v12  ;;  %v5811_v4 = vpop.f32.mrf.mxu0  ;;  %v5860_v62 = vpop.f32.mrf.mxu1  ;;  %v3039_v25 = vsel %vm3023_vm14, %v7786_v10, 0 }
 0x1d8   : > { %6102 = vmatmul.bf16.gmra.mxu2 %v12121_v34  ;;  %v5812_v27 = vadd.f32 %v5811_v4, %v11700_v6  ;;  %v3139_v63 = vunpack.c.l.b16 %v3039_v25  ;;  %v3140_v48 = vunpack.c.h.b16 %v3039_v25  ;;  %v8928_v4 = vld [vmem:[%s14656_s1 + $0x510] sm:$0xf]  ;;  %v12146_v25 = vor.u32 %v9249_v28, %v8138_v19  ;;  %v9467_v28 = vld [vmem:[%s14656_s1 + $0x594] sm:$0xf0] }
 0x1d9   : > { %v12136_v23 = vpop.f32.mrf.mxu3  ;;  %v2479_v12 = vpop.permute.xlu2 %2478  ;;  %v8864_v19 = vld [vmem:[%s14656_s1 + $0x490] sm:$0xf] }
 0x1da   : > { %15259 = vst [vmem:[#allocation87_spill] sm:$0xff] %v12136_v23  ;;  %v2490_v11 = vsel %vm633_vm12, %v11554_v2, %v2479_v12  ;;  %v5861_v30 = vadd.f32 %v5860_v62, %v5812_v27  ;;  %v5907_v57 = vpop.f32.mrf.mxu2  ;;  %v3159_v23 = vpack.c.b16 %v3141_v55, %v3139_v63  ;;  %v3160_v2 = vpack.c.b16 %v3142_v16, %v3140_v48  ;;  %v9451_v62 = vld [vmem:[%s14656_s1 + $0x514] sm:$0xf0]  ;;  %v8800_v27 = vld [vmem:[%s14656_s1 + $0x410] sm:$0xf] }
 0x1db   : > { %v2549_v34 = vunpack.c.l.b16 %v2490_v11  ;;  %v2551_v10 = vunpack.c.h.b16 %v2490_v11  ;;  %v12144_v47 = vadd.f32 %v5907_v57, %v5859_v3  ;;  %15260 = vst [vmem:[#allocation88_spill] sm:$0xff] %v12146_v25  ;;  %v9419_v57 = vld [vmem:[%s14656_s1 + $0x414] sm:$0xf0]  ;;  %v8929_v49 = vor.u32 %v9451_v62, %v8928_v4  ;;  %v8992_v16 = vld [vmem:[%s14656_s1 + $0x590] sm:$0xf] }
 0x1dc   : > { %v8801_v11 = vor.u32 %v9419_v57, %v8800_v27  ;;  %v8136_v63 = vld [vmem:[#allocation2 + $0x248] sm:$0xf]  ;;  %v9256_v48 = vld [vmem:[#allocation2 + $0x27c] sm:$0xf0]  ;;  %3187 = vrot.lane.b32.xlu1 %v3159_v23, %s9556_s21  ;;  %3189 = vrot.lane.b32.xlu0 %v3160_v2, %s9556_s21  ;;  %v9435_v55 = vld [vmem:[%s14656_s1 + $0x494] sm:$0xf0]  ;;  %v12173_v2 = vor.u32 %v9255_v52, %v8128_v1 }
 0x1dd   : > { %v2581_v3 = vpack.c.b16 %v2549_v34, %v2549_v34  ;;  %v2583_v12 = vpack.c.b16 %v2551_v10, %v2551_v10  ;;  %v8993_v34 = vor.u32 %v9467_v28, %v8992_v16  ;;  %v9263_v10 = vld [vmem:[#allocation2 + $0x2bc] sm:$0xf]  ;;  %v8194_v4 = vld [vmem:[#allocation2 + $0x2f0] sm:$0xf0]  ;;  %6276 = vmatpush.bf16.msra.mxu2 %v8929_v49  ;;  %v8865_v62 = vor.u32 %v9435_v55, %v8864_v19  ;;  %v12189_v1 = vld [vmem:[%s9601_s20 + $0x1a0] sm:$0xff] }
 0x1de   : > { %6178 = vmatpush.bf16.msra.mxu0 %v8801_v11  ;;  %15261 = vst [vmem:[#allocation89_spill] sm:$0xff] %v12173_v2  ;;  %v12175_v16 = vor.u32 %v9248_v14, %v8130_v38  ;;  %v12179_v49 = vor.u32 %v9263_v10, %v8194_v4  ;;  %v7788_v38 = vld [vmem:[%s9601_s20 + $0x198] sm:$0xff] }
 0x1df   : > { %2645 = vst [vmem:[#allocation2 + $0x2c0] sm:$0xf] %v2581_v3  ;;  %v5814_v27 = vpop.f32.mrf.mxu0  ;;  %v5863_v57 = vpop.f32.mrf.mxu1  ;;  %6325 = vmatpush.bf16.msra.mxu3 %v8993_v34  ;;  %6227 = vmatpush.bf16.msra.mxu1 %v8865_v62  ;;  %v12177_v3 = vor.u32 %v9256_v48, %v8136_v63  ;;  %v7758_v14 = vld [vmem:[%s9601_s20 + $0x18] sm:$0xff]  ;;  %v2927_v62 = vunpack.c.l.bf16 %v7788_v38 }
 0x1e0   : > { %6156 = vmatmul.bf16.gmra.mxu3 %v12146_v25  ;;  %2647 = vst [vmem:[#allocation2 + $0x2f8] sm:$0xf] %v2583_v12  ;;  %v5815_v23 = vadd.f32 %v5814_v27, %v11700_v6  ;;  %v15267_v63 = vld [vmem:[#allocation22_spill] sm:$0xff]  ;;  %v2928_v27 = vunpack.c.h.bf16 %v7788_v38  ;;  %v7759_v25 = vld [vmem:[%s9601_s20 + $0x20] sm:$0xff] }
 0x1e1   : > { %15262 = vst [vmem:[#allocation90_spill] sm:$0xff] %v12175_v16  ;;  %v15268_v48 = vunpack.c.l.bf16 %v15267_v63  ;;  %vm12203_vm0 = vcmp.gt.f32.partialorder %v2927_v62, -1.0027314e+29 }
 0x1e2   : > { %15263 = vst [vmem:[#allocation91_spill] sm:$0xff] %v12177_v3  ;;  %v2483_v11 = vpop.permute.xlu2 %2482  ;;  %v5864_v28 = vadd.f32 %v5863_v57, %v5815_v23  ;;  %6009 = vmatmul.bf16.gmra.mxu0 %v12173_v2  ;;  %v5909_v12 = vpop.f32.mrf.mxu2  ;;  %v14870_v57 = vunpack.c.l.bf16 %v12189_v1  ;;  %v14869_v23 = vunpack.c.h.bf16 %v12189_v1  ;;  %vm12210_vm1 = vcmp.gt.f32.partialorder %v2928_v27, -1.0027314e+29 }
 0x1e3   : > { %15264 = vst [vmem:[#allocation92_spill] sm:$0xff] %v12179_v49  ;;  %v12183_v19 = vpop.f32.mrf.mxu3  ;;  %v2491_v52 = vsel %vm633_vm12, %v11720_v42, %v2483_v11  ;;  %v2222_v34 = vmax.f32 %v11305_v29, %v15268_v48  ;;  %v12195_v55 = vadd.f32 %v5909_v12, %v5861_v30  ;;  %v2704_v42 = vunpack.c.l.bf16 %v7758_v14  ;;  %vm3025_vm5 = vmpackc.low %vm12210_vm1, %vm12203_vm0 }
 0x1e4   : > { %6058 = vmatmul.bf16.gmra.mxu1 %v12175_v16  ;;  %15265 = vst [vmem:[#allocation93_spill] sm:$0xff] %v12183_v19  ;;  %v2553_v10 = vunpack.c.l.b16 %v2491_v52  ;;  %v2555_v4 = vunpack.c.h.b16 %v2491_v52  ;;  %v12201_v16 = vmax.f32 %v11644_v31, %v2927_v62  ;;  %v12208_v29 = vmax.f32 %v11647_v37, %v2928_v27 }
 0x1e5   : > { %15266 = vst [vmem:[#allocation94_spill] sm:$0xff] %v12189_v1  ;;  %vm12216_vm3 = vcmp.gt.f32.partialorder %v14870_v57, -1.0027314e+29  ;;  %vm12222_vm4 = vcmp.gt.f32.partialorder %v14869_v23, -1.0027314e+29  ;;  %v12232_v37 = vmax.f32 %v11710_v33, %v2704_v42  ;;  %v2707_v62 = vunpack.c.h.bf16 %v7759_v25 }
 0x1e6   : > { %v2585_v11 = vpack.c.b16 %v2553_v10, %v2553_v10  ;;  %v2587_v2 = vpack.c.b16 %v2555_v4, %v2555_v4  ;;  %15271 = vst [vmem:[#allocation22_spill] sm:$0xff] %v12208_v29  ;;  %v2705_v10 = vunpack.c.h.bf16 %v7758_v14  ;;  %v2706_v4 = vunpack.c.l.bf16 %v7759_v25  ;;  %vm3026_vm6 = vmpackc.low %vm12222_vm4, %vm12216_vm3  ;;  %v8186_v29 = vld [vmem:[#allocation2 + $0x2e8] sm:$0xf0] }
 0x1e7   : > { %v5816_v52 = vpop.f32.mrf.mxu0  ;;  %v5865_v48 = vpop.f32.mrf.mxu1  ;;  %15278 = vst [vmem:[#allocation95_spill] sm:$0xff] %v12232_v37  ;;  %vm12239_vm7 = vcmp.gt.f32.partialorder %v2704_v42, -1.0027314e+29  ;;  %v15281_v30 = vunpack.c.h.bf16 %v15267_v63  ;;  %v3042_v23 = vsel %vm3026_vm6, %v12189_v1, 0  ;;  %v9262_v1 = vld [vmem:[#allocation2 + $0x2b4] sm:$0xf]  ;;  %vm2787_vm10 = vcmp.gt.f32.partialorder %v2707_v62, -1.0027314e+29 }
 0x1e8   : > { %6107 = vmatmul.bf16.gmra.mxu2 %v12177_v3  ;;  %2649 = vst [vmem:[#allocation2 + $0x330] sm:$0xf] %v2585_v11  ;;  %v5817_v27 = vadd.f32 %v5816_v52, %v11700_v6  ;;  %v3041_v11 = vsel %vm3025_vm5, %v7788_v38, 0  ;;  %v3145_v38 = vunpack.c.l.b16 %v3042_v23  ;;  %v3146_v42 = vunpack.c.h.b16 %v3042_v23  ;;  %v8920_v23 = vld [vmem:[%s14656_s1 + $0x500] sm:$0xf] }
 0x1e9   : > { %2651 = vst [vmem:[#allocation2 + $0x368] sm:$0xf] %v2587_v2  ;;  %v2223_v33 = vmax.f32 %v11308_v50, %v15281_v30  ;;  %v3143_v57 = vunpack.c.l.b16 %v3041_v11  ;;  %v3144_v3 = vunpack.c.h.b16 %v3041_v11  ;;  %v12248_v2 = vmax.f32 %v11713_v0, %v2705_v10  ;;  %v8184_v50 = vld [vmem:[#allocation2 + $0x2b0] sm:$0xf]  ;;  %v9269_v30 = vld [vmem:[#allocation2 + $0x2e4] sm:$0xf0] }
 0x1ea   : > { %v5866_v12 = vadd.f32 %v5865_v48, %v5817_v27  ;;  %v5912_v52 = vpop.f32.mrf.mxu2  ;;  %vm12252_vm8 = vcmp.gt.f32.partialorder %v2705_v10, -1.0027314e+29  ;;  %vm2786_vm9 = vcmp.gt.f32.partialorder %v2706_v4, -1.0027314e+29  ;;  %v12262_v0 = vmax.f32 %v2222_v34, %v2706_v4  ;;  %v8792_v34 = vld [vmem:[%s14656_s1 + $0x400] sm:$0xf]  ;;  %v9417_v37 = vld [vmem:[%s14656_s1 + $0x404] sm:$0xf0] }
 0x1eb   : > { %15282 = vst [vmem:[#allocation96_spill] sm:$0xff] %v12248_v2  ;;  %v12250_v31 = vpop.f32.mrf.mxu3  ;;  %v12256_v63 = vadd.f32 %v5912_v52, %v5864_v28  ;;  %vm2816_vm11 = vmpackc.low %vm12252_vm8, %vm12239_vm7  ;;  %v9449_v28 = vld [vmem:[%s14656_s1 + $0x504] sm:$0xf0]  ;;  %v3161_v48 = vpack.c.b16 %v3145_v38, %v3143_v57  ;;  %v3162_v10 = vpack.c.b16 %v3146_v42, %v3144_v3  ;;  %v12272_v11 = vmax.f32 %v2223_v33, %v2707_v62  ;;  %v8984_v3 = vld [vmem:[%s14656_s1 + $0x580] sm:$0xf] }
 0x1ec   : > { %15285 = vst [vmem:[#allocation97_spill] sm:$0xff] %v12262_v0  ;;  %vm2817_vm14 = vmpackc.low %vm2787_vm10, %vm2786_vm9  ;;  %v12270_v27 = vsel %vm2816_vm11, %v7758_v14, 0  ;;  %v9465_v14 = vld [vmem:[%s14656_s1 + $0x584] sm:$0xf0]  ;;  %v8921_v62 = vor.u32 %v9449_v28, %v8920_v23  ;;  %v8793_v33 = vor.u32 %v9417_v37, %v8792_v34  ;;  %v12300_v23 = vor.u32 %v9269_v30, %v8184_v50  ;;  %v8192_v34 = vld [vmem:[#allocation2 + $0x2b8] sm:$0xf] }
 0x1ed   : > { %15286 = vst [vmem:[#allocation98_spill] sm:$0xff] %v12272_v11  ;;  %v12280_v4 = vsel %vm2817_vm14, %v7759_v25, 0  ;;  %v3060_v19 = vunpack.c.h.b16 %v12270_v27  ;;  %3191 = vrot.lane.b32.xlu1 %v3161_v48, %s9556_s21  ;;  %3193 = vrot.lane.b32.xlu0 %v3162_v10, %s9556_s21  ;;  %v8856_v25 = vld [vmem:[%s14656_s1 + $0x480] sm:$0xf]  ;;  %v9433_v52 = vld [vmem:[%s14656_s1 + $0x484] sm:$0xf0]  ;;  %v8985_v11 = vor.u32 %v9465_v14, %v8984_v3  ;;  %v12302_v28 = vor.u32 %v9262_v1, %v8186_v29 }
 0x1ee   : > { %v3062_v57 = vunpack.c.h.b16 %v12280_v4  ;;  %v8857_v48 = vor.u32 %v9433_v52, %v8856_v25  ;;  %15287 = vst [vmem:[#allocation99_spill] sm:$0xff] %v12300_v23  ;;  %6277 = vmatpush.bf16.msra.mxu2 %v8921_v62  ;;  %6179 = vmatpush.bf16.msra.mxu0 %v8793_v33  ;;  %v9270_v37 = vld [vmem:[#allocation2 + $0x2ec] sm:$0xf0]  ;;  %v7761_v50 = vld [vmem:[%s9601_s20 + $0x38] sm:$0xff] }
 0x1ef   : > { %v5819_v38 = vpop.f32.mrf.mxu0  ;;  %15288 = vst [vmem:[#allocation100_spill] sm:$0xff] %v12302_v28  ;;  %6326 = vmatpush.bf16.msra.mxu3 %v8985_v11  ;;  %v7760_v25 = vld [vmem:[%s9601_s20 + $0x30] sm:$0xff]  ;;  %v15293_v52 = vld [vmem:[#allocation54_spill] sm:$0xff] }
 0x1f0   : > { %6161 = vmatmul.bf16.gmra.mxu3 %v12179_v49  ;;  %v5820_v10 = vadd.f32 %v5819_v38, %v11700_v6  ;;  %v3091_v0 = vpack.c.b16 %v3062_v57, %v3060_v19  ;;  %6228 = vmatpush.bf16.msra.mxu1 %v8857_v48  ;;  %v15289_v30 = vld [vmem:[#allocation21_spill] sm:$0xff]  ;;  %v2708_v57 = vunpack.c.l.bf16 %v7760_v25  ;;  %v2709_v38 = vunpack.c.h.bf16 %v7760_v25 }
 0x1f1   : > { %v5868_v42 = vpop.f32.mrf.mxu1  ;;  %v15290_v1 = vunpack.c.l.bf16 %v15289_v30  ;;  %v15291_v29 = vld [vmem:[#allocation53_spill] sm:$0xff]  ;;  %v15292_v33 = vunpack.c.h.bf16 %v15289_v30  ;;  %v12318_v48 = vor.u32 %v9270_v37, %v8192_v34  ;;  %v2711_v49 = vunpack.c.h.bf16 %v7761_v50 }
 0x1f2   : > { %v5869_v2 = vadd.f32 %v5868_v42, %v5820_v10  ;;  %6014 = vmatmul.bf16.gmra.mxu0 %v12300_v23  ;;  %v5914_v3 = vpop.f32.mrf.mxu2  ;;  %v2710_v42 = vunpack.c.l.bf16 %v7761_v50  ;;  %v3059_v10 = vunpack.c.l.b16 %v12270_v27  ;;  %v12322_v23 = vmax.f32 %v11783_v7, %v2708_v57 }
 0x1f3   : > { %v12306_v14 = vpop.f32.mrf.mxu3  ;;  %v2226_v62 = vmax.f32 %v15291_v29, %v15290_v1  ;;  %v2227_v19 = vmax.f32 %v15293_v52, %v15292_v33  ;;  %v12316_v11 = vadd.f32 %v5914_v3, %v5866_v12  ;;  %15294 = vst [vmem:[#allocation21_spill] sm:$0xff] %v12318_v48  ;;  %vm12327_vm15 = vcmp.gt.f32.partialorder %v2708_v57, -1.0027314e+29 }
 0x1f4   : > { %6063 = vmatmul.bf16.gmra.mxu1 %v12302_v28  ;;  %15295 = vst [vmem:[#allocation53_spill] sm:$0xff] %v12322_v23  ;;  %v12325_v28 = vmax.f32 %v11794_v54, %v2709_v38  ;;  %vm2789_vm0 = vcmp.gt.f32.partialorder %v2709_v38, -1.0027314e+29  ;;  %vm12331_vm1 = vcmp.gt.f32.partialorder %v2710_v42, -1.0027314e+29  ;;  %vm12335_vm3 = vcmp.gt.f32.partialorder %v2711_v49, -1.0027314e+29  ;;  %v8250_v38 = vld [vmem:[#allocation2 + $0x360] sm:$0xf0] }
 0x1f5   : > { %vm2818_vm4 = vmpackc.low %vm2789_vm0, %vm12327_vm15  ;;  %v12341_v7 = vmax.f32 %v2226_v62, %v2710_v42  ;;  %v12343_v54 = vmax.f32 %v2227_v19, %v2711_v49  ;;  %v9277_v19 = vld [vmem:[#allocation2 + $0x32c] sm:$0xf] }
 0x1f6   : > { %15296 = vst [vmem:[#allocation54_spill] sm:$0xff] %v12325_v28  ;;  %vm2819_vm5 = vmpackc.low %vm12335_vm3, %vm12331_vm1  ;;  %v12352_v52 = vsel %vm2818_vm4, %v7760_v25, 0 }
 0x1f7   : > { %15303 = vst [vmem:[#allocation101_spill] sm:$0xff] %v12341_v7  ;;  %v5821_v34 = vpop.f32.mrf.mxu0  ;;  %v2835_v30 = vsel %vm2819_vm5, %v7761_v50, 0  ;;  %v9104_v50 = vld [vmem:[%s14656_s1 + $0x670] sm:$0xf] }
 0x1f8   : > { %v3164_v12 = vpop.permute.xlu1 %3163  ;;  %v3166_v3 = vpop.permute.xlu0 %3165  ;;  %15304 = vst [vmem:[#allocation102_spill] sm:$0xff] %v12343_v54  ;;  %6112 = vmatmul.bf16.gmra.mxu2 %v12318_v48  ;;  %v5822_v62 = vadd.f32 %v5821_v34, %v11700_v6  ;;  %v3066_v7 = vunpack.c.h.b16 %v2835_v30  ;;  %v9302_v34 = vld [vmem:[%s14656_s1 + $0x74] sm:$0xf]  ;;  %v8402_v48 = vld [vmem:[%s14656_s1 + $0xf8] sm:$0xf0] }
 0x1f9   : > { %v5870_v37 = vpop.f32.mrf.mxu1  ;;  %v3205_v29 = vsel %vm633_vm12, %v3091_v0, %v3164_v12  ;;  %v3195_v33 = vsel %vm633_vm12, %v3164_v12, %v3166_v3  ;;  %v3064_v12 = vunpack.c.h.b16 %v12352_v52 }
 0x1fa   : > { %v3235_v57 = vunpack.c.l.b16 %v3205_v29  ;;  %v7791_v49 = vsel %vm7654_vm13, %v12280_v4, %v3205_v29  ;;  %v3236_v42 = vunpack.c.l.b16 %v3195_v33  ;;  %v3238_v0 = vunpack.c.h.b16 %v3195_v33  ;;  %v5917_v1 = vpop.f32.mrf.mxu2  ;;  %v8338_v4 = vld [vmem:[%s14656_s1 + $0x78] sm:$0xf0] }
 0x1fb   : > { %3333 = vst [vmem:[#allocation2 + $0x5c] sm:$0xff] %v7791_v49  ;;  %v5871_v3 = vadd.f32 %v5870_v37, %v5822_v62  ;;  %v12358_v27 = vpop.f32.mrf.mxu3  ;;  %v12369_v29 = vadd.f32 %v5917_v1, %v5869_v2  ;;  %v12371_v37 = vor.u32 %v9277_v19, %v8250_v38  ;;  %v9283_v62 = vld [vmem:[#allocation2 + $0x354] sm:$0xf0]  ;;  %v9136_v38 = vld [vmem:[%s14656_s1 + $0x6b0] sm:$0xf] }
 0x1fc   : > { %v3267_v25 = vpack.c.b16 %v3235_v57, %v3059_v10  ;;  %v3268_v54 = vpack.c.b16 %v3236_v42, %v3236_v42  ;;  %v3270_v33 = vpack.c.b16 %v3238_v0, %v3238_v0  ;;  %v8240_v10 = vld [vmem:[#allocation2 + $0x320] sm:$0xf]  ;;  %v8341_v57 = vor.u32 %v9302_v34, %v8338_v4  ;;  %v9495_v49 = vld [vmem:[%s14656_s1 + $0x674] sm:$0xf0]  ;;  %v9318_v42 = vld [vmem:[%s14656_s1 + $0xf4] sm:$0xf] }
 0x1fd   : > { %15305 = vst [vmem:[#allocation103_spill] sm:$0xff] %v12371_v37  ;;  %v9105_v2 = vor.u32 %v9495_v49, %v9104_v50  ;;  %v8405_v19 = vor.u32 %v9318_v42, %v8402_v48  ;;  %v9503_v0 = vld [vmem:[%s14656_s1 + $0x6b4] sm:$0xf0]  ;;  %v9276_v1 = vld [vmem:[#allocation2 + $0x324] sm:$0xf]  ;;  %v3092_v4 = vpack.c.b16 %v3066_v7, %v3064_v12  ;;  %v12390_v49 = vor.u32 %v9283_v62, %v8240_v10 }
 0x1fe   : > { %3331 = vst [vmem:[#allocation2 + $0x24] sm:$0xff] %v3267_v25  ;;  %v8242_v34 = vld [vmem:[#allocation2 + $0x358] sm:$0xf0]  ;;  %6466 = vmatpush.bf16.msrb.mxu2 %v8341_v57  ;;  %v9137_v28 = vor.u32 %v9503_v0, %v9136_v38  ;;  %v9284_v57 = vld [vmem:[#allocation2 + $0x35c] sm:$0xf0] }
 0x1ff   : > { %3332 = vst [vmem:[#allocation2 + $0x2c] sm:$0xf] %v3268_v54  ;;  %6368 = vmatpush.bf16.msrb.mxu0 %v9105_v2  ;;  %6515 = vmatpush.bf16.msrb.mxu3 %v8405_v19  ;;  %v5824_v25 = vpop.f32.mrf.mxu0  ;;  %v12392_v42 = vor.u32 %v9276_v1, %v8242_v34  ;;  %v3063_v54 = vunpack.c.l.b16 %v12352_v52  ;;  %v7762_v1 = vld [vmem:[%s9601_s20 + $0x48] sm:$0xff]  ;;  %v7763_v34 = vld [vmem:[%s9601_s20 + $0x50] sm:$0xff] }
 0x200   : > { %3334 = vst [vmem:[#allocation2 + $0x64] sm:$0xf] %v3270_v33  ;;  %6166 = vmatmul.bf16.gmra.mxu3 %v12371_v37  ;;  %6421 = vmatpush.bf16.msrb.mxu1 %v9137_v28  ;;  %v5825_v48 = vadd.f32 %v5824_v25, %v11700_v6  ;;  %v8248_v33 = vld [vmem:[#allocation2 + $0x328] sm:$0xf]  ;;  %v2712_v37 = vunpack.c.l.bf16 %v7762_v1 }
 0x201   : > { %v5873_v50 = vpop.f32.mrf.mxu1  ;;  %15306 = vst [vmem:[#allocation104_spill] sm:$0xff] %v12390_v49  ;;  %v3168_v7 = vpop.permute.xlu1 %3167 }
 0x202   : > { %15307 = vst [vmem:[#allocation105_spill] sm:$0xff] %v12392_v42  ;;  %v3170_v12 = vpop.permute.xlu0 %3169  ;;  %v3208_v2 = vsel %vm633_vm12, %v3092_v4, %v3168_v7  ;;  %v5874_v38 = vadd.f32 %v5873_v50, %v5825_v48  ;;  %6019 = vmatmul.bf16.gmra.mxu0 %v12390_v49  ;;  %v5919_v28 = vpop.f32.mrf.mxu2  ;;  %v12406_v50 = vor.u32 %v9284_v57, %v8248_v33  ;;  %vm12414_vm6 = vcmp.gt.f32.partialorder %v2712_v37, -1.0027314e+29 }
 0x203   : > { %v3196_v19 = vsel %vm633_vm12, %v3168_v7, %v3170_v12  ;;  %v12399_v10 = vpop.f32.mrf.mxu3  ;;  %v3239_v62 = vunpack.c.l.b16 %v3208_v2  ;;  %v7793_v52 = vsel %vm7654_vm13, %v2835_v30, %v3208_v2  ;;  %v12404_v25 = vadd.f32 %v5919_v28, %v5871_v3 }
 0x204   : > { %6068 = vmatmul.bf16.gmra.mxu1 %v12392_v42  ;;  %15308 = vst [vmem:[#allocation106_spill] sm:$0xff] %v12399_v10  ;;  %v3240_v0 = vunpack.c.l.b16 %v3196_v19  ;;  %v3242_v4 = vunpack.c.h.b16 %v3196_v19  ;;  %v2713_v7 = vunpack.c.h.bf16 %v7762_v1  ;;  %v12409_v42 = vmax.f32 %v11854_v20, %v2712_v37  ;;  %v15318_v37 = vld [vmem:[#allocation23_spill] sm:$0xff] }
 0x205   : > { %3337 = vst [vmem:[#allocation2 + $0xcc] sm:$0xff] %v7793_v52  ;;  %v3271_v48 = vpack.c.b16 %v3239_v62, %v3063_v54  ;;  %v2714_v30 = vunpack.c.l.bf16 %v7763_v34  ;;  %v2715_v2 = vunpack.c.h.bf16 %v7763_v34  ;;  %v5792_v54 = vadd.f32 %v11778_v45, %v11700_v6  ;;  %v15320_v62 = vld [vmem:[#allocation39_spill] sm:$0xff] }
 0x206   : > { %15309 = vst [vmem:[#allocation107_spill] sm:$0xff] %v12406_v50  ;;  %v3272_v12 = vpack.c.b16 %v3240_v0, %v3240_v0  ;;  %v3274_v49 = vpack.c.b16 %v3242_v4, %v3242_v4  ;;  %v12412_v23 = vmax.f32 %v11857_v17, %v2713_v7  ;;  %vm12418_vm7 = vcmp.gt.f32.partialorder %v2713_v7, -1.0027314e+29  ;;  %v9181_v17 = vld [vmem:[#allocation2 + $0x2c] sm:$0xf]  ;;  %v15322_v0 = vld [vmem:[#allocation5_spill] sm:$0xff] }
 0x207   : > { %15310 = vst [vmem:[#allocation108_spill] sm:$0xff] %v12409_v42  ;;  %v5826_v33 = vpop.f32.mrf.mxu0  ;;  %vm12425_vm8 = vcmp.gt.f32.partialorder %v2714_v30, -1.0027314e+29  ;;  %vm2820_vm9 = vmpackc.low %vm12418_vm7, %vm12414_vm6  ;;  %v15319_v28 = vunpack.c.l.bf16 %v15318_v37  ;;  %v15321_v45 = vunpack.c.h.bf16 %v15318_v37  ;;  %vm2795_vm10 = vcmp.gt.f32.partialorder %v2715_v2, -1.0027314e+29 }
 0x208   : > { %15311 = vst [vmem:[#allocation109_spill] sm:$0xff] %v12412_v23  ;;  %6117 = vmatmul.bf16.gmra.mxu2 %v12406_v50  ;;  %v5827_v7 = vadd.f32 %v5826_v33, %v11700_v6  ;;  %vm2821_vm11 = vmpackc.low %vm2795_vm10, %vm12425_vm8  ;;  %v7866_v33 = vld [vmem:[#allocation2 + $0x58] sm:$0xf0] }
 0x209   : > { %3335 = vst [vmem:[#allocation2 + $0x94] sm:$0xff] %v3271_v48  ;;  %v5875_v20 = vpop.f32.mrf.mxu1  ;;  %v2230_v52 = vmax.f32 %v15320_v62, %v15319_v28  ;;  %v2231_v4 = vmax.f32 %v15322_v0, %v15321_v45  ;;  %v7874_v48 = vld [vmem:[#allocation2 + $0x60] sm:$0xf0]  ;;  %v2837_v0 = vsel %vm2821_vm11, %v7763_v34, 0 }
 0x20a   : > { %3336 = vst [vmem:[#allocation2 + $0x9c] sm:$0xf] %v3272_v12  ;;  %v12440_v12 = vsel %vm2820_vm9, %v7762_v1, 0  ;;  %v5876_v28 = vadd.f32 %v5875_v20, %v5827_v7  ;;  %v9180_v45 = vld [vmem:[#allocation2 + $0x24] sm:$0xf]  ;;  %v12454_v23 = vor.u32 %v9181_v17, %v7874_v48  ;;  %v3070_v57 = vunpack.c.h.b16 %v2837_v0 }
 0x20b   : > { %3338 = vst [vmem:[#allocation2 + $0xd4] sm:$0xf] %v3274_v49  ;;  %v3068_v3 = vunpack.c.h.b16 %v12440_v12  ;;  %v12445_v19 = vmax.f32 %v2230_v52, %v2714_v30  ;;  %v12447_v50 = vmax.f32 %v2231_v4, %v2715_v2  ;;  %v5922_v37 = vpop.f32.mrf.mxu2  ;;  %v12449_v62 = vpop.f32.mrf.mxu3  ;;  %v5841_v49 = vadd.f32 %v11791_v24, %v5792_v54  ;;  %v9300_v30 = vld [vmem:[%s14656_s1 + $0x64] sm:$0xf]  ;;  %v8330_v2 = vld [vmem:[%s14656_s1 + $0x68] sm:$0xf0] }
 0x20c   : > { %15325 = vst [vmem:[#allocation5_spill] sm:$0xff] %v12449_v62  ;;  %v12452_v1 = vadd.f32 %v5922_v37, %v5874_v38  ;;  %v9096_v20 = vld [vmem:[%s14656_s1 + $0x660] sm:$0xf]  ;;  %v8333_v34 = vor.u32 %v9300_v30, %v8330_v2  ;;  %v9493_v24 = vld [vmem:[%s14656_s1 + $0x664] sm:$0xf0]  ;;  %v5937_v30 = vadd.f32 %v11776_v18, %v11771_v39  ;;  %v12477_v2 = vor.u32 %v9180_v45, %v7866_v33 }
 0x20d   : > { %15323 = vst [vmem:[#allocation23_spill] sm:$0xff] %v12445_v19  ;;  %v9316_v38 = vld [vmem:[%s14656_s1 + $0xe4] sm:$0xf]  ;;  %v8394_v54 = vld [vmem:[%s14656_s1 + $0xe8] sm:$0xf0]  ;;  %v5890_v17 = vadd.f32 %v11847_v58, %v5841_v49  ;;  %v3093_v7 = vpack.c.b16 %v3070_v57, %v3068_v3  ;;  %v9097_v48 = vor.u32 %v9493_v24, %v9096_v20  ;;  %v3067_v3 = vunpack.c.l.b16 %v12440_v12  ;;  %v3172_v49 = vpop.permute.xlu1 %3171  ;;  %v3174_v57 = vpop.permute.xlu0 %3173 }
 0x20e   : > { %15324 = vst [vmem:[#allocation39_spill] sm:$0xff] %v12447_v50  ;;  %v7864_v52 = vld [vmem:[#allocation2 + $0x20] sm:$0xf]  ;;  %v9187_v4 = vld [vmem:[#allocation2 + $0x54] sm:$0xf0]  ;;  %v8397_v37 = vor.u32 %v9316_v38, %v8394_v54  ;;  %6467 = vmatpush.bf16.msrb.mxu2 %v8333_v34  ;;  %v3197_v33 = vsel %vm633_vm12, %v3172_v49, %v3174_v57 }
 0x20f   : > { %15326 = vst [vmem:[#allocation110_spill] sm:$0xff] %v12454_v23  ;;  %v7872_v50 = vld [vmem:[#allocation2 + $0x28] sm:$0xf]  ;;  %v9188_v19 = vld [vmem:[#allocation2 + $0x5c] sm:$0xf0]  ;;  %v5985_v42 = vpop.f32.mrf.mxu0  ;;  %6369 = vmatpush.bf16.msrb.mxu0 %v9097_v48  ;;  %v12480_v58 = vor.u32 %v9187_v4, %v7864_v52  ;;  %v5939_v39 = vadd.f32 %v11807_v9, %v5890_v17  ;;  %v3211_v45 = vsel %vm633_vm12, %v3093_v7, %v3172_v49  ;;  %v3244_v38 = vunpack.c.l.b16 %v3197_v33  ;;  %v15340_v57 = vld [vmem:[#allocation38_spill] sm:$0xff] }
 0x210   : > { %15327 = vst [vmem:[#allocation111_spill] sm:$0xff] %v12477_v2  ;;  %6327 = vmatmul.bf16.vlgmr.msra.gmra.mxu3 %v12454_v23  ;;  %v5986_v10 = vadd.f32 %v5985_v42, %v5937_v30  ;;  %v12484_v18 = vor.u32 %v9188_v19, %v7872_v50  ;;  %v3243_v34 = vunpack.c.l.b16 %v3211_v45  ;;  %v7795_v24 = vsel %vm7654_vm13, %v2837_v0, %v3211_v45  ;;  %v7764_v54 = vld [vmem:[%s9601_s20 + $0x60] sm:$0xff]  ;;  %v7765_v9 = vld [vmem:[%s9601_s20 + $0x68] sm:$0xff]  ;;  %v9088_v49 = vld [vmem:[%s14656_s1 + $0x650] sm:$0xf] }
 0x211   : > { %v6034_v62 = vpop.f32.mrf.mxu1  ;;  %15328 = vst [vmem:[#allocation112_spill] sm:$0xff] %v12480_v58  ;;  %6516 = vmatpush.bf16.msrb.mxu3 %v8397_v37  ;;  %v3246_v19 = vunpack.c.h.b16 %v3197_v33  ;;  %v2716_v17 = vunpack.c.l.bf16 %v7764_v54  ;;  %v2717_v52 = vunpack.c.h.bf16 %v7764_v54  ;;  %v2718_v4 = vunpack.c.l.bf16 %v7765_v9 }
 0x212   : > { %15329 = vst [vmem:[#allocation113_spill] sm:$0xff] %v12484_v18  ;;  %v6035_v20 = vadd.f32 %v6034_v62, %v5986_v10  ;;  %6180 = vmatmul.bf16.vlgmr.msra.gmra.mxu0 %v12480_v58  ;;  %v3275_v10 = vpack.c.b16 %v3243_v34, %v3067_v3  ;;  %v3276_v62 = vpack.c.b16 %v3244_v38, %v3244_v38  ;;  %v2719_v7 = vunpack.c.h.bf16 %v7765_v9  ;;  %v9298_v3 = vld [vmem:[%s14656_s1 + $0x54] sm:$0xf] }
 0x213   : > { %v5924_v42 = vpop.f32.mrf.mxu2  ;;  %v12490_v12 = vpop.f32.mrf.mxu3  ;;  %3341 = vst [vmem:[#allocation2 + $0x13c] sm:$0xff] %v7795_v24  ;;  %v3278_v48 = vpack.c.b16 %v3246_v19, %v3246_v19  ;;  %v12498_v37 = vmax.f32 %v11922_v26, %v2716_v17  ;;  %v12501_v30 = vmax.f32 %v11925_v21, %v2717_v52  ;;  %vm12503_vm14 = vcmp.gt.f32.partialorder %v2716_v17, -1.0027314e+29  ;;  %v15338_v26 = vld [vmem:[#allocation26_spill] sm:$0xff]  ;;  %v15342_v19 = vld [vmem:[#allocation47_spill] sm:$0xff] }
 0x214   : > { %6229 = vmatmul.bf16.vlgmr.msra.gmra.mxu1 %v12477_v2  ;;  %v12495_v50 = vadd.f32 %v5924_v42, %v5876_v28  ;;  %3339 = vst [vmem:[#allocation2 + $0x104] sm:$0xff] %v3275_v10  ;;  %vm12507_vm15 = vcmp.gt.f32.partialorder %v2717_v52, -1.0027314e+29  ;;  %vm12511_vm0 = vcmp.gt.f32.partialorder %v2718_v4, -1.0027314e+29  ;;  %vm12515_vm1 = vcmp.gt.f32.partialorder %v2719_v7, -1.0027314e+29  ;;  %v9195_v24 = vld [vmem:[#allocation2 + $0x9c] sm:$0xf] }
 0x215   : > { %v15339_v21 = vunpack.c.l.bf16 %v15338_v26  ;;  %v5797_v33 = vadd.f32 %v11885_v53, %v11700_v6  ;;  %3340 = vst [vmem:[#allocation2 + $0x10c] sm:$0xf] %v3276_v62  ;;  %vm2822_vm3 = vmpackc.low %vm12507_vm15, %vm12503_vm14  ;;  %v15341_v38 = vunpack.c.h.bf16 %v15338_v26  ;;  %v7930_v10 = vld [vmem:[#allocation2 + $0xd0] sm:$0xf0] }
 0x216   : > { %3342 = vst [vmem:[#allocation2 + $0x144] sm:$0xf] %v3278_v48  ;;  %vm2823_vm4 = vmpackc.low %vm12515_vm1, %vm12511_vm0  ;;  %v12536_v6 = vsel %vm2822_vm3, %v7764_v54, 0 }
 0x217   : > { %v2234_v45 = vmax.f32 %v15340_v57, %v15339_v21  ;;  %v5987_v42 = vpop.f32.mrf.mxu0  ;;  %v2235_v17 = vmax.f32 %v15342_v19, %v15341_v38  ;;  %v2839_v62 = vsel %vm2823_vm4, %v7765_v9, 0  ;;  %v9194_v57 = vld [vmem:[#allocation2 + $0x94] sm:$0xf]  ;;  %v3072_v48 = vunpack.c.h.b16 %v12536_v6 }
 0x218   : > { %6278 = vmatmul.bf16.vlgmr.msra.gmra.mxu2 %v12484_v18  ;;  %v5988_v52 = vadd.f32 %v5987_v42, %v5939_v39  ;;  %v7922_v39 = vld [vmem:[#allocation2 + $0xc8] sm:$0xf0]  ;;  %v3074_v42 = vunpack.c.h.b16 %v2839_v62  ;;  %v5846_v54 = vadd.f32 %v11916_v5, %v5797_v33  ;;  %v12551_v9 = vor.u32 %v9195_v24, %v7930_v10  ;;  %v9314_v5 = vld [vmem:[%s14656_s1 + $0xd4] sm:$0xf]  ;;  %v9128_v33 = vld [vmem:[%s14656_s1 + $0x6a0] sm:$0xf] }
 0x219   : > { %v6036_v34 = vpop.f32.mrf.mxu1  ;;  %v12538_v53 = vmax.f32 %v2234_v45, %v2718_v4  ;;  %v12540_v0 = vmax.f32 %v2235_v17, %v2719_v7  ;;  %v8322_v7 = vld [vmem:[%s14656_s1 + $0x58] sm:$0xf0]  ;;  %v9491_v45 = vld [vmem:[%s14656_s1 + $0x654] sm:$0xf0]  ;;  %v5942_v19 = vadd.f32 %v11866_v51, %v11872_v43  ;;  %v7920_v17 = vld [vmem:[#allocation2 + $0x90] sm:$0xf] }
 0x21a   : > { %v6037_v28 = vadd.f32 %v6036_v34, %v5988_v52  ;;  %15345 = vst [vmem:[#allocation47_spill] sm:$0xff] %v12551_v9  ;;  %v8325_v34 = vor.u32 %v9298_v3, %v8322_v7  ;;  %v9089_v38 = vor.u32 %v9491_v45, %v9088_v49  ;;  %v5895_v24 = vadd.f32 %v11936_v15, %v5846_v54  ;;  %v9201_v52 = vld [vmem:[#allocation2 + $0xc4] sm:$0xf0]  ;;  %v7928_v7 = vld [vmem:[#allocation2 + $0x98] sm:$0xf] }
 0x21b   : > { %15343 = vst [vmem:[#allocation26_spill] sm:$0xff] %v12538_v53  ;;  %v6083_v21 = vpop.f32.mrf.mxu2  ;;  %v12542_v26 = vpop.f32.mrf.mxu3  ;;  %v12577_v3 = vor.u32 %v9194_v57, %v7922_v39  ;;  %v9202_v49 = vld [vmem:[#allocation2 + $0xcc] sm:$0xf0]  ;;  %v3094_v45 = vpack.c.b16 %v3074_v42, %v3072_v48  ;;  %v12580_v43 = vor.u32 %v9201_v52, %v7920_v17  ;;  %v3071_v48 = vunpack.c.l.b16 %v12536_v6 }
 0x21c   : > { %15344 = vst [vmem:[#allocation38_spill] sm:$0xff] %v12540_v0  ;;  %v12549_v4 = vadd.f32 %v6083_v21, %v6035_v20  ;;  %v8386_v20 = vld [vmem:[%s14656_s1 + $0xd8] sm:$0xf0]  ;;  %v9501_v21 = vld [vmem:[%s14656_s1 + $0x6a4] sm:$0xf0]  ;;  %6468 = vmatpush.bf16.msrb.mxu2 %v8325_v34  ;;  %6370 = vmatpush.bf16.msrb.mxu0 %v9089_v38  ;;  %v5944_v57 = vadd.f32 %v11887_v35, %v5895_v24  ;;  %v3178_v52 = vpop.permute.xlu0 %3177 }
 0x21d   : > { %v8389_v10 = vor.u32 %v9314_v5, %v8386_v20  ;;  %15346 = vst [vmem:[#allocation114_spill] sm:$0xff] %v12577_v3  ;;  %v9129_v0 = vor.u32 %v9501_v21, %v9128_v33  ;;  %v12583_v39 = vor.u32 %v9202_v49, %v7928_v7  ;;  %v7766_v5 = vld [vmem:[%s9601_s20 + $0x78] sm:$0xff]  ;;  %v7767_v20 = vld [vmem:[%s9601_s20 + $0x80] sm:$0xff]  ;;  %v15351_v35 = vld [vmem:[#allocation8_spill] sm:$0xff] }
 0x21e   : > { %15347 = vst [vmem:[#allocation115_spill] sm:$0xff] %v12580_v43  ;;  %v2721_v7 = vunpack.c.h.bf16 %v7766_v5  ;;  %v2722_v49 = vunpack.c.l.bf16 %v7767_v20 }
 0x21f   : > { %v5990_v53 = vpop.f32.mrf.mxu0  ;;  %6517 = vmatpush.bf16.msrb.mxu3 %v8389_v10  ;;  %6422 = vmatpush.bf16.msrb.mxu1 %v9129_v0  ;;  %15348 = vst [vmem:[#allocation116_spill] sm:$0xff] %v12583_v39  ;;  %v3176_v42 = vpop.permute.xlu1 %3175  ;;  %v15349_v0 = vld [vmem:[#allocation33_spill] sm:$0xff]  ;;  %v2720_v10 = vunpack.c.l.bf16 %v7766_v5 }
 0x220   : > { %6332 = vmatmul.bf16.gmra.mxu3 %v12551_v9  ;;  %v5991_v51 = vadd.f32 %v5990_v53, %v5942_v19  ;;  %v3214_v53 = vsel %vm633_vm12, %v3094_v45, %v3176_v42  ;;  %v15350_v33 = vunpack.c.l.bf16 %v15349_v0  ;;  %v3198_v21 = vsel %vm633_vm12, %v3176_v42, %v3178_v52  ;;  %v9209_v52 = vld [vmem:[#allocation2 + $0x10c] sm:$0xf] }
 0x221   : > { %v6039_v15 = vpop.f32.mrf.mxu1  ;;  %v3247_v6 = vunpack.c.l.b16 %v3214_v53  ;;  %v7797_v17 = vsel %vm7654_vm13, %v2839_v62, %v3214_v53  ;;  %v3250_v9 = vunpack.c.h.b16 %v3198_v21  ;;  %v12601_v23 = vmax.f32 %v11986_v41, %v2720_v10 }
 0x222   : > { %v6040_v54 = vadd.f32 %v6039_v15, %v5991_v51  ;;  %6185 = vmatmul.bf16.gmra.mxu0 %v12580_v43  ;;  %v2238_v24 = vmax.f32 %v15351_v35, %v15350_v33  ;;  %3345 = vst [vmem:[#allocation2 + $0x1ac] sm:$0xff] %v7797_v17  ;;  %v2723_v15 = vunpack.c.h.bf16 %v7767_v20  ;;  %v3248_v51 = vunpack.c.l.b16 %v3198_v21  ;;  %v15359_v35 = vld [vmem:[#allocation48_spill] sm:$0xff] }
 0x223   : > { %v6085_v34 = vpop.f32.mrf.mxu2  ;;  %v12588_v38 = vpop.f32.mrf.mxu3  ;;  %v3279_v45 = vpack.c.b16 %v3247_v6, %v3071_v48  ;;  %vm12606_vm5 = vcmp.gt.f32.partialorder %v2720_v10, -1.0027314e+29  ;;  %vm12610_vm6 = vcmp.gt.f32.partialorder %v2721_v7, -1.0027314e+29  ;;  %vm12614_vm7 = vcmp.gt.f32.partialorder %v2722_v49, -1.0027314e+29  ;;  %v7986_v10 = vld [vmem:[#allocation2 + $0x140] sm:$0xf0] }
 0x224   : > { %6234 = vmatmul.bf16.gmra.mxu1 %v12577_v3  ;;  %v12596_v19 = vadd.f32 %v6085_v34, %v6037_v28  ;;  %v12604_v28 = vmax.f32 %v11989_v13, %v2721_v7  ;;  %v3280_v41 = vpack.c.b16 %v3248_v51, %v3248_v51  ;;  %v3282_v13 = vpack.c.b16 %v3250_v9, %v3250_v9  ;;  %vm2824_vm9 = vmpackc.low %vm12610_vm6, %vm12606_vm5 }
 0x225   : > { %3343 = vst [vmem:[#allocation2 + $0x174] sm:$0xff] %v3279_v45  ;;  %vm2803_vm8 = vcmp.gt.f32.partialorder %v2723_v15, -1.0027314e+29  ;;  %v15358_v33 = vunpack.c.h.bf16 %v15349_v0  ;;  %v2840_v21 = vsel %vm2824_vm9, %v7766_v5, 0  ;;  %v12628_v7 = vmax.f32 %v2238_v24, %v2722_v49  ;;  %v8314_v5 = vld [vmem:[%s14656_s1 + $0x48] sm:$0xf0] }
 0x226   : > { %vm2825_vm10 = vmpackc.low %vm2803_vm8, %vm12614_vm7  ;;  %3344 = vst [vmem:[#allocation2 + $0x17c] sm:$0xf] %v3280_v41  ;;  %v3076_v45 = vunpack.c.h.b16 %v2840_v21  ;;  %v9208_v49 = vld [vmem:[#allocation2 + $0x104] sm:$0xf] }
 0x227   : > { %v5992_v48 = vpop.f32.mrf.mxu0  ;;  %v2239_v6 = vmax.f32 %v15359_v35, %v15358_v33  ;;  %15360 = vst [vmem:[#allocation33_spill] sm:$0xff] %v12628_v7  ;;  %v2841_v9 = vsel %vm2825_vm10, %v7767_v20, 0  ;;  %v12642_v20 = vor.u32 %v9209_v52, %v7986_v10  ;;  %v9312_v41 = vld [vmem:[%s14656_s1 + $0xc4] sm:$0xf]  ;;  %v9215_v33 = vld [vmem:[#allocation2 + $0x134] sm:$0xf0] }
 0x228   : > { %6283 = vmatmul.bf16.gmra.mxu2 %v12583_v39  ;;  %v5993_v17 = vadd.f32 %v5992_v48, %v5944_v57  ;;  %3346 = vst [vmem:[#allocation2 + $0x1b4] sm:$0xf] %v3282_v13  ;;  %v3078_v0 = vunpack.c.h.b16 %v2841_v9  ;;  %v9296_v57 = vld [vmem:[%s14656_s1 + $0x44] sm:$0xf]  ;;  %v9080_v48 = vld [vmem:[%s14656_s1 + $0x640] sm:$0xf] }
 0x229   : > { %v6041_v53 = vpop.f32.mrf.mxu1  ;;  %v12630_v51 = vmax.f32 %v2239_v6, %v2723_v15  ;;  %15362 = vst [vmem:[#allocation48_spill] sm:$0xff] %v12642_v20  ;;  %v7978_v15 = vld [vmem:[#allocation2 + $0x138] sm:$0xf0]  ;;  %v8317_v42 = vor.u32 %v9296_v57, %v8314_v5  ;;  %v7976_v13 = vld [vmem:[#allocation2 + $0x100] sm:$0xf] }
 0x22a   : > { %v6042_v34 = vadd.f32 %v6041_v53, %v5993_v17  ;;  %v9489_v53 = vld [vmem:[%s14656_s1 + $0x644] sm:$0xf0]  ;;  %v3095_v35 = vpack.c.b16 %v3078_v0, %v3076_v45  ;;  %v15363_v52 = vld [vmem:[#allocation71_spill] sm:$0xff]  ;;  %v12661_v43 = vor.u32 %v9215_v33, %v7976_v13  ;;  %v3075_v45 = vunpack.c.l.b16 %v2840_v21  ;;  %v3180_v0 = vpop.permute.xlu1 %3179 }
 0x22b   : > { %15361 = vst [vmem:[#allocation8_spill] sm:$0xff] %v12630_v51  ;;  %v6088_v62 = vpop.f32.mrf.mxu2  ;;  %v12632_v39 = vpop.f32.mrf.mxu3  ;;  %6469 = vmatpush.bf16.msrb.mxu2 %v8317_v42  ;;  %v9081_v6 = vor.u32 %v9489_v53, %v9080_v48  ;;  %v5947_v10 = vadd.f32 %v15363_v52, %v11996_v44  ;;  %v7984_v51 = vld [vmem:[#allocation2 + $0x108] sm:$0xf]  ;;  %v9216_v7 = vld [vmem:[#allocation2 + $0x13c] sm:$0xf0] }
 0x22c   : > { %v12640_v24 = vadd.f32 %v6088_v62, %v6040_v54  ;;  %v8378_v54 = vld [vmem:[%s14656_s1 + $0xc8] sm:$0xf0]  ;;  %v12658_v62 = vor.u32 %v9208_v49, %v7978_v15  ;;  %15365 = vst [vmem:[#allocation117_spill] sm:$0xff] %v12661_v43  ;;  %v3217_v15 = vsel %vm633_vm12, %v3095_v35, %v3180_v0  ;;  %v12671_v21 = vor.u32 %v9216_v7, %v7984_v51 }
 0x22d   : > { %v8381_v17 = vor.u32 %v9312_v41, %v8378_v54  ;;  %6371 = vmatpush.bf16.msrb.mxu0 %v9081_v6  ;;  %v15366_v44 = vld [vmem:[#allocation76_spill] sm:$0xff]  ;;  %v3251_v13 = vunpack.c.l.b16 %v3217_v15  ;;  %v7799_v33 = vsel %vm7654_vm13, %v2841_v9, %v3217_v15  ;;  %v7768_v6 = vld [vmem:[%s9601_s20 + $0x90] sm:$0xff] }
 0x22e   : > { %15364 = vst [vmem:[#allocation71_spill] sm:$0xff] %v12658_v62  ;;  %v5949_v49 = vadd.f32 %v15366_v44, %v12031_v46 }
 0x22f   : > { %v5995_v57 = vpop.f32.mrf.mxu0  ;;  %6518 = vmatpush.bf16.msrb.mxu3 %v8381_v17  ;;  %15367 = vst [vmem:[#allocation76_spill] sm:$0xff] %v12671_v21  ;;  %v7769_v17 = vld [vmem:[%s9601_s20 + $0x98] sm:$0xff] }
 0x230   : > { %6337 = vmatmul.bf16.gmra.mxu3 %v12642_v20  ;;  %v5996_v18 = vadd.f32 %v5995_v57, %v5947_v10  ;;  %v3182_v42 = vpop.permute.xlu0 %3181  ;;  %3349 = vst [vmem:[#allocation2 + $0x21c] sm:$0xff] %v7799_v33  ;;  %v3283_v10 = vpack.c.b16 %v3251_v13, %v3075_v45  ;;  %v2725_v57 = vunpack.c.h.bf16 %v7768_v6  ;;  %v15376_v13 = vld [vmem:[#allocation46_spill] sm:$0xff]  ;;  %v9072_v45 = vld [vmem:[%s14656_s1 + $0x630] sm:$0xf] }
 0x231   : > { %v6044_v5 = vpop.f32.mrf.mxu1  ;;  %v3199_v48 = vsel %vm633_vm12, %v3180_v0, %v3182_v42  ;;  %v2727_v0 = vunpack.c.h.bf16 %v7769_v17 }
 0x232   : > { %v6045_v53 = vadd.f32 %v6044_v5, %v5996_v18  ;;  %6190 = vmatmul.bf16.gmra.mxu0 %v12661_v43  ;;  %v3252_v35 = vunpack.c.l.b16 %v3199_v48  ;;  %v3254_v52 = vunpack.c.h.b16 %v3199_v48  ;;  %v2724_v18 = vunpack.c.l.bf16 %v7768_v6  ;;  %3347 = vst [vmem:[#allocation2 + $0x1e4] sm:$0xff] %v3283_v10  ;;  %v9223_v48 = vld [vmem:[#allocation2 + $0x17c] sm:$0xf] }
 0x233   : > { %v6090_v41 = vpop.f32.mrf.mxu2  ;;  %v12669_v54 = vpop.f32.mrf.mxu3  ;;  %v2726_v5 = vunpack.c.l.bf16 %v7769_v17  ;;  %v12686_v9 = vmax.f32 %v12055_v8, %v2725_v57  ;;  %vm12688_vm14 = vcmp.gt.f32.partialorder %v2725_v57, -1.0027314e+29  ;;  %vm2807_vm0 = vcmp.gt.f32.partialorder %v2727_v0, -1.0027314e+29  ;;  %v15374_v8 = vld [vmem:[#allocation29_spill] sm:$0xff] }
 0x234   : > { %6239 = vmatmul.bf16.gmra.mxu1 %v12658_v62  ;;  %v12676_v46 = vadd.f32 %v6090_v41, %v6042_v34  ;;  %v3284_v42 = vpack.c.b16 %v3252_v35, %v3252_v35  ;;  %v3286_v44 = vpack.c.b16 %v3254_v52, %v3254_v52  ;;  %v12679_v7 = vmax.f32 %v12052_v56, %v2724_v18  ;;  %v15378_v52 = vld [vmem:[#allocation27_spill] sm:$0xff]  ;;  %v8042_v57 = vld [vmem:[#allocation2 + $0x1b0] sm:$0xf0] }
 0x235   : > { %vm12681_vm11 = vcmp.gt.f32.partialorder %v2724_v18, -1.0027314e+29  ;;  %vm12692_vm15 = vcmp.gt.f32.partialorder %v2726_v5, -1.0027314e+29  ;;  %v15375_v41 = vunpack.c.l.bf16 %v15374_v8  ;;  %v15377_v35 = vunpack.c.h.bf16 %v15374_v8  ;;  %v9222_v8 = vld [vmem:[#allocation2 + $0x174] sm:$0xf] }
 0x236   : > { %3348 = vst [vmem:[#allocation2 + $0x1ec] sm:$0xf] %v3284_v42  ;;  %vm2826_vm1 = vmpackc.low %vm12688_vm14, %vm12681_vm11 }
 0x237   : > { %v5997_v15 = vpop.f32.mrf.mxu0  ;;  %v2242_v33 = vmax.f32 %v15376_v13, %v15375_v41  ;;  %v2243_v18 = vmax.f32 %v15378_v52, %v15377_v35  ;;  %3350 = vst [vmem:[#allocation2 + $0x224] sm:$0xf] %v3286_v44  ;;  %vm2827_vm3 = vmpackc.low %vm2807_vm0, %vm12692_vm15  ;;  %v12709_v42 = vsel %vm2826_vm1, %v7768_v6, 0  ;;  %v8034_v13 = vld [vmem:[#allocation2 + $0x1a8] sm:$0xf0] }
 0x238   : > { %6288 = vmatmul.bf16.gmra.mxu2 %v12671_v21  ;;  %v5998_v10 = vadd.f32 %v5997_v15, %v5949_v49  ;;  %v2843_v51 = vsel %vm2827_vm3, %v7769_v17, 0  ;;  %v3080_v34 = vunpack.c.h.b16 %v12709_v42  ;;  %v9294_v44 = vld [vmem:[%s14656_s1 + $0x34] sm:$0xf]  ;;  %v12723_v17 = vor.u32 %v9223_v48, %v8042_v57  ;;  %v9120_v48 = vld [vmem:[%s14656_s1 + $0x690] sm:$0xf] }
 0x239   : > { %v6046_v56 = vpop.f32.mrf.mxu1  ;;  %v12712_v20 = vmax.f32 %v2242_v33, %v2726_v5  ;;  %v3082_v35 = vunpack.c.h.b16 %v2843_v51  ;;  %v12716_v49 = vmax.f32 %v2243_v18, %v2727_v0  ;;  %v8306_v5 = vld [vmem:[%s14656_s1 + $0x38] sm:$0xf0]  ;;  %v9487_v0 = vld [vmem:[%s14656_s1 + $0x634] sm:$0xf0]  ;;  %v8032_v33 = vld [vmem:[#allocation2 + $0x170] sm:$0xf] }
 0x23a   : > { %v6047_v21 = vadd.f32 %v6046_v56, %v5998_v10  ;;  %15381 = vst [vmem:[#allocation27_spill] sm:$0xff] %v12723_v17  ;;  %v8309_v15 = vor.u32 %v9294_v44, %v8306_v5  ;;  %v9073_v56 = vor.u32 %v9487_v0, %v9072_v45  ;;  %v9229_v52 = vld [vmem:[#allocation2 + $0x1a4] sm:$0xf0]  ;;  %v9499_v57 = vld [vmem:[%s14656_s1 + $0x694] sm:$0xf0]  ;;  %v5952_v44 = vadd.f32 %v12033_v59, %v12072_v61 }
 0x23b   : > { %15379 = vst [vmem:[#allocation29_spill] sm:$0xff] %v12712_v20  ;;  %v6093_v43 = vpop.f32.mrf.mxu2  ;;  %v12714_v41 = vpop.f32.mrf.mxu3  ;;  %v3096_v18 = vpack.c.b16 %v3082_v35, %v3080_v34  ;;  %v12748_v5 = vor.u32 %v9222_v8, %v8034_v13  ;;  %v8040_v45 = vld [vmem:[#allocation2 + $0x178] sm:$0xf]  ;;  %v9230_v0 = vld [vmem:[#allocation2 + $0x1ac] sm:$0xf0]  ;;  %v12751_v35 = vor.u32 %v9229_v52, %v8032_v33  ;;  %v5954_v59 = vadd.f32 %v12067_v60, %v12118_v22  ;;  %v7770_v33 = vld [vmem:[%s9601_s20 + $0xa8] sm:$0xff] }
 0x23c   : > { %15380 = vst [vmem:[#allocation46_spill] sm:$0xff] %v12716_v49  ;;  %v12721_v6 = vadd.f32 %v6093_v43, %v6045_v53  ;;  %v9310_v43 = vld [vmem:[%s14656_s1 + $0xb4] sm:$0xf]  ;;  %v8370_v53 = vld [vmem:[%s14656_s1 + $0xb8] sm:$0xf0]  ;;  %6470 = vmatpush.bf16.msrb.mxu2 %v8309_v15  ;;  %6372 = vmatpush.bf16.msrb.mxu0 %v9073_v56  ;;  %v9121_v49 = vor.u32 %v9499_v57, %v9120_v48  ;;  %vm3772_vm3 = vcmask 523268  }
 0x23d   : > { %v8373_v10 = vor.u32 %v9310_v43, %v8370_v53  ;;  %15382 = vst [vmem:[#allocation118_spill] sm:$0xff] %v12748_v5  ;;  %v3079_v43 = vunpack.c.l.b16 %v12709_v42  ;;  %v3184_v53 = vpop.permute.xlu1 %3183  ;;  %v12756_v61 = vor.u32 %v9230_v0, %v8040_v45  ;;  %v7771_v60 = vld [vmem:[%s9601_s20 + $0xb0] sm:$0xff] }
 0x23e   : > { %15383 = vst [vmem:[#allocation119_spill] sm:$0xff] %v12751_v35  ;;  %v3186_v3 = vpop.permute.xlu0 %3185  ;;  %6423 = vmatpush.bf16.msrb.mxu1 %v9121_v49  ;;  %v3220_v8 = vsel %vm633_vm12, %v3096_v18, %v3184_v53  ;;  %v2728_v18 = vunpack.c.l.bf16 %v7770_v33  ;;  %v2730_v57 = vunpack.c.l.bf16 %v7771_v60 }
 0x23f   : > { %v6000_v20 = vpop.f32.mrf.mxu0  ;;  %6519 = vmatpush.bf16.msrb.mxu3 %v8373_v10  ;;  %15384 = vst [vmem:[#allocation120_spill] sm:$0xff] %v12756_v61  ;;  %v3200_v13 = vsel %vm633_vm12, %v3184_v53, %v3186_v3  ;;  %v3255_v56 = vunpack.c.l.b16 %v3220_v8  ;;  %v7801_v49 = vsel %vm7654_vm13, %v2843_v51, %v3220_v8  ;;  %v2729_v3 = vunpack.c.h.bf16 %v7770_v33  ;;  %v15395_v8 = vld [vmem:[#allocation35_spill] sm:$0xff] }
 0x240   : > { %6342 = vmatmul.bf16.gmra.mxu3 %v12723_v17  ;;  %v6001_v34 = vadd.f32 %v6000_v20, %v5952_v44  ;;  %v3256_v48 = vunpack.c.l.b16 %v3200_v13  ;;  %3353 = vst [vmem:[#allocation2 + $0x28c] sm:$0xff] %v7801_v49  ;;  %v3258_v52 = vunpack.c.h.b16 %v3200_v13  ;;  %v2731_v44 = vunpack.c.h.bf16 %v7771_v60  ;;  %v9237_v49 = vld [vmem:[#allocation2 + $0x1ec] sm:$0xf] }
 0x241   : > { %v6049_v62 = vpop.f32.mrf.mxu1  ;;  %v12770_v0 = vmax.f32 %v12125_v32, %v2728_v18  ;;  %vm12775_vm4 = vcmp.gt.f32.partialorder %v2728_v18, -1.0027314e+29  ;;  %vm12779_vm5 = vcmp.gt.f32.partialorder %v2729_v3, -1.0027314e+29  ;;  %vm12783_vm6 = vcmp.gt.f32.partialorder %v2730_v57, -1.0027314e+29  ;;  %v15393_v32 = vld [vmem:[#allocation40_spill] sm:$0xff] }
 0x242   : > { %v6050_v20 = vadd.f32 %v6049_v62, %v6001_v34  ;;  %6195 = vmatmul.bf16.gmra.mxu0 %v12751_v35  ;;  %v3287_v62 = vpack.c.b16 %v3255_v56, %v3079_v43  ;;  %v3288_v10 = vpack.c.b16 %v3256_v48, %v3256_v48  ;;  %v3290_v45 = vpack.c.b16 %v3258_v52, %v3258_v52  ;;  %vm2828_vm8 = vmpackc.low %vm12779_vm5, %vm12775_vm4  ;;  %v15397_v52 = vld [vmem:[#allocation57_spill] sm:$0xff] }
 0x243   : > { %v6095_v42 = vpop.f32.mrf.mxu2  ;;  %v12762_v15 = vpop.f32.mrf.mxu3  ;;  %v12773_v34 = vmax.f32 %v12128_v40, %v2729_v3  ;;  %vm12787_vm7 = vcmp.gt.f32.partialorder %v2731_v44, -1.0027314e+29  ;;  %v15394_v40 = vunpack.c.l.bf16 %v15393_v32  ;;  %v15396_v48 = vunpack.c.h.bf16 %v15393_v32 }
 0x244   : > { %6244 = vmatmul.bf16.gmra.mxu1 %v12748_v5  ;;  %v12767_v22 = vadd.f32 %v6095_v42, %v6047_v21  ;;  %3351 = vst [vmem:[#allocation2 + $0x254] sm:$0xff] %v3287_v62  ;;  %v8098_v62 = vld [vmem:[#allocation2 + $0x220] sm:$0xf0]  ;;  %vm2829_vm9 = vmpackc.low %vm12787_vm7, %vm12783_vm6 }
 0x245   : > { %v2246_v13 = vmax.f32 %v15395_v8, %v15394_v40  ;;  %3352 = vst [vmem:[#allocation2 + $0x25c] sm:$0xf] %v3288_v10  ;;  %v2247_v18 = vmax.f32 %v15397_v52, %v15396_v48  ;;  %v2844_v40 = vsel %vm2828_vm8, %v7770_v33, 0  ;;  %v2845_v10 = vsel %vm2829_vm9, %v7771_v60, 0  ;;  %v9236_v48 = vld [vmem:[#allocation2 + $0x1e4] sm:$0xf]  ;;  %vm13043_vm6 = vmor %vm3772_vm3, %vm7654_vm13 }
 0x246   : > { %3354 = vst [vmem:[#allocation2 + $0x294] sm:$0xf] %v3290_v45  ;;  %v3084_v51 = vunpack.c.h.b16 %v2844_v40  ;;  %v9292_v45 = vld [vmem:[%s14656_s1 + $0x24] sm:$0xf]  ;;  %v12817_v33 = vor.u32 %v9237_v49, %v8098_v62  ;;  %v8298_v60 = vld [vmem:[%s14656_s1 + $0x28] sm:$0xf0]  ;;  %v3083_v35 = vunpack.c.l.b16 %v2844_v40 }
 0x247   : > { %v6002_v42 = vpop.f32.mrf.mxu0  ;;  %v12806_v8 = vmax.f32 %v2246_v13, %v2730_v57  ;;  %v12808_v17 = vmax.f32 %v2247_v18, %v2731_v44  ;;  %v9064_v57 = vld [vmem:[%s14656_s1 + $0x620] sm:$0xf]  ;;  %v9485_v44 = vld [vmem:[%s14656_s1 + $0x624] sm:$0xf0]  ;;  %v8301_v53 = vor.u32 %v9292_v45, %v8298_v60  ;;  %v9243_v49 = vld [vmem:[#allocation2 + $0x214] sm:$0xf0] }
 0x248   : > { %6293 = vmatmul.bf16.gmra.mxu2 %v12756_v61  ;;  %v6003_v3 = vadd.f32 %v6002_v42, %v5954_v59  ;;  %v8090_v59 = vld [vmem:[#allocation2 + $0x218] sm:$0xf0]  ;;  %v3086_v42 = vunpack.c.h.b16 %v2845_v10  ;;  %15400 = vst [vmem:[#allocation57_spill] sm:$0xff] %v12817_v33  ;;  %v9065_v13 = vor.u32 %v9485_v44, %v9064_v57  ;;  %v9244_v45 = vld [vmem:[#allocation2 + $0x21c] sm:$0xf0] }
 0x249   : > { %v6051_v56 = vpop.f32.mrf.mxu1  ;;  %15398 = vst [vmem:[#allocation40_spill] sm:$0xff] %v12806_v8  ;;  %v12836_v62 = vor.u32 %v9236_v48, %v8090_v59  ;;  %6471 = vmatpush.bf16.msrb.mxu2 %v8301_v53 }
 0x24a   : > { %15399 = vst [vmem:[#allocation35_spill] sm:$0xff] %v12808_v17  ;;  %v6052_v21 = vadd.f32 %v6051_v56, %v6003_v3  ;;  %v8088_v56 = vld [vmem:[#allocation2 + $0x1e0] sm:$0xf]  ;;  %v3097_v52 = vpack.c.b16 %v3086_v42, %v3084_v51  ;;  %v5957_v3 = vadd.f32 %v12110_v36, %v12144_v47  ;;  %v8096_v17 = vld [vmem:[#allocation2 + $0x1e8] sm:$0xf]  ;;  %6373 = vmatpush.bf16.msrb.mxu0 %v9065_v13 }
 0x24b   : > { %v6098_v61 = vpop.f32.mrf.mxu2  ;;  %v12810_v32 = vpop.f32.mrf.mxu3  ;;  %15401 = vst [vmem:[#allocation121_spill] sm:$0xff] %v12836_v62  ;;  %v12839_v8 = vor.u32 %v9243_v49, %v8088_v56  ;;  %v15403_v47 = vld [vmem:[#allocation87_spill] sm:$0xff]  ;;  %v12843_v48 = vor.u32 %v9244_v45, %v8096_v17 }
 0x24c   : > { %v12815_v43 = vadd.f32 %v6098_v61, %v6050_v20  ;;  %v9308_v61 = vld [vmem:[%s14656_s1 + $0xa4] sm:$0xf]  ;;  %v8362_v20 = vld [vmem:[%s14656_s1 + $0xa8] sm:$0xf0]  ;;  %v5959_v36 = vadd.f32 %v15403_v47, %v12195_v55 }
 0x24d   : > { %v8365_v18 = vor.u32 %v9308_v61, %v8362_v20  ;;  %15402 = vst [vmem:[#allocation122_spill] sm:$0xff] %v12839_v8  ;;  %v7773_v55 = vld [vmem:[%s9601_s20 + $0xc8] sm:$0xff] }
 0x24e   : > { %v3188_v51 = vpop.permute.xlu1 %3187  ;;  %v3190_v42 = vpop.permute.xlu0 %3189  ;;  %15404 = vst [vmem:[#allocation87_spill] sm:$0xff] %v12843_v48 }
 0x24f   : > { %v6005_v60 = vpop.f32.mrf.mxu0  ;;  %6520 = vmatpush.bf16.msrb.mxu3 %v8365_v18  ;;  %v3223_v59 = vsel %vm633_vm12, %v3097_v52, %v3188_v51  ;;  %v3201_v53 = vsel %vm633_vm12, %v3188_v51, %v3190_v42  ;;  %v7772_v18 = vld [vmem:[%s9601_s20 + $0xc0] sm:$0xff]  ;;  %v2735_v51 = vunpack.c.h.bf16 %v7773_v55 }
 0x250   : > { %6347 = vmatmul.bf16.gmra.mxu3 %v12817_v33  ;;  %v6006_v44 = vadd.f32 %v6005_v60, %v5957_v3  ;;  %v3259_v20 = vunpack.c.l.b16 %v3223_v59  ;;  %v7803_v56 = vsel %vm7654_vm13, %v2845_v10, %v3223_v59  ;;  %v3260_v49 = vunpack.c.l.b16 %v3201_v53  ;;  %v15405_v33 = vld [vmem:[#allocation22_spill] sm:$0xff] }
 0x251   : > { %v6054_v57 = vpop.f32.mrf.mxu1  ;;  %3357 = vst [vmem:[#allocation2 + $0x2fc] sm:$0xff] %v7803_v56  ;;  %v3262_v52 = vunpack.c.h.b16 %v3201_v53  ;;  %v2732_v3 = vunpack.c.l.bf16 %v7772_v18  ;;  %v2733_v45 = vunpack.c.h.bf16 %v7772_v18  ;;  %vm12874_vm15 = vcmp.gt.f32.partialorder %v2735_v51, -1.0027314e+29  ;;  %v15416_v53 = vld [vmem:[#allocation31_spill] sm:$0xff] }
 0x252   : > { %v6055_v13 = vadd.f32 %v6054_v57, %v6006_v44  ;;  %6200 = vmatmul.bf16.gmra.mxu0 %v12839_v8  ;;  %v3291_v60 = vpack.c.b16 %v3259_v20, %v3083_v35  ;;  %v3292_v57 = vpack.c.b16 %v3260_v49, %v3260_v49  ;;  %v2734_v44 = vunpack.c.l.bf16 %v7773_v55  ;;  %v9251_v49 = vld [vmem:[#allocation2 + $0x25c] sm:$0xf] }
 0x253   : > { %v6100_v40 = vpop.f32.mrf.mxu2  ;;  %v12849_v61 = vpop.f32.mrf.mxu3  ;;  %v3294_v42 = vpack.c.b16 %v3262_v52, %v3262_v52  ;;  %v12857_v47 = vmax.f32 %v12201_v16, %v2732_v3  ;;  %v12860_v8 = vmax.f32 %v15405_v33, %v2733_v45  ;;  %vm12862_vm10 = vcmp.gt.f32.partialorder %v2732_v3, -1.0027314e+29  ;;  %v15414_v16 = vld [vmem:[#allocation51_spill] sm:$0xff] }
 0x254   : > { %6249 = vmatmul.bf16.gmra.mxu1 %v12836_v62  ;;  %v12854_v17 = vadd.f32 %v6100_v40, %v6052_v21  ;;  %3355 = vst [vmem:[#allocation2 + $0x2c4] sm:$0xff] %v3291_v60  ;;  %vm12866_vm11 = vcmp.gt.f32.partialorder %v2733_v45, -1.0027314e+29  ;;  %vm12870_vm14 = vcmp.gt.f32.partialorder %v2734_v44, -1.0027314e+29  ;;  %v15415_v33 = vunpack.c.l.bf16 %v15414_v16  ;;  %v15418_v3 = vld [vmem:[#allocation15_spill] sm:$0xff]  ;;  %v8154_v62 = vld [vmem:[#allocation2 + $0x290] sm:$0xf0] }
 0x255   : > { %3356 = vst [vmem:[#allocation2 + $0x2cc] sm:$0xf] %v3292_v57  ;;  %vm2830_vm0 = vmpackc.low %vm12866_vm11, %vm12862_vm10  ;;  %v15417_v52 = vunpack.c.h.bf16 %v15414_v16 }
 0x256   : > { %v2250_v40 = vmax.f32 %v15416_v53, %v15415_v33  ;;  %3358 = vst [vmem:[#allocation2 + $0x304] sm:$0xf] %v3294_v42  ;;  %vm2831_vm1 = vmpackc.low %vm12874_vm15, %vm12870_vm14  ;;  %v2846_v33 = vsel %vm2830_vm0, %v7772_v18, 0  ;;  %v9290_v42 = vld [vmem:[%s14656_s1 + $0x14] sm:$0xf]  ;;  %v12904_v18 = vor.u32 %v9251_v49, %v8154_v62 }
 0x257   : > { %v6007_v20 = vpop.f32.mrf.mxu0  ;;  %v2251_v45 = vmax.f32 %v15418_v3, %v15417_v52  ;;  %v2847_v57 = vsel %vm2831_vm1, %v7773_v55, 0  ;;  %v3088_v10 = vunpack.c.h.b16 %v2846_v33  ;;  %v9250_v52 = vld [vmem:[#allocation2 + $0x254] sm:$0xf]  ;;  %v8290_v55 = vld [vmem:[%s14656_s1 + $0x18] sm:$0xf0] }
 0x258   : > { %6298 = vmatmul.bf16.gmra.mxu2 %v12843_v48  ;;  %v6008_v60 = vadd.f32 %v6007_v20, %v5959_v36  ;;  %v12893_v53 = vmax.f32 %v2250_v40, %v2734_v44  ;;  %v8146_v36 = vld [vmem:[#allocation2 + $0x288] sm:$0xf0]  ;;  %v3090_v20 = vunpack.c.h.b16 %v2847_v57  ;;  %15421 = vst [vmem:[#allocation31_spill] sm:$0xff] %v12904_v18  ;;  %v9056_v44 = vld [vmem:[%s14656_s1 + $0x610] sm:$0xf]  ;;  %v8293_v59 = vor.u32 %v9290_v42, %v8290_v55 }
 0x259   : > { %v6056_v56 = vpop.f32.mrf.mxu1  ;;  %v12895_v48 = vmax.f32 %v2251_v45, %v2735_v51  ;;  %v9483_v51 = vld [vmem:[%s14656_s1 + $0x614] sm:$0xf0]  ;;  %v8354_v62 = vld [vmem:[%s14656_s1 + $0x98] sm:$0xf0]  ;;  %v9257_v49 = vld [vmem:[#allocation2 + $0x284] sm:$0xf0] }
 0x25a   : > { %15419 = vst [vmem:[#allocation22_spill] sm:$0xff] %v12893_v53  ;;  %v6057_v21 = vadd.f32 %v6056_v56, %v6008_v60  ;;  %v9057_v40 = vor.u32 %v9483_v51, %v9056_v44  ;;  %v8144_v56 = vld [vmem:[#allocation2 + $0x250] sm:$0xf]  ;;  %v3098_v3 = vpack.c.b16 %v3090_v20, %v3088_v10  ;;  %v9497_v60 = vld [vmem:[%s14656_s1 + $0x684] sm:$0xf0]  ;;  %v12929_v44 = vor.u32 %v9250_v52, %v8146_v36 }
 0x25b   : > { %15420 = vst [vmem:[#allocation51_spill] sm:$0xff] %v12895_v48  ;;  %v6103_v5 = vpop.f32.mrf.mxu2  ;;  %v12897_v16 = vpop.f32.mrf.mxu3  ;;  %v15422_v42 = vld [vmem:[#allocation93_spill] sm:$0xff]  ;;  %6472 = vmatpush.bf16.msrb.mxu2 %v8293_v59  ;;  %v12932_v2 = vor.u32 %v9257_v49, %v8144_v56  ;;  %v3087_v10 = vunpack.c.l.b16 %v2846_v33 }
 0x25c   : > { %v12902_v35 = vadd.f32 %v6103_v5, %v6055_v13  ;;  %v9306_v5 = vld [vmem:[%s14656_s1 + $0x94] sm:$0xf]  ;;  %v9112_v13 = vld [vmem:[%s14656_s1 + $0x680] sm:$0xf]  ;;  %v5962_v55 = vadd.f32 %v15422_v42, %v12256_v63  ;;  %15423 = vst [vmem:[#allocation15_spill] sm:$0xff] %v12929_v44  ;;  %6374 = vmatpush.bf16.msrb.mxu0 %v9057_v40  ;;  %v5964_v42 = vadd.f32 %v12250_v31, %v12316_v11 }
 0x25d   : > { %v8357_v45 = vor.u32 %v9306_v5, %v8354_v62  ;;  %v9113_v51 = vor.u32 %v9497_v60, %v9112_v13  ;;  %15424 = vst [vmem:[#allocation93_spill] sm:$0xff] %v12932_v2  ;;  %v9258_v40 = vld [vmem:[#allocation2 + $0x28c] sm:$0xf0]  ;;  %v9288_v31 = vld [vmem:[%s14656_s1 + $0x4] sm:$0xf] }
 0x25f   : > { %v6010_v48 = vpop.f32.mrf.mxu0  ;;  %v3192_v20 = vpop.permute.xlu1 %3191  ;;  %6521 = vmatpush.bf16.msrb.mxu3 %v8357_v45  ;;  %6424 = vmatpush.bf16.msrb.mxu1 %v9113_v51 }
 0x260   : > { %6352 = vmatmul.bf16.gmra.mxu3 %v12904_v18  ;;  %v6011_v58 = vadd.f32 %v6010_v48, %v5962_v55  ;;  %v3194_v5 = vpop.permute.xlu0 %3193  ;;  %v3226_v62 = vsel %vm633_vm12, %v3098_v3, %v3192_v20  ;;  %v8152_v48 = vld [vmem:[#allocation2 + $0x258] sm:$0xf] }
 0x261   : > { %v6059_v53 = vpop.f32.mrf.mxu1  ;;  %v3202_v63 = vsel %vm633_vm12, %v3192_v20, %v3194_v5  ;;  %v3263_v13 = vunpack.c.l.b16 %v3226_v62  ;;  %v7805_v33 = vsel %vm7654_vm13, %v2847_v57, %v3226_v62  ;;  %v9265_v20 = vld [vmem:[#allocation2 + $0x2cc] sm:$0xf] }
 0x262   : > { %v6060_v52 = vadd.f32 %v6059_v53, %v6011_v58  ;;  %6205 = vmatmul.bf16.gmra.mxu0 %v12932_v2  ;;  %v3264_v56 = vunpack.c.l.b16 %v3202_v63  ;;  %3361 = vst [vmem:[#allocation2 + $0x36c] sm:$0xff] %v7805_v33  ;;  %v3266_v3 = vunpack.c.h.b16 %v3202_v63  ;;  %v12943_v58 = vor.u32 %v9258_v40, %v8152_v48  ;;  %v9264_v63 = vld [vmem:[#allocation2 + $0x2c4] sm:$0xf]  ;;  %v8282_v40 = vld [vmem:[%s14656_s1 + $0x8] sm:$0xf0] }
 0x263   : > { %v6105_v36 = vpop.f32.mrf.mxu2  ;;  %v12938_v59 = vpop.f32.mrf.mxu3  ;;  %v3295_v45 = vpack.c.b16 %v3263_v13, %v3087_v10  ;;  %v9048_v13 = vld [vmem:[%s14656_s1 + $0x600] sm:$0xf]  ;;  %v9481_v33 = vld [vmem:[%s14656_s1 + $0x604] sm:$0xf0] }
 0x264   : > { %6254 = vmatmul.bf16.gmra.mxu1 %v12929_v44  ;;  %v12941_v49 = vadd.f32 %v6105_v36, %v6057_v21  ;;  %v3296_v60 = vpack.c.b16 %v3264_v56, %v3264_v56  ;;  %15425 = vst [vmem:[#allocation123_spill] sm:$0xff] %v12943_v58  ;;  %v3298_v53 = vpack.c.b16 %v3266_v3, %v3266_v3  ;;  %v8210_v21 = vld [vmem:[#allocation2 + $0x300] sm:$0xf0]  ;;  %v8202_v36 = vld [vmem:[#allocation2 + $0x2f8] sm:$0xf0] }
 0x265   : > { %3359 = vst [vmem:[#allocation2 + $0x334] sm:$0xff] %v3295_v45  ;;  %v12955_v48 = vor.u32 %v9265_v20, %v8210_v21  ;;  %v8285_v56 = vor.u32 %v9288_v31, %v8282_v40  ;;  %v9049_v3 = vor.u32 %v9481_v33, %v9048_v13  ;;  %v8346_v45 = vld [vmem:[%s14656_s1 + $0x88] sm:$0xf0]  ;;  %v8208_v31 = vld [vmem:[#allocation2 + $0x2c8] sm:$0xf] }
 0x266   : > { %3360 = vst [vmem:[#allocation2 + $0x33c] sm:$0xf] %v3296_v60  ;;  %v8200_v60 = vld [vmem:[#allocation2 + $0x2c0] sm:$0xf]  ;;  %v7808_v33 = vld [vmem:[%s9601_s20 + $0x28] sm:$0x11] }
 0x267   : > { %v6012_v55 = vpop.f32.mrf.mxu0  ;;  %3362 = vst [vmem:[#allocation2 + $0x374] sm:$0xf] %v3298_v53  ;;  %v9271_v53 = vld [vmem:[#allocation2 + $0x2f4] sm:$0xf0]  ;;  %6473 = vmatpush.bf16.msrb.mxu2 %v8285_v56  ;;  %6375 = vmatpush.bf16.msrb.mxu0 %v9049_v3  ;;  %v9272_v40 = vld [vmem:[#allocation2 + $0x2fc] sm:$0xf0] }
 0x268   : > { %6303 = vmatmul.bf16.gmra.mxu2 %v12943_v58  ;;  %v6013_v57 = vadd.f32 %v6012_v55, %v5964_v42  ;;  %15426 = vst [vmem:[#allocation124_spill] sm:$0xff] %v12955_v48  ;;  %v5967_v55 = vadd.f32 %v12306_v14, %v12369_v29 }
 0x269   : > { %v6061_v51 = vpop.f32.mrf.mxu1 }
 0x26a   : > { %v6062_v5 = vadd.f32 %v6061_v51, %v6013_v57  ;;  %v12974_v51 = vor.u32 %v9264_v63, %v8202_v36  ;;  %v7806_v63 = vld [vmem:[%s9601_s20 + $0x18] sm:$0xff]  ;;  %v7807_v36 = vld [vmem:[%s9601_s20 + $0x20] sm:$0xff] }
 0x26b   : > { %v6108_v62 = vpop.f32.mrf.mxu2  ;;  %v12948_v10 = vpop.f32.mrf.mxu3  ;;  %v3388_v3 = vshrl.u32 %v7806_v63, 16 }
 0x26c   : > { %v12953_v11 = vadd.f32 %v6108_v62, %v6060_v52  ;;  %v9304_v52 = vld [vmem:[%s14656_s1 + $0x84] sm:$0xf]  ;;  %15427 = vst [vmem:[#allocation125_spill] sm:$0xff] %v12974_v51  ;;  %v12977_v62 = vor.u32 %v9271_v53, %v8200_v60  ;;  %v3401_v60 = vshrl.u32 %v7807_v36, 16  ;;  %v3407_v53 = vshll.u32 %v7808_v33, 16 }
 0x26d   : > { %v8349_v42 = vor.u32 %v9304_v52, %v8346_v45  ;;  %v3391_v52 = vshll.u32 %v7806_v63, 16  ;;  %v3397_v45 = vshll.u32 %v7807_v36, 16 }
 0x26e   : > { %15428 = vst [vmem:[#allocation126_spill] sm:$0xff] %v12977_v62  ;;  %v8266_v36 = vld [vmem:[#allocation2 + $0x370] sm:$0xf0] }
 0x26f   : > { %v6015_v57 = vpop.f32.mrf.mxu0  ;;  %6522 = vmatpush.bf16.msrb.mxu3 %v8349_v42  ;;  %v12988_v42 = vor.u32 %v9272_v40, %v8208_v31  ;;  %v3409_v31 = vrot.slane %v3407_v53, 5  ;;  %v15430_v40 = vld [vmem:[#allocation106_spill] sm:$0xff] }
 0x270   : > { %6357 = vmatmul.bf16.gmra.mxu3 %v12955_v48  ;;  %v6016_v21 = vadd.f32 %v6015_v57, %v5967_v55  ;;  %v3390_v55 = vrot.slane %v3388_v3, 4  ;;  %v3393_v57 = vrot.slane %v3391_v52, 5  ;;  %v3403_v48 = vrot.slane %v3401_v60, 4 }
 0x271   : > { %v6064_v20 = vpop.f32.mrf.mxu1  ;;  %15429 = vst [vmem:[#allocation127_spill] sm:$0xff] %v12988_v42  ;;  %v5972_v3 = vadd.f32 %v15430_v40, %v12452_v1  ;;  %v9285_v40 = vld [vmem:[#allocation2 + $0x364] sm:$0xf0] }
 0x272   : > { %v6065_v13 = vadd.f32 %v6064_v20, %v6016_v21  ;;  %6210 = vmatmul.bf16.gmra.mxu0 %v12977_v62  ;;  %v3399_v20 = vrot.slane %v3397_v45, 5  ;;  %v5969_v21 = vadd.f32 %v12358_v27, %v12404_v25  ;;  %v3394_v62 = vor.u32 %v3393_v57, %v3390_v55  ;;  %v9334_v57 = vld [vmem:[%s14656_s1 + $0x174] sm:$0xf] }
 0x273   : > { %v6110_v14 = vpop.f32.mrf.mxu2  ;;  %v12981_v29 = vpop.f32.mrf.mxu3 }
 0x274   : > { %6259 = vmatmul.bf16.gmra.mxu1 %v12974_v51  ;;  %v12986_v56 = vadd.f32 %v6110_v14, %v6062_v5  ;;  %v9278_v5 = vld [vmem:[#allocation2 + $0x334] sm:$0xf]  ;;  %v8258_v14 = vld [vmem:[#allocation2 + $0x368] sm:$0xf0]  ;;  %v9279_v51 = vld [vmem:[#allocation2 + $0x33c] sm:$0xf]  ;;  %v3404_v33 = vor.u32 %v3403_v48, %v3399_v20 }
 0x275   : > { %v3395_v52 = vrot.slane %v3394_v62, 4  ;;  %v12997_v25 = vor.u32 %v9278_v5, %v8258_v14  ;;  %v8594_v48 = vld [vmem:[%s14656_s1 + $0x278] sm:$0xf0]  ;;  %v13007_v1 = vor.u32 %v9279_v51, %v8266_v36  ;;  %v9382_v5 = vld [vmem:[%s14656_s1 + $0x2f4] sm:$0xf] }
 0x276   : > { %v3405_v60 = vrot.slane %v3404_v33, 4  ;;  %v8658_v14 = vld [vmem:[%s14656_s1 + $0x2f8] sm:$0xf0]  ;;  %v8256_v33 = vld [vmem:[#allocation2 + $0x330] sm:$0xf] }
 0x277   : > { %v6017_v18 = vpop.f32.mrf.mxu0  ;;  %15432 = vst [vmem:[#allocation128_spill] sm:$0xff] %v12997_v25  ;;  %v3400_v62 = vsel %vm9997_vm2, %v3395_v52, %v3399_v20  ;;  %v8530_v36 = vld [vmem:[%s14656_s1 + $0x1f8] sm:$0xf0] }
 0x278   : > { %6308 = vmatmul.bf16.gmra.mxu2 %v12988_v42  ;;  %v6018_v63 = vadd.f32 %v6017_v18, %v5969_v21  ;;  %v9366_v18 = vld [vmem:[%s14656_s1 + $0x274] sm:$0xf]  ;;  %15433 = vst [vmem:[#allocation129_spill] sm:$0xff] %v13007_v1  ;;  %v8466_v21 = vld [vmem:[%s14656_s1 + $0x178] sm:$0xf0]  ;;  %v3627_v51 = vunpack.c.l.bf16 %v3400_v62 }
 0x279   : > { %v6066_v58 = vpop.f32.mrf.mxu1  ;;  %v8597_v55 = vor.u32 %v9366_v18, %v8594_v48  ;;  %v8469_v20 = vor.u32 %v9334_v57, %v8466_v21  ;;  %v15436_v48 = vld [vmem:[#allocation95_spill] sm:$0xff]  ;;  %v15438_v21 = vld [vmem:[#allocation96_spill] sm:$0xff] }
 0x27a   : > { %v6067_v45 = vadd.f32 %v6066_v58, %v6018_v63  ;;  %v9350_v63 = vld [vmem:[%s14656_s1 + $0x1f4] sm:$0xf]  ;;  %v13036_v57 = vmax.f32 %v15436_v48, %v3627_v51  ;;  %vm3707_vm4 = vcmp.gt.f32.partialorder %v3627_v51, -1.0027314e+29 }
 0x27b   : > { %v6113_v2 = vpop.f32.mrf.mxu2  ;;  %v12995_v27 = vpop.f32.mrf.mxu3  ;;  %6662 = vmatpush.bf16.msra.mxu2 %v8597_v55  ;;  %v8533_v18 = vor.u32 %v9350_v63, %v8530_v36  ;;  %6564 = vmatpush.bf16.msra.mxu0 %v8469_v20  ;;  %v9286_v63 = vld [vmem:[#allocation2 + $0x36c] sm:$0xf0] }
 0x27c   : > { %15431 = vst [vmem:[#allocation106_spill] sm:$0xff] %v12995_v27  ;;  %v13005_v53 = vadd.f32 %v6113_v2, %v6065_v13  ;;  %v13022_v2 = vsel %vm9997_vm2, %v3405_v60, %v3409_v31  ;;  %v3628_v13 = vunpack.c.h.bf16 %v3400_v62  ;;  %v8661_v60 = vor.u32 %v9382_v5, %v8658_v14  ;;  %v8264_v14 = vld [vmem:[#allocation2 + $0x338] sm:$0xf] }
 0x27d   : > { %15435 = vst [vmem:[#allocation20_spill] sm:$0xff] %v13022_v2  ;;  %v15442_v55 = vunpack.c.l.bf16 %v13022_v2  ;;  %v15443_v5 = vunpack.c.h.bf16 %v13022_v2  ;;  %6613 = vmatpush.bf16.msra.mxu1 %v8533_v18 }
 0x27e   : > { %15437 = vst [vmem:[#allocation95_spill] sm:$0xff] %v13036_v57  ;;  %v13039_v42 = vmax.f32 %v15438_v21, %v3628_v13  ;;  %vm3708_vm5 = vcmp.gt.f32.partialorder %v3628_v13, -1.0027314e+29  ;;  %v13052_v13 = vor.u32 %v9285_v40, %v8256_v33  ;;  %6711 = vmatpush.bf16.msra.mxu3 %v8661_v60  ;;  %v7810_v33 = vld [vmem:[%s9601_s20 + $0x38] sm:$0xff]  ;;  %v7811_v40 = vld [vmem:[%s9601_s20 + $0x40] sm:$0x11] }
 0x27f   : > { %v6020_v31 = vpop.f32.mrf.mxu0  ;;  %vm3709_vm7 = vcmp.gt.f32.partialorder %v15442_v55, -1.0027314e+29  ;;  %vm3710_vm8 = vcmp.gt.f32.partialorder %v15443_v5, -1.0027314e+29  ;;  %vm3739_vm9 = vmpackc.low %vm3708_vm5, %vm3707_vm4  ;;  %v3421_v55 = vshll.u32 %v7810_v33, 16  ;;  %v3425_v5 = vshrl.u32 %v7810_v33, 16 }
 0x280   : > { %15439 = vst [vmem:[#allocation96_spill] sm:$0xff] %v13039_v42  ;;  %6362 = vmatmul.bf16.gmra.mxu3 %v13007_v1  ;;  %v6021_v51 = vadd.f32 %v6020_v31, %v5972_v3  ;;  %vm3740_vm10 = vmpackc.low %vm3710_vm8, %vm3709_vm7  ;;  %v3755_v20 = vsel %vm3739_vm9, %v3400_v62, 0  ;;  %v7809_v62 = vld [vmem:[%s9601_s20 + $0x30] sm:$0xff] }
 0x281   : > { %v6069_v52 = vpop.f32.mrf.mxu1  ;;  %15444 = vst [vmem:[#allocation130_spill] sm:$0xff] %v13052_v13  ;;  %v3756_v36 = vsel %vm3740_vm10, %v13022_v2, 0  ;;  %v3412_v18 = vshrl.u32 %v7809_v62, 16  ;;  %v3415_v21 = vshll.u32 %v7809_v62, 16  ;;  %v3423_v2 = vrot.slane %v3421_v55, 5  ;;  %v15447_v42 = vld [vmem:[#allocation5_spill] sm:$0xff] }
 0x282   : > { %3774 = vst.msk [vmem:[#allocation2 + $0x30] sm:$0xff] %vm13043_vm6, %v3755_v20  ;;  %v6070_v48 = vadd.f32 %v6069_v52, %v6021_v51  ;;  %6215 = vmatmul.bf16.gmra.mxu0 %v13052_v13  ;;  %v3431_v52 = vshll.u32 %v7811_v40, 16  ;;  %v13068_v51 = vor.u32 %v9286_v63, %v8264_v14  ;;  %v5974_v57 = vadd.f32 %v15447_v42, %v12495_v50 }
 0x283   : > { %v6115_v3 = vpop.f32.mrf.mxu2  ;;  %v13059_v31 = vpop.f32.mrf.mxu3  ;;  %3775 = vst.msk [vmem:[#allocation2 + $0x68] sm:$0xff] %vm13043_vm6, %v3756_v36  ;;  %v3414_v20 = vrot.slane %v3412_v18, 4  ;;  %v3417_v1 = vrot.slane %v3415_v21, 5  ;;  %v3427_v13 = vrot.slane %v3425_v5, 4  ;;  %v6133_v50 = vadd.f32 %v12490_v12, %v12549_v4  ;;  %v9332_v12 = vld [vmem:[%s14656_s1 + $0x164] sm:$0xf] }
 0x284   : > { %6264 = vmatmul.bf16.gmra.mxu1 %v12997_v25  ;;  %15445 = vst [vmem:[#allocation131_spill] sm:$0xff] %v13059_v31  ;;  %v13066_v60 = vadd.f32 %v6115_v3, %v6067_v45  ;;  %v3433_v33 = vrot.slane %v3431_v52, 5  ;;  %v8458_v4 = vld [vmem:[%s14656_s1 + $0x168] sm:$0xf0] }
 0x285   : > { %15446 = vst [vmem:[#allocation132_spill] sm:$0xff] %v13068_v51  ;;  %v3418_v45 = vor.u32 %v3417_v1, %v3414_v20  ;;  %v3428_v27 = vor.u32 %v3427_v13, %v3423_v2  ;;  %v9364_v1 = vld [vmem:[%s14656_s1 + $0x264] sm:$0xf] }
 0x287   : > { %v6022_v36 = vpop.f32.mrf.mxu0  ;;  %v3419_v63 = vrot.slane %v3418_v45, 4  ;;  %v3429_v5 = vrot.slane %v3428_v27, 4  ;;  %v9380_v27 = vld [vmem:[%s14656_s1 + $0x2e4] sm:$0xf]  ;;  %v8650_v45 = vld [vmem:[%s14656_s1 + $0x2e8] sm:$0xf0] }
 0x288   : > { %6313 = vmatmul.bf16.gmra.mxu2 %v13068_v51  ;;  %v6023_v3 = vadd.f32 %v6022_v36, %v5974_v57  ;;  %v8586_v57 = vld [vmem:[%s14656_s1 + $0x268] sm:$0xf0] }
 0x289   : > { %v6071_v25 = vpop.f32.mrf.mxu1  ;;  %v7880_v31 = vld [vmem:[#allocation2 + $0x30] sm:$0xf]  ;;  %v9182_v62 = vld [vmem:[#allocation2 + $0x34] sm:$0xf]  ;;  %v3424_v52 = vsel %vm9997_vm2, %v3419_v63, %v3423_v2  ;;  %v8589_v20 = vor.u32 %v9364_v1, %v8586_v57  ;;  %v8461_v2 = vor.u32 %v9332_v12, %v8458_v4  ;;  %v15453_v1 = vld [vmem:[#allocation54_spill] sm:$0xff] }
 0x28a   : > { %v9189_v40 = vld [vmem:[#allocation2 + $0x64] sm:$0xf0]  ;;  %v7882_v14 = vld [vmem:[#allocation2 + $0x68] sm:$0xf0]  ;;  %v6072_v18 = vadd.f32 %v6071_v25, %v6023_v3  ;;  %v3632_v36 = vunpack.c.h.bf16 %v3424_v52  ;;  %v9348_v3 = vld [vmem:[%s14656_s1 + $0x1e4] sm:$0xf] }
 0x28b   : > { %v6118_v21 = vpop.f32.mrf.mxu2  ;;  %v13073_v55 = vpop.f32.mrf.mxu3  ;;  %v13077_v42 = vor.u32 %v9189_v40, %v7880_v31  ;;  %v13087_v25 = vor.u32 %v9182_v62, %v7882_v14  ;;  %v3631_v31 = vunpack.c.l.bf16 %v3424_v52  ;;  %v8522_v62 = vld [vmem:[%s14656_s1 + $0x1e8] sm:$0xf0]  ;;  %6663 = vmatpush.bf16.msra.mxu2 %v8589_v20  ;;  %v8653_v14 = vor.u32 %v9380_v27, %v8650_v45  ;;  %6565 = vmatpush.bf16.msra.mxu0 %v8461_v2  ;;  %v7814_v45 = vld [vmem:[%s9601_s20 + $0x58] sm:$0x11] }
 0x28c   : > { %v13085_v13 = vadd.f32 %v6118_v21, %v6070_v48  ;;  %v13102_v48 = vsel %vm9997_vm2, %v3429_v5, %v3433_v33  ;;  %v8525_v63 = vor.u32 %v9348_v3, %v8522_v62  ;;  %v15451_v21 = vld [vmem:[#allocation53_spill] sm:$0xff]  ;;  %v13119_v57 = vmax.f32 %v15453_v1, %v3632_v36  ;;  %v15455_v51 = vld [vmem:[#allocation44_spill] sm:$0xff] }
 0x28d   : > { %15448 = vst [vmem:[#allocation5_spill] sm:$0xff] %v13077_v42  ;;  %v14917_v40 = vunpack.c.l.bf16 %v13102_v48  ;;  %v14916_v33 = vunpack.c.h.bf16 %v13102_v48  ;;  %v13116_v5 = vmax.f32 %v15451_v21, %v3631_v31  ;;  %vm3711_vm11 = vcmp.gt.f32.partialorder %v3631_v31, -1.0027314e+29  ;;  %6712 = vmatpush.bf16.msra.mxu3 %v8653_v14 }
 0x28e   : > { %15449 = vst [vmem:[#allocation133_spill] sm:$0xff] %v13087_v25  ;;  %vm3712_vm14 = vcmp.gt.f32.partialorder %v3632_v36, -1.0027314e+29  ;;  %6614 = vmatpush.bf16.msra.mxu1 %v8525_v63  ;;  %v3455_v1 = vshll.u32 %v7814_v45, 16 }
 0x28f   : > { %15450 = vst [vmem:[#allocation134_spill] sm:$0xff] %v13102_v48  ;;  %v6181_v12 = vpop.f32.mrf.mxu0  ;;  %vm3713_vm15 = vcmp.gt.f32.partialorder %v14917_v40, -1.0027314e+29  ;;  %vm3714_vm0 = vcmp.gt.f32.partialorder %v14916_v33, -1.0027314e+29  ;;  %vm3741_vm1 = vmpackc.low %vm3712_vm14, %vm3711_vm11 }
 0x290   : > { %15452 = vst [vmem:[#allocation53_spill] sm:$0xff] %v13116_v5  ;;  %6523 = vmatmul.bf16.vlgmr.msrb.gmra.mxu3 %v15455_v51  ;;  %v6182_v20 = vadd.f32 %v6181_v12, %v6133_v50  ;;  %vm3742_vm3 = vmpackc.low %vm3714_vm0, %vm3713_vm15  ;;  %v3757_v27 = vsel %vm3741_vm1, %v3424_v52, 0  ;;  %v7812_v50 = vld [vmem:[%s9601_s20 + $0x48] sm:$0xff]  ;;  %v7813_v52 = vld [vmem:[%s9601_s20 + $0x50] sm:$0xff] }
 0x291   : > { %15454 = vst [vmem:[#allocation54_spill] sm:$0xff] %v13119_v57  ;;  %v6230_v4 = vpop.f32.mrf.mxu1  ;;  %v3758_v31 = vsel %vm3742_vm3, %v13102_v48, 0  ;;  %v3436_v62 = vshrl.u32 %v7812_v50, 16  ;;  %v3439_v14 = vshll.u32 %v7812_v50, 16  ;;  %v3445_v63 = vshll.u32 %v7813_v52, 16 }
 0x292   : > { %3776 = vst.msk [vmem:[#allocation2 + $0xa0] sm:$0xff] %vm13043_vm6, %v3757_v27  ;;  %v6231_v51 = vadd.f32 %v6230_v4, %v6182_v20  ;;  %6376 = vmatmul.bf16.vlgmr.msrb.gmra.mxu0 %v13077_v42  ;;  %v3449_v21 = vshrl.u32 %v7813_v52, 16  ;;  %v6135_v27 = vadd.f32 %v12542_v26, %v12596_v19  ;;  %v3457_v50 = vrot.slane %v3455_v1, 5 }
 0x293   : > { %v6120_v36 = vpop.f32.mrf.mxu2  ;;  %v13132_v2 = vpop.f32.mrf.mxu3  ;;  %3777 = vst.msk [vmem:[#allocation2 + $0xd8] sm:$0xff] %vm13043_vm6, %v3758_v31  ;;  %v3438_v12 = vrot.slane %v3436_v62, 4  ;;  %v3441_v4 = vrot.slane %v3439_v14, 5  ;;  %v3447_v20 = vrot.slane %v3445_v63, 5  ;;  %v15456_v31 = vld [vmem:[#allocation6_spill] sm:$0xff]  ;;  %v6138_v26 = vadd.f32 %v12588_v38, %v12640_v24 }
 0x294   : > { %9142 = vmatmul.msk.bf16.vlgmr.msrb.gmra.mxu1 %vm633_vm12, %v13087_v25  ;;  %v13139_v3 = vadd.f32 %v6120_v36, %v6072_v18  ;;  %v3451_v33 = vrot.slane %v3449_v21, 4  ;;  %v9330_v38 = vld [vmem:[%s14656_s1 + $0x154] sm:$0xf]  ;;  %v8450_v24 = vld [vmem:[%s14656_s1 + $0x158] sm:$0xf0] }
 0x295   : > { %v3442_v57 = vor.u32 %v3441_v4, %v3438_v12  ;;  %v8453_v4 = vor.u32 %v9330_v38, %v8450_v24  ;;  %v15464_v24 = vld [vmem:[#allocation19_spill] sm:$0xff] }
 0x296   : > { %v3452_v42 = vor.u32 %v3451_v33, %v3447_v20  ;;  %v8578_v33 = vld [vmem:[%s14656_s1 + $0x258] sm:$0xf0] }
 0x297   : > { %v6183_v40 = vpop.f32.mrf.mxu0  ;;  %v3443_v45 = vrot.slane %v3442_v57, 4  ;;  %6566 = vmatpush.bf16.msra.mxu0 %v8453_v4 }
 0x298   : > { %6474 = vmatmul.bf16.vlgmr.msrb.gmra.mxu2 %v15456_v31  ;;  %v6184_v5 = vadd.f32 %v6183_v40, %v6135_v27  ;;  %v3453_v21 = vrot.slane %v3452_v42, 4  ;;  %v9362_v40 = vld [vmem:[%s14656_s1 + $0x254] sm:$0xf]  ;;  %v8514_v31 = vld [vmem:[%s14656_s1 + $0x1d8] sm:$0xf0] }
 0x299   : > { %v6232_v48 = vpop.f32.mrf.mxu1  ;;  %v7936_v18 = vld [vmem:[#allocation2 + $0xa0] sm:$0xf]  ;;  %v9196_v36 = vld [vmem:[#allocation2 + $0xa4] sm:$0xf]  ;;  %v8581_v57 = vor.u32 %v9362_v40, %v8578_v33  ;;  %v9378_v42 = vld [vmem:[%s14656_s1 + $0x2d4] sm:$0xf] }
 0x29a   : > { %v9203_v25 = vld [vmem:[#allocation2 + $0xd4] sm:$0xf0]  ;;  %v7938_v52 = vld [vmem:[#allocation2 + $0xd8] sm:$0xf0]  ;;  %v6233_v62 = vadd.f32 %v6232_v48, %v6184_v5  ;;  %v3448_v5 = vsel %vm9997_vm2, %v3443_v45, %v3447_v20  ;;  %v9346_v27 = vld [vmem:[%s14656_s1 + $0x1d4] sm:$0xf] }
 0x29b   : > { %v6279_v14 = vpop.f32.mrf.mxu2  ;;  %v13144_v63 = vpop.f32.mrf.mxu3  ;;  %v13148_v19 = vor.u32 %v9203_v25, %v7936_v18  ;;  %v13158_v48 = vor.u32 %v9196_v36, %v7938_v52  ;;  %v13173_v25 = vsel %vm9997_vm2, %v3453_v21, %v3457_v50  ;;  %v3636_v12 = vunpack.c.h.bf16 %v3448_v5  ;;  %v8642_v20 = vld [vmem:[%s14656_s1 + $0x2d8] sm:$0xf0]  ;;  %6664 = vmatpush.bf16.msra.mxu2 %v8581_v57  ;;  %v15460_v45 = vld [vmem:[#allocation108_spill] sm:$0xff]  ;;  %v15462_v21 = vld [vmem:[#allocation109_spill] sm:$0xff] }
 0x29c   : > { %v13156_v1 = vadd.f32 %v6279_v14, %v6231_v51  ;;  %15459 = vst [vmem:[#allocation135_spill] sm:$0xff] %v13173_v25  ;;  %v3635_v51 = vunpack.c.l.bf16 %v3448_v5  ;;  %v14923_v18 = vunpack.c.l.bf16 %v13173_v25  ;;  %v14922_v36 = vunpack.c.h.bf16 %v13173_v25 }
 0x29d   : > { %15457 = vst [vmem:[#allocation44_spill] sm:$0xff] %v13148_v19  ;;  %v8645_v50 = vor.u32 %v9378_v42, %v8642_v20  ;;  %v8517_v52 = vor.u32 %v9346_v27, %v8514_v31  ;;  %v13190_v40 = vmax.f32 %v15462_v21, %v3636_v12  ;;  %vm3716_vm5 = vcmp.gt.f32.partialorder %v3636_v12, -1.0027314e+29  ;;  %v7817_v27 = vld [vmem:[%s9601_s20 + $0x70] sm:$0x11] }
 0x29e   : > { %15458 = vst [vmem:[#allocation6_spill] sm:$0xff] %v13158_v48  ;;  %v13187_v14 = vmax.f32 %v15460_v45, %v3635_v51  ;;  %vm3715_vm4 = vcmp.gt.f32.partialorder %v3635_v51, -1.0027314e+29  ;;  %vm3717_vm7 = vcmp.gt.f32.partialorder %v14923_v18, -1.0027314e+29  ;;  %vm3718_vm8 = vcmp.gt.f32.partialorder %v14922_v36, -1.0027314e+29 }
 0x29f   : > { %15463 = vst [vmem:[#allocation109_spill] sm:$0xff] %v13190_v40  ;;  %v6186_v33 = vpop.f32.mrf.mxu0  ;;  %vm3743_vm9 = vmpackc.low %vm3716_vm5, %vm3715_vm4  ;;  %6615 = vmatpush.bf16.msra.mxu1 %v8517_v52  ;;  %6713 = vmatpush.bf16.msra.mxu3 %v8645_v50 }
 0x2a0   : > { %15461 = vst [vmem:[#allocation108_spill] sm:$0xff] %v13187_v14  ;;  %6528 = vmatmul.bf16.gmra.mxu3 %v15464_v24  ;;  %v6187_v57 = vadd.f32 %v6186_v33, %v6138_v26  ;;  %vm3744_vm10 = vmpackc.low %vm3718_vm8, %vm3717_vm7  ;;  %v3759_v42 = vsel %vm3743_vm9, %v3448_v5, 0  ;;  %v7815_v26 = vld [vmem:[%s9601_s20 + $0x60] sm:$0xff]  ;;  %v7816_v5 = vld [vmem:[%s9601_s20 + $0x68] sm:$0xff]  ;;  %v3479_v33 = vshll.u32 %v7817_v27, 16 }
 0x2a1   : > { %v6235_v38 = vpop.f32.mrf.mxu1  ;;  %v3760_v51 = vsel %vm3744_vm10, %v13173_v25, 0  ;;  %3778 = vst.msk [vmem:[#allocation2 + $0x110] sm:$0xff] %vm13043_vm6, %v3759_v42  ;;  %v3460_v50 = vshrl.u32 %v7815_v26, 16  ;;  %v3463_v52 = vshll.u32 %v7815_v26, 16  ;;  %v3469_v45 = vshll.u32 %v7816_v5, 16 }
 0x2a2   : > { %v6236_v12 = vadd.f32 %v6235_v38, %v6187_v57  ;;  %6381 = vmatmul.bf16.gmra.mxu0 %v13148_v19  ;;  %3779 = vst.msk [vmem:[#allocation2 + $0x148] sm:$0xff] %vm13043_vm6, %v3760_v51  ;;  %v3473_v21 = vshrl.u32 %v7816_v5, 16  ;;  %v6140_v42 = vadd.f32 %v12632_v39, %v12676_v46  ;;  %v15465_v51 = vld [vmem:[#allocation18_spill] sm:$0xff]  ;;  %v3481_v26 = vrot.slane %v3479_v33, 5 }
 0x2a3   : > { %v6281_v4 = vpop.f32.mrf.mxu2  ;;  %v13203_v20 = vpop.f32.mrf.mxu3  ;;  %v3462_v38 = vrot.slane %v3460_v50, 4  ;;  %v3465_v24 = vrot.slane %v3463_v52, 5  ;;  %v3471_v57 = vrot.slane %v3469_v45, 5  ;;  %v6143_v39 = vadd.f32 %v12669_v54, %v12721_v6  ;;  %v9328_v54 = vld [vmem:[%s14656_s1 + $0x144] sm:$0xf] }
 0x2a4   : > { %9143 = vmatmul.msk.bf16.gmra.mxu1 %vm633_vm12, %v13158_v48  ;;  %v13210_v31 = vadd.f32 %v6281_v4, %v6233_v62  ;;  %v3475_v36 = vrot.slane %v3473_v21, 4  ;;  %v8442_v6 = vld [vmem:[%s14656_s1 + $0x148] sm:$0xf0] }
 0x2a5   : > { %v3466_v40 = vor.u32 %v3465_v24, %v3462_v38  ;;  %v8445_v24 = vor.u32 %v9328_v54, %v8442_v6 }
 0x2a6   : > { %v3476_v19 = vor.u32 %v3475_v36, %v3471_v57  ;;  %v8570_v36 = vld [vmem:[%s14656_s1 + $0x248] sm:$0xf0] }
 0x2a7   : > { %v6188_v18 = vpop.f32.mrf.mxu0  ;;  %v3467_v27 = vrot.slane %v3466_v40, 4  ;;  %6567 = vmatpush.bf16.msra.mxu0 %v8445_v24 }
 0x2a8   : > { %6479 = vmatmul.bf16.gmra.mxu2 %v15465_v51  ;;  %v6189_v14 = vadd.f32 %v6188_v18, %v6140_v42  ;;  %v7992_v62 = vld [vmem:[#allocation2 + $0x110] sm:$0xf]  ;;  %v9210_v4 = vld [vmem:[#allocation2 + $0x114] sm:$0xf]  ;;  %v3477_v21 = vrot.slane %v3476_v19, 4 }
 0x2a9   : > { %v6237_v25 = vpop.f32.mrf.mxu1  ;;  %v9217_v48 = vld [vmem:[#allocation2 + $0x144] sm:$0xf0]  ;;  %v7994_v5 = vld [vmem:[#allocation2 + $0x148] sm:$0xf0]  ;;  %v9360_v18 = vld [vmem:[%s14656_s1 + $0x244] sm:$0xf] }
 0x2aa   : > { %v6238_v50 = vadd.f32 %v6237_v25, %v6189_v14  ;;  %v13219_v46 = vor.u32 %v9217_v48, %v7992_v62  ;;  %v13229_v25 = vor.u32 %v9210_v4, %v7994_v5  ;;  %v3472_v14 = vsel %vm9997_vm2, %v3467_v27, %v3471_v57  ;;  %v9376_v19 = vld [vmem:[%s14656_s1 + $0x2c4] sm:$0xf]  ;;  %v8634_v57 = vld [vmem:[%s14656_s1 + $0x2c8] sm:$0xf0] }
 0x2ab   : > { %v6284_v52 = vpop.f32.mrf.mxu2  ;;  %v13215_v45 = vpop.f32.mrf.mxu3  ;;  %v8573_v40 = vor.u32 %v9360_v18, %v8570_v36  ;;  %v13244_v48 = vsel %vm9997_vm2, %v3477_v21, %v3481_v26  ;;  %v3640_v38 = vunpack.c.h.bf16 %v3472_v14  ;;  %v9344_v42 = vld [vmem:[%s14656_s1 + $0x1c4] sm:$0xf]  ;;  %v8506_v51 = vld [vmem:[%s14656_s1 + $0x1c8] sm:$0xf0]  ;;  %v8637_v26 = vor.u32 %v9376_v19, %v8634_v57 }
 0x2ac   : > { %v13227_v33 = vadd.f32 %v6284_v52, %v6236_v12  ;;  %15466 = vst [vmem:[#allocation19_spill] sm:$0xff] %v13244_v48  ;;  %v3639_v12 = vunpack.c.l.bf16 %v3472_v14  ;;  %v14929_v62 = vunpack.c.l.bf16 %v13244_v48  ;;  %v14928_v4 = vunpack.c.h.bf16 %v13244_v48  ;;  %v15469_v36 = vld [vmem:[#allocation55_spill] sm:$0xff] }
 0x2ad   : > { %6665 = vmatpush.bf16.msra.mxu2 %v8573_v40  ;;  %v8509_v5 = vor.u32 %v9344_v42, %v8506_v51  ;;  %v13261_v52 = vmax.f32 %v12501_v30, %v3640_v38  ;;  %vm3720_vm14 = vcmp.gt.f32.partialorder %v3640_v38, -1.0027314e+29  ;;  %6714 = vmatpush.bf16.msra.mxu3 %v8637_v26 }
 0x2ae   : > { %v13258_v27 = vmax.f32 %v12498_v37, %v3639_v12  ;;  %vm3719_vm11 = vcmp.gt.f32.partialorder %v3639_v12, -1.0027314e+29  ;;  %vm3721_vm15 = vcmp.gt.f32.partialorder %v14929_v62, -1.0027314e+29  ;;  %vm3722_vm0 = vcmp.gt.f32.partialorder %v14928_v4, -1.0027314e+29  ;;  %v7820_v12 = vld [vmem:[%s9601_s20 + $0x88] sm:$0x11] }
 0x2af   : > { %15468 = vst [vmem:[#allocation136_spill] sm:$0xff] %v13261_v52  ;;  %v6191_v21 = vpop.f32.mrf.mxu0  ;;  %vm3745_vm1 = vmpackc.low %vm3720_vm14, %vm3719_vm11  ;;  %6616 = vmatpush.bf16.msra.mxu1 %v8509_v5  ;;  %v3503_v26 = vshll.u32 %v7820_v12, 16 }
 0x2b0   : > { %15467 = vst [vmem:[#allocation18_spill] sm:$0xff] %v13258_v27  ;;  %6533 = vmatmul.bf16.gmra.mxu3 %v15469_v36  ;;  %v6192_v37 = vadd.f32 %v6191_v21, %v6143_v39  ;;  %vm3746_vm3 = vmpackc.low %vm3722_vm0, %vm3721_vm15  ;;  %v3761_v30 = vsel %vm3745_vm1, %v3472_v14, 0  ;;  %v7818_v39 = vld [vmem:[%s9601_s20 + $0x78] sm:$0xff]  ;;  %v7819_v14 = vld [vmem:[%s9601_s20 + $0x80] sm:$0xff]  ;;  %v6145_v36 = vadd.f32 %v12714_v41, %v12767_v22  ;;  %v6148_v41 = vadd.f32 %v12762_v15, %v12815_v43 }
 0x2b1   : > { %v6240_v18 = vpop.f32.mrf.mxu1  ;;  %v3762_v40 = vsel %vm3746_vm3, %v13244_v48, 0  ;;  %3780 = vst.msk [vmem:[#allocation2 + $0x180] sm:$0xff] %vm13043_vm6, %v3761_v30  ;;  %v3484_v24 = vshrl.u32 %v7818_v39, 16  ;;  %v3487_v57 = vshll.u32 %v7818_v39, 16  ;;  %v3493_v42 = vshll.u32 %v7819_v14, 16 }
 0x2b2   : > { %v6241_v54 = vadd.f32 %v6240_v18, %v6192_v37  ;;  %6386 = vmatmul.bf16.gmra.mxu0 %v13219_v46  ;;  %3781 = vst.msk [vmem:[#allocation2 + $0x1b8] sm:$0xff] %vm13043_vm6, %v3762_v40  ;;  %v3497_v51 = vshrl.u32 %v7819_v14, 16  ;;  %v15470_v40 = vld [vmem:[#allocation14_spill] sm:$0xff]  ;;  %v3505_v39 = vrot.slane %v3503_v26, 5  ;;  %v9326_v15 = vld [vmem:[%s14656_s1 + $0x134] sm:$0xf] }
 0x2b3   : > { %v6286_v6 = vpop.f32.mrf.mxu2  ;;  %v13274_v19 = vpop.f32.mrf.mxu3  ;;  %v3486_v5 = vrot.slane %v3484_v24, 4  ;;  %v3489_v21 = vrot.slane %v3487_v57, 5  ;;  %v3495_v18 = vrot.slane %v3493_v42, 5  ;;  %v8562_v26 = vld [vmem:[%s14656_s1 + $0x238] sm:$0xf0] }
 0x2b4   : > { %9144 = vmatmul.msk.bf16.gmra.mxu1 %vm633_vm12, %v13229_v25  ;;  %v13281_v38 = vadd.f32 %v6286_v6, %v6238_v50  ;;  %v3499_v37 = vrot.slane %v3497_v51, 4  ;;  %v8434_v43 = vld [vmem:[%s14656_s1 + $0x138] sm:$0xf0] }
 0x2b5   : > { %v3490_v62 = vor.u32 %v3489_v21, %v3486_v5  ;;  %v9358_v5 = vld [vmem:[%s14656_s1 + $0x234] sm:$0xf] }
 0x2b6   : > { %v3500_v52 = vor.u32 %v3499_v37, %v3495_v18  ;;  %v8626_v37 = vld [vmem:[%s14656_s1 + $0x2b8] sm:$0xf0] }
 0x2b7   : > { %v6193_v30 = vpop.f32.mrf.mxu0  ;;  %v3491_v12 = vrot.slane %v3490_v62, 4 }
 0x2b8   : > { %6484 = vmatmul.bf16.gmra.mxu2 %v15470_v40  ;;  %v6194_v48 = vadd.f32 %v6193_v30, %v6145_v36  ;;  %v8048_v50 = vld [vmem:[#allocation2 + $0x180] sm:$0xf]  ;;  %v9224_v6 = vld [vmem:[#allocation2 + $0x184] sm:$0xf]  ;;  %v3501_v51 = vrot.slane %v3500_v52, 4 }
 0x2b9   : > { %v6242_v4 = vpop.f32.mrf.mxu1  ;;  %v9231_v27 = vld [vmem:[#allocation2 + $0x1b4] sm:$0xf0]  ;;  %v8050_v14 = vld [vmem:[#allocation2 + $0x1b8] sm:$0xf0]  ;;  %v3496_v62 = vsel %vm9997_vm2, %v3491_v12, %v3495_v18  ;;  %v8437_v18 = vor.u32 %v9326_v15, %v8434_v43  ;;  %v9342_v30 = vld [vmem:[%s14656_s1 + $0x1b4] sm:$0xf] }
 0x2ba   : > { %v6243_v24 = vadd.f32 %v6242_v4, %v6194_v48  ;;  %v13290_v22 = vor.u32 %v9231_v27, %v8048_v50  ;;  %v13300_v48 = vor.u32 %v9224_v6, %v8050_v14  ;;  %v8565_v4 = vor.u32 %v9358_v5, %v8562_v26  ;;  %v9374_v27 = vld [vmem:[%s14656_s1 + $0x2b4] sm:$0xf]  ;;  %v8498_v40 = vld [vmem:[%s14656_s1 + $0x1b8] sm:$0xf0] }
 0x2bb   : > { %v6289_v57 = vpop.f32.mrf.mxu2  ;;  %v13286_v42 = vpop.f32.mrf.mxu3  ;;  %v13315_v52 = vsel %vm9997_vm2, %v3501_v51, %v3505_v39  ;;  %v3644_v36 = vunpack.c.h.bf16 %v3496_v62  ;;  %v8629_v39 = vor.u32 %v9374_v27, %v8626_v37  ;;  %v8501_v14 = vor.u32 %v9342_v30, %v8498_v40  ;;  %6568 = vmatpush.bf16.msra.mxu0 %v8437_v18  ;;  %v15474_v26 = vld [vmem:[#allocation37_spill] sm:$0xff] }
 0x2bc   : > { %v13298_v21 = vadd.f32 %v6289_v57, %v6241_v54  ;;  %15471 = vst [vmem:[#allocation55_spill] sm:$0xff] %v13315_v52  ;;  %v3643_v54 = vunpack.c.l.bf16 %v3496_v62  ;;  %v14933_v50 = vunpack.c.l.bf16 %v13315_v52  ;;  %v14932_v6 = vunpack.c.h.bf16 %v13315_v52  ;;  %6666 = vmatpush.bf16.msra.mxu2 %v8565_v4 }
 0x2bd   : > { %v13332_v57 = vmax.f32 %v12604_v28, %v3644_v36  ;;  %vm3724_vm5 = vcmp.gt.f32.partialorder %v3644_v36, -1.0027314e+29  ;;  %6617 = vmatpush.bf16.msra.mxu1 %v8501_v14  ;;  %6715 = vmatpush.bf16.msra.mxu3 %v8629_v39 }
 0x2be   : > { %v13329_v12 = vmax.f32 %v12601_v23, %v3643_v54  ;;  %vm3723_vm4 = vcmp.gt.f32.partialorder %v3643_v54, -1.0027314e+29  ;;  %vm3725_vm7 = vcmp.gt.f32.partialorder %v14933_v50, -1.0027314e+29  ;;  %vm3726_vm8 = vcmp.gt.f32.partialorder %v14932_v6, -1.0027314e+29  ;;  %v7823_v54 = vld [vmem:[%s9601_s20 + $0xa0] sm:$0x11] }
 0x2bf   : > { %15473 = vst [vmem:[#allocation137_spill] sm:$0xff] %v13332_v57  ;;  %v6196_v51 = vpop.f32.mrf.mxu0  ;;  %vm3747_vm9 = vmpackc.low %vm3724_vm5, %vm3723_vm4  ;;  %v3527_v39 = vshll.u32 %v7823_v54, 16 }
 0x2c0   : > { %15472 = vst [vmem:[#allocation14_spill] sm:$0xff] %v13329_v12  ;;  %6538 = vmatmul.bf16.gmra.mxu3 %v15474_v26  ;;  %v6197_v23 = vadd.f32 %v6196_v51, %v6148_v41  ;;  %vm3748_vm10 = vmpackc.low %vm3726_vm8, %vm3725_vm7  ;;  %v3763_v28 = vsel %vm3747_vm9, %v3496_v62, 0  ;;  %v7821_v41 = vld [vmem:[%s9601_s20 + $0x90] sm:$0xff]  ;;  %v7822_v62 = vld [vmem:[%s9601_s20 + $0x98] sm:$0xff]  ;;  %v6150_v26 = vadd.f32 %v12810_v32, %v12854_v17  ;;  %v6153_v32 = vadd.f32 %v12849_v61, %v12902_v35 }
 0x2c1   : > { %v6245_v5 = vpop.f32.mrf.mxu1  ;;  %v3764_v4 = vsel %vm3748_vm10, %v13315_v52, 0  ;;  %3782 = vst.msk [vmem:[#allocation2 + $0x1f0] sm:$0xff] %vm13043_vm6, %v3763_v28  ;;  %v3508_v18 = vshrl.u32 %v7821_v41, 16  ;;  %v3511_v37 = vshll.u32 %v7821_v41, 16  ;;  %v3517_v30 = vshll.u32 %v7822_v62, 16 }
 0x2c2   : > { %v6246_v15 = vadd.f32 %v6245_v5, %v6197_v23  ;;  %6391 = vmatmul.bf16.gmra.mxu0 %v13290_v22  ;;  %3783 = vst.msk [vmem:[#allocation2 + $0x228] sm:$0xff] %vm13043_vm6, %v3764_v4  ;;  %v3521_v40 = vshrl.u32 %v7822_v62, 16  ;;  %v15475_v4 = vld [vmem:[#allocation36_spill] sm:$0xff]  ;;  %v3529_v41 = vrot.slane %v3527_v39, 5  ;;  %v9324_v61 = vld [vmem:[%s14656_s1 + $0x124] sm:$0xf] }
 0x2c3   : > { %v6291_v43 = vpop.f32.mrf.mxu2  ;;  %v13345_v27 = vpop.f32.mrf.mxu3  ;;  %v3510_v14 = vrot.slane %v3508_v18, 4  ;;  %v3513_v51 = vrot.slane %v3511_v37, 5  ;;  %v3519_v5 = vrot.slane %v3517_v30, 5  ;;  %v8554_v39 = vld [vmem:[%s14656_s1 + $0x228] sm:$0xf0] }
 0x2c4   : > { %9145 = vmatmul.msk.bf16.gmra.mxu1 %vm633_vm12, %v13300_v48  ;;  %v13352_v36 = vadd.f32 %v6291_v43, %v6243_v24  ;;  %v3523_v23 = vrot.slane %v3521_v40, 4  ;;  %v8426_v35 = vld [vmem:[%s14656_s1 + $0x128] sm:$0xf0] }
 0x2c5   : > { %v3514_v50 = vor.u32 %v3513_v51, %v3510_v14  ;;  %v9356_v14 = vld [vmem:[%s14656_s1 + $0x224] sm:$0xf] }
 0x2c6   : > { %v3524_v57 = vor.u32 %v3523_v23, %v3519_v5  ;;  %v8618_v23 = vld [vmem:[%s14656_s1 + $0x2a8] sm:$0xf0] }
 0x2c7   : > { %v6198_v28 = vpop.f32.mrf.mxu0  ;;  %v3515_v54 = vrot.slane %v3514_v50, 4 }
 0x2c8   : > { %6489 = vmatmul.bf16.gmra.mxu2 %v15475_v4  ;;  %v6199_v52 = vadd.f32 %v6198_v28, %v6150_v26  ;;  %v8104_v24 = vld [vmem:[#allocation2 + $0x1f0] sm:$0xf]  ;;  %v9238_v43 = vld [vmem:[#allocation2 + $0x1f4] sm:$0xf]  ;;  %v3525_v40 = vrot.slane %v3524_v57, 4 }
 0x2c9   : > { %v6247_v6 = vpop.f32.mrf.mxu1  ;;  %v9245_v12 = vld [vmem:[#allocation2 + $0x224] sm:$0xf0]  ;;  %v8106_v62 = vld [vmem:[#allocation2 + $0x228] sm:$0xf0]  ;;  %v3520_v50 = vsel %vm9997_vm2, %v3515_v54, %v3519_v5  ;;  %v8429_v5 = vor.u32 %v9324_v61, %v8426_v35  ;;  %v9340_v28 = vld [vmem:[%s14656_s1 + $0x1a4] sm:$0xf] }
 0x2ca   : > { %v6248_v18 = vadd.f32 %v6247_v6, %v6199_v52  ;;  %v13361_v17 = vor.u32 %v9245_v12, %v8104_v24  ;;  %v13371_v52 = vor.u32 %v9238_v43, %v8106_v62  ;;  %v8557_v6 = vor.u32 %v9356_v14, %v8554_v39  ;;  %v9372_v12 = vld [vmem:[%s14656_s1 + $0x2a4] sm:$0xf]  ;;  %v8490_v4 = vld [vmem:[%s14656_s1 + $0x1a8] sm:$0xf0]  ;;  %v15479_v39 = vld [vmem:[#allocation25_spill] sm:$0xff] }
 0x2cb   : > { %v6294_v37 = vpop.f32.mrf.mxu2  ;;  %v13357_v30 = vpop.f32.mrf.mxu3  ;;  %v13386_v57 = vsel %vm9997_vm2, %v3525_v40, %v3529_v41  ;;  %v3648_v26 = vunpack.c.h.bf16 %v3520_v50  ;;  %v8621_v41 = vor.u32 %v9372_v12, %v8618_v23  ;;  %v8493_v62 = vor.u32 %v9340_v28, %v8490_v4  ;;  %6569 = vmatpush.bf16.msra.mxu0 %v8429_v5 }
 0x2cc   : > { %v13369_v51 = vadd.f32 %v6294_v37, %v6246_v15  ;;  %15476 = vst [vmem:[#allocation37_spill] sm:$0xff] %v13386_v57  ;;  %v3647_v15 = vunpack.c.l.bf16 %v3520_v50  ;;  %v14937_v24 = vunpack.c.l.bf16 %v13386_v57  ;;  %v14936_v43 = vunpack.c.h.bf16 %v13386_v57  ;;  %6667 = vmatpush.bf16.msra.mxu2 %v8557_v6 }
 0x2cd   : > { %v13403_v37 = vmax.f32 %v12686_v9, %v3648_v26  ;;  %vm3728_vm14 = vcmp.gt.f32.partialorder %v3648_v26, -1.0027314e+29  ;;  %6618 = vmatpush.bf16.msra.mxu1 %v8493_v62  ;;  %6716 = vmatpush.bf16.msra.mxu3 %v8621_v41 }
 0x2ce   : > { %v13400_v54 = vmax.f32 %v12679_v7, %v3647_v15  ;;  %vm3727_vm11 = vcmp.gt.f32.partialorder %v3647_v15, -1.0027314e+29  ;;  %vm3729_vm15 = vcmp.gt.f32.partialorder %v14937_v24, -1.0027314e+29  ;;  %vm3730_vm0 = vcmp.gt.f32.partialorder %v14936_v43, -1.0027314e+29  ;;  %v7826_v15 = vld [vmem:[%s9601_s20 + $0xb8] sm:$0x11] }
 0x2cf   : > { %15478 = vst [vmem:[#allocation138_spill] sm:$0xff] %v13403_v37  ;;  %v6201_v40 = vpop.f32.mrf.mxu0  ;;  %vm3749_vm1 = vmpackc.low %vm3728_vm14, %vm3727_vm11  ;;  %v3551_v41 = vshll.u32 %v7826_v15, 16 }
 0x2d0   : > { %15477 = vst [vmem:[#allocation36_spill] sm:$0xff] %v13400_v54  ;;  %6543 = vmatmul.bf16.gmra.mxu3 %v15479_v39  ;;  %v6202_v7 = vadd.f32 %v6201_v40, %v6153_v32  ;;  %vm3750_vm3 = vmpackc.low %vm3730_vm0, %vm3729_vm15  ;;  %v3765_v9 = vsel %vm3749_vm1, %v3520_v50, 0  ;;  %v7824_v32 = vld [vmem:[%s9601_s20 + $0xa8] sm:$0xff]  ;;  %v7825_v50 = vld [vmem:[%s9601_s20 + $0xb0] sm:$0xff]  ;;  %v6155_v39 = vadd.f32 %v12897_v16, %v12941_v49  ;;  %v6158_v16 = vadd.f32 %v12938_v59, %v12953_v11 }
 0x2d1   : > { %v6250_v14 = vpop.f32.mrf.mxu1  ;;  %v3766_v6 = vsel %vm3750_vm3, %v13386_v57, 0  ;;  %3784 = vst.msk [vmem:[#allocation2 + $0x260] sm:$0xff] %vm13043_vm6, %v3765_v9  ;;  %v3532_v5 = vshrl.u32 %v7824_v32, 16  ;;  %v3535_v23 = vshll.u32 %v7824_v32, 16  ;;  %v3541_v28 = vshll.u32 %v7825_v50, 16 }
 0x2d2   : > { %v6251_v61 = vadd.f32 %v6250_v14, %v6202_v7  ;;  %6396 = vmatmul.bf16.gmra.mxu0 %v13361_v17  ;;  %3785 = vst.msk [vmem:[#allocation2 + $0x298] sm:$0xff] %vm13043_vm6, %v3766_v6  ;;  %v3545_v4 = vshrl.u32 %v7825_v50, 16  ;;  %v15480_v6 = vld [vmem:[#allocation24_spill] sm:$0xff]  ;;  %v3553_v32 = vrot.slane %v3551_v41, 5  ;;  %v8546_v41 = vld [vmem:[%s14656_s1 + $0x218] sm:$0xf0] }
 0x2d3   : > { %v6296_v35 = vpop.f32.mrf.mxu2  ;;  %v13416_v12 = vpop.f32.mrf.mxu3  ;;  %v3534_v62 = vrot.slane %v3532_v5, 4  ;;  %v3537_v40 = vrot.slane %v3535_v23, 5  ;;  %v3543_v14 = vrot.slane %v3541_v28, 5  ;;  %v9322_v59 = vld [vmem:[%s14656_s1 + $0x114] sm:$0xf] }
 0x2d4   : > { %9146 = vmatmul.msk.bf16.gmra.mxu1 %vm633_vm12, %v13371_v52  ;;  %v13423_v26 = vadd.f32 %v6296_v35, %v6248_v18  ;;  %v3547_v7 = vrot.slane %v3545_v4, 4  ;;  %v8418_v11 = vld [vmem:[%s14656_s1 + $0x118] sm:$0xf0] }
 0x2d5   : > { %v3538_v24 = vor.u32 %v3537_v40, %v3534_v62  ;;  %v9354_v62 = vld [vmem:[%s14656_s1 + $0x214] sm:$0xf] }
 0x2d6   : > { %v3548_v37 = vor.u32 %v3547_v7, %v3543_v14  ;;  %v8610_v7 = vld [vmem:[%s14656_s1 + $0x298] sm:$0xf0] }
 0x2d7   : > { %v6203_v9 = vpop.f32.mrf.mxu0  ;;  %v3539_v15 = vrot.slane %v3538_v24, 4 }
 0x2d8   : > { %6494 = vmatmul.bf16.gmra.mxu2 %v15480_v6  ;;  %v6204_v57 = vadd.f32 %v6203_v9, %v6155_v39  ;;  %v8160_v18 = vld [vmem:[#allocation2 + $0x260] sm:$0xf]  ;;  %v9252_v35 = vld [vmem:[#allocation2 + $0x264] sm:$0xf]  ;;  %v3549_v4 = vrot.slane %v3548_v37, 4 }
 0x2d9   : > { %v6252_v43 = vpop.f32.mrf.mxu1  ;;  %v9259_v54 = vld [vmem:[#allocation2 + $0x294] sm:$0xf0]  ;;  %v8162_v50 = vld [vmem:[#allocation2 + $0x298] sm:$0xf0]  ;;  %v3544_v24 = vsel %vm9997_vm2, %v3539_v15, %v3543_v14  ;;  %v8421_v14 = vor.u32 %v9322_v59, %v8418_v11  ;;  %v9338_v9 = vld [vmem:[%s14656_s1 + $0x194] sm:$0xf] }
 0x2da   : > { %v6253_v5 = vadd.f32 %v6252_v43, %v6204_v57  ;;  %v13432_v49 = vor.u32 %v9259_v54, %v8160_v18  ;;  %v13442_v57 = vor.u32 %v9252_v35, %v8162_v50  ;;  %v8549_v43 = vor.u32 %v9354_v62, %v8546_v41  ;;  %v9370_v54 = vld [vmem:[%s14656_s1 + $0x294] sm:$0xf]  ;;  %v8482_v6 = vld [vmem:[%s14656_s1 + $0x198] sm:$0xf0] }
 0x2db   : > { %v6299_v23 = vpop.f32.mrf.mxu2  ;;  %v13428_v28 = vpop.f32.mrf.mxu3  ;;  %v13457_v37 = vsel %vm9997_vm2, %v3549_v4, %v3553_v32  ;;  %v3652_v39 = vunpack.c.h.bf16 %v3544_v24  ;;  %v8613_v32 = vor.u32 %v9370_v54, %v8610_v7  ;;  %v8485_v50 = vor.u32 %v9338_v9, %v8482_v6  ;;  %6570 = vmatpush.bf16.msra.mxu0 %v8421_v14  ;;  %v15484_v41 = vld [vmem:[#allocation10_spill] sm:$0xff] }
 0x2dc   : > { %v13440_v40 = vadd.f32 %v6299_v23, %v6251_v61  ;;  %15481 = vst [vmem:[#allocation25_spill] sm:$0xff] %v13457_v37  ;;  %v3651_v61 = vunpack.c.l.bf16 %v3544_v24  ;;  %v14941_v18 = vunpack.c.l.bf16 %v13457_v37  ;;  %v14940_v35 = vunpack.c.h.bf16 %v13457_v37  ;;  %6668 = vmatpush.bf16.msra.mxu2 %v8549_v43 }
 0x2dd   : > { %v13474_v23 = vmax.f32 %v12773_v34, %v3652_v39  ;;  %vm3732_vm5 = vcmp.gt.f32.partialorder %v3652_v39, -1.0027314e+29  ;;  %6619 = vmatpush.bf16.msra.mxu1 %v8485_v50  ;;  %6717 = vmatpush.bf16.msra.mxu3 %v8613_v32 }
 0x2de   : > { %v13471_v15 = vmax.f32 %v12770_v0, %v3651_v61  ;;  %vm3731_vm4 = vcmp.gt.f32.partialorder %v3651_v61, -1.0027314e+29  ;;  %vm3733_vm7 = vcmp.gt.f32.partialorder %v14941_v18, -1.0027314e+29  ;;  %vm3734_vm8 = vcmp.gt.f32.partialorder %v14940_v35, -1.0027314e+29  ;;  %v7829_v61 = vld [vmem:[%s9601_s20 + $0xd0] sm:$0x11] }
 0x2df   : > { %15483 = vst [vmem:[#allocation139_spill] sm:$0xff] %v13474_v23  ;;  %v6206_v4 = vpop.f32.mrf.mxu0  ;;  %vm3751_vm9 = vmpackc.low %vm3732_vm5, %vm3731_vm4  ;;  %v3575_v32 = vshll.u32 %v7829_v61, 16 }
 0x2e0   : > { %15482 = vst [vmem:[#allocation24_spill] sm:$0xff] %v13471_v15  ;;  %6548 = vmatmul.bf16.gmra.mxu3 %v15484_v41  ;;  %v6207_v0 = vadd.f32 %v6206_v4, %v6158_v16  ;;  %vm3752_vm10 = vmpackc.low %vm3734_vm8, %vm3733_vm7  ;;  %v3767_v34 = vsel %vm3751_vm9, %v3544_v24, 0  ;;  %v7827_v16 = vld [vmem:[%s9601_s20 + $0xc0] sm:$0xff]  ;;  %v7828_v24 = vld [vmem:[%s9601_s20 + $0xc8] sm:$0xff]  ;;  %v6160_v41 = vadd.f32 %v12948_v10, %v12986_v56  ;;  %v6163_v10 = vadd.f32 %v12981_v29, %v13005_v53 }
 0x2e1   : > { %v6255_v62 = vpop.f32.mrf.mxu1  ;;  %v3768_v43 = vsel %vm3752_vm10, %v13457_v37, 0  ;;  %3786 = vst.msk [vmem:[#allocation2 + $0x2d0] sm:$0xff] %vm13043_vm6, %v3767_v34  ;;  %v3556_v14 = vshrl.u32 %v7827_v16, 16  ;;  %v3559_v7 = vshll.u32 %v7827_v16, 16  ;;  %v3565_v9 = vshll.u32 %v7828_v24, 16 }
 0x2e2   : > { %v6256_v59 = vadd.f32 %v6255_v62, %v6207_v0  ;;  %6401 = vmatmul.bf16.gmra.mxu0 %v13432_v49  ;;  %3787 = vst.msk [vmem:[#allocation2 + $0x308] sm:$0xff] %vm13043_vm6, %v3768_v43  ;;  %v3569_v6 = vshrl.u32 %v7828_v24, 16  ;;  %v15485_v43 = vld [vmem:[#allocation9_spill] sm:$0xff]  ;;  %v3577_v16 = vrot.slane %v3575_v32, 5  ;;  %v8538_v32 = vld [vmem:[%s14656_s1 + $0x208] sm:$0xf0] }
 0x2e3   : > { %v6301_v11 = vpop.f32.mrf.mxu2  ;;  %v13487_v54 = vpop.f32.mrf.mxu3  ;;  %v3558_v50 = vrot.slane %v3556_v14, 4  ;;  %v3561_v4 = vrot.slane %v3559_v7, 5  ;;  %v3567_v62 = vrot.slane %v3565_v9, 5  ;;  %v9320_v29 = vld [vmem:[%s14656_s1 + $0x104] sm:$0xf] }
 0x2e4   : > { %9147 = vmatmul.msk.bf16.gmra.mxu1 %vm633_vm12, %v13442_v57  ;;  %v13494_v39 = vadd.f32 %v6301_v11, %v6253_v5  ;;  %v3571_v0 = vrot.slane %v3569_v6, 4  ;;  %v8410_v53 = vld [vmem:[%s14656_s1 + $0x108] sm:$0xf0] }
 0x2e5   : > { %v3562_v18 = vor.u32 %v3561_v4, %v3558_v50  ;;  %v9352_v50 = vld [vmem:[%s14656_s1 + $0x204] sm:$0xf] }
 0x2e6   : > { %v3572_v23 = vor.u32 %v3571_v0, %v3567_v62  ;;  %v8602_v0 = vld [vmem:[%s14656_s1 + $0x288] sm:$0xf0] }
 0x2e7   : > { %v6208_v34 = vpop.f32.mrf.mxu0  ;;  %v3563_v61 = vrot.slane %v3562_v18, 4 }
 0x2e8   : > { %6499 = vmatmul.bf16.gmra.mxu2 %v15485_v43  ;;  %v6209_v37 = vadd.f32 %v6208_v34, %v6160_v41  ;;  %v8216_v5 = vld [vmem:[#allocation2 + $0x2d0] sm:$0xf]  ;;  %v9266_v11 = vld [vmem:[#allocation2 + $0x2d4] sm:$0xf]  ;;  %v3573_v6 = vrot.slane %v3572_v23, 4 }
 0x2e9   : > { %v6257_v35 = vpop.f32.mrf.mxu1  ;;  %v9273_v15 = vld [vmem:[#allocation2 + $0x304] sm:$0xf0]  ;;  %v8218_v24 = vld [vmem:[#allocation2 + $0x308] sm:$0xf0]  ;;  %v3568_v18 = vsel %vm9997_vm2, %v3563_v61, %v3567_v62  ;;  %v8413_v62 = vor.u32 %v9320_v29, %v8410_v53  ;;  %v9336_v34 = vld [vmem:[%s14656_s1 + $0x184] sm:$0xf] }
 0x2ea   : > { %v6258_v14 = vadd.f32 %v6257_v35, %v6209_v37  ;;  %v13503_v56 = vor.u32 %v9273_v15, %v8216_v5  ;;  %v13513_v37 = vor.u32 %v9266_v11, %v8218_v24  ;;  %v8541_v35 = vor.u32 %v9352_v50, %v8538_v32  ;;  %v9368_v15 = vld [vmem:[%s14656_s1 + $0x284] sm:$0xf]  ;;  %v8474_v43 = vld [vmem:[%s14656_s1 + $0x188] sm:$0xf0]  ;;  %v15486_v50 = vld [vmem:[#allocation50_spill] sm:$0xff] }
 0x2eb   : > { %v6304_v7 = vpop.f32.mrf.mxu2  ;;  %v13499_v9 = vpop.f32.mrf.mxu3  ;;  %v13528_v23 = vsel %vm9997_vm2, %v3573_v6, %v3577_v16  ;;  %v3656_v41 = vunpack.c.h.bf16 %v3568_v18  ;;  %v8605_v11 = vor.u32 %v9368_v15, %v8602_v0  ;;  %v8477_v16 = vor.u32 %v9336_v34, %v8474_v43  ;;  %6571 = vmatpush.bf16.msra.mxu0 %v8413_v62  ;;  %v15488_v62 = vld [vmem:[#allocation11_spill] sm:$0xff] }
 0x2ec   : > { %v13511_v4 = vadd.f32 %v6304_v7, %v6256_v59  ;;  %v3655_v59 = vunpack.c.l.bf16 %v3568_v18  ;;  %v14945_v5 = vunpack.c.l.bf16 %v13528_v23  ;;  %v14944_v58 = vunpack.c.h.bf16 %v13528_v23  ;;  %6669 = vmatpush.bf16.msra.mxu2 %v8541_v35 }
 0x2ed   : > { %v13545_v61 = vmax.f32 %v12860_v8, %v3656_v41  ;;  %vm3736_vm11 = vcmp.gt.f32.partialorder %v3656_v41, -1.0027314e+29  ;;  %6620 = vmatpush.bf16.msra.mxu1 %v8477_v16  ;;  %6718 = vmatpush.bf16.msra.mxu3 %v8605_v11 }
 0x2ee   : > { %v13542_v24 = vmax.f32 %v12857_v47, %v3655_v59  ;;  %vm3735_vm2 = vcmp.gt.f32.partialorder %v3655_v59, -1.0027314e+29  ;;  %vm3737_vm14 = vcmp.gt.f32.partialorder %v14945_v5, -1.0027314e+29  ;;  %vm3738_vm15 = vcmp.gt.f32.partialorder %v14944_v58, -1.0027314e+29 }
 0x2ef   : > { %v6211_v7 = vpop.f32.mrf.mxu0  ;;  %vm3753_vm0 = vmpackc.low %vm3736_vm11, %vm3735_vm2 }
 0x2f0   : > { %6553 = vmatmul.bf16.gmra.mxu3 %v15486_v50  ;;  %v6212_v47 = vadd.f32 %v6211_v7, %v6163_v10  ;;  %vm3754_vm1 = vmpackc.low %vm3738_vm15, %vm3737_vm14  ;;  %v3769_v32 = vsel %vm3753_vm0, %v3568_v18, 0  ;;  %v15487_v18 = vld [vmem:[#allocation106_spill] sm:$0xff] }
 0x2f1   : > { %v6260_v6 = vpop.f32.mrf.mxu1  ;;  %v3770_v8 = vsel %vm3754_vm1, %v13528_v23, 0  ;;  %3788 = vst.msk [vmem:[#allocation2 + $0x340] sm:$0xff] %vm13043_vm6, %v3769_v32  ;;  %v6165_v15 = vadd.f32 %v15487_v18, %v13066_v60  ;;  %v8850_v60 = vld [vmem:[%s14656_s1 + $0x478] sm:$0xf0]  ;;  %v15489_v32 = vld [vmem:[#allocation131_spill] sm:$0xff] }
 0x2f2   : > { %v6261_v35 = vadd.f32 %v6260_v6, %v6212_v47  ;;  %6406 = vmatmul.bf16.gmra.mxu0 %v13503_v56  ;;  %3789 = vst.msk [vmem:[#allocation2 + $0x378] sm:$0xff] %vm13043_vm6, %v3770_v8  ;;  %v9398_v47 = vld [vmem:[%s14656_s1 + $0x374] sm:$0xf]  ;;  %v6168_v8 = vadd.f32 %v15489_v32, %v13085_v13  ;;  %v15490_v32 = vld [vmem:[#allocation58_spill] sm:$0xff] }
 0x2f3   : > { %v6306_v29 = vpop.f32.mrf.mxu2  ;;  %v13558_v53 = vpop.f32.mrf.mxu3  ;;  %v9446_v18 = vld [vmem:[%s14656_s1 + $0x4f4] sm:$0xf] }
 0x2f4   : > { %9148 = vmatmul.msk.bf16.gmra.mxu1 %vm633_vm12, %v13513_v37  ;;  %v13562_v10 = vadd.f32 %v6306_v29, %v6258_v14  ;;  %v9430_v14 = vld [vmem:[%s14656_s1 + $0x474] sm:$0xf]  ;;  %v8722_v29 = vld [vmem:[%s14656_s1 + $0x378] sm:$0xf0] }
 0x2f5   : > { %v9414_v13 = vld [vmem:[%s14656_s1 + $0x3f4] sm:$0xf] }
 0x2f7   : > { %v6213_v59 = vpop.f32.mrf.mxu0 }
 0x2f8   : > { %6504 = vmatmul.bf16.gmra.mxu2 %v15488_v62  ;;  %v6214_v0 = vadd.f32 %v6213_v59, %v6165_v15  ;;  %v8272_v16 = vld [vmem:[#allocation2 + $0x340] sm:$0xf]  ;;  %v9280_v44 = vld [vmem:[#allocation2 + $0x344] sm:$0xf]  ;;  %v8914_v15 = vld [vmem:[%s14656_s1 + $0x4f8] sm:$0xf0]  ;;  %v8725_v62 = vor.u32 %v9398_v47, %v8722_v29  ;;  %v6170_v29 = vadd.f32 %v13073_v55, %v13139_v3 }
 0x2f9   : > { %v6262_v41 = vpop.f32.mrf.mxu1  ;;  %v9287_v6 = vld [vmem:[#allocation2 + $0x374] sm:$0xf0]  ;;  %v8274_v50 = vld [vmem:[#allocation2 + $0x378] sm:$0xf0]  ;;  %v9396_v55 = vld [vmem:[%s14656_s1 + $0x364] sm:$0xf] }
 0x2fa   : > { %v6263_v34 = vadd.f32 %v6262_v41, %v6214_v0  ;;  %v13591_v59 = vor.u32 %v9287_v6, %v8272_v16  ;;  %v13593_v41 = vor.u32 %v9280_v44, %v8274_v50  ;;  %v8917_v0 = vor.u32 %v9446_v18, %v8914_v15  ;;  %6760 = vmatpush.bf16.msrb.mxu0 %v8725_v62 }
 0x2fb   : > { %v6309_v43 = vpop.f32.mrf.mxu2  ;;  %v13567_v11 = vpop.f32.mrf.mxu3 }
 0x2fc   : > { %v13569_v7 = vadd.f32 %v6309_v43, %v6261_v35  ;;  %v8853_v35 = vor.u32 %v9430_v14, %v8850_v60  ;;  %v8786_v43 = vld [vmem:[%s14656_s1 + $0x3f8] sm:$0xf0]  ;;  %6907 = vmatpush.bf16.msrb.mxu3 %v8917_v0 }
 0x2fd   : > { %v8789_v58 = vor.u32 %v9414_v13, %v8786_v43  ;;  %v9428_v43 = vld [vmem:[%s14656_s1 + $0x464] sm:$0xf] }
 0x2fe   : > { %6858 = vmatpush.bf16.msrb.mxu2 %v8853_v35 }
 0x2ff   : > { %v6216_v14 = vpop.f32.mrf.mxu0  ;;  %6809 = vmatpush.bf16.msrb.mxu1 %v8789_v58 }
 0x300   : > { %6558 = vmatmul.bf16.gmra.mxu3 %v15490_v32  ;;  %v6217_v16 = vadd.f32 %v6216_v14, %v6168_v8  ;;  %v15491_v8 = vld [vmem:[#allocation42_spill] sm:$0xff]  ;;  %v8714_v14 = vld [vmem:[%s14656_s1 + $0x368] sm:$0xf0] }
 0x301   : > { %v6265_v60 = vpop.f32.mrf.mxu1  ;;  %v8906_v32 = vld [vmem:[%s14656_s1 + $0x4e8] sm:$0xf0] }
 0x302   : > { %v6266_v6 = vadd.f32 %v6265_v60, %v6217_v16  ;;  %6411 = vmatmul.bf16.gmra.mxu0 %v13591_v59  ;;  %v9444_v60 = vld [vmem:[%s14656_s1 + $0x4e4] sm:$0xf]  ;;  %v6329_v16 = vadd.f32 %v13132_v2, %v13156_v1  ;;  %v15494_v1 = vld [vmem:[#allocation45_spill] sm:$0xff] }
 0x303   : > { %v6311_v44 = vpop.f32.mrf.mxu2  ;;  %v13605_v50 = vpop.f32.mrf.mxu3 }
 0x304   : > { %9149 = vmatmul.msk.bf16.gmra.mxu1 %vm633_vm12, %v13593_v41  ;;  %v13607_v47 = vadd.f32 %v6311_v44, %v6263_v34  ;;  %v8842_v34 = vld [vmem:[%s14656_s1 + $0x468] sm:$0xf0]  ;;  %v8909_v44 = vor.u32 %v9444_v60, %v8906_v32  ;;  %v6331_v32 = vadd.f32 %v13144_v63, %v13210_v31  ;;  %v9394_v31 = vld [vmem:[%s14656_s1 + $0x354] sm:$0xf] }
 0x305   : > { %v8845_v3 = vor.u32 %v9428_v43, %v8842_v34  ;;  %v15495_v34 = vld [vmem:[#allocation17_spill] sm:$0xff] }
 0x306   : > { %6908 = vmatpush.bf16.msrb.mxu3 %v8909_v44 }
 0x307   : > { %v6218_v35 = vpop.f32.mrf.mxu0  ;;  %6859 = vmatpush.bf16.msrb.mxu2 %v8845_v3 }
 0x308   : > { %6509 = vmatmul.bf16.gmra.mxu2 %v15491_v8  ;;  %v6219_v15 = vadd.f32 %v6218_v35, %v6170_v29  ;;  %v9412_v29 = vld [vmem:[%s14656_s1 + $0x3e4] sm:$0xf]  ;;  %v8778_v35 = vld [vmem:[%s14656_s1 + $0x3e8] sm:$0xf0] }
 0x309   : > { %v6267_v18 = vpop.f32.mrf.mxu1 }
 0x30a   : > { %v6268_v58 = vadd.f32 %v6267_v18, %v6219_v15  ;;  %v15492_v15 = vld [vmem:[#allocation63_spill] sm:$0xff] }
 0x30b   : > { %v6314_v62 = vpop.f32.mrf.mxu2  ;;  %v13612_v0 = vpop.f32.mrf.mxu3 }
 0x30c   : > { %v13614_v13 = vadd.f32 %v6314_v62, %v6266_v6  ;;  %v8717_v6 = vor.u32 %v9396_v55, %v8714_v14  ;;  %v8781_v62 = vor.u32 %v9412_v29, %v8778_v35 }
 0x30e   : > { %6761 = vmatpush.bf16.msrb.mxu0 %v8717_v6  ;;  %6810 = vmatpush.bf16.msrb.mxu1 %v8781_v62  ;;  %v9442_v62 = vld [vmem:[%s14656_s1 + $0x4d4] sm:$0xf] }
 0x30f   : > { %v6377_v18 = vpop.f32.mrf.mxu0 }
 0x310   : > { %6719 = vmatmul.bf16.vlgmr.msra.gmra.mxu3 %v15492_v15  ;;  %v6378_v43 = vadd.f32 %v6377_v18, %v6329_v16  ;;  %v15496_v16 = vld [vmem:[#allocation62_spill] sm:$0xff] }
 0x311   : > { %v6426_v8 = vpop.f32.mrf.mxu1  ;;  %v8706_v15 = vld [vmem:[%s14656_s1 + $0x358] sm:$0xf0] }
 0x312   : > { %v13643_v2 = vadd.f32 %v6426_v8, %v6378_v43  ;;  %6572 = vmatmul.bf16.vlgmr.msra.gmra.mxu0 %v15494_v1  ;;  %v9426_v8 = vld [vmem:[%s14656_s1 + $0x454] sm:$0xf]  ;;  %v6334_v43 = vadd.f32 %v13203_v20, %v13227_v33  ;;  %v8709_v1 = vor.u32 %v9394_v31, %v8706_v15 }
 0x313   : > { %v6316_v55 = vpop.f32.mrf.mxu2  ;;  %v13647_v14 = vpop.f32.mrf.mxu3  ;;  %v15501_v31 = vld [vmem:[#allocation49_spill] sm:$0xff] }
 0x314   : > { %15493 = vst [vmem:[#allocation10_spill] sm:$0xff] %v13643_v2  ;;  %6621 = vmatmul.bf16.vlgmr.msra.gmra.mxu1 %v15495_v34  ;;  %v13649_v60 = vadd.f32 %v6316_v55, %v6268_v58  ;;  %v8834_v58 = vld [vmem:[%s14656_s1 + $0x458] sm:$0xf0]  ;;  %v9410_v55 = vld [vmem:[%s14656_s1 + $0x3d4] sm:$0xf]  ;;  %6762 = vmatpush.bf16.msrb.mxu0 %v8709_v1 }
 0x315   : > { %v8837_v63 = vor.u32 %v9426_v8, %v8834_v58  ;;  %v8898_v34 = vld [vmem:[%s14656_s1 + $0x4d8] sm:$0xf0]  ;;  %v15500_v58 = vld [vmem:[#allocation4_spill] sm:$0xff] }
 0x316   : > { %v15550_v2 = vld [vmem:[#allocation70_spill] sm:$0xff] }
 0x317   : > { %v6379_v3 = vpop.f32.mrf.mxu0  ;;  %6860 = vmatpush.bf16.msrb.mxu2 %v8837_v63 }
 0x318   : > { %6670 = vmatmul.bf16.vlgmr.msra.gmra.mxu2 %v15496_v16  ;;  %v6380_v6 = vadd.f32 %v6379_v3, %v6331_v32  ;;  %v8770_v32 = vld [vmem:[%s14656_s1 + $0x3d8] sm:$0xf0]  ;;  %v15498_v16 = vld [vmem:[#allocation67_spill] sm:$0xff] }
 0x319   : > { %v6428_v29 = vpop.f32.mrf.mxu1  ;;  %v8773_v20 = vor.u32 %v9410_v55, %v8770_v32 }
 0x31a   : > { %v13654_v44 = vadd.f32 %v6428_v29, %v6380_v6  ;;  %v8901_v6 = vor.u32 %v9442_v62, %v8898_v34  ;;  %v15502_v34 = vld [vmem:[#allocation66_spill] sm:$0xff] }
 0x31b   : > { %v13656_v35 = vpop.f32.mrf.mxu2  ;;  %v13658_v18 = vpop.f32.mrf.mxu3  ;;  %6811 = vmatpush.bf16.msrb.mxu1 %v8773_v20  ;;  %v9440_v20 = vld [vmem:[%s14656_s1 + $0x4c4] sm:$0xf] }
 0x31c   : > { %15497 = vst [vmem:[#allocation9_spill] sm:$0xff] %v13654_v44  ;;  %6909 = vmatpush.bf16.msrb.mxu3 %v8901_v6  ;;  %v8698_v6 = vld [vmem:[%s14656_s1 + $0x348] sm:$0xf0]  ;;  %v15542_v44 = vld [vmem:[#allocation61_spill] sm:$0xff] }
 0x31f   : > { %v6382_v3 = vpop.f32.mrf.mxu0 }
 0x320   : > { %6724 = vmatmul.bf16.gmra.mxu3 %v15498_v16  ;;  %v6383_v33 = vadd.f32 %v6382_v3, %v6334_v43  ;;  %v6336_v16 = vadd.f32 %v13215_v45, %v13281_v38  ;;  %v9424_v3 = vld [vmem:[%s14656_s1 + $0x444] sm:$0xf] }
 0x321   : > { %v6431_v29 = vpop.f32.mrf.mxu1  ;;  %v9392_v38 = vld [vmem:[%s14656_s1 + $0x344] sm:$0xf] }
 0x322   : > { %v13687_v8 = vadd.f32 %v6431_v29, %v6383_v33  ;;  %6577 = vmatmul.bf16.gmra.mxu0 %v15500_v58  ;;  %v8826_v29 = vld [vmem:[%s14656_s1 + $0x448] sm:$0xf0]  ;;  %v6339_v33 = vadd.f32 %v13274_v19, %v13298_v21  ;;  %v8701_v58 = vor.u32 %v9392_v38, %v8698_v6 }
 0x323   : > { %v13691_v15 = vpop.f32.mrf.mxu2  ;;  %v13693_v5 = vpop.f32.mrf.mxu3  ;;  %v8829_v45 = vor.u32 %v9424_v3, %v8826_v29  ;;  %v15506_v38 = vld [vmem:[#allocation56_spill] sm:$0xff] }
 0x324   : > { %15499 = vst [vmem:[#allocation50_spill] sm:$0xff] %v13687_v8  ;;  %6626 = vmatmul.bf16.gmra.mxu1 %v15501_v31  ;;  %v8890_v31 = vld [vmem:[%s14656_s1 + $0x4c8] sm:$0xf0]  ;;  %6763 = vmatpush.bf16.msrb.mxu0 %v8701_v58 }
 0x325   : > { %6861 = vmatpush.bf16.msrb.mxu2 %v8829_v45  ;;  %v8893_v3 = vor.u32 %v9440_v20, %v8890_v31  ;;  %v15507_v6 = vld [vmem:[#allocation12_spill] sm:$0xff] }
 0x326   : > { %v15508_v31 = vld [vmem:[#allocation72_spill] sm:$0xff] }
 0x327   : > { %v6384_v63 = vpop.f32.mrf.mxu0  ;;  %6910 = vmatpush.bf16.msrb.mxu3 %v8893_v3  ;;  %v8690_v3 = vld [vmem:[%s14656_s1 + $0x338] sm:$0xf0] }
 0x328   : > { %6675 = vmatmul.bf16.gmra.mxu2 %v15502_v34  ;;  %v6385_v43 = vadd.f32 %v6384_v63, %v6336_v16  ;;  %v9408_v16 = vld [vmem:[%s14656_s1 + $0x3c4] sm:$0xf]  ;;  %v8762_v63 = vld [vmem:[%s14656_s1 + $0x3c8] sm:$0xf0] }
 0x329   : > { %v6433_v62 = vpop.f32.mrf.mxu1  ;;  %v8765_v19 = vor.u32 %v9408_v16, %v8762_v63 }
 0x32a   : > { %v13698_v1 = vadd.f32 %v6433_v62, %v6385_v43  ;;  %v15504_v43 = vld [vmem:[#allocation73_spill] sm:$0xff] }
 0x32b   : > { %v13700_v55 = vpop.f32.mrf.mxu2  ;;  %v13702_v32 = vpop.f32.mrf.mxu3  ;;  %6812 = vmatpush.bf16.msrb.mxu1 %v8765_v19  ;;  %v9438_v19 = vld [vmem:[%s14656_s1 + $0x4b4] sm:$0xf] }
 0x32c   : > { %15503 = vst [vmem:[#allocation106_spill] sm:$0xff] %v13698_v1 }
 0x32f   : > { %v6387_v62 = vpop.f32.mrf.mxu0 }
 0x330   : > { %6729 = vmatmul.bf16.gmra.mxu3 %v15504_v43  ;;  %v6388_v21 = vadd.f32 %v6387_v62, %v6339_v33  ;;  %v6341_v43 = vadd.f32 %v13286_v42, %v13352_v36  ;;  %v9422_v62 = vld [vmem:[%s14656_s1 + $0x434] sm:$0xf] }
 0x331   : > { %v6436_v34 = vpop.f32.mrf.mxu1  ;;  %v9390_v36 = vld [vmem:[%s14656_s1 + $0x334] sm:$0xf] }
 0x332   : > { %v13731_v29 = vadd.f32 %v6436_v34, %v6388_v21  ;;  %6582 = vmatmul.bf16.gmra.mxu0 %v15506_v38  ;;  %v8818_v34 = vld [vmem:[%s14656_s1 + $0x438] sm:$0xf0]  ;;  %v6344_v21 = vadd.f32 %v13345_v27, %v13369_v51  ;;  %v8693_v38 = vor.u32 %v9390_v36, %v8690_v3  ;;  %v15512_v36 = vld [vmem:[#allocation43_spill] sm:$0xff]  ;;  %v15513_v3 = vld [vmem:[#allocation16_spill] sm:$0xff] }
 0x333   : > { %v13735_v1 = vpop.f32.mrf.mxu2  ;;  %v13737_v8 = vpop.f32.mrf.mxu3  ;;  %v8821_v42 = vor.u32 %v9422_v62, %v8818_v34 }
 0x334   : > { %15505 = vst [vmem:[#allocation11_spill] sm:$0xff] %v13731_v29  ;;  %6631 = vmatmul.bf16.gmra.mxu1 %v15507_v6  ;;  %v8882_v6 = vld [vmem:[%s14656_s1 + $0x4b8] sm:$0xf0]  ;;  %6764 = vmatpush.bf16.msrb.mxu0 %v8693_v38 }
 0x335   : > { %6862 = vmatpush.bf16.msrb.mxu2 %v8821_v42  ;;  %v8885_v62 = vor.u32 %v9438_v19, %v8882_v6  ;;  %v15514_v6 = vld [vmem:[#allocation78_spill] sm:$0xff] }
 0x337   : > { %v6389_v45 = vpop.f32.mrf.mxu0  ;;  %6911 = vmatpush.bf16.msrb.mxu3 %v8885_v62  ;;  %v8682_v62 = vld [vmem:[%s14656_s1 + $0x328] sm:$0xf0] }
 0x338   : > { %6680 = vmatmul.bf16.gmra.mxu2 %v15508_v31  ;;  %v6390_v33 = vadd.f32 %v6389_v45, %v6341_v43  ;;  %v9406_v43 = vld [vmem:[%s14656_s1 + $0x3b4] sm:$0xf]  ;;  %v8754_v45 = vld [vmem:[%s14656_s1 + $0x3b8] sm:$0xf0] }
 0x339   : > { %v6438_v20 = vpop.f32.mrf.mxu1  ;;  %v8757_v27 = vor.u32 %v9406_v43, %v8754_v45 }
 0x33a   : > { %v13742_v58 = vadd.f32 %v6438_v20, %v6390_v33  ;;  %v15510_v33 = vld [vmem:[#allocation79_spill] sm:$0xff] }
 0x33b   : > { %v13744_v16 = vpop.f32.mrf.mxu2  ;;  %v13746_v63 = vpop.f32.mrf.mxu3  ;;  %6813 = vmatpush.bf16.msrb.mxu1 %v8757_v27  ;;  %v9436_v27 = vld [vmem:[%s14656_s1 + $0x4a4] sm:$0xf] }
 0x33c   : > { %15509 = vst [vmem:[#allocation131_spill] sm:$0xff] %v13742_v58 }
 0x33f   : > { %v6392_v20 = vpop.f32.mrf.mxu0 }
 0x340   : > { %6734 = vmatmul.bf16.gmra.mxu3 %v15510_v33  ;;  %v6393_v51 = vadd.f32 %v6392_v20, %v6344_v21  ;;  %v6346_v33 = vadd.f32 %v13357_v30, %v13423_v26  ;;  %v9420_v20 = vld [vmem:[%s14656_s1 + $0x424] sm:$0xf] }
 0x341   : > { %v6441_v31 = vpop.f32.mrf.mxu1  ;;  %v9388_v26 = vld [vmem:[%s14656_s1 + $0x324] sm:$0xf] }
 0x342   : > { %v13775_v34 = vadd.f32 %v6441_v31, %v6393_v51  ;;  %6587 = vmatmul.bf16.gmra.mxu0 %v15512_v36  ;;  %v8810_v31 = vld [vmem:[%s14656_s1 + $0x428] sm:$0xf0]  ;;  %v6349_v51 = vadd.f32 %v13416_v12, %v13440_v40  ;;  %v8685_v36 = vor.u32 %v9388_v26, %v8682_v62  ;;  %v15518_v26 = vld [vmem:[#allocation7_spill] sm:$0xff]  ;;  %v15519_v62 = vld [vmem:[#allocation30_spill] sm:$0xff] }
 0x343   : > { %v13779_v58 = vpop.f32.mrf.mxu2  ;;  %v13781_v29 = vpop.f32.mrf.mxu3  ;;  %v8813_v30 = vor.u32 %v9420_v20, %v8810_v31 }
 0x344   : > { %15511 = vst [vmem:[#allocation58_spill] sm:$0xff] %v13775_v34  ;;  %6636 = vmatmul.bf16.gmra.mxu1 %v15513_v3  ;;  %v8874_v3 = vld [vmem:[%s14656_s1 + $0x4a8] sm:$0xf0]  ;;  %6765 = vmatpush.bf16.msrb.mxu0 %v8685_v36 }
 0x345   : > { %6863 = vmatpush.bf16.msrb.mxu2 %v8813_v30  ;;  %v8877_v20 = vor.u32 %v9436_v27, %v8874_v3  ;;  %v15520_v3 = vld [vmem:[#allocation83_spill] sm:$0xff] }
 0x347   : > { %v6394_v42 = vpop.f32.mrf.mxu0  ;;  %6912 = vmatpush.bf16.msrb.mxu3 %v8877_v20  ;;  %v8674_v20 = vld [vmem:[%s14656_s1 + $0x318] sm:$0xf0] }
 0x348   : > { %6685 = vmatmul.bf16.gmra.mxu2 %v15514_v6  ;;  %v6395_v21 = vadd.f32 %v6394_v42, %v6346_v33  ;;  %v9404_v33 = vld [vmem:[%s14656_s1 + $0x3a4] sm:$0xf]  ;;  %v8746_v42 = vld [vmem:[%s14656_s1 + $0x3a8] sm:$0xf0] }
 0x349   : > { %v6443_v19 = vpop.f32.mrf.mxu1  ;;  %v8749_v12 = vor.u32 %v9404_v33, %v8746_v42 }
 0x34a   : > { %v13786_v38 = vadd.f32 %v6443_v19, %v6395_v21  ;;  %v15516_v21 = vld [vmem:[#allocation84_spill] sm:$0xff] }
 0x34b   : > { %v13788_v43 = vpop.f32.mrf.mxu2  ;;  %v13790_v45 = vpop.f32.mrf.mxu3  ;;  %6814 = vmatpush.bf16.msrb.mxu1 %v8749_v12  ;;  %v9434_v12 = vld [vmem:[%s14656_s1 + $0x494] sm:$0xf] }
 0x34c   : > { %15515 = vst [vmem:[#allocation42_spill] sm:$0xff] %v13786_v38 }
 0x34f   : > { %v6397_v19 = vpop.f32.mrf.mxu0 }
 0x350   : > { %6739 = vmatmul.bf16.gmra.mxu3 %v15516_v21  ;;  %v6398_v40 = vadd.f32 %v6397_v19, %v6349_v51  ;;  %v6351_v21 = vadd.f32 %v13428_v28, %v13494_v39  ;;  %v9418_v19 = vld [vmem:[%s14656_s1 + $0x414] sm:$0xf] }
 0x351   : > { %v6446_v6 = vpop.f32.mrf.mxu1  ;;  %v9386_v39 = vld [vmem:[%s14656_s1 + $0x314] sm:$0xf] }
 0x352   : > { %v13819_v31 = vadd.f32 %v6446_v6, %v6398_v40  ;;  %6592 = vmatmul.bf16.gmra.mxu0 %v15518_v26  ;;  %v8802_v6 = vld [vmem:[%s14656_s1 + $0x418] sm:$0xf0]  ;;  %v6354_v40 = vadd.f32 %v13487_v54, %v13511_v4  ;;  %v8677_v26 = vor.u32 %v9386_v39, %v8674_v20  ;;  %v15524_v39 = vld [vmem:[#allocation28_spill] sm:$0xff]  ;;  %v15525_v20 = vld [vmem:[#allocation3_spill] sm:$0xff] }
 0x353   : > { %v13823_v38 = vpop.f32.mrf.mxu2  ;;  %v13825_v34 = vpop.f32.mrf.mxu3  ;;  %v8805_v28 = vor.u32 %v9418_v19, %v8802_v6 }
 0x354   : > { %15517 = vst [vmem:[#allocation63_spill] sm:$0xff] %v13819_v31  ;;  %6641 = vmatmul.bf16.gmra.mxu1 %v15519_v62  ;;  %v8866_v62 = vld [vmem:[%s14656_s1 + $0x498] sm:$0xf0]  ;;  %6766 = vmatpush.bf16.msrb.mxu0 %v8677_v26 }
 0x355   : > { %6864 = vmatpush.bf16.msrb.mxu2 %v8805_v28  ;;  %v8869_v19 = vor.u32 %v9434_v12, %v8866_v62  ;;  %v15526_v62 = vld [vmem:[#allocation89_spill] sm:$0xff] }
 0x357   : > { %v6399_v30 = vpop.f32.mrf.mxu0  ;;  %6913 = vmatpush.bf16.msrb.mxu3 %v8869_v19  ;;  %v8666_v19 = vld [vmem:[%s14656_s1 + $0x308] sm:$0xf0] }
 0x358   : > { %6690 = vmatmul.bf16.gmra.mxu2 %v15520_v3  ;;  %v6400_v51 = vadd.f32 %v6399_v30, %v6351_v21  ;;  %v9402_v21 = vld [vmem:[%s14656_s1 + $0x394] sm:$0xf]  ;;  %v8738_v30 = vld [vmem:[%s14656_s1 + $0x398] sm:$0xf0] }
 0x359   : > { %v6448_v27 = vpop.f32.mrf.mxu1  ;;  %v8741_v54 = vor.u32 %v9402_v21, %v8738_v30 }
 0x35a   : > { %v13830_v36 = vadd.f32 %v6448_v27, %v6400_v51  ;;  %v15522_v51 = vld [vmem:[#allocation90_spill] sm:$0xff] }
 0x35b   : > { %v13832_v33 = vpop.f32.mrf.mxu2  ;;  %v13834_v42 = vpop.f32.mrf.mxu3  ;;  %6815 = vmatpush.bf16.msrb.mxu1 %v8741_v54  ;;  %v9432_v54 = vld [vmem:[%s14656_s1 + $0x484] sm:$0xf] }
 0x35c   : > { %15521 = vst [vmem:[#allocation45_spill] sm:$0xff] %v13830_v36 }
 0x35f   : > { %v6402_v27 = vpop.f32.mrf.mxu0 }
 0x360   : > { %6744 = vmatmul.bf16.gmra.mxu3 %v15522_v51  ;;  %v6403_v4 = vadd.f32 %v6402_v27, %v6354_v40  ;;  %v6356_v51 = vadd.f32 %v13499_v9, %v13562_v10  ;;  %v9416_v27 = vld [vmem:[%s14656_s1 + $0x404] sm:$0xf] }
 0x361   : > { %v6451_v3 = vpop.f32.mrf.mxu1  ;;  %v9384_v10 = vld [vmem:[%s14656_s1 + $0x304] sm:$0xf] }
 0x362   : > { %v13863_v6 = vadd.f32 %v6451_v3, %v6403_v4  ;;  %6597 = vmatmul.bf16.gmra.mxu0 %v15524_v39  ;;  %v8794_v3 = vld [vmem:[%s14656_s1 + $0x408] sm:$0xf0]  ;;  %v6359_v4 = vadd.f32 %v13558_v53, %v13569_v7  ;;  %v8669_v39 = vor.u32 %v9384_v10, %v8666_v19  ;;  %v15530_v10 = vld [vmem:[#allocation13_spill] sm:$0xff]  ;;  %v15531_v19 = vld [vmem:[#allocation34_spill] sm:$0xff] }
 0x363   : > { %v13867_v36 = vpop.f32.mrf.mxu2  ;;  %v13869_v31 = vpop.f32.mrf.mxu3  ;;  %v8797_v9 = vor.u32 %v9416_v27, %v8794_v3 }
 0x364   : > { %15523 = vst [vmem:[#allocation17_spill] sm:$0xff] %v13863_v6  ;;  %6646 = vmatmul.bf16.gmra.mxu1 %v15525_v20  ;;  %v8858_v20 = vld [vmem:[%s14656_s1 + $0x488] sm:$0xf0]  ;;  %6767 = vmatpush.bf16.msrb.mxu0 %v8669_v39 }
 0x365   : > { %6865 = vmatpush.bf16.msrb.mxu2 %v8797_v9  ;;  %v8861_v27 = vor.u32 %v9432_v54, %v8858_v20  ;;  %v15532_v20 = vld [vmem:[#allocation99_spill] sm:$0xff] }
 0x367   : > { %v6404_v28 = vpop.f32.mrf.mxu0  ;;  %6914 = vmatpush.bf16.msrb.mxu3 %v8861_v27  ;;  %v8978_v27 = vld [vmem:[%s14656_s1 + $0x578] sm:$0xf0] }
 0x368   : > { %6695 = vmatmul.bf16.gmra.mxu2 %v15526_v62  ;;  %v6405_v40 = vadd.f32 %v6404_v28, %v6356_v51  ;;  %v9400_v51 = vld [vmem:[%s14656_s1 + $0x384] sm:$0xf]  ;;  %v8730_v28 = vld [vmem:[%s14656_s1 + $0x388] sm:$0xf0] }
 0x369   : > { %v6453_v12 = vpop.f32.mrf.mxu1  ;;  %v8733_v53 = vor.u32 %v9400_v51, %v8730_v28 }
 0x36a   : > { %v13874_v26 = vadd.f32 %v6453_v12, %v6405_v40  ;;  %v15528_v40 = vld [vmem:[#allocation100_spill] sm:$0xff] }
 0x36b   : > { %v13876_v21 = vpop.f32.mrf.mxu2  ;;  %v13878_v30 = vpop.f32.mrf.mxu3  ;;  %6816 = vmatpush.bf16.msrb.mxu1 %v8733_v53  ;;  %v9502_v53 = vld [vmem:[%s14656_s1 + $0x6b4] sm:$0xf] }
 0x36c   : > { %15527 = vst [vmem:[#allocation62_spill] sm:$0xff] %v13874_v26 }
 0x36f   : > { %v6407_v12 = vpop.f32.mrf.mxu0 }
 0x370   : > { %6749 = vmatmul.bf16.gmra.mxu3 %v15528_v40  ;;  %v6408_v7 = vadd.f32 %v6407_v12, %v6359_v4  ;;  %v6361_v40 = vadd.f32 %v13567_v11, %v13607_v47  ;;  %v9494_v12 = vld [vmem:[%s14656_s1 + $0x674] sm:$0xf] }
 0x371   : > { %v6456_v62 = vpop.f32.mrf.mxu1  ;;  %v9462_v11 = vld [vmem:[%s14656_s1 + $0x574] sm:$0xf] }
 0x372   : > { %v13907_v3 = vadd.f32 %v6456_v62, %v6408_v7  ;;  %6602 = vmatmul.bf16.gmra.mxu0 %v15530_v10  ;;  %v9106_v62 = vld [vmem:[%s14656_s1 + $0x678] sm:$0xf0]  ;;  %v8981_v10 = vor.u32 %v9462_v11, %v8978_v27 }
 0x373   : > { %v13911_v26 = vpop.f32.mrf.mxu2  ;;  %v13913_v6 = vpop.f32.mrf.mxu3  ;;  %v9109_v47 = vor.u32 %v9494_v12, %v9106_v62  ;;  %v9138_v7 = vld [vmem:[%s14656_s1 + $0x6b8] sm:$0xf0]  ;;  %v15534_v62 = vld [vmem:[#allocation105_spill] sm:$0xff] }
 0x374   : > { %15529 = vst [vmem:[#allocation67_spill] sm:$0xff] %v13907_v3  ;;  %6651 = vmatmul.bf16.gmra.mxu1 %v15531_v19  ;;  %v9141_v19 = vor.u32 %v9502_v53, %v9138_v7  ;;  %6956 = vmatpush.bf16.msra.mxu0 %v8981_v10  ;;  %v15536_v53 = vld [vmem:[#allocation60_spill] sm:$0xff]  ;;  %v15537_v7 = vld [vmem:[#allocation41_spill] sm:$0xff]  ;;  %v6366_v10 = vadd.f32 %v13612_v0, %v13649_v60  ;;  %v9460_v60 = vld [vmem:[%s14656_s1 + $0x564] sm:$0xf] }
 0x375   : > { %7054 = vmatpush.bf16.msra.mxu2 %v9109_v47  ;;  %v9098_v0 = vld [vmem:[%s14656_s1 + $0x668] sm:$0xf0]  ;;  %v15541_v3 = vld [vmem:[#allocation65_spill] sm:$0xff] }
 0x376   : > { %7107 = vmatpush.bf16.msra.mxu3 %v9141_v19 }
 0x377   : > { %v6409_v9 = vpop.f32.mrf.mxu0 }
 0x378   : > { %6700 = vmatmul.bf16.gmra.mxu2 %v15532_v20  ;;  %v6410_v4 = vadd.f32 %v6409_v9, %v6361_v40  ;;  %v9478_v40 = vld [vmem:[%s14656_s1 + $0x5f4] sm:$0xf]  ;;  %v9042_v9 = vld [vmem:[%s14656_s1 + $0x5f8] sm:$0xf0]  ;;  %v6364_v20 = vadd.f32 %v13605_v50, %v13614_v13  ;;  %v9531_v50 = vld [vmem:[%s14657_s2] sm:$0x3] }
 0x379   : > { %v6458_v54 = vpop.f32.mrf.mxu1  ;;  %v13962_v13 = vperm.slane %v9531_v50, 1  ;;  %v9034_v50 = vld [vmem:[%s14656_s1 + $0x5e8] sm:$0xf0] }
 0x37a   : > { %v13918_v39 = vadd.f32 %v6458_v54, %v6410_v4  ;;  %v9045_v54 = vor.u32 %v9478_v40, %v9042_v9  ;;  %v15538_v9 = vld [vmem:[#allocation104_spill] sm:$0xff] }
 0x37b   : > { %v13920_v51 = vpop.f32.mrf.mxu2  ;;  %v13922_v28 = vpop.f32.mrf.mxu3 }
 0x37c   : > { %15533 = vst [vmem:[#allocation4_spill] sm:$0xff] %v13918_v39  ;;  %7005 = vmatpush.bf16.msra.mxu1 %v9045_v54 }
 0x37f   : > { %v6412_v4 = vpop.f32.mrf.mxu0 }
 0x380   : > { %6754 = vmatmul.bf16.gmra.mxu3 %v15534_v62  ;;  %v6413_v11 = vadd.f32 %v6412_v4, %v6364_v20  ;;  %v6476_v20 = vadd.f32 %v13656_v35, %v13962_v13  ;;  %v8970_v35 = vld [vmem:[%s14656_s1 + $0x568] sm:$0xf0] }
 0x381   : > { %v6461_v12 = vpop.f32.mrf.mxu1 }
 0x382   : > { %v13951_v27 = vadd.f32 %v6461_v12, %v6413_v11  ;;  %6607 = vmatmul.bf16.gmra.mxu0 %v15536_v53  ;;  %v9492_v11 = vld [vmem:[%s14656_s1 + $0x664] sm:$0xf] }
 0x383   : > { %v13955_v39 = vpop.f32.mrf.mxu2  ;;  %v13957_v47 = vpop.f32.mrf.mxu3  ;;  %v9101_v53 = vor.u32 %v9492_v11, %v9098_v0  ;;  %v15540_v11 = vld [vmem:[#allocation111_spill] sm:$0xff] }
 0x384   : > { %15535 = vst [vmem:[#allocation49_spill] sm:$0xff] %v13951_v27  ;;  %6656 = vmatmul.bf16.gmra.mxu1 %v15537_v7  ;;  %v9476_v7 = vld [vmem:[%s14656_s1 + $0x5e4] sm:$0xf] }
 0x385   : > { %7055 = vmatpush.bf16.msra.mxu2 %v9101_v53 }
 0x387   : > { %v6414_v19 = vpop.f32.mrf.mxu0 }
 0x388   : > { %6705 = vmatmul.bf16.gmra.mxu2 %v15538_v9  ;;  %v6415_v54 = vadd.f32 %v6414_v19, %v6366_v10  ;;  %v8973_v10 = vor.u32 %v9460_v60, %v8970_v35  ;;  %v9037_v19 = vor.u32 %v9476_v7, %v9034_v50  ;;  %v15543_v7 = vld [vmem:[#allocation112_spill] sm:$0xff] }
 0x389   : > { %v6463_v40 = vpop.f32.mrf.mxu1 }
 0x38a   : > { %v13969_v4 = vadd.f32 %v6463_v40, %v6415_v54  ;;  %v6525_v40 = vadd.f32 %v13647_v14, %v6476_v20  ;;  %6957 = vmatpush.bf16.msra.mxu0 %v8973_v10  ;;  %7006 = vmatpush.bf16.msra.mxu1 %v9037_v19  ;;  %v6481_v10 = vadd.f32 %v13700_v55, %v13962_v13  ;;  %v8962_v55 = vld [vmem:[%s14656_s1 + $0x558] sm:$0xf0] }
 0x38b   : > { %v13971_v12 = vpop.f32.mrf.mxu2  ;;  %v13973_v62 = vpop.f32.mrf.mxu3 }
 0x38c   : > { %15539 = vst [vmem:[#allocation66_spill] sm:$0xff] %v13969_v4  ;;  %v6478_v4 = vadd.f32 %v13691_v15, %v13962_v13 }
 0x38e   : > { %v6527_v14 = vadd.f32 %v13658_v18, %v6478_v4  ;;  %v9090_v18 = vld [vmem:[%s14656_s1 + $0x658] sm:$0xf0] }
 0x38f   : > { %v6573_v9 = vpop.f32.mrf.mxu0 }
 0x390   : > { %6915 = vmatmul.bf16.vlgmr.msrb.gmra.mxu3 %v15540_v11  ;;  %v6574_v0 = vadd.f32 %v6573_v9, %v6525_v40  ;;  %v9130_v11 = vld [vmem:[%s14656_s1 + $0x6a8] sm:$0xf0] }
 0x391   : > { %v6622_v54 = vpop.f32.mrf.mxu1 }
 0x392   : > { %v6623_v27 = vadd.f32 %v6622_v54, %v6574_v0  ;;  %6768 = vmatmul.bf16.vlgmr.msrb.gmra.mxu0 %v15541_v3  ;;  %v9458_v3 = vld [vmem:[%s14656_s1 + $0x554] sm:$0xf]  ;;  %v9500_v54 = vld [vmem:[%s14656_s1 + $0x6a4] sm:$0xf] }
 0x393   : > { %v13999_v60 = vpop.f32.mrf.mxu2  ;;  %v14001_v53 = vpop.f32.mrf.mxu3  ;;  %v8965_v0 = vor.u32 %v9458_v3, %v8962_v55  ;;  %v6483_v3 = vadd.f32 %v13735_v1, %v13962_v13  ;;  %v6486_v1 = vadd.f32 %v13744_v16, %v13962_v13  ;;  %v8954_v16 = vld [vmem:[%s14656_s1 + $0x548] sm:$0xf0] }
 0x394   : > { %6817 = vmatmul.bf16.vlgmr.msrb.gmra.mxu1 %v15542_v44  ;;  %v9490_v44 = vld [vmem:[%s14656_s1 + $0x654] sm:$0xf] }
 0x395   : > { %v9093_v9 = vor.u32 %v9490_v44, %v9090_v18  ;;  %6958 = vmatpush.bf16.msra.mxu0 %v8965_v0  ;;  %v15544_v44 = vld [vmem:[#allocation114_spill] sm:$0xff] }
 0x397   : > { %v6575_v20 = vpop.f32.mrf.mxu0  ;;  %7056 = vmatpush.bf16.msra.mxu2 %v9093_v9 }
 0x398   : > { %6866 = vmatmul.bf16.vlgmr.msrb.gmra.mxu2 %v15543_v7  ;;  %v6576_v50 = vadd.f32 %v6575_v20, %v6527_v14  ;;  %v9133_v14 = vor.u32 %v9500_v54, %v9130_v11  ;;  %v9026_v20 = vld [vmem:[%s14656_s1 + $0x5d8] sm:$0xf0]  ;;  %v6530_v7 = vadd.f32 %v13693_v5, %v6481_v10  ;;  %v15545_v54 = vld [vmem:[#allocation68_spill] sm:$0xff]  ;;  %v6532_v10 = vadd.f32 %v13702_v32, %v6483_v3 }
 0x399   : > { %v6624_v35 = vpop.f32.mrf.mxu1  ;;  %v15546_v11 = vld [vmem:[#allocation52_spill] sm:$0xff] }
 0x39a   : > { %v6625_v15 = vadd.f32 %v6624_v35, %v6576_v50  ;;  %7108 = vmatpush.bf16.msra.mxu3 %v9133_v14  ;;  %v9082_v32 = vld [vmem:[%s14656_s1 + $0x648] sm:$0xf0] }
 0x39b   : > { %v6671_v19 = vpop.f32.mrf.mxu2  ;;  %v14007_v40 = vpop.f32.mrf.mxu3 }
 0x39c   : > { %v14018_v4 = vadd.f32 %v6671_v19, %v6623_v27  ;;  %v9474_v27 = vld [vmem:[%s14656_s1 + $0x5d4] sm:$0xf] }
 0x39d   : > { %v9029_v35 = vor.u32 %v9474_v27, %v9026_v20  ;;  %v15547_v20 = vld [vmem:[#allocation115_spill] sm:$0xff] }
 0x39f   : > { %v6578_v50 = vpop.f32.mrf.mxu0  ;;  %7007 = vmatpush.bf16.msra.mxu1 %v9029_v35 }
 0x3a0   : > { %6920 = vmatmul.bf16.gmra.mxu3 %v15544_v44  ;;  %v6579_v18 = vadd.f32 %v6578_v50, %v6530_v7  ;;  %v9488_v44 = vld [vmem:[%s14656_s1 + $0x644] sm:$0xf] }
 0x3a1   : > { %v6627_v19 = vpop.f32.mrf.mxu1  ;;  %v9085_v3 = vor.u32 %v9488_v44, %v9082_v32  ;;  %v15549_v32 = vld [vmem:[#allocation75_spill] sm:$0xff] }
 0x3a2   : > { %v6628_v55 = vadd.f32 %v6627_v19, %v6579_v18  ;;  %6773 = vmatmul.bf16.gmra.mxu0 %v15545_v54  ;;  %v9472_v54 = vld [vmem:[%s14656_s1 + $0x5c4] sm:$0xf] }
 0x3a3   : > { %v6673_v9 = vpop.f32.mrf.mxu2  ;;  %v14041_v27 = vpop.f32.mrf.mxu3  ;;  %7057 = vmatpush.bf16.msra.mxu2 %v9085_v3 }
 0x3a4   : > { %6822 = vmatmul.bf16.gmra.mxu1 %v15546_v11  ;;  %v14043_v5 = vadd.f32 %v6673_v9, %v6625_v15  ;;  %v9456_v15 = vld [vmem:[%s14656_s1 + $0x544] sm:$0xf]  ;;  %v9018_v11 = vld [vmem:[%s14656_s1 + $0x5c8] sm:$0xf0] }
 0x3a5   : > { %v8957_v9 = vor.u32 %v9456_v15, %v8954_v16 }
 0x3a7   : > { %v6580_v0 = vpop.f32.mrf.mxu0  ;;  %6959 = vmatpush.bf16.msra.mxu0 %v8957_v9 }
 0x3a8   : > { %6871 = vmatmul.bf16.gmra.mxu2 %v15547_v20  ;;  %v6581_v35 = vadd.f32 %v6580_v0, %v6532_v10  ;;  %v9021_v10 = vor.u32 %v9472_v54, %v9018_v11  ;;  %v6535_v0 = vadd.f32 %v13737_v8, %v6486_v1  ;;  %v15548_v20 = vld [vmem:[#allocation71_spill] sm:$0xff]  ;;  %v15551_v11 = vld [vmem:[#allocation117_spill] sm:$0xff] }
 0x3a9   : > { %v6629_v14 = vpop.f32.mrf.mxu1 }
 0x3aa   : > { %v6630_v7 = vadd.f32 %v6629_v14, %v6581_v35  ;;  %7008 = vmatpush.bf16.msra.mxu1 %v9021_v10 }
 0x3ab   : > { %v6676_v50 = vpop.f32.mrf.mxu2  ;;  %v14049_v19 = vpop.f32.mrf.mxu3 }
 0x3ac   : > { %v14060_v18 = vadd.f32 %v6676_v50, %v6628_v55  ;;  %v6488_v50 = vadd.f32 %v13779_v58, %v13962_v13  ;;  %v6491_v58 = vadd.f32 %v13788_v43, %v13962_v13  ;;  %v8946_v43 = vld [vmem:[%s14656_s1 + $0x538] sm:$0xf0] }
 0x3ae   : > { %v6537_v8 = vadd.f32 %v13746_v63, %v6488_v50  ;;  %v9074_v63 = vld [vmem:[%s14656_s1 + $0x638] sm:$0xf0] }
 0x3af   : > { %v6583_v55 = vpop.f32.mrf.mxu0  ;;  %v9122_v50 = vld [vmem:[%s14656_s1 + $0x698] sm:$0xf0] }
 0x3b0   : > { %6925 = vmatmul.bf16.gmra.mxu3 %v15548_v20  ;;  %v6584_v35 = vadd.f32 %v6583_v55, %v6535_v0 }
 0x3b1   : > { %v6632_v14 = vpop.f32.mrf.mxu1 }
 0x3b2   : > { %v6633_v44 = vadd.f32 %v6632_v14, %v6584_v35  ;;  %6778 = vmatmul.bf16.gmra.mxu0 %v15549_v32  ;;  %v9498_v35 = vld [vmem:[%s14656_s1 + $0x694] sm:$0xf] }
 0x3b3   : > { %v6678_v15 = vpop.f32.mrf.mxu2  ;;  %v14077_v16 = vpop.f32.mrf.mxu3 }
 0x3b4   : > { %6827 = vmatmul.bf16.gmra.mxu1 %v15550_v2  ;;  %v14079_v3 = vadd.f32 %v6678_v15, %v6630_v7  ;;  %v9486_v2 = vld [vmem:[%s14656_s1 + $0x634] sm:$0xf]  ;;  %v9125_v15 = vor.u32 %v9498_v35, %v9122_v50 }
 0x3b5   : > { %v9454_v7 = vld [vmem:[%s14656_s1 + $0x534] sm:$0xf]  ;;  %v9077_v20 = vor.u32 %v9486_v2, %v9074_v63  ;;  %v6493_v63 = vadd.f32 %v13823_v38, %v13962_v13  ;;  %v6496_v38 = vadd.f32 %v13832_v33, %v13962_v13  ;;  %v8938_v33 = vld [vmem:[%s14656_s1 + $0x528] sm:$0xf0] }
 0x3b6   : > { %v8949_v32 = vor.u32 %v9454_v7, %v8946_v43  ;;  %7109 = vmatpush.bf16.msra.mxu3 %v9125_v15  ;;  %v15553_v43 = vld [vmem:[#allocation81_spill] sm:$0xff] }
 0x3b7   : > { %v6585_v1 = vpop.f32.mrf.mxu0  ;;  %7058 = vmatpush.bf16.msra.mxu2 %v9077_v20  ;;  %v15554_v35 = vld [vmem:[#allocation77_spill] sm:$0xff] }
 0x3b8   : > { %6876 = vmatmul.bf16.gmra.mxu2 %v15551_v11  ;;  %v6586_v9 = vadd.f32 %v6585_v1, %v6537_v8  ;;  %v9010_v8 = vld [vmem:[%s14656_s1 + $0x5b8] sm:$0xf0]  ;;  %6960 = vmatpush.bf16.msra.mxu0 %v8949_v32 }
 0x3b9   : > { %v6634_v54 = vpop.f32.mrf.mxu1 }
 0x3ba   : > { %v6635_v10 = vadd.f32 %v6634_v54, %v6586_v9  ;;  %v6540_v54 = vadd.f32 %v13781_v29, %v6491_v58  ;;  %v6542_v58 = vadd.f32 %v13790_v45, %v6493_v63  ;;  %v9066_v45 = vld [vmem:[%s14656_s1 + $0x628] sm:$0xf0]  ;;  %v9468_v63 = vld [vmem:[%s14656_s1 + $0x5a4] sm:$0xf] }
 0x3bb   : > { %v6681_v0 = vpop.f32.mrf.mxu2  ;;  %v14085_v55 = vpop.f32.mrf.mxu3 }
 0x3bc   : > { %v14096_v14 = vadd.f32 %v6681_v0, %v6633_v44  ;;  %v9470_v44 = vld [vmem:[%s14656_s1 + $0x5b4] sm:$0xf]  ;;  %v15552_v0 = vld [vmem:[#allocation118_spill] sm:$0xff] }
 0x3bd   : > { %v9013_v1 = vor.u32 %v9470_v44, %v9010_v8  ;;  %v15555_v44 = vld [vmem:[#allocation119_spill] sm:$0xff] }
 0x3bf   : > { %v6588_v11 = vpop.f32.mrf.mxu0  ;;  %7009 = vmatpush.bf16.msra.mxu1 %v9013_v1 }
 0x3c0   : > { %6930 = vmatmul.bf16.gmra.mxu3 %v15552_v0  ;;  %v6589_v2 = vadd.f32 %v6588_v11, %v6540_v54 }
 0x3c1   : > { %v6637_v9 = vpop.f32.mrf.mxu1 }
 0x3c2   : > { %v6638_v7 = vadd.f32 %v6637_v9, %v6589_v2  ;;  %6783 = vmatmul.bf16.gmra.mxu0 %v15553_v43  ;;  %v9484_v9 = vld [vmem:[%s14656_s1 + $0x624] sm:$0xf]  ;;  %v9002_v43 = vld [vmem:[%s14656_s1 + $0x5a8] sm:$0xf0] }
 0x3c3   : > { %v6683_v20 = vpop.f32.mrf.mxu2  ;;  %v14119_v50 = vpop.f32.mrf.mxu3  ;;  %v9069_v2 = vor.u32 %v9484_v9, %v9066_v45  ;;  %v15557_v9 = vld [vmem:[#allocation86_spill] sm:$0xff] }
 0x3c4   : > { %6832 = vmatmul.bf16.gmra.mxu1 %v15554_v35  ;;  %v14121_v29 = vadd.f32 %v6683_v20, %v6635_v10  ;;  %v9452_v10 = vld [vmem:[%s14656_s1 + $0x524] sm:$0xf]  ;;  %v9005_v20 = vor.u32 %v9468_v63, %v9002_v43  ;;  %v15558_v45 = vld [vmem:[#allocation82_spill] sm:$0xff] }
 0x3c5   : > { %v8941_v35 = vor.u32 %v9452_v10, %v8938_v33  ;;  %7059 = vmatpush.bf16.msra.mxu2 %v9069_v2  ;;  %v15559_v43 = vld [vmem:[#allocation122_spill] sm:$0xff] }
 0x3c6   : > { %7010 = vmatpush.bf16.msra.mxu1 %v9005_v20 }
 0x3c7   : > { %v6590_v32 = vpop.f32.mrf.mxu0  ;;  %6961 = vmatpush.bf16.msra.mxu0 %v8941_v35 }
 0x3c8   : > { %6881 = vmatmul.bf16.gmra.mxu2 %v15555_v44  ;;  %v6591_v8 = vadd.f32 %v6590_v32, %v6542_v58  ;;  %v6545_v58 = vadd.f32 %v13825_v34, %v6496_v38 }
 0x3c9   : > { %v6639_v15 = vpop.f32.mrf.mxu1 }
 0x3ca   : > { %v6640_v1 = vadd.f32 %v6639_v15, %v6591_v8  ;;  %v15556_v15 = vld [vmem:[#allocation121_spill] sm:$0xff]  ;;  %v6498_v8 = vadd.f32 %v13867_v36, %v13962_v13  ;;  %v6501_v36 = vadd.f32 %v13876_v21, %v13962_v13  ;;  %v8930_v21 = vld [vmem:[%s14656_s1 + $0x518] sm:$0xf0] }
 0x3cb   : > { %v6686_v54 = vpop.f32.mrf.mxu2  ;;  %v14127_v11 = vpop.f32.mrf.mxu3 }
 0x3cc   : > { %v14138_v0 = vadd.f32 %v6686_v54, %v6638_v7  ;;  %v6547_v34 = vadd.f32 %v13834_v42, %v6498_v8  ;;  %v9058_v42 = vld [vmem:[%s14656_s1 + $0x618] sm:$0xf0]  ;;  %v9496_v8 = vld [vmem:[%s14656_s1 + $0x684] sm:$0xf] }
 0x3cf   : > { %v6593_v7 = vpop.f32.mrf.mxu0 }
 0x3d0   : > { %6935 = vmatmul.bf16.gmra.mxu3 %v15556_v15  ;;  %v6594_v44 = vadd.f32 %v6593_v7, %v6545_v58 }
 0x3d1   : > { %v6642_v32 = vpop.f32.mrf.mxu1 }
 0x3d2   : > { %v6643_v54 = vadd.f32 %v6642_v32, %v6594_v44  ;;  %6788 = vmatmul.bf16.gmra.mxu0 %v15557_v9  ;;  %v9482_v32 = vld [vmem:[%s14656_s1 + $0x614] sm:$0xf]  ;;  %v9114_v9 = vld [vmem:[%s14656_s1 + $0x688] sm:$0xf0] }
 0x3d3   : > { %v6688_v10 = vpop.f32.mrf.mxu2  ;;  %v14155_v33 = vpop.f32.mrf.mxu3  ;;  %v9061_v44 = vor.u32 %v9482_v32, %v9058_v42  ;;  %v6503_v42 = vadd.f32 %v13911_v26, %v13962_v13  ;;  %v6506_v26 = vadd.f32 %v13920_v51, %v13962_v13  ;;  %v8922_v51 = vld [vmem:[%s14656_s1 + $0x508] sm:$0xf0] }
 0x3d4   : > { %6837 = vmatmul.bf16.gmra.mxu1 %v15558_v45  ;;  %v14157_v2 = vadd.f32 %v6688_v10, %v6640_v1  ;;  %v9450_v1 = vld [vmem:[%s14656_s1 + $0x514] sm:$0xf]  ;;  %v9117_v10 = vor.u32 %v9496_v8, %v9114_v9  ;;  %v15562_v8 = vld [vmem:[#allocation88_spill] sm:$0xff] }
 0x3d5   : > { %v8933_v45 = vor.u32 %v9450_v1, %v8930_v21  ;;  %7060 = vmatpush.bf16.msra.mxu2 %v9061_v44  ;;  %v15561_v21 = vld [vmem:[#allocation91_spill] sm:$0xff] }
 0x3d6   : > { %7110 = vmatpush.bf16.msra.mxu3 %v9117_v10 }
 0x3d7   : > { %v6595_v38 = vpop.f32.mrf.mxu0  ;;  %6962 = vmatpush.bf16.msra.mxu0 %v8933_v45 }
 0x3d8   : > { %6886 = vmatmul.bf16.gmra.mxu2 %v15559_v43  ;;  %v6596_v35 = vadd.f32 %v6595_v38, %v6547_v34  ;;  %v8994_v34 = vld [vmem:[%s14656_s1 + $0x598] sm:$0xf0] }
 0x3d9   : > { %v6644_v63 = vpop.f32.mrf.mxu1 }
 0x3da   : > { %v6645_v20 = vadd.f32 %v6644_v63, %v6596_v35  ;;  %v6550_v63 = vadd.f32 %v13869_v31, %v6501_v36  ;;  %v6552_v36 = vadd.f32 %v13878_v30, %v6503_v42  ;;  %v9050_v30 = vld [vmem:[%s14656_s1 + $0x608] sm:$0xf0]  ;;  %v9464_v42 = vld [vmem:[%s14656_s1 + $0x584] sm:$0xf] }
 0x3db   : > { %v6691_v58 = vpop.f32.mrf.mxu2  ;;  %v14163_v7 = vpop.f32.mrf.mxu3 }
 0x3dc   : > { %v14174_v15 = vadd.f32 %v6691_v58, %v6643_v54  ;;  %v9466_v54 = vld [vmem:[%s14656_s1 + $0x594] sm:$0xf]  ;;  %v15560_v58 = vld [vmem:[#allocation15_spill] sm:$0xff] }
 0x3dd   : > { %v8997_v38 = vor.u32 %v9466_v54, %v8994_v34  ;;  %v15563_v54 = vld [vmem:[#allocation93_spill] sm:$0xff] }
 0x3df   : > { %v6598_v43 = vpop.f32.mrf.mxu0  ;;  %7011 = vmatpush.bf16.msra.mxu1 %v8997_v38 }
 0x3e0   : > { %6940 = vmatmul.bf16.gmra.mxu3 %v15560_v58  ;;  %v6599_v32 = vadd.f32 %v6598_v43, %v6550_v63 }
 0x3e1   : > { %v6647_v35 = vpop.f32.mrf.mxu1 }
 0x3e2   : > { %v6648_v1 = vadd.f32 %v6647_v35, %v6599_v32  ;;  %6793 = vmatmul.bf16.gmra.mxu0 %v15561_v21  ;;  %v9480_v35 = vld [vmem:[%s14656_s1 + $0x604] sm:$0xf]  ;;  %v8986_v21 = vld [vmem:[%s14656_s1 + $0x588] sm:$0xf0] }
 0x3e3   : > { %v6693_v44 = vpop.f32.mrf.mxu2  ;;  %v14197_v9 = vpop.f32.mrf.mxu3  ;;  %v9053_v32 = vor.u32 %v9480_v35, %v9050_v30  ;;  %v15565_v35 = vld [vmem:[#allocation21_spill] sm:$0xff]  ;;  %v15566_v30 = vld [vmem:[#allocation92_spill] sm:$0xff] }
 0x3e4   : > { %6842 = vmatmul.bf16.gmra.mxu1 %v15562_v8  ;;  %v14199_v31 = vadd.f32 %v6693_v44, %v6645_v20  ;;  %v9448_v20 = vld [vmem:[%s14656_s1 + $0x504] sm:$0xf]  ;;  %v8989_v44 = vor.u32 %v9464_v42, %v8986_v21  ;;  %v15567_v21 = vld [vmem:[#allocation126_spill] sm:$0xff] }
 0x3e5   : > { %v8925_v8 = vor.u32 %v9448_v20, %v8922_v51  ;;  %7061 = vmatpush.bf16.msra.mxu2 %v9053_v32 }
 0x3e6   : > { %7012 = vmatpush.bf16.msra.mxu1 %v8989_v44 }
 0x3e7   : > { %v6600_v45 = vpop.f32.mrf.mxu0  ;;  %6963 = vmatpush.bf16.msra.mxu0 %v8925_v8 }
 0x3e8   : > { %6891 = vmatmul.bf16.gmra.mxu2 %v15563_v54  ;;  %v6601_v34 = vadd.f32 %v6600_v45, %v6552_v36  ;;  %v6555_v36 = vadd.f32 %v13913_v6, %v6506_v26 }
 0x3e9   : > { %v6649_v10 = vpop.f32.mrf.mxu1 }
 0x3ea   : > { %v6650_v38 = vadd.f32 %v6649_v10, %v6601_v34  ;;  %v15564_v10 = vld [vmem:[#allocation125_spill] sm:$0xff]  ;;  %v6508_v34 = vadd.f32 %v13955_v39, %v13962_v13  ;;  %v6511_v39 = vadd.f32 %v13971_v12, %v13962_v13  ;;  %v15570_v12 = vld [vmem:[#allocation103_spill] sm:$0xff] }
 0x3eb   : > { %v6696_v63 = vpop.f32.mrf.mxu2  ;;  %v14205_v43 = vpop.f32.mrf.mxu3 }
 0x3ec   : > { %v14216_v58 = vadd.f32 %v6696_v63, %v6648_v1  ;;  %v6557_v6 = vadd.f32 %v13922_v28, %v6508_v34  ;;  %v6513_v34 = vadd.f32 %v13999_v60, %v13962_v13 }
 0x3ef   : > { %v6603_v1 = vpop.f32.mrf.mxu0 }
 0x3f0   : > { %6945 = vmatmul.bf16.gmra.mxu3 %v15564_v10  ;;  %v6604_v54 = vadd.f32 %v6603_v1, %v6555_v36  ;;  %v6560_v10 = vadd.f32 %v13957_v47, %v6511_v39  ;;  %v6562_v47 = vadd.f32 %v13973_v62, %v6513_v34  ;;  %v15573_v34 = vld [vmem:[#allocation113_spill] sm:$0xff] }
 0x3f1   : > { %v6652_v45 = vpop.f32.mrf.mxu1 }
 0x3f2   : > { %v6653_v63 = vadd.f32 %v6652_v45, %v6604_v54  ;;  %6798 = vmatmul.bf16.gmra.mxu0 %v15565_v35  ;;  %v15568_v35 = vld [vmem:[#allocation128_spill] sm:$0xff] }
 0x3f3   : > { %v6698_v20 = vpop.f32.mrf.mxu2  ;;  %v14233_v51 = vpop.f32.mrf.mxu3 }
 0x3f4   : > { %6847 = vmatmul.bf16.gmra.mxu1 %v15566_v30  ;;  %v14235_v32 = vadd.f32 %v6698_v20, %v6650_v38  ;;  %v15569_v20 = vld [vmem:[#allocation107_spill] sm:$0xff] }
 0x3f7   : > { %v6605_v26 = vpop.f32.mrf.mxu0 }
 0x3f8   : > { %6896 = vmatmul.bf16.gmra.mxu2 %v15567_v21  ;;  %v6606_v8 = vadd.f32 %v6605_v26, %v6557_v6 }
 0x3f9   : > { %v6654_v42 = vpop.f32.mrf.mxu1 }
 0x3fa   : > { %v6655_v44 = vadd.f32 %v6654_v42, %v6606_v8  ;;  %v15571_v8 = vld [vmem:[#allocation130_spill] sm:$0xff] }
 0x3fb   : > { %v6701_v36 = vpop.f32.mrf.mxu2  ;;  %v14241_v1 = vpop.f32.mrf.mxu3 }
 0x3fc   : > { %v14243_v45 = vadd.f32 %v6701_v36, %v6653_v63 }
 0x3ff   : > { %v6608_v38 = vpop.f32.mrf.mxu0 }
 0x400   : > { %6950 = vmatmul.bf16.gmra.mxu3 %v15568_v35  ;;  %v6609_v28 = vadd.f32 %v6608_v38, %v6560_v10  ;;  %v6721_v38 = vadd.f32 %v14001_v53, %v14018_v4 }
 0x401   : > { %v6657_v54 = vpop.f32.mrf.mxu1 }
 0x402   : > { %v6658_v30 = vadd.f32 %v6657_v54, %v6609_v28  ;;  %6803 = vmatmul.bf16.gmra.mxu0 %v15569_v20  ;;  %v15574_v20 = vld [vmem:[#allocation110_spill] sm:$0xff] }
 0x403   : > { %v6703_v6 = vpop.f32.mrf.mxu2  ;;  %v14251_v26 = vpop.f32.mrf.mxu3 }
 0x404   : > { %6852 = vmatmul.bf16.gmra.mxu1 %v15570_v12  ;;  %v14253_v63 = vadd.f32 %v6703_v6, %v6655_v44  ;;  %v15572_v44 = vld [vmem:[#allocation133_spill] sm:$0xff] }
 0x407   : > { %v6610_v42 = vpop.f32.mrf.mxu0 }
 0x408   : > { %6901 = vmatmul.bf16.gmra.mxu2 %v15571_v8  ;;  %v6611_v39 = vadd.f32 %v6610_v42, %v6562_v47  ;;  %v15575_v42 = vld [vmem:[#allocation5_spill] sm:$0xff] }
 0x409   : > { %v6659_v21 = vpop.f32.mrf.mxu1 }
 0x40a   : > { %v6660_v36 = vadd.f32 %v6659_v21, %v6611_v39 }
 0x40b   : > { %v6706_v10 = vpop.f32.mrf.mxu2  ;;  %v14257_v13 = vpop.f32.mrf.mxu3 }
 0x40c   : > { %v14259_v60 = vadd.f32 %v6706_v10, %v6658_v30  ;;  %v6723_v30 = vadd.f32 %v14007_v40, %v14043_v5  ;;  %v15582_v40 = vld [vmem:[#allocation95_spill] sm:$0xff]  ;;  %v15583_v5 = vld [vmem:[#allocation96_spill] sm:$0xff] }
 0x40f   : > { %v6769_v54 = vpop.f32.mrf.mxu0 }
 0x410   : > { %9150 = vmatmul.msk.bf16.vlgmr.msra.gmra.mxu3 %vm633_vm12, %v15572_v44  ;;  %v6770_v62 = vadd.f32 %v6769_v54, %v6721_v38  ;;  %v15577_v54 = vld [vmem:[#allocation32_spill] sm:$0xff]  ;;  %v15579_v44 = vld [vmem:[#allocation97_spill] sm:$0xff] }
 0x411   : > { %v6818_v35 = vpop.f32.mrf.mxu1 }
 0x412   : > { %v6819_v28 = vadd.f32 %v6818_v35, %v6770_v62  ;;  %6964 = vmatmul.bf16.vlgmr.msra.gmra.mxu0 %v15573_v34  ;;  %v15578_v35 = vunpack.c.l.bf16 %v15577_v54  ;;  %v15581_v34 = vld [vmem:[#allocation98_spill] sm:$0xff] }
 0x413   : > { %v6708_v12 = vpop.f32.mrf.mxu2  ;;  %v14267_v6 = vpop.f32.mrf.mxu3 }
 0x414   : > { %7013 = vmatmul.bf16.vlgmr.msra.gmra.mxu1 %v15574_v20  ;;  %v14269_v47 = vadd.f32 %v6708_v12, %v6660_v36  ;;  %v2933_v62 = vmax.f32 %v15579_v44, %v15578_v35  ;;  %v15580_v36 = vunpack.c.h.bf16 %v15577_v54  ;;  %v14286_v12 = vpack.c.bf16 %v15583_v5, %v15582_v40  ;;  %v15587_v35 = vld [vmem:[#allocation6_spill] sm:$0xff]  ;;  %v15589_v5 = vld [vmem:[#allocation47_spill] sm:$0xff] }
 0x416   : > { %v2934_v20 = vmax.f32 %v15581_v34, %v15580_v36  ;;  %v7272_v44 = vunpack.c.l.b16 %v14286_v12 }
 0x417   : > { %v6771_v53 = vpop.f32.mrf.mxu0 }
 0x418   : > { %7062 = vmatmul.bf16.vlgmr.msra.gmra.mxu2 %v15575_v42  ;;  %v6772_v21 = vadd.f32 %v6771_v53, %v6723_v30  ;;  %v15584_v42 = vld [vmem:[#allocation20_spill] sm:$0xff] }
 0x419   : > { %v6820_v4 = vpop.f32.mrf.mxu1  ;;  %v15585_v30 = vunpack.c.l.bf16 %v15584_v42 }
 0x41a   : > { %v6821_v8 = vadd.f32 %v6820_v4, %v6772_v21  ;;  %v15586_v4 = vunpack.c.h.bf16 %v15584_v42 }
 0x41b   : > { %v6867_v39 = vpop.f32.mrf.mxu2  ;;  %v14274_v10 = vpop.f32.mrf.mxu3  ;;  %v3661_v53 = vmax.f32 %v2933_v62, %v15585_v30  ;;  %v15588_v62 = vld [vmem:[#allocation116_spill] sm:$0xff]  ;;  %v6728_v30 = vadd.f32 %v14049_v19, %v14079_v3  ;;  %v15598_v19 = vld [vmem:[#allocation53_spill] sm:$0xff]  ;;  %v15599_v3 = vld [vmem:[#allocation54_spill] sm:$0xff] }
 0x41c   : > { %15576 = vst [vmem:[#allocation73_spill] sm:$0xff] %v14274_v10  ;;  %v14276_v38 = vadd.f32 %v6867_v39, %v6819_v28  ;;  %v3662_v21 = vmax.f32 %v2934_v20, %v15586_v4  ;;  %v6726_v28 = vadd.f32 %v14041_v27, %v14060_v18 }
 0x41e   : > { %v14296_v54 = vpack.c.bf16 %v3662_v21, %v3661_v53  ;;  %v15592_v21 = vld [vmem:[#allocation44_spill] sm:$0xff] }
 0x41f   : > { %v6774_v39 = vpop.f32.mrf.mxu0 }
 0x420   : > { %9151 = vmatmul.msk.bf16.gmra.mxu3 %vm633_vm12, %v15587_v35  ;;  %v6775_v36 = vadd.f32 %v6774_v39, %v6726_v28  ;;  %v7274_v34 = vunpack.c.l.b16 %v14296_v54 }
 0x421   : > { %v6823_v10 = vpop.f32.mrf.mxu1 }
 0x422   : > { %v6824_v40 = vadd.f32 %v6823_v10, %v6775_v36  ;;  %6969 = vmatmul.bf16.gmra.mxu0 %v15588_v62  ;;  %v7304_v18 = vpack.c.b16 %v7274_v34, %v7272_v44  ;;  %v15593_v62 = vld [vmem:[#allocation59_spill] sm:$0xff] }
 0x423   : > { %v6869_v20 = vpop.f32.mrf.mxu2  ;;  %v14302_v42 = vpop.f32.mrf.mxu3  ;;  %v15596_v34 = vunpack.c.h.bf16 %v15593_v62 }
 0x424   : > { %7018 = vmatmul.bf16.gmra.mxu1 %v15589_v5  ;;  %15590 = vst [vmem:[#allocation56_spill] sm:$0xff] %v14302_v42  ;;  %v14304_v27 = vadd.f32 %v6869_v20, %v6821_v8  ;;  %7320 = vrot.lane.b32.xlu1 %v7304_v18, %s9556_s21  ;;  %v15594_v8 = vunpack.c.l.bf16 %v15593_v62  ;;  %v15595_v5 = vld [vmem:[#allocation101_spill] sm:$0xff]  ;;  %v15597_v20 = vld [vmem:[#allocation102_spill] sm:$0xff]  ;;  %v3693_v42 = vpack.c.bf16 %v15599_v3, %v15598_v19  ;;  %v15603_v19 = vld [vmem:[#allocation76_spill] sm:$0xff] }
 0x425   : > { %v2938_v18 = vmax.f32 %v15597_v20, %v15596_v34  ;;  %v15604_v3 = vld [vmem:[#allocation48_spill] sm:$0xff] }
 0x426   : > { %15591 = vst [vmem:[#allocation12_spill] sm:$0xff] %v14304_v27  ;;  %v2937_v44 = vmax.f32 %v15595_v5, %v15594_v8  ;;  %v15600_v27 = vld [vmem:[#allocation134_spill] sm:$0xff]  ;;  %v7276_v8 = vunpack.c.l.b16 %v3693_v42 }
 0x427   : > { %v6776_v53 = vpop.f32.mrf.mxu0 }
 0x428   : > { %7067 = vmatmul.bf16.gmra.mxu2 %v15592_v21  ;;  %v6777_v10 = vadd.f32 %v6776_v53, %v6728_v30  ;;  %v15601_v21 = vunpack.c.l.bf16 %v15600_v27  ;;  %v15602_v53 = vunpack.c.h.bf16 %v15600_v27 }
 0x429   : > { %v6825_v4 = vpop.f32.mrf.mxu1 }
 0x42a   : > { %v6826_v28 = vadd.f32 %v6825_v4, %v6777_v10  ;;  %v3665_v30 = vmax.f32 %v2937_v44, %v15601_v21  ;;  %v3666_v4 = vmax.f32 %v2938_v18, %v15602_v53 }
 0x42b   : > { %v6872_v39 = vpop.f32.mrf.mxu2  ;;  %v14310_v35 = vpop.f32.mrf.mxu3 }
 0x42c   : > { %v14312_v36 = vadd.f32 %v6872_v39, %v6824_v40  ;;  %v6731_v40 = vadd.f32 %v14077_v16, %v14096_v14  ;;  %v3694_v62 = vpack.c.bf16 %v3666_v4, %v3665_v30 }
 0x42e   : > { %v7278_v34 = vunpack.c.l.b16 %v3694_v62 }
 0x42f   : > { %v6779_v10 = vpop.f32.mrf.mxu0 }
 0x430   : > { %9152 = vmatmul.msk.bf16.gmra.mxu3 %vm633_vm12, %v13229_v25  ;;  %v6780_v5 = vadd.f32 %v6779_v10, %v6731_v40  ;;  %v7306_v16 = vpack.c.b16 %v7278_v34, %v7276_v8  ;;  %v6733_v25 = vadd.f32 %v14085_v55, %v14121_v29 }
 0x431   : > { %v6828_v39 = vpop.f32.mrf.mxu1 }
 0x432   : > { %v6829_v20 = vadd.f32 %v6828_v39, %v6780_v5  ;;  %6974 = vmatmul.bf16.gmra.mxu0 %v15603_v19  ;;  %7324 = vrot.lane.b32.xlu0 %v7306_v16, %s9556_s21  ;;  %v15605_v5 = vld [vmem:[#allocation120_spill] sm:$0xff] }
 0x433   : > { %v6874_v44 = vpop.f32.mrf.mxu2  ;;  %v14332_v27 = vpop.f32.mrf.mxu3 }
 0x434   : > { %7023 = vmatmul.bf16.gmra.mxu1 %v15604_v3  ;;  %v14334_v18 = vadd.f32 %v6874_v44, %v6826_v28  ;;  %v6736_v28 = vadd.f32 %v14119_v50, %v14138_v0  ;;  %v7279_v44 = vunpack.c.h.b16 %v3694_v62  ;;  %v6738_v50 = vadd.f32 %v14127_v11, %v14157_v2  ;;  %v15609_v11 = vld [vmem:[#allocation26_spill] sm:$0xff] }
 0x435   : > { %v7275_v62 = vunpack.c.h.b16 %v14296_v54 }
 0x437   : > { %v6781_v14 = vpop.f32.mrf.mxu0 }
 0x438   : > { %7072 = vmatmul.bf16.gmra.mxu2 %v13219_v46  ;;  %v6782_v30 = vadd.f32 %v6781_v14, %v6733_v25  ;;  %v15606_v46 = vld [vmem:[#allocation27_spill] sm:$0xff] }
 0x439   : > { %v6830_v21 = vpop.f32.mrf.mxu1 }
 0x43a   : > { %v6831_v53 = vadd.f32 %v6830_v21, %v6782_v30 }
 0x43b   : > { %v6877_v4 = vpop.f32.mrf.mxu2  ;;  %v14340_v40 = vpop.f32.mrf.mxu3 }
 0x43c   : > { %v14342_v10 = vadd.f32 %v6877_v4, %v6829_v20  ;;  %v7277_v20 = vunpack.c.h.b16 %v3693_v42  ;;  %v7273_v42 = vunpack.c.h.b16 %v14286_v12  ;;  %v6741_v12 = vadd.f32 %v14155_v33, %v14174_v15 }
 0x43e   : > { %v7307_v16 = vpack.c.b16 %v7279_v44, %v7277_v20  ;;  %v15614_v20 = vld [vmem:[#allocation19_spill] sm:$0xff] }
 0x43f   : > { %v6784_v39 = vpop.f32.mrf.mxu0  ;;  %v15616_v54 = vunpack.c.h.bf16 %v15614_v20 }
 0x440   : > { %9153 = vmatmul.msk.bf16.gmra.mxu3 %vm633_vm12, %v13300_v48  ;;  %v6785_v55 = vadd.f32 %v6784_v39, %v6736_v28  ;;  %7326 = vrot.lane.b32.xlu1 %v7307_v16, %s9556_s21 }
 0x441   : > { %v6833_v8 = vpop.f32.mrf.mxu1 }
 0x442   : > { %v6834_v29 = vadd.f32 %v6833_v8, %v6785_v55  ;;  %6979 = vmatmul.bf16.gmra.mxu0 %v15605_v5  ;;  %v15612_v55 = vld [vmem:[#allocation18_spill] sm:$0xff]  ;;  %v15613_v5 = vld [vmem:[#allocation136_spill] sm:$0xff] }
 0x443   : > { %v6879_v34 = vpop.f32.mrf.mxu2  ;;  %v14350_v19 = vpop.f32.mrf.mxu3 }
 0x444   : > { %7028 = vmatmul.bf16.gmra.mxu1 %v15606_v46  ;;  %v14352_v3 = vadd.f32 %v6879_v34, %v6831_v53  ;;  %v15607_v53 = vld [vmem:[#allocation69_spill] sm:$0xff]  ;;  %v14372_v46 = vpack.c.bf16 %v15613_v5, %v15612_v55  ;;  %v7305_v34 = vpack.c.b16 %v7275_v62, %v7273_v42  ;;  %v15617_v62 = vld [vmem:[#allocation87_spill] sm:$0xff] }
 0x445   : > { %v15608_v28 = vunpack.c.l.bf16 %v15607_v53  ;;  %v15610_v39 = vunpack.c.h.bf16 %v15607_v53  ;;  %v15618_v53 = vld [vmem:[#allocation57_spill] sm:$0xff]  ;;  %v15623_v55 = vld [vmem:[#allocation39_spill] sm:$0xff] }
 0x446   : > { %7322 = vrot.lane.b32.xlu2 %v7305_v34, %s9556_s21  ;;  %v15624_v34 = vld [vmem:[#allocation108_spill] sm:$0xff] }
 0x447   : > { %v6786_v0 = vpop.f32.mrf.mxu0  ;;  %v2945_v2 = vmax.f32 %v15609_v11, %v15608_v28 }
 0x448   : > { %7077 = vmatmul.bf16.gmra.mxu2 %v13290_v22  ;;  %v6787_v48 = vadd.f32 %v6786_v0, %v6738_v50  ;;  %v15611_v22 = vld [vmem:[#allocation38_spill] sm:$0xff] }
 0x449   : > { %v6835_v25 = vpop.f32.mrf.mxu1  ;;  %v2946_v8 = vmax.f32 %v15611_v22, %v15610_v39  ;;  %v15621_v39 = vld [vmem:[#allocation23_spill] sm:$0xff] }
 0x44a   : > { %v6836_v14 = vadd.f32 %v6835_v25, %v6787_v48 }
 0x44b   : > { %v6882_v21 = vpop.f32.mrf.mxu2  ;;  %v14358_v30 = vpop.f32.mrf.mxu3  ;;  %v3674_v16 = vmax.f32 %v2946_v8, %v15616_v54 }
 0x44c   : > { %v14360_v4 = vadd.f32 %v6882_v21, %v6834_v29  ;;  %v15615_v29 = vunpack.c.l.bf16 %v15614_v20  ;;  %v7284_v21 = vunpack.c.l.b16 %v14372_v46  ;;  %v15625_v20 = vld [vmem:[#allocation109_spill] sm:$0xff] }
 0x44e   : > { %v3673_v44 = vmax.f32 %v2945_v2, %v15615_v29  ;;  %v3695_v29 = vpack.c.bf16 %v15625_v20, %v15624_v34  ;;  %v15631_v20 = vld [vmem:[#allocation33_spill] sm:$0xff] }
 0x44f   : > { %v6789_v50 = vpop.f32.mrf.mxu0 }
 0x450   : > { %9154 = vmatmul.msk.bf16.gmra.mxu3 %vm633_vm12, %v13371_v52  ;;  %v6790_v25 = vadd.f32 %v6789_v50, %v6741_v12  ;;  %v14383_v48 = vpack.c.bf16 %v3674_v16, %v3673_v44  ;;  %v15619_v52 = vld [vmem:[#allocation64_spill] sm:$0xff]  ;;  %v15626_v12 = vld [vmem:[#allocation135_spill] sm:$0xff] }
 0x451   : > { %v6838_v0 = vpop.f32.mrf.mxu1  ;;  %v15620_v2 = vunpack.c.l.bf16 %v15619_v52  ;;  %v15622_v8 = vunpack.c.h.bf16 %v15619_v52  ;;  %v15627_v54 = vunpack.c.l.bf16 %v15626_v12  ;;  %v15628_v50 = vunpack.c.h.bf16 %v15626_v12  ;;  %v15633_v12 = vld [vmem:[#allocation8_spill] sm:$0xff] }
 0x452   : > { %v6839_v42 = vadd.f32 %v6838_v0, %v6790_v25  ;;  %6984 = vmatmul.bf16.gmra.mxu0 %v15617_v62  ;;  %v7286_v28 = vunpack.c.l.b16 %v14383_v48  ;;  %v7280_v52 = vunpack.c.l.b16 %v3695_v29 }
 0x453   : > { %v6884_v33 = vpop.f32.mrf.mxu2  ;;  %v14388_v15 = vpop.f32.mrf.mxu3  ;;  %v2941_v22 = vmax.f32 %v15621_v39, %v15620_v2  ;;  %v2942_v5 = vmax.f32 %v15623_v55, %v15622_v8 }
 0x454   : > { %7033 = vmatmul.bf16.gmra.mxu1 %v15618_v53  ;;  %v14391_v11 = vadd.f32 %v6884_v33, %v6836_v14  ;;  %v7310_v44 = vpack.c.b16 %v7286_v28, %v7284_v21  ;;  %v6743_v14 = vadd.f32 %v14163_v7, %v14199_v31  ;;  %v7281_v33 = vunpack.c.h.b16 %v3695_v29  ;;  %v15629_v31 = vld [vmem:[#allocation74_spill] sm:$0xff] }
 0x455   : > { %v3669_v16 = vmax.f32 %v2941_v22, %v15627_v54  ;;  %v3670_v0 = vmax.f32 %v2942_v5, %v15628_v50  ;;  %v15630_v34 = vunpack.c.l.bf16 %v15629_v31  ;;  %v15634_v29 = vld [vmem:[#allocation14_spill] sm:$0xff] }
 0x456   : > { %7332 = vrot.lane.b32.xlu1 %v7310_v44, %s9556_s21 }
 0x457   : > { %v6791_v25 = vpop.f32.mrf.mxu0  ;;  %v3696_v53 = vpack.c.bf16 %v3670_v0, %v3669_v16  ;;  %v2949_v44 = vmax.f32 %v15631_v20, %v15630_v34  ;;  %v15635_v16 = vld [vmem:[#allocation137_spill] sm:$0xff]  ;;  %v15636_v0 = vld [vmem:[#allocation55_spill] sm:$0xff] }
 0x458   : > { %7082 = vmatmul.bf16.gmra.mxu2 %v13361_v17  ;;  %v6792_v2 = vadd.f32 %v6791_v25, %v6743_v14  ;;  %v15632_v17 = vunpack.c.h.bf16 %v15629_v31  ;;  %v3699_v50 = vpack.c.bf16 %v15635_v16, %v15634_v29  ;;  %v6746_v25 = vadd.f32 %v14197_v9, %v14216_v58 }
 0x459   : > { %v6840_v62 = vpop.f32.mrf.mxu1  ;;  %v7283_v21 = vunpack.c.h.b16 %v3696_v53  ;;  %v7282_v28 = vunpack.c.l.b16 %v3696_v53 }
 0x45a   : > { %v6841_v39 = vadd.f32 %v6840_v62, %v6792_v2  ;;  %v2950_v54 = vmax.f32 %v15633_v12, %v15632_v17  ;;  %v15638_v62 = vunpack.c.h.bf16 %v15636_v0 }
 0x45b   : > { %v6887_v22 = vpop.f32.mrf.mxu2  ;;  %v14409_v8 = vpop.f32.mrf.mxu3  ;;  %v7309_v5 = vpack.c.b16 %v7283_v21, %v7281_v33  ;;  %v7308_v7 = vpack.c.b16 %v7282_v28, %v7280_v52  ;;  %v7288_v28 = vunpack.c.l.b16 %v3699_v50 }
 0x45c   : > { %v14411_v55 = vadd.f32 %v6887_v22, %v6839_v42  ;;  %v15637_v42 = vunpack.c.l.bf16 %v15636_v0  ;;  %v3678_v53 = vmax.f32 %v2950_v54, %v15638_v62 }
 0x45d   : > { %7330 = vrot.lane.b32.xlu0 %v7309_v5, %s9556_s21  ;;  %7328 = vrot.lane.b32.xlu2 %v7308_v7, %s9556_s21  ;;  %v15639_v5 = vld [vmem:[#allocation123_spill] sm:$0xff] }
 0x45e   : > { %v3677_v14 = vmax.f32 %v2949_v44, %v15637_v42  ;;  %v15640_v7 = vld [vmem:[#allocation31_spill] sm:$0xff]  ;;  %v6748_v44 = vadd.f32 %v14205_v43, %v14235_v32 }
 0x45f   : > { %v6794_v33 = vpop.f32.mrf.mxu0 }
 0x460   : > { %9155 = vmatmul.msk.bf16.gmra.mxu3 %vm633_vm12, %v13442_v57  ;;  %v6795_v2 = vadd.f32 %v6794_v33, %v6746_v25  ;;  %v3700_v21 = vpack.c.bf16 %v3678_v53, %v3677_v14  ;;  %v15641_v25 = vld [vmem:[#allocation127_spill] sm:$0xff] }
 0x461   : > { %v6843_v52 = vpop.f32.mrf.mxu1 }
 0x462   : > { %v6844_v22 = vadd.f32 %v6843_v52, %v6795_v2  ;;  %6989 = vmatmul.bf16.gmra.mxu0 %v15639_v5  ;;  %v7290_v9 = vunpack.c.l.b16 %v3700_v21  ;;  %v7289_v52 = vunpack.c.h.b16 %v3699_v50  ;;  %v7291_v2 = vunpack.c.h.b16 %v3700_v21 }
 0x463   : > { %v6889_v31 = vpop.f32.mrf.mxu2  ;;  %v14433_v34 = vpop.f32.mrf.mxu3  ;;  %v6756_v50 = vadd.f32 %v14251_v26, %v14259_v60  ;;  %v7287_v26 = vunpack.c.h.b16 %v14383_v48  ;;  %v15645_v60 = vld [vmem:[#allocation85_spill] sm:$0xff] }
 0x464   : > { %7038 = vmatmul.bf16.gmra.mxu1 %v15640_v7  ;;  %v14435_v58 = vadd.f32 %v6889_v31, %v6841_v39  ;;  %v7312_v20 = vpack.c.b16 %v7290_v9, %v7288_v28  ;;  %v6751_v39 = vadd.f32 %v14233_v51, %v14243_v45  ;;  %v7313_v28 = vpack.c.b16 %v7291_v2, %v7289_v52  ;;  %v15652_v52 = vld [vmem:[#allocation25_spill] sm:$0xff] }
 0x465   : > { %v6753_v51 = vadd.f32 %v14241_v1, %v14253_v63  ;;  %v15653_v2 = vunpack.c.l.bf16 %v15652_v52  ;;  %v15654_v48 = vunpack.c.h.bf16 %v15652_v52 }
 0x466   : > { %7336 = vrot.lane.b32.xlu0 %v7312_v20, %s9556_s21  ;;  %7338 = vrot.lane.b32.xlu1 %v7313_v28, %s9556_s21 }
 0x467   : > { %v6796_v57 = vpop.f32.mrf.mxu0 }
 0x468   : > { %7087 = vmatmul.bf16.gmra.mxu2 %v13432_v49  ;;  %v6797_v12 = vadd.f32 %v6796_v57, %v6748_v44  ;;  %v15642_v49 = vld [vmem:[#allocation124_spill] sm:$0xff]  ;;  %v15644_v44 = vld [vmem:[#allocation129_spill] sm:$0xff] }
 0x469   : > { %v6845_v17 = vpop.f32.mrf.mxu1 }
 0x46a   : > { %v6846_v54 = vadd.f32 %v6845_v17, %v6797_v12 }
 0x46b   : > { %v6892_v29 = vpop.f32.mrf.mxu2  ;;  %v14441_v16 = vpop.f32.mrf.mxu3 }
 0x46c   : > { %v14443_v0 = vadd.f32 %v6892_v29, %v6844_v22  ;;  %v15646_v29 = vunpack.c.l.bf16 %v15645_v60 }
 0x46f   : > { %v6799_v42 = vpop.f32.mrf.mxu0 }
 0x470   : > { %9156 = vmatmul.msk.bf16.gmra.mxu3 %vm633_vm12, %v13513_v37  ;;  %v6800_v43 = vadd.f32 %v6799_v42, %v6751_v39  ;;  %v15647_v39 = vld [vmem:[#allocation40_spill] sm:$0xff] }
 0x471   : > { %v6848_v14 = vpop.f32.mrf.mxu1  ;;  %v2957_v42 = vmax.f32 %v15647_v39, %v15646_v29  ;;  %v15661_v29 = vld [vmem:[#allocation138_spill] sm:$0xff] }
 0x472   : > { %v6849_v32 = vadd.f32 %v6848_v14, %v6800_v43  ;;  %6994 = vmatmul.bf16.gmra.mxu0 %v15641_v25  ;;  %v15649_v14 = vld [vmem:[#allocation35_spill] sm:$0xff] }
 0x473   : > { %v6894_v62 = vpop.f32.mrf.mxu2  ;;  %v14451_v53 = vpop.f32.mrf.mxu3  ;;  %v15651_v25 = vld [vmem:[#allocation139_spill] sm:$0xff]  ;;  %v3685_v28 = vmax.f32 %v2957_v42, %v15653_v2 }
 0x474   : > { %7043 = vmatmul.bf16.gmra.mxu1 %v15642_v49  ;;  %v14453_v33 = vadd.f32 %v6894_v62, %v6846_v54  ;;  %v7285_v54 = vunpack.c.h.b16 %v14372_v46  ;;  %v6758_v46 = vadd.f32 %v14257_v13, %v14269_v47 }
 0x476   : > { %v7311_v62 = vpack.c.b16 %v7287_v26, %v7285_v54  ;;  %v15659_v54 = vld [vmem:[#allocation46_spill] sm:$0xff] }
 0x477   : > { %v6801_v45 = vpop.f32.mrf.mxu0 }
 0x478   : > { %7092 = vmatmul.bf16.gmra.mxu2 %v13503_v56  ;;  %v6802_v37 = vadd.f32 %v6801_v45, %v6753_v51  ;;  %v15643_v56 = vld [vmem:[#allocation132_spill] sm:$0xff]  ;;  %7334 = vrot.lane.b32.xlu2 %v7311_v62, %s9556_s21 }
 0x479   : > { %v6850_v22 = vpop.f32.mrf.mxu1 }
 0x47a   : > { %v6851_v5 = vadd.f32 %v6850_v22, %v6802_v37 }
 0x47b   : > { %v6897_v7 = vpop.f32.mrf.mxu2  ;;  %v14459_v31 = vpop.f32.mrf.mxu3 }
 0x47c   : > { %v14461_v9 = vadd.f32 %v6897_v7, %v6849_v32  ;;  %v15650_v32 = vld [vmem:[#allocation24_spill] sm:$0xff] }
 0x47d   : > { %v14483_v49 = vpack.c.bf16 %v15651_v25, %v15650_v32 }
 0x47f   : > { %v6804_v21 = vpop.f32.mrf.mxu0  ;;  %v7296_v7 = vunpack.c.l.b16 %v14483_v49 }
 0x480   : > { %9157 = vmatmul.msk.bf16.gmra.mxu3 %vm633_vm12, %v13593_v41  ;;  %v6805_v1 = vadd.f32 %v6804_v21, %v6756_v50  ;;  %v15648_v41 = vunpack.c.h.bf16 %v15645_v60  ;;  %v15660_v60 = vld [vmem:[#allocation36_spill] sm:$0xff] }
 0x481   : > { %v6853_v20 = vpop.f32.mrf.mxu1  ;;  %v3701_v39 = vpack.c.bf16 %v15661_v29, %v15660_v60 }
 0x482   : > { %v6854_v63 = vadd.f32 %v6853_v20, %v6805_v1  ;;  %6999 = vmatmul.bf16.gmra.mxu0 %v15643_v56  ;;  %v2958_v43 = vmax.f32 %v15649_v14, %v15648_v41  ;;  %v15655_v1 = vld [vmem:[#allocation80_spill] sm:$0xff]  ;;  %v15662_v41 = vld [vmem:[#allocation37_spill] sm:$0xff] }
 0x483   : > { %v6899_v57 = vpop.f32.mrf.mxu2  ;;  %v14469_v17 = vpop.f32.mrf.mxu3  ;;  %v15656_v56 = vunpack.c.l.bf16 %v15655_v1  ;;  %v15663_v14 = vunpack.c.l.bf16 %v15662_v41  ;;  %v15664_v32 = vunpack.c.h.bf16 %v15662_v41  ;;  %v7293_v2 = vunpack.c.h.b16 %v3701_v39 }
 0x484   : > { %7048 = vmatmul.bf16.gmra.mxu1 %v15644_v44  ;;  %v14471_v12 = vadd.f32 %v6899_v57, %v6851_v5  ;;  %v3686_v51 = vmax.f32 %v2958_v43, %v15654_v48  ;;  %v15657_v44 = vld [vmem:[#allocation29_spill] sm:$0xff] }
 0x485   : > { %v2953_v57 = vmax.f32 %v15657_v44, %v15656_v56  ;;  %v15667_v56 = vld [vmem:[#allocation22_spill] sm:$0xff] }
 0x486   : > { %v14493_v5 = vpack.c.bf16 %v3686_v51, %v3685_v28  ;;  %v7292_v28 = vunpack.c.l.b16 %v3701_v39  ;;  %v6917_v51 = vadd.f32 %v14267_v6, %v14276_v38  ;;  %v15670_v6 = vunpack.c.l.bf16 %v13528_v23 }
 0x487   : > { %v6806_v45 = vpop.f32.mrf.mxu0  ;;  %v3681_v43 = vmax.f32 %v2953_v57, %v15663_v14 }
 0x488   : > { %7097 = vmatmul.bf16.gmra.mxu2 %v13591_v59  ;;  %v6807_v37 = vadd.f32 %v6806_v45, %v6758_v46  ;;  %v7298_v13 = vunpack.c.l.b16 %v14493_v5  ;;  %v15658_v59 = vunpack.c.h.bf16 %v15655_v1 }
 0x489   : > { %v6855_v22 = vpop.f32.mrf.mxu1 }
 0x48a   : > { %v6856_v50 = vadd.f32 %v6855_v22, %v6807_v37  ;;  %v2954_v26 = vmax.f32 %v15659_v54, %v15658_v59  ;;  %v7316_v42 = vpack.c.b16 %v7298_v13, %v7296_v7  ;;  %v15665_v13 = vld [vmem:[#allocation94_spill] sm:$0xff]  ;;  %v15669_v59 = vld [vmem:[#allocation51_spill] sm:$0xff] }
 0x48b   : > { %v6902_v21 = vpop.f32.mrf.mxu2  ;;  %v14496_v20 = vpop.f32.mrf.mxu3  ;;  %v15666_v1 = vunpack.c.l.bf16 %v15665_v13  ;;  %v15668_v57 = vunpack.c.h.bf16 %v15665_v13 }
 0x48c   : > { %v14499_v47 = vadd.f32 %v6902_v21, %v6854_v63  ;;  %v3682_v25 = vmax.f32 %v2954_v26, %v15664_v32  ;;  %7344 = vrot.lane.b32.xlu1 %v7316_v42, %s9556_s21  ;;  %v3705_v26 = vpack.c.bf16 %v13545_v61, %v13542_v24 }
 0x48d   : > { %v2961_v44 = vmax.f32 %v15667_v56, %v15666_v1  ;;  %v2962_v54 = vmax.f32 %v15669_v59, %v15668_v57 }
 0x48e   : > { %v3702_v52 = vpack.c.bf16 %v3682_v25, %v3681_v43  ;;  %v7300_v14 = vunpack.c.l.b16 %v3705_v26  ;;  %v7301_v43 = vunpack.c.h.b16 %v3705_v26 }
 0x48f   : > { %v6965_v63 = vpop.f32.mrf.mxu0  ;;  %v3689_v38 = vmax.f32 %v2961_v44, %v15670_v6  ;;  %v7299_v6 = vunpack.c.h.b16 %v14493_v5 }
 0x490   : > { %v7295_v46 = vunpack.c.h.b16 %v3702_v52  ;;  %v7294_v48 = vunpack.c.l.b16 %v3702_v52  ;;  %v6966_v60 = vadd.f32 %v6965_v63, %v6917_v51  ;;  %v15672_v63 = vld [vmem:[#allocation12_spill] sm:$0xff] }
 0x491   : > { %v7014_v62 = vpop.f32.mrf.mxu1 }
 0x492   : > { %v7315_v7 = vpack.c.b16 %v7295_v46, %v7293_v2  ;;  %v7314_v21 = vpack.c.b16 %v7294_v48, %v7292_v28  ;;  %v7015_v32 = vadd.f32 %v7014_v62, %v6966_v60  ;;  %v15673_v2 = vld [vmem:[#allocation73_spill] sm:$0xff] }
 0x493   : > { %v6904_v45 = vpop.f32.mrf.mxu2  ;;  %v7112_v22 = vpop.f32.mrf.mxu3  ;;  %v6919_v28 = vadd.f32 %v15673_v2, %v15672_v63 }
 0x494   : > { %v14516_v37 = vadd.f32 %v6904_v45, %v6856_v50  ;;  %7342 = vrot.lane.b32.xlu0 %v7315_v7, %s9556_s21  ;;  %7340 = vrot.lane.b32.xlu2 %v7314_v21, %s9556_s21  ;;  %v15671_v50 = vunpack.c.h.bf16 %v13528_v23  ;;  %v15674_v7 = vld [vmem:[#allocation10_spill] sm:$0xff] }
 0x495   : > { %v7152_v62 = vmax.f32 %v15674_v7, 0.0  ;;  %v15677_v7 = vld [vmem:[#allocation50_spill] sm:$0xff] }
 0x496   : > { %v3690_v29 = vmax.f32 %v2962_v54, %v15671_v50  ;;  %v15675_v54 = vld [vmem:[#allocation56_spill] sm:$0xff]  ;;  %v7321_v63 = vpop.permute.xlu1 %7320 }
 0x497   : > { %v6967_v39 = vpop.f32.mrf.mxu0  ;;  %v6922_v26 = vadd.f32 %v15675_v54, %v14312_v36  ;;  %v6924_v36 = vadd.f32 %v14310_v35, %v14334_v18 }
 0x498   : > { %v3706_v41 = vpack.c.bf16 %v3690_v29, %v3689_v38  ;;  %v6968_v45 = vadd.f32 %v6967_v39, %v6919_v28  ;;  %v15676_v39 = vld [vmem:[#allocation9_spill] sm:$0xff] }
 0x499   : > { %v7016_v42 = vpop.f32.mrf.mxu1 }
 0x49a   : > { %v7302_v24 = vunpack.c.l.b16 %v3706_v41  ;;  %v7303_v61 = vunpack.c.h.b16 %v3706_v41  ;;  %v7017_v56 = vadd.f32 %v7016_v42, %v6968_v45  ;;  %v7154_v41 = vmax.f32 %v15676_v39, 0.0 }
 0x49b   : > { %v7063_v25 = vpop.f32.mrf.mxu2  ;;  %v7114_v52 = vpop.f32.mrf.mxu3 }
 0x49c   : > { %v7064_v46 = vadd.f32 %v7063_v25, %v7015_v32  ;;  %v7318_v48 = vpack.c.b16 %v7302_v24, %v7300_v14  ;;  %v7319_v51 = vpack.c.b16 %v7303_v61, %v7301_v43 }
 0x49e   : > { %v7113_v23 = vadd.f32 %v7112_v22, %v7064_v46  ;;  %7348 = vrot.lane.b32.xlu0 %v7318_v48, %s9556_s21  ;;  %7350 = vrot.lane.b32.xlu1 %v7319_v51, %s9556_s21  ;;  %v7297_v22 = vunpack.c.h.b16 %v14483_v49 }
 0x49f   : > { %v6970_v13 = vpop.f32.mrf.mxu0 }
 0x4a0   : > { %v7153_v21 = vmax.f32 %v7113_v23, 0.0  ;;  %v6971_v38 = vadd.f32 %v6970_v13, %v6922_v26  ;;  %v7317_v29 = vpack.c.b16 %v7299_v6, %v7297_v22  ;;  %v7323_v2 = vpop.permute.xlu2 %7322 }
 0x4a1   : > { %v7019_v1 = vpop.f32.mrf.mxu1  ;;  %v7352_v46 = vsel %vm633_vm12, %v7321_v63, %v7323_v2 }
 0x4a2   : > { %v7184_v44 = vpack.c.bf16 %v7153_v21, %v7152_v62  ;;  %7346 = vrot.lane.b32.xlu2 %v7317_v29, %s9556_s21  ;;  %v7020_v32 = vadd.f32 %v7019_v1, %v6971_v38  ;;  %v7393_v45 = vunpack.c.l.b16 %v7352_v46  ;;  %v7395_v23 = vunpack.c.h.b16 %v7352_v46 }
 0x4a3   : > { %v7065_v57 = vpop.f32.mrf.mxu2  ;;  %v7117_v59 = vpop.f32.mrf.mxu3  ;;  %v7156_v62 = vmax.f32 %v15677_v7, 0.0 }
 0x4a4   : > { %v7066_v60 = vadd.f32 %v7065_v57, %v7017_v56  ;;  %v7217_v5 = vunpack.c.h.b16 %v7184_v44  ;;  %v7425_v1 = vpack.c.b16 %v7393_v45, %v7393_v45  ;;  %v7427_v56 = vpack.c.b16 %v7395_v23, %v7395_v23  ;;  %v15679_v23 = vld [vmem:[#allocation11_spill] sm:$0xff] }
 0x4a5   : > { %v7216_v57 = vunpack.c.l.b16 %v7184_v44  ;;  %v7160_v7 = vmax.f32 %v15679_v23, 0.0 }
 0x4a6   : > { %v7115_v50 = vadd.f32 %v7114_v52, %v7066_v60  ;;  %7489 = vst [vmem:[%s14552_s17 + $0x8] sm:$0xf] %v7425_v1 }
 0x4a7   : > { %v6972_v42 = vpop.f32.mrf.mxu0  ;;  %7491 = vst [vmem:[%s14552_s17 + $0x14] sm:$0xf] %v7427_v56 }
 0x4a8   : > { %v7155_v14 = vmax.f32 %v7115_v50, 0.0  ;;  %v6973_v28 = vadd.f32 %v6972_v42, %v6924_v36  ;;  %v6927_v50 = vadd.f32 %v14332_v27, %v14342_v10  ;;  %v7325_v10 = vpop.permute.xlu0 %7324 }
 0x4a9   : > { %v7021_v43 = vpop.f32.mrf.mxu1 }
 0x4aa   : > { %v7185_v25 = vpack.c.bf16 %v7155_v14, %v7154_v41  ;;  %v7022_v26 = vadd.f32 %v7021_v43, %v6973_v28  ;;  %v15678_v14 = vld [vmem:[#allocation106_spill] sm:$0xff] }
 0x4ab   : > { %v7068_v24 = vpop.f32.mrf.mxu2  ;;  %v7119_v49 = vpop.f32.mrf.mxu3  ;;  %v7158_v44 = vmax.f32 %v15678_v14, 0.0 }
 0x4ac   : > { %v7219_v61 = vunpack.c.h.b16 %v7185_v25  ;;  %v7069_v52 = vadd.f32 %v7068_v24, %v7020_v32  ;;  %v6929_v24 = vadd.f32 %v14340_v40, %v14352_v3 }
 0x4ae   : > { %v7118_v48 = vadd.f32 %v7117_v59, %v7069_v52  ;;  %v7248_v51 = vpack.c.b16 %v7219_v61, %v7217_v5 }
 0x4af   : > { %v6975_v18 = vpop.f32.mrf.mxu0 }
 0x4b0   : > { %v7157_v35 = vmax.f32 %v7118_v48, 0.0  ;;  %v7362_v13 = vsel %vm633_vm12, %v7248_v51, %v7321_v63  ;;  %v6976_v39 = vadd.f32 %v6975_v18, %v6927_v50 }
 0x4b1   : > { %v7024_v21 = vpop.f32.mrf.mxu1  ;;  %v7392_v59 = vunpack.c.l.b16 %v7362_v13  ;;  %v9159_v54 = vsel %vm7654_vm13, %v7185_v25, %v7362_v13 }
 0x4b2   : > { %v7186_v60 = vpack.c.bf16 %v7157_v35, %v7156_v62  ;;  %7490 = vst [vmem:[%s14552_s17 + $0xc] sm:$0xff] %v9159_v54  ;;  %v7025_v43 = vadd.f32 %v7024_v21, %v6976_v39  ;;  %v7327_v2 = vpop.permute.xlu1 %7326  ;;  %v15680_v39 = vld [vmem:[#allocation131_spill] sm:$0xff] }
 0x4b3   : > { %v7424_v22 = vpack.c.b16 %v7392_v59, %v7216_v57  ;;  %v7070_v6 = vpop.f32.mrf.mxu2  ;;  %v7122_v38 = vpop.f32.mrf.mxu3 }
 0x4b4   : > { %v7071_v29 = vadd.f32 %v7070_v6, %v7022_v26  ;;  %v7221_v52 = vunpack.c.h.b16 %v7186_v60  ;;  %v7220_v13 = vunpack.c.l.b16 %v7186_v60  ;;  %v6932_v6 = vadd.f32 %v14350_v19, %v14360_v4 }
 0x4b5   : > { %7488 = vst [vmem:[%s14552_s17] sm:$0xff] %v7424_v22  ;;  %v7162_v60 = vmax.f32 %v15680_v39, 0.0 }
 0x4b6   : > { %v7120_v41 = vadd.f32 %v7119_v49, %v7071_v29  ;;  %v7353_v49 = vsel %vm633_vm12, %v7325_v10, %v7327_v2 }
 0x4b7   : > { %v6977_v32 = vpop.f32.mrf.mxu0  ;;  %v7397_v51 = vunpack.c.l.b16 %v7353_v49  ;;  %v7399_v45 = vunpack.c.h.b16 %v7353_v49  ;;  %v7329_v4 = vpop.permute.xlu2 %7328 }
 0x4b8   : > { %v7159_v42 = vmax.f32 %v7120_v41, 0.0  ;;  %v6978_v28 = vadd.f32 %v6977_v32, %v6929_v24 }
 0x4b9   : > { %v7026_v25 = vpop.f32.mrf.mxu1  ;;  %v7429_v18 = vpack.c.b16 %v7397_v51, %v7397_v51  ;;  %v7431_v21 = vpack.c.b16 %v7399_v45, %v7399_v45 }
 0x4ba   : > { %v7187_v36 = vpack.c.bf16 %v7159_v42, %v7158_v44  ;;  %v7027_v57 = vadd.f32 %v7026_v25, %v6978_v28 }
 0x4bb   : > { %v7073_v5 = vpop.f32.mrf.mxu2  ;;  %v7124_v61 = vpop.f32.mrf.mxu3  ;;  %7493 = vst [vmem:[%s14552_s17 + $0x20] sm:$0xf] %v7429_v18 }
 0x4bc   : > { %v7223_v63 = vunpack.c.h.b16 %v7187_v36  ;;  %v7074_v27 = vadd.f32 %v7073_v5, %v7025_v43  ;;  %7495 = vst [vmem:[%s14552_s17 + $0x2c] sm:$0xf] %v7431_v21  ;;  %v6934_v5 = vadd.f32 %v14358_v30, %v14391_v11  ;;  %v6937_v21 = vadd.f32 %v14388_v15, %v14411_v55 }
 0x4bd   : > { %v6939_v15 = vadd.f32 %v14409_v8, %v14435_v58 }
 0x4be   : > { %v7123_v46 = vadd.f32 %v7122_v38, %v7074_v27  ;;  %v7249_v48 = vpack.c.b16 %v7223_v63, %v7221_v52  ;;  %v15681_v27 = vld [vmem:[#allocation58_spill] sm:$0xff] }
 0x4bf   : > { %v6980_v40 = vpop.f32.mrf.mxu0 }
 0x4c0   : > { %v7161_v62 = vmax.f32 %v7123_v46, 0.0  ;;  %v7365_v35 = vsel %vm633_vm12, %v7249_v48, %v7325_v10  ;;  %v6981_v50 = vadd.f32 %v6980_v40, %v6932_v6  ;;  %v7164_v10 = vmax.f32 %v15681_v27, 0.0 }
 0x4c1   : > { %v7029_v3 = vpop.f32.mrf.mxu1  ;;  %v7396_v1 = vunpack.c.l.b16 %v7365_v35  ;;  %v9161_v56 = vsel %vm7654_vm13, %v7187_v36, %v7365_v35 }
 0x4c2   : > { %v7188_v59 = vpack.c.bf16 %v7161_v62, %v7160_v7  ;;  %7494 = vst [vmem:[%s14552_s17 + $0x24] sm:$0xff] %v9161_v56  ;;  %v7030_v42 = vadd.f32 %v7029_v3, %v6981_v50 }
 0x4c3   : > { %v7428_v54 = vpack.c.b16 %v7396_v1, %v7220_v13  ;;  %v7075_v26 = vpop.f32.mrf.mxu2  ;;  %v7127_v22 = vpop.f32.mrf.mxu3 }
 0x4c4   : > { %v7076_v38 = vadd.f32 %v7075_v26, %v7027_v57  ;;  %v7225_v36 = vunpack.c.h.b16 %v7188_v59  ;;  %v7224_v48 = vunpack.c.l.b16 %v7188_v59 }
 0x4c5   : > { %7492 = vst [vmem:[%s14552_s17 + $0x18] sm:$0xff] %v7428_v54  ;;  %v15682_v54 = vld [vmem:[#allocation42_spill] sm:$0xff] }
 0x4c6   : > { %v7125_v29 = vadd.f32 %v7124_v61, %v7076_v38  ;;  %v7166_v26 = vmax.f32 %v15682_v54, 0.0 }
 0x4c7   : > { %v6982_v14 = vpop.f32.mrf.mxu0 }
 0x4c8   : > { %v7163_v41 = vmax.f32 %v7125_v29, 0.0  ;;  %v6983_v52 = vadd.f32 %v6982_v14, %v6934_v5 }
 0x4c9   : > { %v7031_v44 = vpop.f32.mrf.mxu1 }
 0x4ca   : > { %v7189_v32 = vpack.c.bf16 %v7163_v41, %v7162_v60  ;;  %v7032_v30 = vadd.f32 %v7031_v44, %v6983_v52  ;;  %v7333_v44 = vpop.permute.xlu1 %7332 }
 0x4cb   : > { %v7078_v25 = vpop.f32.mrf.mxu2  ;;  %v7129_v43 = vpop.f32.mrf.mxu3 }
 0x4cc   : > { %v7227_v24 = vunpack.c.h.b16 %v7189_v32  ;;  %v7079_v19 = vadd.f32 %v7078_v25, %v7030_v42 }
 0x4ce   : > { %v7128_v63 = vadd.f32 %v7127_v22, %v7079_v19  ;;  %v7250_v61 = vpack.c.b16 %v7227_v24, %v7225_v36 }
 0x4cf   : > { %v6985_v28 = vpop.f32.mrf.mxu0  ;;  %v7331_v23 = vpop.permute.xlu0 %7330 }
 0x4d0   : > { %v7165_v2 = vmax.f32 %v7128_v63, 0.0  ;;  %v7368_v46 = vsel %vm633_vm12, %v7250_v61, %v7329_v4  ;;  %v7354_v7 = vsel %vm633_vm12, %v7329_v4, %v7331_v23  ;;  %v6986_v57 = vadd.f32 %v6985_v28, %v6937_v21 }
 0x4d1   : > { %v7034_v49 = vpop.f32.mrf.mxu1  ;;  %v7400_v51 = vunpack.c.l.b16 %v7368_v46  ;;  %v9163_v45 = vsel %vm7654_vm13, %v7189_v32, %v7368_v46  ;;  %v7401_v35 = vunpack.c.l.b16 %v7354_v7  ;;  %v7403_v18 = vunpack.c.h.b16 %v7354_v7 }
 0x4d2   : > { %v7190_v11 = vpack.c.bf16 %v7165_v2, %v7164_v10  ;;  %7498 = vst [vmem:[%s14552_s17 + $0x3c] sm:$0xff] %v9163_v45  ;;  %v7035_v50 = vadd.f32 %v7034_v49, %v6986_v57  ;;  %v7335_v58 = vpop.permute.xlu2 %7334  ;;  %v6942_v46 = vadd.f32 %v14433_v34, %v14443_v0  ;;  %v6944_v34 = vadd.f32 %v14441_v16, %v14453_v33 }
 0x4d3   : > { %v7432_v62 = vpack.c.b16 %v7400_v51, %v7224_v48  ;;  %v7080_v40 = vpop.f32.mrf.mxu2  ;;  %v7132_v3 = vpop.f32.mrf.mxu3  ;;  %v7433_v1 = vpack.c.b16 %v7401_v35, %v7401_v35  ;;  %v7435_v56 = vpack.c.b16 %v7403_v18, %v7403_v18  ;;  %v7355_v49 = vsel %vm633_vm12, %v7333_v44, %v7335_v58 }
 0x4d4   : > { %v7081_v13 = vadd.f32 %v7080_v40, %v7032_v30  ;;  %v7229_v41 = vunpack.c.h.b16 %v7190_v11  ;;  %v7228_v52 = vunpack.c.l.b16 %v7190_v11  ;;  %v7405_v51 = vunpack.c.l.b16 %v7355_v49 }
 0x4d5   : > { %7496 = vst [vmem:[%s14552_s17 + $0x30] sm:$0xff] %v7432_v62  ;;  %v7407_v45 = vunpack.c.h.b16 %v7355_v49  ;;  %v15684_v62 = vld [vmem:[#allocation45_spill] sm:$0xff] }
 0x4d6   : > { %v7130_v59 = vadd.f32 %v7129_v43, %v7081_v13  ;;  %7497 = vst [vmem:[%s14552_s17 + $0x38] sm:$0xf] %v7433_v1  ;;  %v15683_v43 = vld [vmem:[#allocation63_spill] sm:$0xff]  ;;  %v7437_v11 = vpack.c.b16 %v7405_v51, %v7405_v51  ;;  %v7170_v40 = vmax.f32 %v15684_v62, 0.0  ;;  %v6949_v51 = vadd.f32 %v14459_v31, %v14471_v12 }
 0x4d7   : > { %v6987_v6 = vpop.f32.mrf.mxu0  ;;  %7499 = vst [vmem:[%s14552_s17 + $0x44] sm:$0xf] %v7435_v56  ;;  %v7168_v36 = vmax.f32 %v15683_v43, 0.0  ;;  %v7439_v7 = vpack.c.b16 %v7407_v45, %v7407_v45 }
 0x4d8   : > { %v7167_v22 = vmax.f32 %v7130_v59, 0.0  ;;  %v6988_v42 = vadd.f32 %v6987_v6, %v6939_v15  ;;  %7501 = vst [vmem:[%s14552_s17 + $0x50] sm:$0xf] %v7437_v11  ;;  %v7337_v1 = vpop.permute.xlu0 %7336 }
 0x4d9   : > { %v7036_v38 = vpop.f32.mrf.mxu1  ;;  %7503 = vst [vmem:[%s14552_s17 + $0x5c] sm:$0xf] %v7439_v7  ;;  %v15687_v7 = vld [vmem:[#allocation67_spill] sm:$0xff] }
 0x4da   : > { %v7191_v29 = vpack.c.bf16 %v7167_v22, %v7166_v26  ;;  %v7037_v27 = vadd.f32 %v7036_v38, %v6988_v42  ;;  %v7339_v26 = vpop.permute.xlu1 %7338  ;;  %v7176_v62 = vmax.f32 %v15687_v7, 0.0 }
 0x4db   : > { %v7083_v39 = vpop.f32.mrf.mxu2  ;;  %v7134_v60 = vpop.f32.mrf.mxu3  ;;  %v7356_v6 = vsel %vm633_vm12, %v7337_v1, %v7339_v26 }
 0x4dc   : > { %v7231_v14 = vunpack.c.h.b16 %v7191_v29  ;;  %v7084_v55 = vadd.f32 %v7083_v39, %v7035_v50  ;;  %v7411_v39 = vunpack.c.h.b16 %v7356_v6 }
 0x4de   : > { %v7133_v32 = vadd.f32 %v7132_v3, %v7084_v55  ;;  %v7251_v25 = vpack.c.b16 %v7231_v14, %v7229_v41  ;;  %v7443_v55 = vpack.c.b16 %v7411_v39, %v7411_v39  ;;  %v15688_v39 = vld [vmem:[#allocation4_spill] sm:$0xff] }
 0x4df   : > { %v6990_v5 = vpop.f32.mrf.mxu0 }
 0x4e0   : > { %v7169_v24 = vmax.f32 %v7133_v32, 0.0  ;;  %v7371_v4 = vsel %vm633_vm12, %v7251_v25, %v7333_v44  ;;  %v6991_v23 = vadd.f32 %v6990_v5, %v6942_v46  ;;  %7507 = vst [vmem:[%s14552_s17 + $0x74] sm:$0xf] %v7443_v55 }
 0x4e1   : > { %v7039_v19 = vpop.f32.mrf.mxu1  ;;  %v7404_v63 = vunpack.c.l.b16 %v7371_v4  ;;  %v9165_v61 = vsel %vm7654_vm13, %v7191_v29, %v7371_v4  ;;  %v7409_v29 = vunpack.c.l.b16 %v7356_v6 }
 0x4e2   : > { %v7192_v8 = vpack.c.bf16 %v7169_v24, %v7168_v36  ;;  %7502 = vst [vmem:[%s14552_s17 + $0x54] sm:$0xff] %v9165_v61  ;;  %v7040_v21 = vadd.f32 %v7039_v19, %v6991_v23  ;;  %v6947_v19 = vadd.f32 %v14451_v53, %v14461_v9 }
 0x4e3   : > { %v7436_v10 = vpack.c.b16 %v7404_v63, %v7228_v52  ;;  %v7085_v2 = vpop.f32.mrf.mxu2  ;;  %v7137_v28 = vpop.f32.mrf.mxu3  ;;  %v7441_v15 = vpack.c.b16 %v7409_v29, %v7409_v29 }
 0x4e4   : > { %v7086_v48 = vadd.f32 %v7085_v2, %v7037_v27  ;;  %v7233_v56 = vunpack.c.h.b16 %v7192_v8  ;;  %v7232_v44 = vunpack.c.l.b16 %v7192_v8  ;;  %v15686_v27 = vld [vmem:[#allocation62_spill] sm:$0xff] }
 0x4e5   : > { %7500 = vst [vmem:[%s14552_s17 + $0x48] sm:$0xff] %v7436_v10  ;;  %v7174_v8 = vmax.f32 %v15686_v27, 0.0  ;;  %v15689_v27 = vld [vmem:[#allocation49_spill] sm:$0xff] }
 0x4e6   : > { %v7135_v30 = vadd.f32 %v7134_v60, %v7086_v48  ;;  %v15685_v60 = vld [vmem:[#allocation17_spill] sm:$0xff]  ;;  %7505 = vst [vmem:[%s14552_s17 + $0x68] sm:$0xf] %v7441_v15 }
 0x4e7   : > { %v6992_v35 = vpop.f32.mrf.mxu0  ;;  %v7172_v41 = vmax.f32 %v15685_v60, 0.0  ;;  %v7178_v60 = vmax.f32 %v15688_v39, 0.0 }
 0x4e8   : > { %v7171_v3 = vmax.f32 %v7135_v30, 0.0  ;;  %v6993_v22 = vadd.f32 %v6992_v35, %v6944_v34 }
 0x4e9   : > { %v7041_v18 = vpop.f32.mrf.mxu1 }
 0x4ea   : > { %v7193_v13 = vpack.c.bf16 %v7171_v3, %v7170_v40  ;;  %v7042_v25 = vadd.f32 %v7041_v18, %v6993_v22 }
 0x4eb   : > { %v7088_v0 = vpop.f32.mrf.mxu2  ;;  %v7139_v54 = vpop.f32.mrf.mxu3 }
 0x4ec   : > { %v7235_v57 = vunpack.c.h.b16 %v7193_v13  ;;  %v7089_v59 = vadd.f32 %v7088_v0, %v7040_v21 }
 0x4ee   : > { %v7138_v38 = vadd.f32 %v7137_v28, %v7089_v59  ;;  %v7252_v50 = vpack.c.b16 %v7235_v57, %v7233_v56  ;;  %v7341_v9 = vpop.permute.xlu2 %7340  ;;  %v6952_v56 = vadd.f32 %v14469_v17, %v14499_v47 }
 0x4ef   : > { %v6995_v16 = vpop.f32.mrf.mxu0 }
 0x4f0   : > { %v7173_v14 = vmax.f32 %v7138_v38, 0.0  ;;  %v7374_v33 = vsel %vm633_vm12, %v7252_v50, %v7337_v1  ;;  %v6996_v52 = vadd.f32 %v6995_v16, %v6947_v19 }
 0x4f1   : > { %v7408_v42 = vunpack.c.l.b16 %v7374_v33  ;;  %v9167_v32 = vsel %vm7654_vm13, %v7193_v13, %v7374_v33  ;;  %v7044_v36 = vpop.f32.mrf.mxu1 }
 0x4f2   : > { %v7194_v43 = vpack.c.bf16 %v7173_v14, %v7172_v41  ;;  %7506 = vst [vmem:[%s14552_s17 + $0x6c] sm:$0xff] %v9167_v32  ;;  %v7045_v2 = vadd.f32 %v7044_v36, %v6996_v52 }
 0x4f3   : > { %v7440_v24 = vpack.c.b16 %v7408_v42, %v7232_v44  ;;  %v7090_v5 = vpop.f32.mrf.mxu2  ;;  %v7142_v61 = vpop.f32.mrf.mxu3 }
 0x4f4   : > { %v7091_v4 = vadd.f32 %v7090_v5, %v7042_v25  ;;  %v7237_v46 = vunpack.c.h.b16 %v7194_v43  ;;  %v7236_v21 = vunpack.c.l.b16 %v7194_v43 }
 0x4f5   : > { %7504 = vst [vmem:[%s14552_s17 + $0x60] sm:$0xff] %v7440_v24  ;;  %v6954_v24 = vadd.f32 %v14496_v20, %v14516_v37 }
 0x4f6   : > { %v7140_v63 = vadd.f32 %v7139_v54, %v7091_v4 }
 0x4f7   : > { %v6997_v10 = vpop.f32.mrf.mxu0 }
 0x4f8   : > { %v7175_v58 = vmax.f32 %v7140_v63, 0.0  ;;  %v6998_v23 = vadd.f32 %v6997_v10, %v6949_v51 }
 0x4f9   : > { %v7046_v45 = vpop.f32.mrf.mxu1 }
 0x4fa   : > { %v7195_v28 = vpack.c.bf16 %v7175_v58, %v7174_v8  ;;  %v7047_v31 = vadd.f32 %v7046_v45, %v6998_v23  ;;  %v7180_v8 = vmax.f32 %v15689_v27, 0.0 }
 0x4fb   : > { %v7093_v49 = vpop.f32.mrf.mxu2  ;;  %v7144_v3 = vpop.f32.mrf.mxu3 }
 0x4fc   : > { %v7239_v48 = vunpack.c.h.b16 %v7195_v28  ;;  %v7094_v53 = vadd.f32 %v7093_v49, %v7045_v2  ;;  %v7347_v54 = vpop.permute.xlu2 %7346 }
 0x4fe   : > { %v7143_v30 = vadd.f32 %v7142_v61, %v7094_v53  ;;  %v7253_v11 = vpack.c.b16 %v7239_v48, %v7237_v46  ;;  %v7345_v59 = vpop.permute.xlu1 %7344 }
 0x4ff   : > { %v7000_v18 = vpop.f32.mrf.mxu0  ;;  %v7358_v26 = vsel %vm633_vm12, %v7345_v59, %v7347_v54 }
 0x500   : > { %v7177_v40 = vmax.f32 %v7143_v30, 0.0  ;;  %v7377_v35 = vsel %vm633_vm12, %v7253_v11, %v7341_v9  ;;  %v7001_v22 = vadd.f32 %v7000_v18, %v6952_v56  ;;  %v7417_v50 = vunpack.c.l.b16 %v7358_v26 }
 0x501   : > { %v7412_v13 = vunpack.c.l.b16 %v7377_v35  ;;  %v9169_v34 = vsel %vm7654_vm13, %v7195_v28, %v7377_v35  ;;  %v7049_v6 = vpop.f32.mrf.mxu1  ;;  %v7419_v29 = vunpack.c.h.b16 %v7358_v26  ;;  %v15690_v35 = vld [vmem:[#allocation66_spill] sm:$0xff] }
 0x502   : > { %v7196_v12 = vpack.c.bf16 %v7177_v40, %v7176_v62  ;;  %7510 = vst [vmem:[%s14552_s17 + $0x84] sm:$0xff] %v9169_v34  ;;  %v7449_v14 = vpack.c.b16 %v7417_v50, %v7417_v50  ;;  %v7050_v17 = vadd.f32 %v7049_v6, %v7001_v22  ;;  %v7182_v18 = vmax.f32 %v15690_v35, 0.0 }
 0x503   : > { %v7444_v0 = vpack.c.b16 %v7412_v13, %v7236_v21  ;;  %v7095_v1 = vpop.f32.mrf.mxu2  ;;  %v7451_v16 = vpack.c.b16 %v7419_v29, %v7419_v29  ;;  %v7147_v15 = vpop.f32.mrf.mxu3 }
 0x504   : > { %v7096_v57 = vadd.f32 %v7095_v1, %v7047_v31  ;;  %7513 = vst [vmem:[%s14552_s17 + $0x98] sm:$0xf] %v7449_v14  ;;  %v7241_v43 = vunpack.c.h.b16 %v7196_v12  ;;  %v7240_v28 = vunpack.c.l.b16 %v7196_v12 }
 0x505   : > { %7508 = vst [vmem:[%s14552_s17 + $0x78] sm:$0xff] %v7444_v0 }
 0x506   : > { %v7145_v38 = vadd.f32 %v7144_v3, %v7096_v57  ;;  %v7343_v33 = vpop.permute.xlu0 %7342  ;;  %7515 = vst [vmem:[%s14552_s17 + $0xa4] sm:$0xf] %v7451_v16 }
 0x507   : > { %v7357_v55 = vsel %vm633_vm12, %v7341_v9, %v7343_v33  ;;  %v7002_v44 = vpop.f32.mrf.mxu0 }
 0x508   : > { %v7179_v41 = vmax.f32 %v7145_v38, 0.0  ;;  %v7413_v32 = vunpack.c.l.b16 %v7357_v55  ;;  %v7415_v25 = vunpack.c.h.b16 %v7357_v55  ;;  %v7003_v52 = vadd.f32 %v7002_v44, %v6954_v24 }
 0x509   : > { %v7051_v58 = vpop.f32.mrf.mxu1 }
 0x50a   : > { %v7197_v47 = vpack.c.bf16 %v7179_v41, %v7178_v60  ;;  %v7445_v19 = vpack.c.b16 %v7413_v32, %v7413_v32  ;;  %v7447_v4 = vpack.c.b16 %v7415_v25, %v7415_v25  ;;  %v7052_v48 = vadd.f32 %v7051_v58, %v7003_v52 }
 0x50b   : > { %v7098_v42 = vpop.f32.mrf.mxu2  ;;  %v7149_v7 = vpop.f32.mrf.mxu3 }
 0x50c   : > { %v7243_v36 = vunpack.c.h.b16 %v7197_v47  ;;  %v7099_v5 = vadd.f32 %v7098_v42, %v7050_v17  ;;  %7509 = vst [vmem:[%s14552_s17 + $0x80] sm:$0xf] %v7445_v19 }
 0x50d   : > { %7511 = vst [vmem:[%s14552_s17 + $0x8c] sm:$0xf] %v7447_v4 }
 0x50e   : > { %v7148_v63 = vadd.f32 %v7147_v15, %v7099_v5  ;;  %v7254_v61 = vpack.c.b16 %v7243_v36, %v7241_v43 }
 0x510   : > { %v7181_v10 = vmax.f32 %v7148_v63, 0.0  ;;  %v7380_v2 = vsel %vm633_vm12, %v7254_v61, %v7345_v59  ;;  %v7349_v37 = vpop.permute.xlu0 %7348  ;;  %v7351_v46 = vpop.permute.xlu1 %7350 }
 0x511   : > { %v7416_v49 = vunpack.c.l.b16 %v7380_v2  ;;  %v9171_v20 = vsel %vm7654_vm13, %v7197_v47, %v7380_v2  ;;  %v7359_v45 = vsel %vm633_vm12, %v7349_v37, %v7351_v46 }
 0x512   : > { %v7198_v51 = vpack.c.bf16 %v7181_v10, %v7180_v8  ;;  %7514 = vst [vmem:[%s14552_s17 + $0x9c] sm:$0xff] %v9171_v20  ;;  %v7421_v23 = vunpack.c.l.b16 %v7359_v45  ;;  %v7423_v30 = vunpack.c.h.b16 %v7359_v45 }
 0x513   : > { %v7448_v53 = vpack.c.b16 %v7416_v49, %v7240_v28  ;;  %v7100_v9 = vpop.f32.mrf.mxu2 }
 0x514   : > { %v7101_v11 = vadd.f32 %v7100_v9, %v7052_v48  ;;  %v7453_v62 = vpack.c.b16 %v7421_v23, %v7421_v23  ;;  %v7455_v40 = vpack.c.b16 %v7423_v30, %v7423_v30  ;;  %v7245_v34 = vunpack.c.h.b16 %v7198_v51 }
 0x515   : > { %7512 = vst [vmem:[%s14552_s17 + $0x90] sm:$0xff] %v7448_v53  ;;  %v7244_v1 = vunpack.c.l.b16 %v7198_v51 }
 0x516   : > { %v7150_v3 = vadd.f32 %v7149_v7, %v7101_v11  ;;  %7517 = vst [vmem:[%s14552_s17 + $0xb0] sm:$0xf] %v7453_v62 }
 0x517   : > { %7519 = vst [vmem:[%s14552_s17 + $0xbc] sm:$0xf] %v7455_v40 }
 0x518   : > { %v7183_v21 = vmax.f32 %v7150_v3, 0.0 }
 0x51a   : > { %v7199_v13 = vpack.c.bf16 %v7183_v21, %v7182_v18 }
 0x51c   : > { %v7247_v31 = vunpack.c.h.b16 %v7199_v13 }
 0x51e   : > { %v7255_v12 = vpack.c.b16 %v7247_v31, %v7245_v34 }
 0x520   : > { %v7383_v0 = vsel %vm633_vm12, %v7255_v12, %v7349_v37 }
 0x521   : > { %v7420_v56 = vunpack.c.l.b16 %v7383_v0  ;;  %v9173_v57 = vsel %vm7654_vm13, %v7199_v13, %v7383_v0 }
 0x522   : > { %7518 = vst [vmem:[%s14552_s17 + $0xb4] sm:$0xff] %v9173_v57 }
 0x523   : > { %v7452_v59 = vpack.c.b16 %v7420_v56, %v7244_v1 }
 0x525   : > { %7516 = vst [vmem:[%s14552_s17 + $0xa8] sm:$0xff] %v7452_v59 }
 0x526 PF: > { %s13_s14 = sadd.s32 1, %s9554_s14   ;;  %s15691_s12 = smov %s9550_s13 }
 0x527   : > { %p10_p6 = scmp.ge.s32.totalorder %s13_s14, 4   ;;  %s15692_s13 = smov %s15694_s15 }
 0x529   :  { %12 = sbr.rel (!%p10_p6) target bundleno = 2 (0x2), region = 68 }

</bundles_post_ra>
